<compile_context>
chip_gen: v6e
topology: v6e:2x2x1
jax: 0.10.0
libtpu: 0.0.40
codegen_flags: <defaults>
</compile_context>

<pallas_src>
import math

import jax
import jax.numpy as jnp
from jax.experimental import pallas as pl
from jax.experimental.pallas import tpu as pltpu


# ----------------------------- Pallas kernels ------------------------------

def _matmul_bias_relu_kernel(x_ref, w_ref, b_ref, o_ref):
    acc = jnp.dot(x_ref[...], w_ref[...], preferred_element_type=jnp.float32)
    acc = acc + b_ref[...]
    o_ref[...] = jnp.maximum(acc, 0.0)


def conv_matmul_bias_relu(x, w, b, *, tm_cap=512):
    """Fused (M,K)@(K,N) + bias + ReLU, tiled over M with a parallel grid axis."""
    M, K = x.shape
    K2, N = w.shape
    assert K == K2 and b.shape == (1, N)
    # Whole-M block when small; otherwise 512-row blocks (multiple of 8) so the
    # grid axis can shard across TensorCores (v7x). Edge block is masked.
    tm = M if M <= tm_cap else tm_cap
    grid = (pl.cdiv(M, tm),)
    return pl.pallas_call(
        _matmul_bias_relu_kernel,
        out_shape=jax.ShapeDtypeStruct((M, N), jnp.float32),
        grid=grid,
        in_specs=[
            pl.BlockSpec((tm, K), lambda i: (i, 0)),
            pl.BlockSpec((K, N), lambda i: (0, 0)),
            pl.BlockSpec((1, N), lambda i: (0, 0)),
        ],
        out_specs=pl.BlockSpec((tm, N), lambda i: (i, 0)),
        compiler_params=pltpu.CompilerParams(
            dimension_semantics=("parallel",),
            vmem_limit_bytes=32 * 1024 * 1024),
    )(x, w, b)


def _mlp_head_kernel(feat_ref, w1_ref, b1_ref, w2_ref, b2_ref, o_ref):
    # fc1 (bf16 weights, f32 accumulate) + ReLU + fc2, fully fused: the hidden
    # activation stays in VMEM/vregs and never touches HBM.
    f = feat_ref[...].astype(jnp.bfloat16)
    h = jnp.dot(f, w1_ref[...], preferred_element_type=jnp.float32) + b1_ref[...]
    h = jnp.maximum(h, 0.0).astype(jnp.bfloat16)
    o = jnp.dot(h, w2_ref[...], preferred_element_type=jnp.float32) + b2_ref[...]
    o_ref[...] = o


def mlp_head(feat, w1, b1, w2, b2):
    B, K = feat.shape
    H = w1.shape[1]
    N = w2.shape[1]
    return pl.pallas_call(
        _mlp_head_kernel,
        out_shape=jax.ShapeDtypeStruct((B, N), jnp.float32),
        grid=(1,),
        in_specs=[
            pl.BlockSpec((B, K), lambda i: (0, 0)),
            pl.BlockSpec((K, H), lambda i: (0, 0)),
            pl.BlockSpec((1, H), lambda i: (0, 0)),
            pl.BlockSpec((H, N), lambda i: (0, 0)),
            pl.BlockSpec((1, N), lambda i: (0, 0)),
        ],
        out_specs=pl.BlockSpec((B, N), lambda i: (0, 0)),
        compiler_params=pltpu.CompilerParams(
            vmem_limit_bytes=32 * 1024 * 1024),
    )(feat, w1, b1, w2, b2)


# ------------------------------- glue (JAX) --------------------------------

def im2col_nhwc(x, kh, kw, stride):
    """x: (B, H, W, C) -> patches (B*Ho*Wo, kh*kw*C), feature order (kh, kw, C)."""
    B, H, W, C = x.shape
    Ho = (H - kh) // stride + 1
    Wo = (W - kw) // stride + 1
    cols = []
    for i in range(kh):
        for j in range(kw):
            cols.append(x[:, i:i + stride * Ho:stride, j:j + stride * Wo:stride, :])
    p = jnp.stack(cols, axis=3)                     # (B, Ho, Wo, kh*kw, C)
    p = p.reshape(B * Ho * Wo, kh * kw * C)
    return p, Ho, Wo


def conv2d_relu_nhwc(x, wm, b, *, kh, kw, stride):
    """Valid conv, NHWC in / NHWC out, via im2col + Pallas matmul+bias+ReLU."""
    B = x.shape[0]
    Cout = wm.shape[1]
    p, Ho, Wo = im2col_nhwc(x, kh, kw, stride)
    y = conv_matmul_bias_relu(p, wm, b)             # (B*Ho*Wo, Cout)
    return y.reshape(B, Ho, Wo, Cout)


def conv_params(key, cout, cin, k):
    kw_, kb_ = jax.random.split(key)
    bound = 1.0 / math.sqrt(cin * k * k)
    w = jax.random.uniform(kw_, (cout, cin, k, k), jnp.float32, -bound, bound)
    b = jax.random.uniform(kb_, (cout,), jnp.float32, -bound, bound)
    return w, b


def linear_params(key, in_f, out_f):
    kw_, kb_ = jax.random.split(key)
    bound = 1.0 / math.sqrt(in_f)
    w = jax.random.uniform(kw_, (out_f, in_f), jnp.float32, -bound, bound)
    b = jax.random.uniform(kb_, (out_f,), jnp.float32, -bound, bound)
    return w, b


def init_params(key, outputs):
    """Parameters in PyTorch layout (OIHW convs, (out,in) linears)."""
    ks = jax.random.split(key, 5)
    return {
        'conv1': conv_params(ks[0], 32, 4, 8),
        'conv2': conv_params(ks[1], 64, 32, 5),
        'conv3': conv_params(ks[2], 64, 64, 3),
        'linear': linear_params(ks[3], 4224, 512),
        'out': linear_params(ks[4], 512, outputs),
    }


def prepare_kernel_params(params, feat_hw):
    """One-time layout conversion: PyTorch layout -> kernel (NHWC/matmul) layout."""
    h3, w3 = feat_hw

    def conv_prep(w, b):
        cout, cin, kh, kw = w.shape
        wm = jnp.transpose(w, (2, 3, 1, 0)).reshape(kh * kw * cin, cout)
        return wm, b.reshape(1, cout)

    kp = {
        'conv1': conv_prep(*params['conv1']),
        'conv2': conv_prep(*params['conv2']),
        'conv3': conv_prep(*params['conv3']),
    }

    w1, b1 = params['linear']                       # (512, 4224), (512,)
    c3 = params['conv3'][0].shape[0]                # 64
    hidden = w1.shape[0]
    # PyTorch flattens NCHW (c,h,w)-major; our features flatten NHWC (h,w,c)-major.
    # Permute fc1 weight rows once so the NHWC flatten gives identical results.
    w1_t = w1.T.reshape(c3, h3, w3, hidden)         # (C, h, w, 512)
    w1_nhwc = jnp.transpose(w1_t, (1, 2, 0, 3)).reshape(h3 * w3 * c3, hidden)
    kp['linear'] = (w1_nhwc.astype(jnp.bfloat16), b1.reshape(1, hidden))

    w2, b2 = params['out']                          # (A, 512), (A,)
    kp['out'] = (w2.T.astype(jnp.bfloat16), b2.reshape(1, -1))
    return kp


@jax.jit
def dqn_paper_forward(kparams, x_nchw):
    """x: (B, 4, H, W) float32 -> (B, outputs) float32."""
    x = jnp.transpose(x_nchw, (0, 2, 3, 1))          # one-time NCHW -> NHWC
    x = conv2d_relu_nhwc(x, *kparams['conv1'], kh=8, kw=8, stride=4)
    x = conv2d_relu_nhwc(x, *kparams['conv2'], kh=5, kw=5, stride=2)
    x = conv2d_relu_nhwc(x, *kparams['conv3'], kh=3, kw=3, stride=1)
    feat = x.reshape(x.shape[0], -1)                 # NHWC flatten (fc1 rows permuted to match)
    w1, b1 = kparams['linear']
    w2, b2 = kparams['out']
    return mlp_head(feat, w1, b1, w2, b2)


def reference_forward(params, x):
    """Pure-JAX reference mirroring the PyTorch forward (f32 throughout)."""
    def conv(x, w, b, stride):
        y = jax.lax.conv_general_dilated(
            x, w, (stride, stride), 'VALID',
            dimension_numbers=('NCHW', 'OIHW', 'NCHW'))
        return jax.nn.relu(y + b[None, :, None, None])
    x = conv(x, *params['conv1'], 4)
    x = conv(x, *params['conv2'], 2)
    x = conv(x, *params['conv3'], 1)
    feat = x.reshape(x.shape[0], -1)
    w1, b1 = params['linear']
    w2, b2 = params['out']
    h = jax.nn.relu(feat @ w1.T + b1)
    return h @ w2.T + b2


def _conv_out(n, k, s):
    return (n - k) // s + 1


if __name__ == "__main__":
    outputs = 6
    batch = 2
    # Smallest spatial size whose conv stack flattens to exactly 4224
    # (= 64 channels * 6 * 11), matching the hard-coded nn.Linear(4224, 512).
    H, W = 80, 120
    h3 = _conv_out(_conv_out(_conv_out(H, 8, 4), 5, 2), 3, 1)
    w3 = _conv_out(_conv_out(_conv_out(W, 8, 4), 5, 2), 3, 1)
    assert 64 * h3 * w3 == 4224

    key = jax.random.PRNGKey(0)
    k_params, k_x = jax.random.split(key)
    params = init_params(k_params, outputs)
    kparams = prepare_kernel_params(params, feat_hw=(h3, w3))
    x = jax.random.normal(k_x, (batch, 4, H, W), jnp.float32)

    q = jax.block_until_ready(dqn_paper_forward(kparams, x))
    q_ref = jax.block_until_ready(reference_forward(params, x))

    assert q.shape == (batch, outputs)
    assert bool(jnp.all(jnp.isfinite(q)))
    # fc weights run in bf16 (f32 accumulation) -> slightly looser tolerance.
    assert bool(jnp.allclose(q, q_ref, atol=2e-2, rtol=2e-2)), "mismatch vs JAX reference"

    print("KERNEL_OK")
</pallas_src>

<mosaic_0001>
module attributes {stable_mosaic.version = 11 : i64} {
  func.func @_matmul_bias_relu_kernel(%arg0: i32, %arg1: memref<512x256xf32, #tpu.memory_space<vmem>>, %arg2: memref<256x32xf32, #tpu.memory_space<vmem>>, %arg3: memref<1x32xf32, #tpu.memory_space<vmem>>, %arg4: memref<512x32xf32, #tpu.memory_space<vmem>>) attributes {dimension_semantics = [#tpu.dimension_semantics<parallel>], iteration_bounds = array<i64: 3>, scalar_prefetch = 0 : i64, scratch_operands = 0 : i64, tpu.core_type = #tpu.core_type<tc>, window_params = [{transform_indices = @transform_0, window_bounds = array<i64: 512, 256>}, {pipeline_mode = #tpu.pipeline_mode<synchronous>, transform_indices = @transform_1, window_bounds = array<i64: 256, 32>}, {pipeline_mode = #tpu.pipeline_mode<synchronous>, transform_indices = @transform_2, window_bounds = array<i64: 1, 32>}, {transform_indices = @transform_3, window_bounds = array<i64: 512, 32>}]} {
    %c0 = arith.constant 0 : index
    %c0_0 = arith.constant 0 : index
    %0 = vector.load %arg1[%c0, %c0_0] : memref<512x256xf32, #tpu.memory_space<vmem>>, vector<512x256xf32>
    %c0_1 = arith.constant 0 : index
    %c0_2 = arith.constant 0 : index
    %1 = vector.load %arg2[%c0_1, %c0_2] : memref<256x32xf32, #tpu.memory_space<vmem>>, vector<256x32xf32>
    %cst = arith.constant dense<0.000000e+00> : vector<512x32xf32>
    %2 = tpu.matmul %0, %1, %cst {dimension_numbers = #tpu.dot_dimension_numbers<[1], [0], [0], [1], [0, 0, 1, 1], [], []>} : vector<512x256xf32>, vector<256x32xf32>, vector<512x32xf32> -> vector<512x32xf32>
    %c0_3 = arith.constant 0 : index
    %c0_4 = arith.constant 0 : index
    %3 = vector.load %arg3[%c0_3, %c0_4] : memref<1x32xf32, #tpu.memory_space<vmem>>, vector<1x32xf32>
    %4 = vector.broadcast %3 : vector<1x32xf32> to vector<512x32xf32>
    %5 = arith.addf %2, %4 : vector<512x32xf32>
    %cst_5 = arith.constant 0.000000e+00 : f32
    %6 = vector.broadcast %cst_5 : f32 to vector<512x32xf32>
    %7 = arith.maximumf %5, %6 : vector<512x32xf32>
    %c0_6 = arith.constant 0 : index
    %c0_7 = arith.constant 0 : index
    %8 = vector.load %arg4[%c0_6, %c0_7] : memref<512x32xf32, #tpu.memory_space<vmem>>, vector<512x32xf32>
    tpu.vector_store %arg4[%c0_6, %c0_7], %7 {strides = array<i32>} : memref<512x32xf32, #tpu.memory_space<vmem>>, vector<512x32xf32>,
    return
  }
  func.func @transform_0(%arg0: i32) -> (i32, i32) {
    %c0_i32 = arith.constant 0 : i32
    %c0_i32_0 = arith.constant 0 : i32
    return %arg0, %c0_i32 : i32, i32
  }
  func.func @transform_1(%arg0: i32) -> (i32, i32) {
    %c0_i32 = arith.constant 0 : i32
    %c0_i32_0 = arith.constant 0 : i32
    %c0_i32_1 = arith.constant 0 : i32
    return %c0_i32, %c0_i32_0 : i32, i32
  }
  func.func @transform_2(%arg0: i32) -> (i32, i32) {
    %c0_i32 = arith.constant 0 : i32
    %c0_i32_0 = arith.constant 0 : i32
    %c0_i32_1 = arith.constant 0 : i32
    return %c0_i32, %c0_i32_0 : i32, i32
  }
  func.func @transform_3(%arg0: i32) -> (i32, i32) {
    %c0_i32 = arith.constant 0 : i32
    %c0_i32_0 = arith.constant 0 : i32
    return %arg0, %c0_i32 : i32, i32
  }
}

module attributes {stable_mosaic.version = 11 : i64} {
  func.func @_matmul_bias_relu_kernel(%arg0: i32, %arg1: memref<208x800xf32, #tpu.memory_space<vmem>>, %arg2: memref<800x64xf32, #tpu.memory_space<vmem>>, %arg3: memref<1x64xf32, #tpu.memory_space<vmem>>, %arg4: memref<208x64xf32, #tpu.memory_space<vmem>>) attributes {dimension_semantics = [#tpu.dimension_semantics<parallel>], iteration_bounds = array<i64: 1>, scalar_prefetch = 0 : i64, scratch_operands = 0 : i64, tpu.core_type = #tpu.core_type<tc>, window_params = [{transform_indices = @transform_0, window_bounds = array<i64: 208, 800>}, {pipeline_mode = #tpu.pipeline_mode<synchronous>, transform_indices = @transform_1, window_bounds = array<i64: 800, 64>}, {pipeline_mode = #tpu.pipeline_mode<synchronous>, transform_indices = @transform_2, window_bounds = array<i64: 1, 64>}, {transform_indices = @transform_3, window_bounds = array<i64: 208, 64>}]} {
    %c0 = arith.constant 0 : index
    %c0_0 = arith.constant 0 : index
    %0 = vector.load %arg1[%c0, %c0_0] : memref<208x800xf32, #tpu.memory_space<vmem>>, vector<208x800xf32>
    %c0_1 = arith.constant 0 : index
    %c0_2 = arith.constant 0 : index
    %1 = vector.load %arg2[%c0_1, %c0_2] : memref<800x64xf32, #tpu.memory_space<vmem>>, vector<800x64xf32>
    %cst = arith.constant dense<0.000000e+00> : vector<208x64xf32>
    %2 = tpu.matmul %0, %1, %cst {dimension_numbers = #tpu.dot_dimension_numbers<[1], [0], [0], [1], [0, 0, 1, 1], [], []>} : vector<208x800xf32>, vector<800x64xf32>, vector<208x64xf32> -> vector<208x64xf32>
    %c0_3 = arith.constant 0 : index
    %c0_4 = arith.constant 0 : index
    %3 = vector.load %arg3[%c0_3, %c0_4] : memref<1x64xf32, #tpu.memory_space<vmem>>, vector<1x64xf32>
    %4 = vector.broadcast %3 : vector<1x64xf32> to vector<208x64xf32>
    %5 = arith.addf %2, %4 : vector<208x64xf32>
    %cst_5 = arith.constant 0.000000e+00 : f32
    %6 = vector.broadcast %cst_5 : f32 to vector<208x64xf32>
    %7 = arith.maximumf %5, %6 : vector<208x64xf32>
    %c0_6 = arith.constant 0 : index
    %c0_7 = arith.constant 0 : index
    %8 = vector.load %arg4[%c0_6, %c0_7] : memref<208x64xf32, #tpu.memory_space<vmem>>, vector<208x64xf32>
    tpu.vector_store %arg4[%c0_6, %c0_7], %7 {strides = array<i32>} : memref<208x64xf32, #tpu.memory_space<vmem>>, vector<208x64xf32>,
    return
  }
  func.func @transform_0(%arg0: i32) -> (i32, i32) {
    %c0_i32 = arith.constant 0 : i32
    %c0_i32_0 = arith.constant 0 : i32
    return %arg0, %c0_i32 : i32, i32
  }
  func.func @transform_1(%arg0: i32) -> (i32, i32) {
    %c0_i32 = arith.constant 0 : i32
    %c0_i32_0 = arith.constant 0 : i32
    %c0_i32_1 = arith.constant 0 : i32
    return %c0_i32, %c0_i32_0 : i32, i32
  }
  func.func @transform_2(%arg0: i32) -> (i32, i32) {
    %c0_i32 = arith.constant 0 : i32
    %c0_i32_0 = arith.constant 0 : i32
    %c0_i32_1 = arith.constant 0 : i32
    return %c0_i32, %c0_i32_0 : i32, i32
  }
  func.func @transform_3(%arg0: i32) -> (i32, i32) {
    %c0_i32 = arith.constant 0 : i32
    %c0_i32_0 = arith.constant 0 : i32
    return %arg0, %c0_i32 : i32, i32
  }
}

module attributes {stable_mosaic.version = 11 : i64} {
  func.func @_matmul_bias_relu_kernel(%arg0: i32, %arg1: memref<132x576xf32, #tpu.memory_space<vmem>>, %arg2: memref<576x64xf32, #tpu.memory_space<vmem>>, %arg3: memref<1x64xf32, #tpu.memory_space<vmem>>, %arg4: memref<132x64xf32, #tpu.memory_space<vmem>>) attributes {dimension_semantics = [#tpu.dimension_semantics<parallel>], iteration_bounds = array<i64: 1>, scalar_prefetch = 0 : i64, scratch_operands = 0 : i64, tpu.core_type = #tpu.core_type<tc>, window_params = [{transform_indices = @transform_0, window_bounds = array<i64: 132, 576>}, {pipeline_mode = #tpu.pipeline_mode<synchronous>, transform_indices = @transform_1, window_bounds = array<i64: 576, 64>}, {pipeline_mode = #tpu.pipeline_mode<synchronous>, transform_indices = @transform_2, window_bounds = array<i64: 1, 64>}, {transform_indices = @transform_3, window_bounds = array<i64: 132, 64>}]} {
    %c0 = arith.constant 0 : index
    %c0_0 = arith.constant 0 : index
    %0 = vector.load %arg1[%c0, %c0_0] : memref<132x576xf32, #tpu.memory_space<vmem>>, vector<132x576xf32>
    %c0_1 = arith.constant 0 : index
    %c0_2 = arith.constant 0 : index
    %1 = vector.load %arg2[%c0_1, %c0_2] : memref<576x64xf32, #tpu.memory_space<vmem>>, vector<576x64xf32>
    %cst = arith.constant dense<0.000000e+00> : vector<132x64xf32>
    %2 = tpu.matmul %0, %1, %cst {dimension_numbers = #tpu.dot_dimension_numbers<[1], [0], [0], [1], [0, 0, 1, 1], [], []>} : vector<132x576xf32>, vector<576x64xf32>, vector<132x64xf32> -> vector<132x64xf32>
    %c0_3 = arith.constant 0 : index
    %c0_4 = arith.constant 0 : index
    %3 = vector.load %arg3[%c0_3, %c0_4] : memref<1x64xf32, #tpu.memory_space<vmem>>, vector<1x64xf32>
    %4 = vector.broadcast %3 : vector<1x64xf32> to vector<132x64xf32>
    %5 = arith.addf %2, %4 : vector<132x64xf32>
    %cst_5 = arith.constant 0.000000e+00 : f32
    %6 = vector.broadcast %cst_5 : f32 to vector<132x64xf32>
    %7 = arith.maximumf %5, %6 : vector<132x64xf32>
    %c0_6 = arith.constant 0 : index
    %c0_7 = arith.constant 0 : index
    %8 = vector.load %arg4[%c0_6, %c0_7] : memref<132x64xf32, #tpu.memory_space<vmem>>, vector<132x64xf32>
    tpu.vector_store %arg4[%c0_6, %c0_7], %7 {strides = array<i32>} : memref<132x64xf32, #tpu.memory_space<vmem>>, vector<132x64xf32>,
    return
  }
  func.func @transform_0(%arg0: i32) -> (i32, i32) {
    %c0_i32 = arith.constant 0 : i32
    %c0_i32_0 = arith.constant 0 : i32
    return %arg0, %c0_i32 : i32, i32
  }
  func.func @transform_1(%arg0: i32) -> (i32, i32) {
    %c0_i32 = arith.constant 0 : i32
    %c0_i32_0 = arith.constant 0 : i32
    %c0_i32_1 = arith.constant 0 : i32
    return %c0_i32, %c0_i32_0 : i32, i32
  }
  func.func @transform_2(%arg0: i32) -> (i32, i32) {
    %c0_i32 = arith.constant 0 : i32
    %c0_i32_0 = arith.constant 0 : i32
    %c0_i32_1 = arith.constant 0 : i32
    return %c0_i32, %c0_i32_0 : i32, i32
  }
  func.func @transform_3(%arg0: i32) -> (i32, i32) {
    %c0_i32 = arith.constant 0 : i32
    %c0_i32_0 = arith.constant 0 : i32
    return %arg0, %c0_i32 : i32, i32
  }
}

module attributes {stable_mosaic.version = 11 : i64} {
  func.func @_mlp_head_kernel(%arg0: i32, %arg1: memref<2x4224xf32, #tpu.memory_space<vmem>>, %arg2: memref<4224x512xbf16, #tpu.memory_space<vmem>>, %arg3: memref<1x512xf32, #tpu.memory_space<vmem>>, %arg4: memref<512x6xbf16, #tpu.memory_space<vmem>>, %arg5: memref<1x6xf32, #tpu.memory_space<vmem>>, %arg6: memref<2x6xf32, #tpu.memory_space<vmem>>) attributes {dimension_semantics = [#tpu.dimension_semantics<arbitrary>], iteration_bounds = array<i64: 1>, scalar_prefetch = 0 : i64, scratch_operands = 0 : i64, tpu.core_type = #tpu.core_type<tc>, window_params = [{pipeline_mode = #tpu.pipeline_mode<synchronous>, transform_indices = @transform_0, window_bounds = array<i64: 2, 4224>}, {pipeline_mode = #tpu.pipeline_mode<synchronous>, transform_indices = @transform_1, window_bounds = array<i64: 4224, 512>}, {pipeline_mode = #tpu.pipeline_mode<synchronous>, transform_indices = @transform_2, window_bounds = array<i64: 1, 512>}, {pipeline_mode = #tpu.pipeline_mode<synchronous>, transform_indices = @transform_3, window_bounds = array<i64: 512, 6>}, {pipeline_mode = #tpu.pipeline_mode<synchronous>, transform_indices = @transform_4, window_bounds = array<i64: 1, 6>}, {pipeline_mode = #tpu.pipeline_mode<synchronous>, transform_indices = @transform_5, window_bounds = array<i64: 2, 6>}]} {
    %c0 = arith.constant 0 : index
    %c0_0 = arith.constant 0 : index
    %0 = vector.load %arg1[%c0, %c0_0] : memref<2x4224xf32, #tpu.memory_space<vmem>>, vector<2x4224xf32>
    %1 = arith.truncf %0 : vector<2x4224xf32> to vector<2x4224xbf16>
    %c0_1 = arith.constant 0 : index
    %c0_2 = arith.constant 0 : index
    %2 = vector.load %arg2[%c0_1, %c0_2] : memref<4224x512xbf16, #tpu.memory_space<vmem>>, vector<4224x512xbf16>
    %cst = arith.constant dense<0.000000e+00> : vector<2x512xf32>
    %3 = tpu.matmul %1, %2, %cst {dimension_numbers = #tpu.dot_dimension_numbers<[1], [0], [0], [1], [0, 0, 1, 1], [], []>} : vector<2x4224xbf16>, vector<4224x512xbf16>, vector<2x512xf32> -> vector<2x512xf32>
    %c0_3 = arith.constant 0 : index
    %c0_4 = arith.constant 0 : index
    %4 = vector.load %arg3[%c0_3, %c0_4] : memref<1x512xf32, #tpu.memory_space<vmem>>, vector<1x512xf32>
    %5 = vector.broadcast %4 : vector<1x512xf32> to vector<2x512xf32>
    %6 = arith.addf %3, %5 : vector<2x512xf32>
    %cst_5 = arith.constant 0.000000e+00 : f32
    %7 = vector.broadcast %cst_5 : f32 to vector<2x512xf32>
    %8 = arith.maximumf %6, %7 : vector<2x512xf32>
    %9 = arith.truncf %8 : vector<2x512xf32> to vector<2x512xbf16>
    %c0_6 = arith.constant 0 : index
    %c0_7 = arith.constant 0 : index
    %10 = vector.load %arg4[%c0_6, %c0_7] : memref<512x6xbf16, #tpu.memory_space<vmem>>, vector<512x6xbf16>
    %cst_8 = arith.constant dense<0.000000e+00> : vector<2x6xf32>
    %11 = tpu.matmul %9, %10, %cst_8 {dimension_numbers = #tpu.dot_dimension_numbers<[1], [0], [0], [1], [0, 0, 1, 1], [], []>} : vector<2x512xbf16>, vector<512x6xbf16>, vector<2x6xf32> -> vector<2x6xf32>
    %c0_9 = arith.constant 0 : index
    %c0_10 = arith.constant 0 : index
    %12 = vector.load %arg5[%c0_9, %c0_10] : memref<1x6xf32, #tpu.memory_space<vmem>>, vector<1x6xf32>
    %13 = vector.broadcast %12 : vector<1x6xf32> to vector<2x6xf32>
    %14 = arith.addf %11, %13 : vector<2x6xf32>
    %c0_11 = arith.constant 0 : index
    %c0_12 = arith.constant 0 : index
    %15 = vector.load %arg6[%c0_11, %c0_12] : memref<2x6xf32, #tpu.memory_space<vmem>>, vector<2x6xf32>
    tpu.vector_store %arg6[%c0_11, %c0_12], %14 {strides = array<i32>} : memref<2x6xf32, #tpu.memory_space<vmem>>, vector<2x6xf32>,
    return
  }
  func.func @transform_0(%arg0: i32) -> (i32, i32) {
    %c0_i32 = arith.constant 0 : i32
    %c0_i32_0 = arith.constant 0 : i32
    %c0_i32_1 = arith.constant 0 : i32
    return %c0_i32, %c0_i32_0 : i32, i32
  }
  func.func @transform_1(%arg0: i32) -> (i32, i32) {
    %c0_i32 = arith.constant 0 : i32
    %c0_i32_0 = arith.constant 0 : i32
    %c0_i32_1 = arith.constant 0 : i32
    return %c0_i32, %c0_i32_0 : i32, i32
  }
  func.func @transform_2(%arg0: i32) -> (i32, i32) {
    %c0_i32 = arith.constant 0 : i32
    %c0_i32_0 = arith.constant 0 : i32
    %c0_i32_1 = arith.constant 0 : i32
    return %c0_i32, %c0_i32_0 : i32, i32
  }
  func.func @transform_3(%arg0: i32) -> (i32, i32) {
    %c0_i32 = arith.constant 0 : i32
    %c0_i32_0 = arith.constant 0 : i32
    %c0_i32_1 = arith.constant 0 : i32
    return %c0_i32, %c0_i32_0 : i32, i32
  }
  func.func @transform_4(%arg0: i32) -> (i32, i32) {
    %c0_i32 = arith.constant 0 : i32
    %c0_i32_0 = arith.constant 0 : i32
    %c0_i32_1 = arith.constant 0 : i32
    return %c0_i32, %c0_i32_0 : i32, i32
  }
  func.func @transform_5(%arg0: i32) -> (i32, i32) {
    %c0_i32 = arith.constant 0 : i32
    %c0_i32_0 = arith.constant 0 : i32
    %c0_i32_1 = arith.constant 0 : i32
    return %c0_i32, %c0_i32_0 : i32, i32
  }
}

</mosaic_0001>

<bundles_post_ra>
// kernel: dqn_paper_forward.4
= control target key start
LH: loop header
LB: loop body
LE: loop exit
PB: predicated region body
PF: predicated region fallthrough
CT: control target
= control target key end

     0   :  { %s1641_s12 = smov 0   ;;  %s1643_s13 = smov 0   ;;  %s2374_s0 = inlined_call_operand.vmem [shape: f32[1102,256], index: 0, kind: input, shape index: {}]   ;;  %s2375_s1 = inlined_call_operand.vmem [shape: f32[256,32], index: 1, kind: input, shape index: {}]   ;;  %s2376_s2 = inlined_call_operand.vmem [shape: f32[1,32], index: 2, kind: input, shape index: {}]   ;;  %s2377_s3 = inlined_call_operand.vmem [shape: f32[1102,32], index: 3, kind: output, shape index: {}]  }
   0x1   :  { %s1645_s14 = smov 0  }
   0x2 LB: > { %s1654_s15 = sadd.s32 4294967295, %s1586_s14   ;;  %s1656_s16 = sadd.s32 1, %s1586_s14   ;;  %s1586_s14 = sphi %s1645_s14, %s2386_s14   ;;  %s1582_s13 = sphi %s1643_s13, %s2385_s13   ;;  %s1578_s12 = sphi %s1641_s12, %s2384_s12  }
   0x3   : > { %s85_s17 = ssub.s32 %s1586_s14, %s1656_s16  ;;  %s88_s18 = sadd.s32 1, %s1582_s13 }
   0x4   : > { %p86_p0 = scmp.eq.s32.totalorder %s85_s17, 0  ;;  %p98_p1 = scmp.ne.s32.totalorder %s1582_s13, %s1578_s12 }
   0x5   : > { %p99_p2 = scmp.eq.s32.totalorder %s1654_s15, 2  ;;  %p1352_p3 = scmp.ge.s32.totalorder %s1586_s14, 1 }
   0x6   : > { %s1664_s19 = scalar_select %p86_p0, %s1582_s13, %s88_s18  }
   0x7   : > { %p1666_p4 = por %p99_p2, %p98_p1  ;;  %p149_p5 = scmp.lt.s32.totalorder %s1586_s14, 4 }
   0x9   : > { %p150_p6 = pnand %p1352_p3, %p149_p5 }
   0xa   : > { %s1789_s27 = sshll.u32 (!%p150_p6), %s1654_s15, 6  ;;  %s175_s29 = sand.u32 (!%p150_p6), 1, %s1578_s12  }
   0xb   : > { %153 = sbr.rel (%p150_p6) target bundleno = 468 (0x1d4), region = 32  ;;  %p184_p7 = scmp.lt.s32.totalorder (!%p150_p6), %s1789_s27, 137 }
   0xc   : > { %s1353_s5 = sshll.u32 (!%p150_p6), %s175_s29, 9 }
   0xd   : > { %s1976_s12 = scalar_lea.vmem (!%p150_p6), [#allocation2], %s1353_s5  }
  0x10   : > { %v343_v0 = vld [vmem:[%s2375_s1 + $0x78] sm:$0xff]  ;;  %v1620_v1 = vmov 0.0   ;;  %v342_v2 = vld [vmem:[%s2375_s1 + $0x70] sm:$0xff]  ;;  %v341_v3 = vld [vmem:[%s2375_s1 + $0x68] sm:$0xff]  ;;  %s185_s7 = scalar_select %p184_p7, %s1789_s27, 137  ;;  %vm816_vm0 = vcmask 261120  }
  0x11   : > { %367 = vmatprep.subr.mxu0 %v1620_v1  ;;  %1379 = vmatprep.subr.mxu1 %v1620_v1  ;;  %v340_v4 = vld [vmem:[%s2375_s1 + $0x60] sm:$0xff]  ;;  %v339_v5 = vld [vmem:[%s2375_s1 + $0x58] sm:$0xff]  ;;  %v338_v6 = vld [vmem:[%s2375_s1 + $0x50] sm:$0xff]  ;;  %s889_s6 = ssub.s32 (%p1666_p4), 138, %s1789_s27 }
  0x12   : > { %368 = vmatpush1.msra.mxu0 %v343_v0  ;;  %1411 = vmatpush1.msra.mxu1 %v343_v0  ;;  %v337_v7 = vld [vmem:[%s2375_s1 + $0x48] sm:$0xff]  ;;  %v336_v8 = vld [vmem:[%s2375_s1 + $0x40] sm:$0xff]  ;;  %v335_v9 = vld [vmem:[%s2375_s1 + $0x38] sm:$0xff]  ;;  %s1375_s14 = sshll.u32 %s185_s7, 4  ;;  %s1376_s7 = sshll.u32 (%p1666_p4), %s1654_s15, 9 }
  0x13   : > { %369 = vmatprep.subr.mxu0 %v1620_v1  ;;  %1380 = vmatprep.subr.mxu1 %v1620_v1  ;;  %v334_v10 = vld [vmem:[%s2375_s1 + $0x30] sm:$0xff]  ;;  %v333_v11 = vld [vmem:[%s2375_s1 + $0x28] sm:$0xff]  ;;  %v332_v12 = vld [vmem:[%s2375_s1 + $0x20] sm:$0xff]  ;;  %s1831_s25 = scalar_lea.vmem %s2374_s0, %s1375_s14  ;;  %p890_p8 = scmp.lt.s32.totalorder (%p1666_p4), %s889_s6, 64 }
  0x14   : > { %370 = vmatpush1.msra.mxu0 %v342_v2  ;;  %1412 = vmatpush1.msra.mxu1 %v342_v2  ;;  %v331_v13 = vld [vmem:[%s2375_s1 + $0x18] sm:$0xff]  ;;  %v330_v14 = vld [vmem:[%s2375_s1 + $0x10] sm:$0xff]  ;;  %v329_v15 = vld [vmem:[%s2375_s1 + $0x8] sm:$0xff]  ;;  %s2175_s10 = scalar_lea.vmem (%p1666_p4), %s2377_s3, %s1376_s7  }
  0x15   : > { %371 = vmatprep.subr.mxu0 %v1620_v1  ;;  %1381 = vmatprep.subr.mxu1 %v1620_v1  ;;  %v328_v16 = vld [vmem:[%s2375_s1] sm:$0xff]  ;;  %v359_v17 = vld [vmem:[%s2375_s1 + $0xf8] sm:$0xff]  ;;  %v358_v18 = vld [vmem:[%s2375_s1 + $0xf0] sm:$0xff] }
  0x16   : > { %372 = vmatpush1.msra.mxu0 %v341_v3  ;;  %1413 = vmatpush1.msra.mxu1 %v341_v3  ;;  %v357_v19 = vld [vmem:[%s2375_s1 + $0xe8] sm:$0xff]  ;;  %v356_v20 = vld [vmem:[%s2375_s1 + $0xe0] sm:$0xff]  ;;  %v355_v21 = vld [vmem:[%s2375_s1 + $0xd8] sm:$0xff] }
  0x17   : > { %373 = vmatprep.subr.mxu0 %v1620_v1  ;;  %1382 = vmatprep.subr.mxu1 %v1620_v1  ;;  %v354_v22 = vld [vmem:[%s2375_s1 + $0xd0] sm:$0xff]  ;;  %v353_v23 = vld [vmem:[%s2375_s1 + $0xc8] sm:$0xff]  ;;  %v352_v24 = vld [vmem:[%s2375_s1 + $0xc0] sm:$0xff] }
  0x18   : > { %374 = vmatpush1.msra.mxu0 %v340_v4  ;;  %1414 = vmatpush1.msra.mxu1 %v340_v4  ;;  %v351_v25 = vld [vmem:[%s2375_s1 + $0xb8] sm:$0xff]  ;;  %v350_v26 = vld [vmem:[%s2375_s1 + $0xb0] sm:$0xff]  ;;  %v349_v27 = vld [vmem:[%s2375_s1 + $0xa8] sm:$0xff] }
  0x19   : > { %375 = vmatprep.subr.mxu0 %v1620_v1  ;;  %1383 = vmatprep.subr.mxu1 %v1620_v1  ;;  %v348_v28 = vld [vmem:[%s2375_s1 + $0xa0] sm:$0xff]  ;;  %v347_v29 = vld [vmem:[%s2375_s1 + $0x98] sm:$0xff]  ;;  %v346_v30 = vld [vmem:[%s2375_s1 + $0x90] sm:$0xff] }
  0x1a   : > { %376 = vmatpush1.msra.mxu0 %v339_v5  ;;  %1415 = vmatpush1.msra.mxu1 %v339_v5  ;;  %v345_v31 = vld [vmem:[%s2375_s1 + $0x88] sm:$0xff]  ;;  %v344_v32 = vld [vmem:[%s2375_s1 + $0x80] sm:$0xff]  ;;  %v203_v37 = vld [vmem:[%s1831_s25 + $0x18] sm:$0xff] }
  0x1b   : > { %377 = vmatprep.subr.mxu0 %v1620_v1  ;;  %1384 = vmatprep.subr.mxu1 %v1620_v1  ;;  %v201_v33 = vld [vmem:[%s1831_s25 + $0x8] sm:$0xff]  ;;  %v200_v35 = vld [vmem:[%s1831_s25] sm:$0xff]  ;;  %v267_v38 = vld [vmem:[%s1831_s25 + $0x218] sm:$0xff] }
  0x1c   : > { %378 = vmatpush1.msra.mxu0 %v338_v6  ;;  %1416 = vmatpush1.msra.mxu1 %v338_v6  ;;  %v265_v34 = vld [vmem:[%s1831_s25 + $0x208] sm:$0xff]  ;;  %v264_v36 = vld [vmem:[%s1831_s25 + $0x200] sm:$0xff]  ;;  %v202_v39 = vld [vmem:[%s1831_s25 + $0x10] sm:$0xff] }
  0x1d   : > { %379 = vmatprep.subr.mxu0 %v1620_v1  ;;  %1385 = vmatprep.subr.mxu1 %v1620_v1  ;;  %v266_v40 = vld [vmem:[%s1831_s25 + $0x210] sm:$0xff]  ;;  %v205_v41 = vld [vmem:[%s1831_s25 + $0x28] sm:$0xff]  ;;  %v204_v43 = vld [vmem:[%s1831_s25 + $0x20] sm:$0xff] }
  0x1e   : > { %380 = vmatpush1.msra.mxu0 %v337_v7  ;;  %1417 = vmatpush1.msra.mxu1 %v337_v7  ;;  %v269_v42 = vld [vmem:[%s1831_s25 + $0x228] sm:$0xff]  ;;  %v268_v44 = vld [vmem:[%s1831_s25 + $0x220] sm:$0xff]  ;;  %v207_v45 = vld [vmem:[%s1831_s25 + $0x38] sm:$0xff] }
  0x1f   : > { %381 = vmatprep.subr.mxu0 %v1620_v1  ;;  %1386 = vmatprep.subr.mxu1 %v1620_v1  ;;  %v271_v46 = vld [vmem:[%s1831_s25 + $0x238] sm:$0xff]  ;;  %v206_v47 = vld [vmem:[%s1831_s25 + $0x30] sm:$0xff]  ;;  %v209_v49 = vld [vmem:[%s1831_s25 + $0x48] sm:$0xff] }
  0x20   : > { %382 = vmatpush1.msra.mxu0 %v336_v8  ;;  %1418 = vmatpush1.msra.mxu1 %v336_v8  ;;  %v270_v48 = vld [vmem:[%s1831_s25 + $0x230] sm:$0xff]  ;;  %v273_v50 = vld [vmem:[%s1831_s25 + $0x248] sm:$0xff]  ;;  %v208_v51 = vld [vmem:[%s1831_s25 + $0x40] sm:$0xff] }
  0x21   : > { %383 = vmatprep.subr.mxu0 %v1620_v1  ;;  %1387 = vmatprep.subr.mxu1 %v1620_v1  ;;  %v272_v52 = vld [vmem:[%s1831_s25 + $0x240] sm:$0xff]  ;;  %v211_v53 = vld [vmem:[%s1831_s25 + $0x58] sm:$0xff]  ;;  %v210_v55 = vld [vmem:[%s1831_s25 + $0x50] sm:$0xff] }
  0x22   : > { %384 = vmatpush1.msra.mxu0 %v335_v9  ;;  %1419 = vmatpush1.msra.mxu1 %v335_v9  ;;  %v275_v54 = vld [vmem:[%s1831_s25 + $0x258] sm:$0xff]  ;;  %v274_v56 = vld [vmem:[%s1831_s25 + $0x250] sm:$0xff]  ;;  %v213_v57 = vld [vmem:[%s1831_s25 + $0x68] sm:$0xff] }
  0x23   : > { %385 = vmatprep.subr.mxu0 %v1620_v1  ;;  %1388 = vmatprep.subr.mxu1 %v1620_v1  ;;  %v277_v58 = vld [vmem:[%s1831_s25 + $0x268] sm:$0xff]  ;;  %v212_v59 = vld [vmem:[%s1831_s25 + $0x60] sm:$0xff]  ;;  %v215_v61 = vld [vmem:[%s1831_s25 + $0x78] sm:$0xff] }
  0x24   : > { %386 = vmatpush1.msra.mxu0 %v334_v10  ;;  %1420 = vmatpush1.msra.mxu1 %v334_v10  ;;  %v276_v60 = vld [vmem:[%s1831_s25 + $0x260] sm:$0xff]  ;;  %v279_v62 = vld [vmem:[%s1831_s25 + $0x278] sm:$0xff]  ;;  %v214_v63 = vld [vmem:[%s1831_s25 + $0x70] sm:$0xff] }
  0x25   : > { %387 = vmatprep.subr.mxu0 %v1620_v1  ;;  %1389 = vmatprep.subr.mxu1 %v1620_v1  ;;  %v278_v0 = vld [vmem:[%s1831_s25 + $0x270] sm:$0xff]  ;;  %v281_v2 = vld [vmem:[%s1831_s25 + $0x288] sm:$0xff]  ;;  %v216_v3 = vld [vmem:[%s1831_s25 + $0x80] sm:$0xff] }
  0x26   : > { %388 = vmatpush1.msra.mxu0 %v333_v11  ;;  %1421 = vmatpush1.msra.mxu1 %v333_v11  ;;  %v280_v4 = vld [vmem:[%s1831_s25 + $0x280] sm:$0xff]  ;;  %v219_v5 = vld [vmem:[%s1831_s25 + $0x98] sm:$0xff]  ;;  %v218_v7 = vld [vmem:[%s1831_s25 + $0x90] sm:$0xff] }
  0x27   : > { %389 = vmatprep.subr.mxu0 %v1620_v1  ;;  %1390 = vmatprep.subr.mxu1 %v1620_v1  ;;  %v283_v6 = vld [vmem:[%s1831_s25 + $0x298] sm:$0xff]  ;;  %v282_v8 = vld [vmem:[%s1831_s25 + $0x290] sm:$0xff]  ;;  %v221_v9 = vld [vmem:[%s1831_s25 + $0xa8] sm:$0xff] }
  0x28   : > { %390 = vmatpush1.msra.mxu0 %v332_v12  ;;  %1422 = vmatpush1.msra.mxu1 %v332_v12  ;;  %v285_v10 = vld [vmem:[%s1831_s25 + $0x2a8] sm:$0xff]  ;;  %v220_v11 = vld [vmem:[%s1831_s25 + $0xa0] sm:$0xff] }
  0x29   : > { %391 = vmatprep.subr.mxu0 %v1620_v1  ;;  %1391 = vmatprep.subr.mxu1 %v1620_v1  ;;  %v284_v12 = vld [vmem:[%s1831_s25 + $0x2a0] sm:$0xff] }
  0x2a   : > { %392 = vmatpush1.msra.mxu0 %v331_v13  ;;  %1423 = vmatpush1.msra.mxu1 %v331_v13  ;;  %v223_v13 = vld [vmem:[%s1831_s25 + $0xb8] sm:$0xff] }
  0x2b   : > { %393 = vmatprep.subr.mxu0 %v1620_v1  ;;  %1392 = vmatprep.subr.mxu1 %v1620_v1 }
  0x2c   : > { %394 = vmatpush1.msra.mxu0 %v330_v14  ;;  %1424 = vmatpush1.msra.mxu1 %v330_v14  ;;  %v287_v14 = vld [vmem:[%s1831_s25 + $0x2b8] sm:$0xff] }
  0x2d   : > { %395 = vmatprep.subr.mxu0 %v1620_v1  ;;  %1393 = vmatprep.subr.mxu1 %v1620_v1 }
  0x2e   : > { %396 = vmatpush1.msra.mxu0 %v329_v15  ;;  %1425 = vmatpush1.msra.mxu1 %v329_v15  ;;  %v222_v15 = vld [vmem:[%s1831_s25 + $0xb0] sm:$0xff] }
  0x2f   : > { %397 = vmatprep.subr.mxu0 %v1620_v1  ;;  %1394 = vmatprep.subr.mxu1 %v1620_v1 }
  0x30   : > { %398 = vmatpush1.msra.mxu0 %v328_v16  ;;  %1426 = vmatpush1.msra.mxu1 %v328_v16  ;;  %v286_v16 = vld [vmem:[%s1831_s25 + $0x2b0] sm:$0xff] }
  0x31   : > { %399 = vmatprep.subr.mxu0 %v1620_v1  ;;  %1395 = vmatprep.subr.mxu1 %v1620_v1 }
  0x32   : > { %400 = vmatpush2.msra.mxu0 %v359_v17  ;;  %1427 = vmatpush2.msra.mxu1 %v359_v17  ;;  %v225_v17 = vld [vmem:[%s1831_s25 + $0xc8] sm:$0xff] }
  0x33   : > { %401 = vmatprep.subr.mxu0 %v1620_v1  ;;  %1396 = vmatprep.subr.mxu1 %v1620_v1 }
  0x34   : > { %402 = vmatpush2.msra.mxu0 %v358_v18  ;;  %1428 = vmatpush2.msra.mxu1 %v358_v18  ;;  %v289_v18 = vld [vmem:[%s1831_s25 + $0x2c8] sm:$0xff] }
  0x35   : > { %403 = vmatprep.subr.mxu0 %v1620_v1  ;;  %1397 = vmatprep.subr.mxu1 %v1620_v1 }
  0x36   : > { %404 = vmatpush2.msra.mxu0 %v357_v19  ;;  %1429 = vmatpush2.msra.mxu1 %v357_v19  ;;  %v224_v19 = vld [vmem:[%s1831_s25 + $0xc0] sm:$0xff] }
  0x37   : > { %405 = vmatprep.subr.mxu0 %v1620_v1  ;;  %1398 = vmatprep.subr.mxu1 %v1620_v1 }
  0x38   : > { %406 = vmatpush2.msra.mxu0 %v356_v20  ;;  %1430 = vmatpush2.msra.mxu1 %v356_v20  ;;  %v288_v20 = vld [vmem:[%s1831_s25 + $0x2c0] sm:$0xff] }
  0x39   : > { %407 = vmatprep.subr.mxu0 %v1620_v1  ;;  %1399 = vmatprep.subr.mxu1 %v1620_v1 }
  0x3a   : > { %408 = vmatpush2.msra.mxu0 %v355_v21  ;;  %1431 = vmatpush2.msra.mxu1 %v355_v21  ;;  %v227_v21 = vld [vmem:[%s1831_s25 + $0xd8] sm:$0xff] }
  0x3b   : > { %409 = vmatprep.subr.mxu0 %v1620_v1  ;;  %1400 = vmatprep.subr.mxu1 %v1620_v1 }
  0x3c   : > { %410 = vmatpush2.msra.mxu0 %v354_v22  ;;  %1432 = vmatpush2.msra.mxu1 %v354_v22  ;;  %v291_v22 = vld [vmem:[%s1831_s25 + $0x2d8] sm:$0xff] }
  0x3d   : > { %411 = vmatprep.subr.mxu0 %v1620_v1  ;;  %1401 = vmatprep.subr.mxu1 %v1620_v1 }
  0x3e   : > { %412 = vmatpush2.msra.mxu0 %v353_v23  ;;  %1433 = vmatpush2.msra.mxu1 %v353_v23  ;;  %v226_v23 = vld [vmem:[%s1831_s25 + $0xd0] sm:$0xff] }
  0x3f   : > { %413 = vmatprep.subr.mxu0 %v1620_v1  ;;  %1402 = vmatprep.subr.mxu1 %v1620_v1 }
  0x40   : > { %414 = vmatpush2.msra.mxu0 %v352_v24  ;;  %1434 = vmatpush2.msra.mxu1 %v352_v24  ;;  %v290_v24 = vld [vmem:[%s1831_s25 + $0x2d0] sm:$0xff] }
  0x41   : > { %415 = vmatprep.subr.mxu0 %v1620_v1  ;;  %1403 = vmatprep.subr.mxu1 %v1620_v1 }
  0x42   : > { %416 = vmatpush2.msra.mxu0 %v351_v25  ;;  %1435 = vmatpush2.msra.mxu1 %v351_v25  ;;  %v229_v25 = vld [vmem:[%s1831_s25 + $0xe8] sm:$0xff] }
  0x43   : > { %417 = vmatprep.subr.mxu0 %v1620_v1  ;;  %1404 = vmatprep.subr.mxu1 %v1620_v1 }
  0x44   : > { %418 = vmatpush2.msra.mxu0 %v350_v26  ;;  %1436 = vmatpush2.msra.mxu1 %v350_v26  ;;  %v293_v26 = vld [vmem:[%s1831_s25 + $0x2e8] sm:$0xff] }
  0x45   : > { %419 = vmatprep.subr.mxu0 %v1620_v1  ;;  %1405 = vmatprep.subr.mxu1 %v1620_v1 }
  0x46   : > { %420 = vmatpush2.msra.mxu0 %v349_v27  ;;  %1437 = vmatpush2.msra.mxu1 %v349_v27  ;;  %v228_v27 = vld [vmem:[%s1831_s25 + $0xe0] sm:$0xff] }
  0x47   : > { %421 = vmatprep.subr.mxu0 %v1620_v1  ;;  %1406 = vmatprep.subr.mxu1 %v1620_v1 }
  0x48   : > { %422 = vmatpush2.msra.mxu0 %v348_v28  ;;  %1438 = vmatpush2.msra.mxu1 %v348_v28  ;;  %v292_v28 = vld [vmem:[%s1831_s25 + $0x2e0] sm:$0xff] }
  0x49   : > { %423 = vmatprep.subr.mxu0 %v1620_v1  ;;  %1407 = vmatprep.subr.mxu1 %v1620_v1 }
  0x4a   : > { %424 = vmatpush2.msra.mxu0 %v347_v29  ;;  %1439 = vmatpush2.msra.mxu1 %v347_v29  ;;  %v231_v29 = vld [vmem:[%s1831_s25 + $0xf8] sm:$0xff] }
  0x4b   : > { %425 = vmatprep.subr.mxu0 %v1620_v1  ;;  %1408 = vmatprep.subr.mxu1 %v1620_v1 }
  0x4c   : > { %426 = vmatpush2.msra.mxu0 %v346_v30  ;;  %1440 = vmatpush2.msra.mxu1 %v346_v30  ;;  %v295_v30 = vld [vmem:[%s1831_s25 + $0x2f8] sm:$0xff] }
  0x4d   : > { %427 = vmatprep.subr.mxu0 %v1620_v1  ;;  %1409 = vmatprep.subr.mxu1 %v1620_v1 }
  0x4e   : > { %428 = vmatpush2.msra.mxu0 %v345_v31  ;;  %1441 = vmatpush2.msra.mxu1 %v345_v31  ;;  %v230_v31 = vld [vmem:[%s1831_s25 + $0xf0] sm:$0xff] }
  0x4f   : > { %429 = vmatprep.subr.mxu0 %v1620_v1  ;;  %1410 = vmatprep.subr.mxu1 %v1620_v1  ;;  %v217_v1 = vld [vmem:[%s1831_s25 + $0x88] sm:$0xff] }
  0x50   : > { %430 = vmatpush2.msra.mxu0 %v344_v32  ;;  %1442 = vmatpush2.msra.mxu1 %v344_v32  ;;  %v294_v32 = vld [vmem:[%s1831_s25 + $0x2f0] sm:$0xff] }
  0x51   : > { %431 = vmatprep.mubr.f32.mxu0 %v201_v33  ;;  %591 = vmatprep.mubr.f32.mxu1 %v265_v34  ;;  %v233_v33 = vld [vmem:[%s1831_s25 + $0x108] sm:$0xff] }
  0x52   : > { %432 = vmatmul.mubr.f32.vlgmr.msra.gmra.mxu0 %v200_v35  ;;  %592 = vmatmul.mubr.f32.vlgmr.msra.gmra.mxu1 %v264_v36  ;;  %v297_v34 = vld [vmem:[%s1831_s25 + $0x308] sm:$0xff]  ;;  %v232_v35 = vld [vmem:[%s1831_s25 + $0x100] sm:$0xff] }
  0x53   : > { %436 = vmatprep.mubr.f32.mxu0 %v203_v37  ;;  %596 = vmatprep.mubr.f32.mxu1 %v267_v38  ;;  %v296_v36 = vld [vmem:[%s1831_s25 + $0x300] sm:$0xff]  ;;  %v235_v37 = vld [vmem:[%s1831_s25 + $0x118] sm:$0xff] }
  0x54   : > { %v299_v38 = vld [vmem:[%s1831_s25 + $0x318] sm:$0xff] }
  0x56   : > { %437 = vmatmul.mubr.f32.gmra.mxu0 %v202_v39  ;;  %597 = vmatmul.mubr.f32.gmra.mxu1 %v266_v40  ;;  %v234_v39 = vld [vmem:[%s1831_s25 + $0x110] sm:$0xff] }
  0x57   : > { %441 = vmatprep.mubr.f32.mxu0 %v205_v41  ;;  %601 = vmatprep.mubr.f32.mxu1 %v269_v42  ;;  %v298_v40 = vld [vmem:[%s1831_s25 + $0x310] sm:$0xff]  ;;  %v237_v41 = vld [vmem:[%s1831_s25 + $0x128] sm:$0xff] }
  0x58   : > { %v301_v42 = vld [vmem:[%s1831_s25 + $0x328] sm:$0xff] }
  0x5a   : > { %442 = vmatmul.mubr.f32.gmra.mxu0 %v204_v43  ;;  %602 = vmatmul.mubr.f32.gmra.mxu1 %v268_v44  ;;  %v236_v43 = vld [vmem:[%s1831_s25 + $0x120] sm:$0xff] }
  0x5b   : > { %446 = vmatprep.mubr.f32.mxu0 %v207_v45  ;;  %606 = vmatprep.mubr.f32.mxu1 %v271_v46  ;;  %v300_v44 = vld [vmem:[%s1831_s25 + $0x320] sm:$0xff]  ;;  %v239_v45 = vld [vmem:[%s1831_s25 + $0x138] sm:$0xff] }
  0x5c   : > { %v303_v46 = vld [vmem:[%s1831_s25 + $0x338] sm:$0xff] }
  0x5e   : > { %447 = vmatmul.mubr.f32.gmra.mxu0 %v206_v47  ;;  %607 = vmatmul.mubr.f32.gmra.mxu1 %v270_v48  ;;  %v238_v47 = vld [vmem:[%s1831_s25 + $0x130] sm:$0xff] }
  0x5f   : > { %451 = vmatprep.mubr.f32.mxu0 %v209_v49  ;;  %611 = vmatprep.mubr.f32.mxu1 %v273_v50  ;;  %v302_v48 = vld [vmem:[%s1831_s25 + $0x330] sm:$0xff]  ;;  %v241_v49 = vld [vmem:[%s1831_s25 + $0x148] sm:$0xff] }
  0x60   : > { %v305_v50 = vld [vmem:[%s1831_s25 + $0x348] sm:$0xff] }
  0x62   : > { %452 = vmatmul.mubr.f32.gmra.mxu0 %v208_v51  ;;  %612 = vmatmul.mubr.f32.gmra.mxu1 %v272_v52  ;;  %v240_v51 = vld [vmem:[%s1831_s25 + $0x140] sm:$0xff] }
  0x63   : > { %456 = vmatprep.mubr.f32.mxu0 %v211_v53  ;;  %616 = vmatprep.mubr.f32.mxu1 %v275_v54  ;;  %v304_v52 = vld [vmem:[%s1831_s25 + $0x340] sm:$0xff]  ;;  %v243_v53 = vld [vmem:[%s1831_s25 + $0x158] sm:$0xff] }
  0x64   : > { %v307_v54 = vld [vmem:[%s1831_s25 + $0x358] sm:$0xff] }
  0x66   : > { %457 = vmatmul.mubr.f32.gmra.mxu0 %v210_v55  ;;  %617 = vmatmul.mubr.f32.gmra.mxu1 %v274_v56  ;;  %v242_v55 = vld [vmem:[%s1831_s25 + $0x150] sm:$0xff] }
  0x67   : > { %461 = vmatprep.mubr.f32.mxu0 %v213_v57  ;;  %621 = vmatprep.mubr.f32.mxu1 %v277_v58  ;;  %v306_v56 = vld [vmem:[%s1831_s25 + $0x350] sm:$0xff]  ;;  %v245_v57 = vld [vmem:[%s1831_s25 + $0x168] sm:$0xff] }
  0x68   : > { %v309_v58 = vld [vmem:[%s1831_s25 + $0x368] sm:$0xff] }
  0x6a   : > { %462 = vmatmul.mubr.f32.gmra.mxu0 %v212_v59  ;;  %622 = vmatmul.mubr.f32.gmra.mxu1 %v276_v60  ;;  %v244_v59 = vld [vmem:[%s1831_s25 + $0x160] sm:$0xff] }
  0x6b   : > { %466 = vmatprep.mubr.f32.mxu0 %v215_v61  ;;  %626 = vmatprep.mubr.f32.mxu1 %v279_v62  ;;  %v308_v60 = vld [vmem:[%s1831_s25 + $0x360] sm:$0xff]  ;;  %v247_v61 = vld [vmem:[%s1831_s25 + $0x178] sm:$0xff] }
  0x6c   : > { %v311_v62 = vld [vmem:[%s1831_s25 + $0x378] sm:$0xff] }
  0x6e   : > { %467 = vmatmul.mubr.f32.gmra.mxu0 %v214_v63  ;;  %627 = vmatmul.mubr.f32.gmra.mxu1 %v278_v0  ;;  %v246_v63 = vld [vmem:[%s1831_s25 + $0x170] sm:$0xff] }
  0x6f   : > { %471 = vmatprep.mubr.f32.mxu0 %v217_v1  ;;  %631 = vmatprep.mubr.f32.mxu1 %v281_v2  ;;  %v310_v0 = vld [vmem:[%s1831_s25 + $0x370] sm:$0xff]  ;;  %v249_v1 = vld [vmem:[%s1831_s25 + $0x188] sm:$0xff] }
  0x70   : > { %v313_v2 = vld [vmem:[%s1831_s25 + $0x388] sm:$0xff] }
  0x72   : > { %472 = vmatmul.mubr.f32.gmra.mxu0 %v216_v3  ;;  %632 = vmatmul.mubr.f32.gmra.mxu1 %v280_v4  ;;  %v248_v3 = vld [vmem:[%s1831_s25 + $0x180] sm:$0xff] }
  0x73   : > { %476 = vmatprep.mubr.f32.mxu0 %v219_v5  ;;  %636 = vmatprep.mubr.f32.mxu1 %v283_v6  ;;  %v312_v4 = vld [vmem:[%s1831_s25 + $0x380] sm:$0xff]  ;;  %v251_v5 = vld [vmem:[%s1831_s25 + $0x198] sm:$0xff] }
  0x74   : > { %v315_v6 = vld [vmem:[%s1831_s25 + $0x398] sm:$0xff] }
  0x76   : > { %477 = vmatmul.mubr.f32.gmra.mxu0 %v218_v7  ;;  %637 = vmatmul.mubr.f32.gmra.mxu1 %v282_v8  ;;  %v250_v7 = vld [vmem:[%s1831_s25 + $0x190] sm:$0xff] }
  0x77   : > { %481 = vmatprep.mubr.f32.mxu0 %v221_v9  ;;  %641 = vmatprep.mubr.f32.mxu1 %v285_v10  ;;  %v314_v8 = vld [vmem:[%s1831_s25 + $0x390] sm:$0xff]  ;;  %v253_v9 = vld [vmem:[%s1831_s25 + $0x1a8] sm:$0xff] }
  0x78   : > { %v317_v10 = vld [vmem:[%s1831_s25 + $0x3a8] sm:$0xff] }
  0x7a   : > { %482 = vmatmul.mubr.f32.gmra.mxu0 %v220_v11  ;;  %642 = vmatmul.mubr.f32.gmra.mxu1 %v284_v12  ;;  %v252_v11 = vld [vmem:[%s1831_s25 + $0x1a0] sm:$0xff] }
  0x7b   : > { %486 = vmatprep.mubr.f32.mxu0 %v223_v13  ;;  %646 = vmatprep.mubr.f32.mxu1 %v287_v14  ;;  %v316_v12 = vld [vmem:[%s1831_s25 + $0x3a0] sm:$0xff]  ;;  %v255_v13 = vld [vmem:[%s1831_s25 + $0x1b8] sm:$0xff] }
  0x7c   : > { %v319_v14 = vld [vmem:[%s1831_s25 + $0x3b8] sm:$0xff] }
  0x7e   : > { %487 = vmatmul.mubr.f32.gmra.mxu0 %v222_v15  ;;  %647 = vmatmul.mubr.f32.gmra.mxu1 %v286_v16  ;;  %v254_v15 = vld [vmem:[%s1831_s25 + $0x1b0] sm:$0xff] }
  0x7f   : > { %491 = vmatprep.mubr.f32.mxu0 %v225_v17  ;;  %651 = vmatprep.mubr.f32.mxu1 %v289_v18  ;;  %v318_v16 = vld [vmem:[%s1831_s25 + $0x3b0] sm:$0xff]  ;;  %v257_v17 = vld [vmem:[%s1831_s25 + $0x1c8] sm:$0xff] }
  0x80   : > { %v321_v18 = vld [vmem:[%s1831_s25 + $0x3c8] sm:$0xff] }
  0x82   : > { %492 = vmatmul.mubr.f32.gmra.mxu0 %v224_v19  ;;  %652 = vmatmul.mubr.f32.gmra.mxu1 %v288_v20  ;;  %v256_v19 = vld [vmem:[%s1831_s25 + $0x1c0] sm:$0xff] }
  0x83   : > { %496 = vmatprep.mubr.f32.mxu0 %v227_v21  ;;  %656 = vmatprep.mubr.f32.mxu1 %v291_v22  ;;  %v320_v20 = vld [vmem:[%s1831_s25 + $0x3c0] sm:$0xff]  ;;  %v259_v21 = vld [vmem:[%s1831_s25 + $0x1d8] sm:$0xff] }
  0x84   : > { %v323_v22 = vld [vmem:[%s1831_s25 + $0x3d8] sm:$0xff] }
  0x86   : > { %497 = vmatmul.mubr.f32.gmra.mxu0 %v226_v23  ;;  %657 = vmatmul.mubr.f32.gmra.mxu1 %v290_v24  ;;  %v258_v23 = vld [vmem:[%s1831_s25 + $0x1d0] sm:$0xff] }
  0x87   : > { %501 = vmatprep.mubr.f32.mxu0 %v229_v25  ;;  %661 = vmatprep.mubr.f32.mxu1 %v293_v26  ;;  %v322_v24 = vld [vmem:[%s1831_s25 + $0x3d0] sm:$0xff]  ;;  %v261_v25 = vld [vmem:[%s1831_s25 + $0x1e8] sm:$0xff] }
  0x88   : > { %v325_v26 = vld [vmem:[%s1831_s25 + $0x3e8] sm:$0xff] }
  0x8a   : > { %502 = vmatmul.mubr.f32.gmra.mxu0 %v228_v27  ;;  %662 = vmatmul.mubr.f32.gmra.mxu1 %v292_v28  ;;  %v260_v27 = vld [vmem:[%s1831_s25 + $0x1e0] sm:$0xff] }
  0x8b   : > { %506 = vmatprep.mubr.f32.mxu0 %v231_v29  ;;  %666 = vmatprep.mubr.f32.mxu1 %v295_v30  ;;  %v324_v28 = vld [vmem:[%s1831_s25 + $0x3e0] sm:$0xff]  ;;  %v263_v29 = vld [vmem:[%s1831_s25 + $0x1f8] sm:$0xff] }
  0x8c   : > { %v327_v30 = vld [vmem:[%s1831_s25 + $0x3f8] sm:$0xff] }
  0x8e   : > { %507 = vmatmul.mubr.f32.gmra.mxu0 %v230_v31  ;;  %667 = vmatmul.mubr.f32.gmra.mxu1 %v294_v32  ;;  %v262_v31 = vld [vmem:[%s1831_s25 + $0x1f0] sm:$0xff] }
  0x8f   : > { %511 = vmatprep.mubr.f32.mxu0 %v233_v33  ;;  %671 = vmatprep.mubr.f32.mxu1 %v297_v34  ;;  %v326_v32 = vld [vmem:[%s1831_s25 + $0x3f0] sm:$0xff]  ;;  %v1972_v33 = vld [vmem:[%s2376_s2] ss:$0 sm:$0xff] }
  0x92   : > { %512 = vmatmul.mubr.f32.gmra.mxu0 %v232_v35  ;;  %672 = vmatmul.mubr.f32.gmra.mxu1 %v296_v36 }
  0x93   : > { %516 = vmatprep.mubr.f32.mxu0 %v235_v37  ;;  %676 = vmatprep.mubr.f32.mxu1 %v299_v38 }
  0x96   : > { %517 = vmatmul.mubr.f32.gmra.mxu0 %v234_v39  ;;  %677 = vmatmul.mubr.f32.gmra.mxu1 %v298_v40 }
  0x97   : > { %521 = vmatprep.mubr.f32.mxu0 %v237_v41  ;;  %681 = vmatprep.mubr.f32.mxu1 %v301_v42 }
  0x9a   : > { %522 = vmatmul.mubr.f32.gmra.mxu0 %v236_v43  ;;  %682 = vmatmul.mubr.f32.gmra.mxu1 %v300_v44 }
  0x9b   : > { %526 = vmatprep.mubr.f32.mxu0 %v239_v45  ;;  %686 = vmatprep.mubr.f32.mxu1 %v303_v46 }
  0x9e   : > { %527 = vmatmul.mubr.f32.gmra.mxu0 %v238_v47  ;;  %687 = vmatmul.mubr.f32.gmra.mxu1 %v302_v48 }
  0x9f   : > { %531 = vmatprep.mubr.f32.mxu0 %v241_v49  ;;  %691 = vmatprep.mubr.f32.mxu1 %v305_v50 }
  0xa2   : > { %532 = vmatmul.mubr.f32.gmra.mxu0 %v240_v51  ;;  %692 = vmatmul.mubr.f32.gmra.mxu1 %v304_v52 }
  0xa3   : > { %536 = vmatprep.mubr.f32.mxu0 %v243_v53  ;;  %696 = vmatprep.mubr.f32.mxu1 %v307_v54 }
  0xa6   : > { %537 = vmatmul.mubr.f32.gmra.mxu0 %v242_v55  ;;  %697 = vmatmul.mubr.f32.gmra.mxu1 %v306_v56 }
  0xa7   : > { %541 = vmatprep.mubr.f32.mxu0 %v245_v57  ;;  %701 = vmatprep.mubr.f32.mxu1 %v309_v58 }
  0xaa   : > { %542 = vmatmul.mubr.f32.gmra.mxu0 %v244_v59  ;;  %702 = vmatmul.mubr.f32.gmra.mxu1 %v308_v60 }
  0xab   : > { %546 = vmatprep.mubr.f32.mxu0 %v247_v61  ;;  %706 = vmatprep.mubr.f32.mxu1 %v311_v62 }
  0xae   : > { %547 = vmatmul.mubr.f32.gmra.mxu0 %v246_v63  ;;  %707 = vmatmul.mubr.f32.gmra.mxu1 %v310_v0 }
  0xaf   : > { %551 = vmatprep.mubr.f32.mxu0 %v249_v1  ;;  %711 = vmatprep.mubr.f32.mxu1 %v313_v2 }
  0xb2   : > { %552 = vmatmul.mubr.f32.gmra.mxu0 %v248_v3  ;;  %712 = vmatmul.mubr.f32.gmra.mxu1 %v312_v4 }
  0xb3   : > { %556 = vmatprep.mubr.f32.mxu0 %v251_v5  ;;  %716 = vmatprep.mubr.f32.mxu1 %v315_v6 }
  0xb6   : > { %557 = vmatmul.mubr.f32.gmra.mxu0 %v250_v7  ;;  %717 = vmatmul.mubr.f32.gmra.mxu1 %v314_v8 }
  0xb7   : > { %561 = vmatprep.mubr.f32.mxu0 %v253_v9  ;;  %721 = vmatprep.mubr.f32.mxu1 %v317_v10 }
  0xba   : > { %562 = vmatmul.mubr.f32.gmra.mxu0 %v252_v11  ;;  %722 = vmatmul.mubr.f32.gmra.mxu1 %v316_v12 }
  0xbb   : > { %566 = vmatprep.mubr.f32.mxu0 %v255_v13  ;;  %726 = vmatprep.mubr.f32.mxu1 %v319_v14 }
  0xbe   : > { %567 = vmatmul.mubr.f32.gmra.mxu0 %v254_v15  ;;  %727 = vmatmul.mubr.f32.gmra.mxu1 %v318_v16 }
  0xbf   : > { %571 = vmatprep.mubr.f32.mxu0 %v257_v17  ;;  %731 = vmatprep.mubr.f32.mxu1 %v321_v18 }
  0xc2   : > { %572 = vmatmul.mubr.f32.gmra.mxu0 %v256_v19  ;;  %732 = vmatmul.mubr.f32.gmra.mxu1 %v320_v20 }
  0xc3   : > { %576 = vmatprep.mubr.f32.mxu0 %v259_v21  ;;  %736 = vmatprep.mubr.f32.mxu1 %v323_v22 }
  0xc6   : > { %577 = vmatmul.mubr.f32.gmra.mxu0 %v258_v23  ;;  %737 = vmatmul.mubr.f32.gmra.mxu1 %v322_v24 }
  0xc7   : > { %581 = vmatprep.mubr.f32.mxu0 %v261_v25  ;;  %741 = vmatprep.mubr.f32.mxu1 %v325_v26 }
  0xca   : > { %582 = vmatmul.mubr.f32.gmra.mxu0 %v260_v27  ;;  %742 = vmatmul.mubr.f32.gmra.mxu1 %v324_v28 }
  0xcb   : > { %586 = vmatprep.mubr.f32.mxu0 %v263_v29  ;;  %746 = vmatprep.mubr.f32.mxu1 %v327_v30 }
  0xce   : > { %587 = vmatmul.mubr.f32.gmra.mxu0 %v262_v31  ;;  %747 = vmatmul.mubr.f32.gmra.mxu1 %v326_v32 }
 0x112   : > { %v433_v34 = vpop.f32.mrf.mxu0  ;;  %v593_v35 = vpop.f32.mrf.mxu1 }
 0x113   : > { %v434_v36 = vadd.f32 %v1972_v33, %v433_v34  ;;  %v594_v37 = vadd.f32 %v1972_v33, %v593_v35 }
 0x114   : > { %v435_v38 = vpop.f32.mrf.mxu0  ;;  %v595_v39 = vpop.f32.mrf.mxu1 }
 0x115   : > { %v752_v40 = vmax.f32 %v434_v36, 0.0  ;;  %v784_v41 = vmax.f32 %v594_v37, 0.0 }
 0x116   : > { %v438_v42 = vpop.f32.mrf.mxu0  ;;  %v598_v43 = vpop.f32.mrf.mxu1 }
 0x117   : > { %817 = vst.msk [vmem:[%s1976_s12] sm:$0xff] %vm816_vm0, %v752_v40  ;;  %849 = vst.msk [vmem:[%s1976_s12 + $0x100] sm:$0xff] %vm816_vm0, %v784_v41  ;;  %v439_v44 = vadd.f32 %v1972_v33, %v438_v42  ;;  %v599_v45 = vadd.f32 %v1972_v33, %v598_v43 }
 0x118   : > { %v440_v46 = vpop.f32.mrf.mxu0  ;;  %v600_v47 = vpop.f32.mrf.mxu1 }
 0x119   : > { %v753_v48 = vmax.f32 %v439_v44, 0.0  ;;  %v785_v49 = vmax.f32 %v599_v45, 0.0 }
 0x11a   : > { %v443_v50 = vpop.f32.mrf.mxu0  ;;  %v603_v51 = vpop.f32.mrf.mxu1 }
 0x11b   : > { %818 = vst.msk [vmem:[%s1976_s12 + $0x8] sm:$0xff] %vm816_vm0, %v753_v48  ;;  %850 = vst.msk [vmem:[%s1976_s12 + $0x108] sm:$0xff] %vm816_vm0, %v785_v49  ;;  %v444_v52 = vadd.f32 %v1972_v33, %v443_v50  ;;  %v604_v53 = vadd.f32 %v1972_v33, %v603_v51 }
 0x11c   : > { %v445_v54 = vpop.f32.mrf.mxu0  ;;  %v605_v55 = vpop.f32.mrf.mxu1 }
 0x11d   : > { %v754_v56 = vmax.f32 %v444_v52, 0.0  ;;  %v786_v57 = vmax.f32 %v604_v53, 0.0 }
 0x11e   : > { %v448_v58 = vpop.f32.mrf.mxu0  ;;  %v608_v59 = vpop.f32.mrf.mxu1 }
 0x11f   : > { %819 = vst.msk [vmem:[%s1976_s12 + $0x10] sm:$0xff] %vm816_vm0, %v754_v56  ;;  %851 = vst.msk [vmem:[%s1976_s12 + $0x110] sm:$0xff] %vm816_vm0, %v786_v57  ;;  %v449_v60 = vadd.f32 %v1972_v33, %v448_v58  ;;  %v609_v61 = vadd.f32 %v1972_v33, %v608_v59 }
 0x120   : > { %v450_v62 = vpop.f32.mrf.mxu0  ;;  %v610_v63 = vpop.f32.mrf.mxu1 }
 0x121   : > { %v755_v0 = vmax.f32 %v449_v60, 0.0  ;;  %v787_v1 = vmax.f32 %v609_v61, 0.0 }
 0x122   : > { %v453_v2 = vpop.f32.mrf.mxu0  ;;  %v613_v3 = vpop.f32.mrf.mxu1 }
 0x123   : > { %820 = vst.msk [vmem:[%s1976_s12 + $0x18] sm:$0xff] %vm816_vm0, %v755_v0  ;;  %852 = vst.msk [vmem:[%s1976_s12 + $0x118] sm:$0xff] %vm816_vm0, %v787_v1  ;;  %v454_v4 = vadd.f32 %v1972_v33, %v453_v2  ;;  %v614_v5 = vadd.f32 %v1972_v33, %v613_v3 }
 0x124   : > { %v455_v6 = vpop.f32.mrf.mxu0  ;;  %v615_v7 = vpop.f32.mrf.mxu1 }
 0x125   : > { %v756_v8 = vmax.f32 %v454_v4, 0.0  ;;  %v788_v9 = vmax.f32 %v614_v5, 0.0 }
 0x126   : > { %v458_v10 = vpop.f32.mrf.mxu0  ;;  %v618_v11 = vpop.f32.mrf.mxu1 }
 0x127   : > { %821 = vst.msk [vmem:[%s1976_s12 + $0x20] sm:$0xff] %vm816_vm0, %v756_v8  ;;  %853 = vst.msk [vmem:[%s1976_s12 + $0x120] sm:$0xff] %vm816_vm0, %v788_v9  ;;  %v459_v12 = vadd.f32 %v1972_v33, %v458_v10  ;;  %v619_v13 = vadd.f32 %v1972_v33, %v618_v11 }
 0x128   : > { %v460_v14 = vpop.f32.mrf.mxu0  ;;  %v620_v15 = vpop.f32.mrf.mxu1 }
 0x129   : > { %v757_v16 = vmax.f32 %v459_v12, 0.0  ;;  %v789_v17 = vmax.f32 %v619_v13, 0.0 }
 0x12a   : > { %v463_v18 = vpop.f32.mrf.mxu0  ;;  %v623_v19 = vpop.f32.mrf.mxu1 }
 0x12b   : > { %822 = vst.msk [vmem:[%s1976_s12 + $0x28] sm:$0xff] %vm816_vm0, %v757_v16  ;;  %854 = vst.msk [vmem:[%s1976_s12 + $0x128] sm:$0xff] %vm816_vm0, %v789_v17  ;;  %v464_v20 = vadd.f32 %v1972_v33, %v463_v18  ;;  %v624_v21 = vadd.f32 %v1972_v33, %v623_v19 }
 0x12c   : > { %v465_v22 = vpop.f32.mrf.mxu0  ;;  %v625_v23 = vpop.f32.mrf.mxu1 }
 0x12d   : > { %v758_v24 = vmax.f32 %v464_v20, 0.0  ;;  %v790_v25 = vmax.f32 %v624_v21, 0.0 }
 0x12e   : > { %v468_v26 = vpop.f32.mrf.mxu0  ;;  %v628_v27 = vpop.f32.mrf.mxu1 }
 0x12f   : > { %823 = vst.msk [vmem:[%s1976_s12 + $0x30] sm:$0xff] %vm816_vm0, %v758_v24  ;;  %855 = vst.msk [vmem:[%s1976_s12 + $0x130] sm:$0xff] %vm816_vm0, %v790_v25  ;;  %v469_v28 = vadd.f32 %v1972_v33, %v468_v26  ;;  %v629_v29 = vadd.f32 %v1972_v33, %v628_v27 }
 0x130   : > { %v470_v30 = vpop.f32.mrf.mxu0  ;;  %v630_v31 = vpop.f32.mrf.mxu1 }
 0x131   : > { %v759_v32 = vmax.f32 %v469_v28, 0.0  ;;  %v791_v34 = vmax.f32 %v629_v29, 0.0 }
 0x132   : > { %v473_v35 = vpop.f32.mrf.mxu0  ;;  %v633_v36 = vpop.f32.mrf.mxu1 }
 0x133   : > { %824 = vst.msk [vmem:[%s1976_s12 + $0x38] sm:$0xff] %vm816_vm0, %v759_v32  ;;  %856 = vst.msk [vmem:[%s1976_s12 + $0x138] sm:$0xff] %vm816_vm0, %v791_v34  ;;  %v474_v37 = vadd.f32 %v1972_v33, %v473_v35  ;;  %v634_v38 = vadd.f32 %v1972_v33, %v633_v36 }
 0x134   : > { %v475_v39 = vpop.f32.mrf.mxu0  ;;  %v635_v40 = vpop.f32.mrf.mxu1 }
 0x135   : > { %v760_v41 = vmax.f32 %v474_v37, 0.0  ;;  %v792_v42 = vmax.f32 %v634_v38, 0.0 }
 0x136   : > { %v478_v43 = vpop.f32.mrf.mxu0  ;;  %v638_v44 = vpop.f32.mrf.mxu1 }
 0x137   : > { %825 = vst.msk [vmem:[%s1976_s12 + $0x40] sm:$0xff] %vm816_vm0, %v760_v41  ;;  %857 = vst.msk [vmem:[%s1976_s12 + $0x140] sm:$0xff] %vm816_vm0, %v792_v42  ;;  %v479_v45 = vadd.f32 %v1972_v33, %v478_v43  ;;  %v639_v46 = vadd.f32 %v1972_v33, %v638_v44 }
 0x138   : > { %v480_v47 = vpop.f32.mrf.mxu0  ;;  %v640_v48 = vpop.f32.mrf.mxu1 }
 0x139   : > { %v761_v49 = vmax.f32 %v479_v45, 0.0  ;;  %v793_v50 = vmax.f32 %v639_v46, 0.0 }
 0x13a   : > { %v483_v51 = vpop.f32.mrf.mxu0  ;;  %v643_v52 = vpop.f32.mrf.mxu1 }
 0x13b   : > { %826 = vst.msk [vmem:[%s1976_s12 + $0x48] sm:$0xff] %vm816_vm0, %v761_v49  ;;  %858 = vst.msk [vmem:[%s1976_s12 + $0x148] sm:$0xff] %vm816_vm0, %v793_v50  ;;  %v484_v53 = vadd.f32 %v1972_v33, %v483_v51  ;;  %v644_v54 = vadd.f32 %v1972_v33, %v643_v52 }
 0x13c   : > { %v485_v55 = vpop.f32.mrf.mxu0  ;;  %v645_v56 = vpop.f32.mrf.mxu1 }
 0x13d   : > { %v762_v57 = vmax.f32 %v484_v53, 0.0  ;;  %v794_v58 = vmax.f32 %v644_v54, 0.0 }
 0x13e   : > { %v488_v59 = vpop.f32.mrf.mxu0  ;;  %v648_v60 = vpop.f32.mrf.mxu1 }
 0x13f   : > { %827 = vst.msk [vmem:[%s1976_s12 + $0x50] sm:$0xff] %vm816_vm0, %v762_v57  ;;  %859 = vst.msk [vmem:[%s1976_s12 + $0x150] sm:$0xff] %vm816_vm0, %v794_v58  ;;  %v489_v61 = vadd.f32 %v1972_v33, %v488_v59  ;;  %v649_v62 = vadd.f32 %v1972_v33, %v648_v60 }
 0x140   : > { %v490_v63 = vpop.f32.mrf.mxu0  ;;  %v650_v0 = vpop.f32.mrf.mxu1 }
 0x141   : > { %v763_v1 = vmax.f32 %v489_v61, 0.0  ;;  %v795_v2 = vmax.f32 %v649_v62, 0.0 }
 0x142   : > { %v493_v3 = vpop.f32.mrf.mxu0  ;;  %v653_v4 = vpop.f32.mrf.mxu1 }
 0x143   : > { %828 = vst.msk [vmem:[%s1976_s12 + $0x58] sm:$0xff] %vm816_vm0, %v763_v1  ;;  %860 = vst.msk [vmem:[%s1976_s12 + $0x158] sm:$0xff] %vm816_vm0, %v795_v2  ;;  %v494_v5 = vadd.f32 %v1972_v33, %v493_v3  ;;  %v654_v6 = vadd.f32 %v1972_v33, %v653_v4 }
 0x144   : > { %v495_v7 = vpop.f32.mrf.mxu0  ;;  %v655_v8 = vpop.f32.mrf.mxu1 }
 0x145   : > { %v764_v9 = vmax.f32 %v494_v5, 0.0  ;;  %v796_v10 = vmax.f32 %v654_v6, 0.0 }
 0x146   : > { %v498_v11 = vpop.f32.mrf.mxu0  ;;  %v658_v12 = vpop.f32.mrf.mxu1 }
 0x147   : > { %829 = vst.msk [vmem:[%s1976_s12 + $0x60] sm:$0xff] %vm816_vm0, %v764_v9  ;;  %861 = vst.msk [vmem:[%s1976_s12 + $0x160] sm:$0xff] %vm816_vm0, %v796_v10  ;;  %v499_v13 = vadd.f32 %v1972_v33, %v498_v11  ;;  %v659_v14 = vadd.f32 %v1972_v33, %v658_v12 }
 0x148   : > { %v500_v15 = vpop.f32.mrf.mxu0  ;;  %v660_v16 = vpop.f32.mrf.mxu1 }
 0x149   : > { %v765_v17 = vmax.f32 %v499_v13, 0.0  ;;  %v797_v18 = vmax.f32 %v659_v14, 0.0 }
 0x14a   : > { %v503_v19 = vpop.f32.mrf.mxu0  ;;  %v663_v20 = vpop.f32.mrf.mxu1 }
 0x14b   : > { %830 = vst.msk [vmem:[%s1976_s12 + $0x68] sm:$0xff] %vm816_vm0, %v765_v17  ;;  %862 = vst.msk [vmem:[%s1976_s12 + $0x168] sm:$0xff] %vm816_vm0, %v797_v18  ;;  %v504_v21 = vadd.f32 %v1972_v33, %v503_v19  ;;  %v664_v22 = vadd.f32 %v1972_v33, %v663_v20 }
 0x14c   : > { %v505_v23 = vpop.f32.mrf.mxu0  ;;  %v665_v24 = vpop.f32.mrf.mxu1 }
 0x14d   : > { %v766_v25 = vmax.f32 %v504_v21, 0.0  ;;  %v798_v26 = vmax.f32 %v664_v22, 0.0 }
 0x14e   : > { %v508_v27 = vpop.f32.mrf.mxu0  ;;  %v668_v28 = vpop.f32.mrf.mxu1 }
 0x14f   : > { %831 = vst.msk [vmem:[%s1976_s12 + $0x70] sm:$0xff] %vm816_vm0, %v766_v25  ;;  %863 = vst.msk [vmem:[%s1976_s12 + $0x170] sm:$0xff] %vm816_vm0, %v798_v26  ;;  %v509_v29 = vadd.f32 %v1972_v33, %v508_v27  ;;  %v669_v30 = vadd.f32 %v1972_v33, %v668_v28 }
 0x150   : > { %v510_v31 = vpop.f32.mrf.mxu0  ;;  %v670_v32 = vpop.f32.mrf.mxu1 }
 0x151   : > { %v767_v34 = vmax.f32 %v509_v29, 0.0  ;;  %v799_v35 = vmax.f32 %v669_v30, 0.0 }
 0x152   : > { %v513_v36 = vpop.f32.mrf.mxu0  ;;  %v673_v37 = vpop.f32.mrf.mxu1 }
 0x153   : > { %832 = vst.msk [vmem:[%s1976_s12 + $0x78] sm:$0xff] %vm816_vm0, %v767_v34  ;;  %864 = vst.msk [vmem:[%s1976_s12 + $0x178] sm:$0xff] %vm816_vm0, %v799_v35  ;;  %v514_v38 = vadd.f32 %v1972_v33, %v513_v36  ;;  %v674_v39 = vadd.f32 %v1972_v33, %v673_v37 }
 0x154   : > { %v515_v40 = vpop.f32.mrf.mxu0  ;;  %v675_v41 = vpop.f32.mrf.mxu1 }
 0x155   : > { %v768_v42 = vmax.f32 %v514_v38, 0.0  ;;  %v800_v43 = vmax.f32 %v674_v39, 0.0 }
 0x156   : > { %v518_v44 = vpop.f32.mrf.mxu0  ;;  %v678_v45 = vpop.f32.mrf.mxu1 }
 0x157   : > { %833 = vst.msk [vmem:[%s1976_s12 + $0x80] sm:$0xff] %vm816_vm0, %v768_v42  ;;  %865 = vst.msk [vmem:[%s1976_s12 + $0x180] sm:$0xff] %vm816_vm0, %v800_v43  ;;  %v519_v46 = vadd.f32 %v1972_v33, %v518_v44  ;;  %v679_v47 = vadd.f32 %v1972_v33, %v678_v45 }
 0x158   : > { %v520_v48 = vpop.f32.mrf.mxu0  ;;  %v680_v49 = vpop.f32.mrf.mxu1 }
 0x159   : > { %v769_v50 = vmax.f32 %v519_v46, 0.0  ;;  %v801_v51 = vmax.f32 %v679_v47, 0.0 }
 0x15a   : > { %v523_v52 = vpop.f32.mrf.mxu0  ;;  %v683_v53 = vpop.f32.mrf.mxu1 }
 0x15b   : > { %834 = vst.msk [vmem:[%s1976_s12 + $0x88] sm:$0xff] %vm816_vm0, %v769_v50  ;;  %866 = vst.msk [vmem:[%s1976_s12 + $0x188] sm:$0xff] %vm816_vm0, %v801_v51  ;;  %v524_v54 = vadd.f32 %v1972_v33, %v523_v52  ;;  %v684_v55 = vadd.f32 %v1972_v33, %v683_v53 }
 0x15c   : > { %v525_v56 = vpop.f32.mrf.mxu0  ;;  %v685_v57 = vpop.f32.mrf.mxu1 }
 0x15d   : > { %v770_v58 = vmax.f32 %v524_v54, 0.0  ;;  %v802_v59 = vmax.f32 %v684_v55, 0.0 }
 0x15e   : > { %v528_v60 = vpop.f32.mrf.mxu0  ;;  %v688_v61 = vpop.f32.mrf.mxu1 }
 0x15f   : > { %835 = vst.msk [vmem:[%s1976_s12 + $0x90] sm:$0xff] %vm816_vm0, %v770_v58  ;;  %867 = vst.msk [vmem:[%s1976_s12 + $0x190] sm:$0xff] %vm816_vm0, %v802_v59  ;;  %v529_v62 = vadd.f32 %v1972_v33, %v528_v60  ;;  %v689_v63 = vadd.f32 %v1972_v33, %v688_v61 }
 0x160   : > { %v530_v0 = vpop.f32.mrf.mxu0  ;;  %v690_v1 = vpop.f32.mrf.mxu1 }
 0x161   : > { %v771_v2 = vmax.f32 %v529_v62, 0.0  ;;  %v803_v3 = vmax.f32 %v689_v63, 0.0 }
 0x162   : > { %v533_v4 = vpop.f32.mrf.mxu0  ;;  %v693_v5 = vpop.f32.mrf.mxu1 }
 0x163   : > { %836 = vst.msk [vmem:[%s1976_s12 + $0x98] sm:$0xff] %vm816_vm0, %v771_v2  ;;  %868 = vst.msk [vmem:[%s1976_s12 + $0x198] sm:$0xff] %vm816_vm0, %v803_v3  ;;  %v534_v6 = vadd.f32 %v1972_v33, %v533_v4  ;;  %v694_v7 = vadd.f32 %v1972_v33, %v693_v5 }
 0x164   : > { %v535_v8 = vpop.f32.mrf.mxu0  ;;  %v695_v9 = vpop.f32.mrf.mxu1 }
 0x165   : > { %v772_v10 = vmax.f32 %v534_v6, 0.0  ;;  %v804_v11 = vmax.f32 %v694_v7, 0.0 }
 0x166   : > { %v538_v12 = vpop.f32.mrf.mxu0  ;;  %v698_v13 = vpop.f32.mrf.mxu1 }
 0x167   : > { %837 = vst.msk [vmem:[%s1976_s12 + $0xa0] sm:$0xff] %vm816_vm0, %v772_v10  ;;  %869 = vst.msk [vmem:[%s1976_s12 + $0x1a0] sm:$0xff] %vm816_vm0, %v804_v11  ;;  %v539_v14 = vadd.f32 %v1972_v33, %v538_v12  ;;  %v699_v15 = vadd.f32 %v1972_v33, %v698_v13 }
 0x168   : > { %v540_v16 = vpop.f32.mrf.mxu0  ;;  %v700_v17 = vpop.f32.mrf.mxu1 }
 0x169   : > { %v773_v18 = vmax.f32 %v539_v14, 0.0  ;;  %v805_v19 = vmax.f32 %v699_v15, 0.0 }
 0x16a   : > { %v543_v20 = vpop.f32.mrf.mxu0  ;;  %v703_v21 = vpop.f32.mrf.mxu1 }
 0x16b   : > { %838 = vst.msk [vmem:[%s1976_s12 + $0xa8] sm:$0xff] %vm816_vm0, %v773_v18  ;;  %870 = vst.msk [vmem:[%s1976_s12 + $0x1a8] sm:$0xff] %vm816_vm0, %v805_v19  ;;  %v544_v22 = vadd.f32 %v1972_v33, %v543_v20  ;;  %v704_v23 = vadd.f32 %v1972_v33, %v703_v21 }
 0x16c   : > { %v545_v24 = vpop.f32.mrf.mxu0  ;;  %v705_v25 = vpop.f32.mrf.mxu1 }
 0x16d   : > { %v774_v26 = vmax.f32 %v544_v22, 0.0  ;;  %v806_v27 = vmax.f32 %v704_v23, 0.0 }
 0x16e   : > { %v548_v28 = vpop.f32.mrf.mxu0  ;;  %v708_v29 = vpop.f32.mrf.mxu1 }
 0x16f   : > { %839 = vst.msk [vmem:[%s1976_s12 + $0xb0] sm:$0xff] %vm816_vm0, %v774_v26  ;;  %871 = vst.msk [vmem:[%s1976_s12 + $0x1b0] sm:$0xff] %vm816_vm0, %v806_v27  ;;  %v549_v30 = vadd.f32 %v1972_v33, %v548_v28  ;;  %v709_v31 = vadd.f32 %v1972_v33, %v708_v29 }
 0x170   : > { %v550_v32 = vpop.f32.mrf.mxu0  ;;  %v710_v34 = vpop.f32.mrf.mxu1 }
 0x171   : > { %v775_v35 = vmax.f32 %v549_v30, 0.0  ;;  %v807_v36 = vmax.f32 %v709_v31, 0.0 }
 0x172   : > { %v553_v37 = vpop.f32.mrf.mxu0  ;;  %v713_v38 = vpop.f32.mrf.mxu1 }
 0x173   : > { %840 = vst.msk [vmem:[%s1976_s12 + $0xb8] sm:$0xff] %vm816_vm0, %v775_v35  ;;  %872 = vst.msk [vmem:[%s1976_s12 + $0x1b8] sm:$0xff] %vm816_vm0, %v807_v36  ;;  %v554_v39 = vadd.f32 %v1972_v33, %v553_v37  ;;  %v714_v40 = vadd.f32 %v1972_v33, %v713_v38 }
 0x174   : > { %v555_v41 = vpop.f32.mrf.mxu0  ;;  %v715_v42 = vpop.f32.mrf.mxu1 }
 0x175   : > { %v776_v43 = vmax.f32 %v554_v39, 0.0  ;;  %v808_v44 = vmax.f32 %v714_v40, 0.0 }
 0x176   : > { %v558_v45 = vpop.f32.mrf.mxu0  ;;  %v718_v46 = vpop.f32.mrf.mxu1 }
 0x177   : > { %841 = vst.msk [vmem:[%s1976_s12 + $0xc0] sm:$0xff] %vm816_vm0, %v776_v43  ;;  %873 = vst.msk [vmem:[%s1976_s12 + $0x1c0] sm:$0xff] %vm816_vm0, %v808_v44  ;;  %v559_v47 = vadd.f32 %v1972_v33, %v558_v45  ;;  %v719_v48 = vadd.f32 %v1972_v33, %v718_v46 }
 0x178   : > { %v560_v49 = vpop.f32.mrf.mxu0  ;;  %v720_v50 = vpop.f32.mrf.mxu1 }
 0x179   : > { %v777_v51 = vmax.f32 %v559_v47, 0.0  ;;  %v809_v52 = vmax.f32 %v719_v48, 0.0 }
 0x17a   : > { %v563_v53 = vpop.f32.mrf.mxu0  ;;  %v723_v54 = vpop.f32.mrf.mxu1 }
 0x17b   : > { %842 = vst.msk [vmem:[%s1976_s12 + $0xc8] sm:$0xff] %vm816_vm0, %v777_v51  ;;  %874 = vst.msk [vmem:[%s1976_s12 + $0x1c8] sm:$0xff] %vm816_vm0, %v809_v52  ;;  %v564_v55 = vadd.f32 %v1972_v33, %v563_v53  ;;  %v724_v56 = vadd.f32 %v1972_v33, %v723_v54 }
 0x17c   : > { %v565_v57 = vpop.f32.mrf.mxu0  ;;  %v725_v58 = vpop.f32.mrf.mxu1 }
 0x17d   : > { %v778_v59 = vmax.f32 %v564_v55, 0.0  ;;  %v810_v60 = vmax.f32 %v724_v56, 0.0 }
 0x17e   : > { %v568_v61 = vpop.f32.mrf.mxu0  ;;  %v728_v62 = vpop.f32.mrf.mxu1 }
 0x17f   : > { %843 = vst.msk [vmem:[%s1976_s12 + $0xd0] sm:$0xff] %vm816_vm0, %v778_v59  ;;  %875 = vst.msk [vmem:[%s1976_s12 + $0x1d0] sm:$0xff] %vm816_vm0, %v810_v60  ;;  %v569_v63 = vadd.f32 %v1972_v33, %v568_v61  ;;  %v729_v0 = vadd.f32 %v1972_v33, %v728_v62 }
 0x180   : > { %v570_v1 = vpop.f32.mrf.mxu0  ;;  %v730_v2 = vpop.f32.mrf.mxu1 }
 0x181   : > { %v779_v3 = vmax.f32 %v569_v63, 0.0  ;;  %v811_v4 = vmax.f32 %v729_v0, 0.0 }
 0x182   : > { %v573_v5 = vpop.f32.mrf.mxu0  ;;  %v733_v6 = vpop.f32.mrf.mxu1 }
 0x183   : > { %844 = vst.msk [vmem:[%s1976_s12 + $0xd8] sm:$0xff] %vm816_vm0, %v779_v3  ;;  %876 = vst.msk [vmem:[%s1976_s12 + $0x1d8] sm:$0xff] %vm816_vm0, %v811_v4  ;;  %v574_v7 = vadd.f32 %v1972_v33, %v573_v5  ;;  %v734_v8 = vadd.f32 %v1972_v33, %v733_v6 }
 0x184   : > { %v575_v9 = vpop.f32.mrf.mxu0  ;;  %v735_v10 = vpop.f32.mrf.mxu1 }
 0x185   : > { %v780_v11 = vmax.f32 %v574_v7, 0.0  ;;  %v812_v12 = vmax.f32 %v734_v8, 0.0 }
 0x186   : > { %v578_v13 = vpop.f32.mrf.mxu0  ;;  %v738_v14 = vpop.f32.mrf.mxu1 }
 0x187   : > { %845 = vst.msk [vmem:[%s1976_s12 + $0xe0] sm:$0xff] %vm816_vm0, %v780_v11  ;;  %877 = vst.msk [vmem:[%s1976_s12 + $0x1e0] sm:$0xff] %vm816_vm0, %v812_v12  ;;  %v579_v15 = vadd.f32 %v1972_v33, %v578_v13  ;;  %v739_v16 = vadd.f32 %v1972_v33, %v738_v14 }
 0x188   : > { %v580_v17 = vpop.f32.mrf.mxu0  ;;  %v740_v18 = vpop.f32.mrf.mxu1 }
 0x189   : > { %v781_v19 = vmax.f32 %v579_v15, 0.0  ;;  %v813_v20 = vmax.f32 %v739_v16, 0.0 }
 0x18a   : > { %v583_v21 = vpop.f32.mrf.mxu0  ;;  %v743_v22 = vpop.f32.mrf.mxu1 }
 0x18b   : > { %846 = vst.msk [vmem:[%s1976_s12 + $0xe8] sm:$0xff] %vm816_vm0, %v781_v19  ;;  %878 = vst.msk [vmem:[%s1976_s12 + $0x1e8] sm:$0xff] %vm816_vm0, %v813_v20  ;;  %v584_v23 = vadd.f32 %v1972_v33, %v583_v21  ;;  %v744_v24 = vadd.f32 %v1972_v33, %v743_v22 }
 0x18c   : > { %v585_v25 = vpop.f32.mrf.mxu0  ;;  %v745_v26 = vpop.f32.mrf.mxu1 }
 0x18d   : > { %v782_v27 = vmax.f32 %v584_v23, 0.0  ;;  %v814_v28 = vmax.f32 %v744_v24, 0.0 }
 0x18e   : > { %v588_v29 = vpop.f32.mrf.mxu0  ;;  %v748_v30 = vpop.f32.mrf.mxu1 }
 0x18f   : > { %847 = vst.msk [vmem:[%s1976_s12 + $0xf0] sm:$0xff] %vm816_vm0, %v782_v27  ;;  %879 = vst.msk [vmem:[%s1976_s12 + $0x1f0] sm:$0xff] %vm816_vm0, %v814_v28  ;;  %v589_v31 = vadd.f32 %v1972_v33, %v588_v29  ;;  %v749_v32 = vadd.f32 %v1972_v33, %v748_v30  ;;  %887 = sbr.rel (!%p1666_p4) target bundleno = 468 (0x1d4), region = 36 }
 0x190   : > { %v590_v34 = vpop.f32.mrf.mxu0  ;;  %v750_v35 = vpop.f32.mrf.mxu1 }
 0x191   : > { %v783_v36 = vmax.f32 %v589_v31, 0.0  ;;  %v815_v37 = vmax.f32 %v749_v32, 0.0 }
 0x193   : > { %848 = vst.msk [vmem:[%s1976_s12 + $0xf8] sm:$0xff] %vm816_vm0, %v783_v36  ;;  %880 = vst.msk [vmem:[%s1976_s12 + $0x1f8] sm:$0xff] %vm816_vm0, %v815_v37 }
 0x194   : > { %s2388_s6 = smov (!%p890_p8, %s889_s6), 64 }
 0x195   : > { %s1360_s11 = sshll.u32 %s2388_s6, 7 }
 0x196   : > { %p1363_p9 = scmp.eq.s32.totalorder %s1360_s11, 0 }
 0x197   : > { %s2181_s14 = sshrl.u32 (!%p1363_p9), %s2388_s6, 6 }
 0x198   : > { %898 = sbr.rel (%p1363_p9) target bundleno = 468 (0x1d4), region = 40  ;;  %p1364_p10 = scmp.le.s32.totalorder (!%p1363_p9), %s2181_s14, 0 }
 0x19d   : > { %1305 = sbr.rel (%p1364_p10) target bundleno = 451 (0x1c3), region = 116  ;;  %s2379_s15 = smov (!%p1364_p10), %s2175_s10 }
 0x19e   : > { %s2380_s20 = smov (!%p1364_p10), %s1976_s12  ;;  %s2190_s27 = smov (!%p1364_p10), 0  }
 0x19f   : > { %s2192_s17 = smov (!%p1364_p10), 0  }
 0x1a2 LB: >> { %v1087_v33 = vld [vmem:[%s1594_s20] sm:$0xff]  ;;  %v1089_v38 = vld [vmem:[%s1594_s20 + $0x8] sm:$0xff]  ;;  %v1091_v39 = vld [vmem:[%s1594_s20 + $0x10] sm:$0xff]  ;;  %s1215_s18 = sadd.s32 1, %s1598_s27  ;;  %s1081_s17 = sadd.s32 1, %s1602_s17   ;;  %s1602_s17 = sphi %s2192_s17, %s1081_s17   ;;  %s1598_s27 = sphi %s2190_s27, %s2383_s27   ;;  %s1594_s20 = sphi %s2380_s20, %s2382_s20   ;;  %s1590_s15 = sphi %s2379_s15, %s2381_s15  }
 0x1a3   : >> { %1088 = vst [vmem:[%s1590_s15] sm:$0xff] %v1087_v33  ;;  %1090 = vst [vmem:[%s1590_s15 + $0x8] sm:$0xff] %v1089_v38  ;;  %v1093_v40 = vld [vmem:[%s1594_s20 + $0x18] sm:$0xff]  ;;  %v1095_v41 = vld [vmem:[%s1594_s20 + $0x20] sm:$0xff]  ;;  %p1216_p11 = scmp.ge.s32.totalorder %s1215_s18, %s2181_s14  ;;  %p1080_p12 = scmp.ge.s32.totalorder %s1081_s17, %s2181_s14 }
 0x1a4   : >> { %1092 = vst [vmem:[%s1590_s15 + $0x10] sm:$0xff] %v1091_v39  ;;  %v1097_v42 = vld [vmem:[%s1594_s20 + $0x28] sm:$0xff]  ;;  %1094 = vst [vmem:[%s1590_s15 + $0x18] sm:$0xff] %v1093_v40  ;;  %v1099_v43 = vld [vmem:[%s1594_s20 + $0x30] sm:$0xff] }
 0x1a5   : >> { %1096 = vst [vmem:[%s1590_s15 + $0x20] sm:$0xff] %v1095_v41  ;;  %1098 = vst [vmem:[%s1590_s15 + $0x28] sm:$0xff] %v1097_v42  ;;  %v1101_v44 = vld [vmem:[%s1594_s20 + $0x38] sm:$0xff]  ;;  %v1103_v45 = vld [vmem:[%s1594_s20 + $0x40] sm:$0xff]  ;;  %s2390_s18 = smov (%p1216_p11, %s1215_s18), 0 }
 0x1a6   : >> { %1100 = vst [vmem:[%s1590_s15 + $0x30] sm:$0xff] %v1099_v43  ;;  %1102 = vst [vmem:[%s1590_s15 + $0x38] sm:$0xff] %v1101_v44  ;;  %v1105_v46 = vld [vmem:[%s1594_s20 + $0x48] sm:$0xff]  ;;  %v1107_v47 = vld [vmem:[%s1594_s20 + $0x50] sm:$0xff]  ;;  %s1365_s21 = sshll.u32 %s2390_s18, 9  ;;  %s2383_s27 = smov %s2390_s18 }
 0x1a7   : >> { %1104 = vst [vmem:[%s1590_s15 + $0x40] sm:$0xff] %v1103_v45  ;;  %v1109_v48 = vld [vmem:[%s1594_s20 + $0x58] sm:$0xff]  ;;  %1106 = vst [vmem:[%s1590_s15 + $0x48] sm:$0xff] %v1105_v46  ;;  %v1111_v49 = vld [vmem:[%s1594_s20 + $0x60] sm:$0xff]  ;;  %s2248_s22 = scalar_lea.vmem %s1976_s12, %s1365_s21 [#allocation2]   ;;  %s2251_s23 = scalar_lea.vmem %s2175_s10, %s1365_s21  }
 0x1a8   : >> { %1108 = vst [vmem:[%s1590_s15 + $0x50] sm:$0xff] %v1107_v47  ;;  %1110 = vst [vmem:[%s1590_s15 + $0x58] sm:$0xff] %v1109_v48  ;;  %v1113_v50 = vld [vmem:[%s1594_s20 + $0x68] sm:$0xff]  ;;  %v1115_v51 = vld [vmem:[%s1594_s20 + $0x70] sm:$0xff] }
 0x1a9   : >> { %1112 = vst [vmem:[%s1590_s15 + $0x60] sm:$0xff] %v1111_v49  ;;  %1114 = vst [vmem:[%s1590_s15 + $0x68] sm:$0xff] %v1113_v50  ;;  %v1117_v52 = vld [vmem:[%s1594_s20 + $0x78] sm:$0xff]  ;;  %v1119_v53 = vld [vmem:[%s1594_s20 + $0x80] sm:$0xff] }
 0x1aa   : >> { %1116 = vst [vmem:[%s1590_s15 + $0x70] sm:$0xff] %v1115_v51  ;;  %v1121_v54 = vld [vmem:[%s1594_s20 + $0x88] sm:$0xff]  ;;  %1118 = vst [vmem:[%s1590_s15 + $0x78] sm:$0xff] %v1117_v52  ;;  %v1123_v55 = vld [vmem:[%s1594_s20 + $0x90] sm:$0xff] }
 0x1ab   : >> { %1120 = vst [vmem:[%s1590_s15 + $0x80] sm:$0xff] %v1119_v53  ;;  %1122 = vst [vmem:[%s1590_s15 + $0x88] sm:$0xff] %v1121_v54  ;;  %v1125_v56 = vld [vmem:[%s1594_s20 + $0x98] sm:$0xff]  ;;  %v1127_v57 = vld [vmem:[%s1594_s20 + $0xa0] sm:$0xff] }
 0x1ac   : >> { %1124 = vst [vmem:[%s1590_s15 + $0x90] sm:$0xff] %v1123_v55  ;;  %1126 = vst [vmem:[%s1590_s15 + $0x98] sm:$0xff] %v1125_v56  ;;  %v1129_v58 = vld [vmem:[%s1594_s20 + $0xa8] sm:$0xff]  ;;  %v1131_v59 = vld [vmem:[%s1594_s20 + $0xb0] sm:$0xff] }
 0x1ad   : >> { %1128 = vst [vmem:[%s1590_s15 + $0xa0] sm:$0xff] %v1127_v57  ;;  %v1133_v60 = vld [vmem:[%s1594_s20 + $0xb8] sm:$0xff]  ;;  %1130 = vst [vmem:[%s1590_s15 + $0xa8] sm:$0xff] %v1129_v58  ;;  %v1135_v61 = vld [vmem:[%s1594_s20 + $0xc0] sm:$0xff] }
 0x1ae   : >> { %1132 = vst [vmem:[%s1590_s15 + $0xb0] sm:$0xff] %v1131_v59  ;;  %1134 = vst [vmem:[%s1590_s15 + $0xb8] sm:$0xff] %v1133_v60  ;;  %v1137_v62 = vld [vmem:[%s1594_s20 + $0xc8] sm:$0xff]  ;;  %v1139_v63 = vld [vmem:[%s1594_s20 + $0xd0] sm:$0xff] }
 0x1af   : >> { %1136 = vst [vmem:[%s1590_s15 + $0xc0] sm:$0xff] %v1135_v61  ;;  %1138 = vst [vmem:[%s1590_s15 + $0xc8] sm:$0xff] %v1137_v62  ;;  %v1141_v0 = vld [vmem:[%s1594_s20 + $0xd8] sm:$0xff]  ;;  %v1143_v1 = vld [vmem:[%s1594_s20 + $0xe0] sm:$0xff] }
 0x1b0   : >> { %1140 = vst [vmem:[%s1590_s15 + $0xd0] sm:$0xff] %v1139_v63  ;;  %v1145_v2 = vld [vmem:[%s1594_s20 + $0xe8] sm:$0xff]  ;;  %1142 = vst [vmem:[%s1590_s15 + $0xd8] sm:$0xff] %v1141_v0  ;;  %v1147_v3 = vld [vmem:[%s1594_s20 + $0xf0] sm:$0xff] }
 0x1b1   : >> { %1144 = vst [vmem:[%s1590_s15 + $0xe0] sm:$0xff] %v1143_v1  ;;  %1146 = vst [vmem:[%s1590_s15 + $0xe8] sm:$0xff] %v1145_v2  ;;  %v1149_v4 = vld [vmem:[%s1594_s20 + $0xf8] sm:$0xff]  ;;  %v1151_v5 = vld [vmem:[%s1594_s20 + $0x100] sm:$0xff] }
 0x1b2   : >> { %1148 = vst [vmem:[%s1590_s15 + $0xf0] sm:$0xff] %v1147_v3  ;;  %1150 = vst [vmem:[%s1590_s15 + $0xf8] sm:$0xff] %v1149_v4  ;;  %v1153_v6 = vld [vmem:[%s1594_s20 + $0x108] sm:$0xff]  ;;  %v1155_v7 = vld [vmem:[%s1594_s20 + $0x110] sm:$0xff] }
 0x1b3   : >> { %1152 = vst [vmem:[%s1590_s15 + $0x100] sm:$0xff] %v1151_v5  ;;  %v1157_v8 = vld [vmem:[%s1594_s20 + $0x118] sm:$0xff]  ;;  %1154 = vst [vmem:[%s1590_s15 + $0x108] sm:$0xff] %v1153_v6  ;;  %v1159_v9 = vld [vmem:[%s1594_s20 + $0x120] sm:$0xff] }
 0x1b4   : >> { %1156 = vst [vmem:[%s1590_s15 + $0x110] sm:$0xff] %v1155_v7  ;;  %1158 = vst [vmem:[%s1590_s15 + $0x118] sm:$0xff] %v1157_v8  ;;  %v1161_v10 = vld [vmem:[%s1594_s20 + $0x128] sm:$0xff]  ;;  %v1163_v11 = vld [vmem:[%s1594_s20 + $0x130] sm:$0xff] }
 0x1b5   : >> { %1160 = vst [vmem:[%s1590_s15 + $0x120] sm:$0xff] %v1159_v9  ;;  %1162 = vst [vmem:[%s1590_s15 + $0x128] sm:$0xff] %v1161_v10  ;;  %v1165_v12 = vld [vmem:[%s1594_s20 + $0x138] sm:$0xff]  ;;  %v1167_v13 = vld [vmem:[%s1594_s20 + $0x140] sm:$0xff] }
 0x1b6   : >> { %1164 = vst [vmem:[%s1590_s15 + $0x130] sm:$0xff] %v1163_v11  ;;  %v1169_v14 = vld [vmem:[%s1594_s20 + $0x148] sm:$0xff]  ;;  %1166 = vst [vmem:[%s1590_s15 + $0x138] sm:$0xff] %v1165_v12  ;;  %v1171_v15 = vld [vmem:[%s1594_s20 + $0x150] sm:$0xff] }
 0x1b7   : >> { %1168 = vst [vmem:[%s1590_s15 + $0x140] sm:$0xff] %v1167_v13  ;;  %1170 = vst [vmem:[%s1590_s15 + $0x148] sm:$0xff] %v1169_v14  ;;  %v1173_v16 = vld [vmem:[%s1594_s20 + $0x158] sm:$0xff]  ;;  %v1175_v17 = vld [vmem:[%s1594_s20 + $0x160] sm:$0xff] }
 0x1b8   : >> { %1172 = vst [vmem:[%s1590_s15 + $0x150] sm:$0xff] %v1171_v15  ;;  %1174 = vst [vmem:[%s1590_s15 + $0x158] sm:$0xff] %v1173_v16  ;;  %v1177_v18 = vld [vmem:[%s1594_s20 + $0x168] sm:$0xff]  ;;  %v1179_v19 = vld [vmem:[%s1594_s20 + $0x170] sm:$0xff] }
 0x1b9   : >> { %1176 = vst [vmem:[%s1590_s15 + $0x160] sm:$0xff] %v1175_v17  ;;  %v1181_v20 = vld [vmem:[%s1594_s20 + $0x178] sm:$0xff]  ;;  %1178 = vst [vmem:[%s1590_s15 + $0x168] sm:$0xff] %v1177_v18  ;;  %v1183_v21 = vld [vmem:[%s1594_s20 + $0x180] sm:$0xff] }
 0x1ba   : >> { %1180 = vst [vmem:[%s1590_s15 + $0x170] sm:$0xff] %v1179_v19  ;;  %1182 = vst [vmem:[%s1590_s15 + $0x178] sm:$0xff] %v1181_v20  ;;  %v1185_v22 = vld [vmem:[%s1594_s20 + $0x188] sm:$0xff]  ;;  %v1187_v23 = vld [vmem:[%s1594_s20 + $0x190] sm:$0xff] }
 0x1bb   : >> { %1184 = vst [vmem:[%s1590_s15 + $0x180] sm:$0xff] %v1183_v21  ;;  %1186 = vst [vmem:[%s1590_s15 + $0x188] sm:$0xff] %v1185_v22  ;;  %v1189_v24 = vld [vmem:[%s1594_s20 + $0x198] sm:$0xff]  ;;  %v1191_v25 = vld [vmem:[%s1594_s20 + $0x1a0] sm:$0xff] }
 0x1bc   : >> { %1188 = vst [vmem:[%s1590_s15 + $0x190] sm:$0xff] %v1187_v23  ;;  %v1193_v26 = vld [vmem:[%s1594_s20 + $0x1a8] sm:$0xff]  ;;  %1190 = vst [vmem:[%s1590_s15 + $0x198] sm:$0xff] %v1189_v24  ;;  %v1195_v27 = vld [vmem:[%s1594_s20 + $0x1b0] sm:$0xff] }
 0x1bd   : >> { %1192 = vst [vmem:[%s1590_s15 + $0x1a0] sm:$0xff] %v1191_v25  ;;  %1194 = vst [vmem:[%s1590_s15 + $0x1a8] sm:$0xff] %v1193_v26  ;;  %v1197_v28 = vld [vmem:[%s1594_s20 + $0x1b8] sm:$0xff]  ;;  %v1199_v29 = vld [vmem:[%s1594_s20 + $0x1c0] sm:$0xff] }
 0x1be   : >> { %1196 = vst [vmem:[%s1590_s15 + $0x1b0] sm:$0xff] %v1195_v27  ;;  %1198 = vst [vmem:[%s1590_s15 + $0x1b8] sm:$0xff] %v1197_v28  ;;  %v1201_v30 = vld [vmem:[%s1594_s20 + $0x1c8] sm:$0xff]  ;;  %v1203_v31 = vld [vmem:[%s1594_s20 + $0x1d0] sm:$0xff]  ;;  %1083 = sbr.rel (!%p1080_p12) target bundleno = 418 (0x1a2), region = 122 }
 0x1bf   : >> { %1200 = vst [vmem:[%s1590_s15 + $0x1c0] sm:$0xff] %v1199_v29  ;;  %v1205_v32 = vld [vmem:[%s1594_s20 + $0x1d8] sm:$0xff]  ;;  %1202 = vst [vmem:[%s1590_s15 + $0x1c8] sm:$0xff] %v1201_v30  ;;  %v1207_v34 = vld [vmem:[%s1594_s20 + $0x1e0] sm:$0xff] }
 0x1c0   : >> { %1204 = vst [vmem:[%s1590_s15 + $0x1d0] sm:$0xff] %v1203_v31  ;;  %1206 = vst [vmem:[%s1590_s15 + $0x1d8] sm:$0xff] %v1205_v32  ;;  %v1209_v35 = vld [vmem:[%s1594_s20 + $0x1e8] sm:$0xff]  ;;  %v1211_v36 = vld [vmem:[%s1594_s20 + $0x1f0] sm:$0xff] }
 0x1c1   : >> { %1208 = vst [vmem:[%s1590_s15 + $0x1e0] sm:$0xff] %v1207_v34  ;;  %1210 = vst [vmem:[%s1590_s15 + $0x1e8] sm:$0xff] %v1209_v35  ;;  %v1213_v37 = vld [vmem:[%s1594_s20 + $0x1f8] sm:$0xff]  ;;  %s2382_s20 = smov %s2248_s22 }
 0x1c2   : >> { %1212 = vst [vmem:[%s1590_s15 + $0x1f0] sm:$0xff] %v1211_v36  ;;  %1214 = vst [vmem:[%s1590_s15 + $0x1f8] sm:$0xff] %v1213_v37  ;;  %s2381_s15 = smov %s2251_s23 }
 0x1c3 PF: > { %s2356_s24 = sand.u32 63, %s2388_s6   ;;  %s1377_s25 = sshll.u32 %s2181_s14, 9 }
 0x1c4   : > { %s1226_s26 = scalar_lea.vmem %s1976_s12, %s1377_s25 [#allocation2]   ;;  %s1228_s28 = scalar_lea.vmem %s2175_s10, %s1377_s25  }
 0x1c5   : > { %p1370_p13 = scmp.le.s32.totalorder %s2356_s24, 0 }
 0x1c6   : > { %s1604_s29 = smov (!%p1370_p13), %s1228_s28   ;;  %s1608_s30 = smov (!%p1370_p13), %s1226_s26  }
 0x1c7   : > { %1319 = sbr.rel (%p1370_p13) target bundleno = 468 (0x1d4), region = 127  ;;  %s1612_s4 = smov (!%p1370_p13), 0  }
 0x1c8   : > { %s1616_s5 = smov (!%p1370_p13), 0  }
 0x1cc LB: >> { %v1238_v33 = vld [vmem:[%s1610_s30] sm:$0xff]  ;;  %s1240_s6 = sadd.s32 1, %s1614_s4  ;;  %s1232_s5 = sadd.s32 1, %s1618_s5   ;;  %s1618_s5 = sphi %s1616_s5, %s1232_s5   ;;  %s1614_s4 = sphi %s1612_s4, %s1613_s4   ;;  %s1610_s30 = sphi %s1608_s30, %s1245_s30   ;;  %s1606_s29 = sphi %s1604_s29, %s1246_s29  }
 0x1cd   : >> { %1239 = vst [vmem:[%s1606_s29] sm:$0xff] %v1238_v33  ;;  %p1241_p0 = scmp.ge.s32.totalorder %s1240_s6, %s2356_s24  ;;  %p1231_p1 = scmp.ge.s32.totalorder %s1232_s5, %s2356_s24 }
 0x1cf   : >> { %s2392_s6 = smov (%p1241_p0, %s1240_s6), 0  ;;  %1234 = sbr.rel (!%p1231_p1) target bundleno = 460 (0x1cc), region = 133 }
 0x1d0   : >> { %s1371_s12 = sshll.u32 %s2392_s6, 3  ;;  %s1613_s4 = smov %s2392_s6  }
 0x1d1   : >> { %s1245_s30 = scalar_lea.vmem %s1226_s26, %s1371_s12 [#allocation2]   ;;  %s1246_s29 = scalar_lea.vmem %s1228_s28, %s1371_s12  }
 0x1d4 PF: > { %p10_p2 = scmp.ge.s32.totalorder %s1656_s16, 5   ;;  %s2384_s12 = smov %s1582_s13 }
 0x1d5   : > { %s2385_s13 = smov %s1664_s19  ;;  %s2386_s14 = smov %s1656_s16 }
 0x1d6   :  { %12 = sbr.rel (!%p10_p2) target bundleno = 2 (0x2), region = 144 }

// kernel: dqn_paper_forward.5
= control target key start
LH: loop header
LB: loop body
LE: loop exit
PB: predicated region body
PF: predicated region fallthrough
CT: control target
= control target key end

     0   :  { %v1388_v0 = vmov 0.0   ;;  %vm303_vm0 = vcmask 261120   ;;  %vm1188_vm1 = vcmask 523264   ;;  %s2637_s1 = inlined_call_operand.vmem [shape: f32[800,64], index: 1, kind: input, shape index: {}]   ;;  %s2638_s0 = inlined_call_operand.vmem [shape: f32[208,800], index: 0, kind: input, shape index: {}]   ;;  %s2639_s2 = inlined_call_operand.vmem [shape: f32[1,64], index: 2, kind: input, shape index: {}]   ;;  %s2640_s3 = inlined_call_operand.vmem [shape: f32[208,64], index: 3, kind: output, shape index: {}]  }
   0x1   :  { %382 = vmatprep.subr.mxu0 %v1388_v0  ;;  %577 = vmatprep.subr.mxu1 %v1388_v0  ;;  %v211_v1 = vld [vmem:[%s2637_s1 + $0x78] sm:$0xff]  ;;  %v210_v3 = vld [vmem:[%s2637_s1 + $0x70] sm:$0xff]  ;;  %v209_v5 = vld [vmem:[%s2637_s1 + $0x68] sm:$0xff] }
   0x2   :  { %v243_v2 = vld [vmem:[%s2637_s1 + $0x178] sm:$0xff]  ;;  %383 = vmatpush1.msra.mxu0 %v211_v1  ;;  %v242_v4 = vld [vmem:[%s2637_s1 + $0x170] sm:$0xff]  ;;  %v241_v6 = vld [vmem:[%s2637_s1 + $0x168] sm:$0xff] }
   0x3   :  { %578 = vmatpush1.msra.mxu1 %v243_v2  ;;  %384 = vmatprep.subr.mxu0 %v1388_v0  ;;  %v208_v7 = vld [vmem:[%s2637_s1 + $0x60] sm:$0xff]  ;;  %v207_v9 = vld [vmem:[%s2637_s1 + $0x58] sm:$0xff]  ;;  %v206_v11 = vld [vmem:[%s2637_s1 + $0x50] sm:$0xff] }
   0x4   :  { %579 = vmatprep.subr.mxu1 %v1388_v0  ;;  %385 = vmatpush1.msra.mxu0 %v210_v3  ;;  %v240_v8 = vld [vmem:[%s2637_s1 + $0x160] sm:$0xff]  ;;  %v239_v10 = vld [vmem:[%s2637_s1 + $0x158] sm:$0xff]  ;;  %v238_v12 = vld [vmem:[%s2637_s1 + $0x150] sm:$0xff] }
   0x5   :  { %580 = vmatpush1.msra.mxu1 %v242_v4  ;;  %386 = vmatprep.subr.mxu0 %v1388_v0  ;;  %v205_v13 = vld [vmem:[%s2637_s1 + $0x48] sm:$0xff]  ;;  %v204_v15 = vld [vmem:[%s2637_s1 + $0x40] sm:$0xff]  ;;  %v203_v17 = vld [vmem:[%s2637_s1 + $0x38] sm:$0xff] }
   0x6   :  { %581 = vmatprep.subr.mxu1 %v1388_v0  ;;  %387 = vmatpush1.msra.mxu0 %v209_v5  ;;  %v237_v14 = vld [vmem:[%s2637_s1 + $0x148] sm:$0xff]  ;;  %v236_v16 = vld [vmem:[%s2637_s1 + $0x140] sm:$0xff]  ;;  %v235_v18 = vld [vmem:[%s2637_s1 + $0x138] sm:$0xff] }
   0x7   :  { %582 = vmatpush1.msra.mxu1 %v241_v6  ;;  %388 = vmatprep.subr.mxu0 %v1388_v0  ;;  %v202_v19 = vld [vmem:[%s2637_s1 + $0x30] sm:$0xff]  ;;  %v201_v21 = vld [vmem:[%s2637_s1 + $0x28] sm:$0xff]  ;;  %v200_v23 = vld [vmem:[%s2637_s1 + $0x20] sm:$0xff] }
   0x8   :  { %583 = vmatprep.subr.mxu1 %v1388_v0  ;;  %389 = vmatpush1.msra.mxu0 %v208_v7  ;;  %v234_v20 = vld [vmem:[%s2637_s1 + $0x130] sm:$0xff]  ;;  %v233_v22 = vld [vmem:[%s2637_s1 + $0x128] sm:$0xff]  ;;  %v232_v24 = vld [vmem:[%s2637_s1 + $0x120] sm:$0xff] }
   0x9   :  { %584 = vmatpush1.msra.mxu1 %v240_v8  ;;  %390 = vmatprep.subr.mxu0 %v1388_v0  ;;  %v199_v25 = vld [vmem:[%s2637_s1 + $0x18] sm:$0xff]  ;;  %v198_v27 = vld [vmem:[%s2637_s1 + $0x10] sm:$0xff]  ;;  %v197_v29 = vld [vmem:[%s2637_s1 + $0x8] sm:$0xff] }
   0xa   :  { %585 = vmatprep.subr.mxu1 %v1388_v0  ;;  %391 = vmatpush1.msra.mxu0 %v207_v9  ;;  %v231_v26 = vld [vmem:[%s2637_s1 + $0x118] sm:$0xff]  ;;  %v230_v28 = vld [vmem:[%s2637_s1 + $0x110] sm:$0xff]  ;;  %v229_v30 = vld [vmem:[%s2637_s1 + $0x108] sm:$0xff] }
   0xb   :  { %586 = vmatpush1.msra.mxu1 %v239_v10  ;;  %392 = vmatprep.subr.mxu0 %v1388_v0  ;;  %v196_v31 = vld [vmem:[%s2637_s1] sm:$0xff]  ;;  %v227_v33 = vld [vmem:[%s2637_s1 + $0xf8] sm:$0xff]  ;;  %v226_v35 = vld [vmem:[%s2637_s1 + $0xf0] sm:$0xff] }
   0xc   :  { %587 = vmatprep.subr.mxu1 %v1388_v0  ;;  %393 = vmatpush1.msra.mxu0 %v206_v11  ;;  %v228_v32 = vld [vmem:[%s2637_s1 + $0x100] sm:$0xff]  ;;  %v259_v34 = vld [vmem:[%s2637_s1 + $0x1f8] sm:$0xff]  ;;  %v258_v36 = vld [vmem:[%s2637_s1 + $0x1f0] sm:$0xff] }
   0xd   :  { %588 = vmatpush1.msra.mxu1 %v238_v12  ;;  %394 = vmatprep.subr.mxu0 %v1388_v0  ;;  %v225_v37 = vld [vmem:[%s2637_s1 + $0xe8] sm:$0xff]  ;;  %v224_v39 = vld [vmem:[%s2637_s1 + $0xe0] sm:$0xff]  ;;  %v223_v41 = vld [vmem:[%s2637_s1 + $0xd8] sm:$0xff] }
   0xe   :  { %589 = vmatprep.subr.mxu1 %v1388_v0  ;;  %395 = vmatpush1.msra.mxu0 %v205_v13  ;;  %v257_v38 = vld [vmem:[%s2637_s1 + $0x1e8] sm:$0xff]  ;;  %v256_v40 = vld [vmem:[%s2637_s1 + $0x1e0] sm:$0xff]  ;;  %v255_v42 = vld [vmem:[%s2637_s1 + $0x1d8] sm:$0xff] }
   0xf   :  { %590 = vmatpush1.msra.mxu1 %v237_v14  ;;  %396 = vmatprep.subr.mxu0 %v1388_v0  ;;  %v222_v43 = vld [vmem:[%s2637_s1 + $0xd0] sm:$0xff]  ;;  %v221_v45 = vld [vmem:[%s2637_s1 + $0xc8] sm:$0xff]  ;;  %v220_v47 = vld [vmem:[%s2637_s1 + $0xc0] sm:$0xff] }
  0x10   :  { %591 = vmatprep.subr.mxu1 %v1388_v0  ;;  %397 = vmatpush1.msra.mxu0 %v204_v15  ;;  %v254_v44 = vld [vmem:[%s2637_s1 + $0x1d0] sm:$0xff]  ;;  %v253_v46 = vld [vmem:[%s2637_s1 + $0x1c8] sm:$0xff]  ;;  %v252_v48 = vld [vmem:[%s2637_s1 + $0x1c0] sm:$0xff] }
  0x11   :  { %592 = vmatpush1.msra.mxu1 %v236_v16  ;;  %398 = vmatprep.subr.mxu0 %v1388_v0  ;;  %v219_v49 = vld [vmem:[%s2637_s1 + $0xb8] sm:$0xff]  ;;  %v218_v51 = vld [vmem:[%s2637_s1 + $0xb0] sm:$0xff]  ;;  %v217_v53 = vld [vmem:[%s2637_s1 + $0xa8] sm:$0xff] }
  0x12   :  { %593 = vmatprep.subr.mxu1 %v1388_v0  ;;  %399 = vmatpush1.msra.mxu0 %v203_v17  ;;  %v251_v50 = vld [vmem:[%s2637_s1 + $0x1b8] sm:$0xff]  ;;  %v250_v52 = vld [vmem:[%s2637_s1 + $0x1b0] sm:$0xff]  ;;  %v249_v54 = vld [vmem:[%s2637_s1 + $0x1a8] sm:$0xff] }
  0x13   :  { %594 = vmatpush1.msra.mxu1 %v235_v18  ;;  %400 = vmatprep.subr.mxu0 %v1388_v0  ;;  %v216_v55 = vld [vmem:[%s2637_s1 + $0xa0] sm:$0xff]  ;;  %v215_v57 = vld [vmem:[%s2637_s1 + $0x98] sm:$0xff]  ;;  %v214_v59 = vld [vmem:[%s2637_s1 + $0x90] sm:$0xff] }
  0x14   :  { %595 = vmatprep.subr.mxu1 %v1388_v0  ;;  %401 = vmatpush1.msra.mxu0 %v202_v19  ;;  %v248_v56 = vld [vmem:[%s2637_s1 + $0x1a0] sm:$0xff]  ;;  %v247_v58 = vld [vmem:[%s2637_s1 + $0x198] sm:$0xff]  ;;  %v246_v60 = vld [vmem:[%s2637_s1 + $0x190] sm:$0xff] }
  0x15   :  { %596 = vmatpush1.msra.mxu1 %v234_v20  ;;  %402 = vmatprep.subr.mxu0 %v1388_v0  ;;  %v213_v61 = vld [vmem:[%s2637_s1 + $0x88] sm:$0xff]  ;;  %v212_v63 = vld [vmem:[%s2637_s1 + $0x80] sm:$0xff]  ;;  %v17_v3 = vld [vmem:[%s2638_s0 + $0x18] sm:$0xff] }
  0x16   :  { %597 = vmatprep.subr.mxu1 %v1388_v0  ;;  %403 = vmatpush1.msra.mxu0 %v201_v21  ;;  %v245_v62 = vld [vmem:[%s2637_s1 + $0x188] sm:$0xff]  ;;  %v244_v2 = vld [vmem:[%s2637_s1 + $0x180] sm:$0xff]  ;;  %v16_v5 = vld [vmem:[%s2638_s0 + $0x10] sm:$0xff] }
  0x17   :  { %598 = vmatpush1.msra.mxu1 %v233_v22  ;;  %404 = vmatprep.subr.mxu0 %v1388_v0  ;;  %v15_v1 = vld [vmem:[%s2638_s0 + $0x8] sm:$0xff]  ;;  %v14_v4 = vld [vmem:[%s2638_s0] sm:$0xff]  ;;  %v275_v7 = vld [vmem:[%s2637_s1 + $0x278] sm:$0xff] }
  0x18   :  { %599 = vmatprep.subr.mxu1 %v1388_v0  ;;  %405 = vmatpush1.msra.mxu0 %v200_v23  ;;  %v22_v6 = vld [vmem:[%s2638_s0 + $0x40] sm:$0xff]  ;;  %v24_v8 = vld [vmem:[%s2638_s0 + $0x50] sm:$0xff]  ;;  %v21_v9 = vld [vmem:[%s2638_s0 + $0x38] sm:$0xff] }
  0x19   :  { %600 = vmatpush1.msra.mxu1 %v232_v24  ;;  %406 = vmatprep.subr.mxu0 %v1388_v0  ;;  %v23_v10 = vld [vmem:[%s2638_s0 + $0x48] sm:$0xff]  ;;  %v274_v11 = vld [vmem:[%s2637_s1 + $0x270] sm:$0xff]  ;;  %v29_v12 = vld [vmem:[%s2638_s0 + $0x78] sm:$0xff] }
  0x1a   :  { %601 = vmatprep.subr.mxu1 %v1388_v0  ;;  %407 = vmatpush1.msra.mxu0 %v199_v25  ;;  %v31_v13 = vld [vmem:[%s2638_s0 + $0x88] sm:$0xff]  ;;  %v28_v14 = vld [vmem:[%s2638_s0 + $0x70] sm:$0xff]  ;;  %v30_v15 = vld [vmem:[%s2638_s0 + $0x80] sm:$0xff] }
  0x1b   :  { %602 = vmatpush1.msra.mxu1 %v231_v26  ;;  %408 = vmatprep.subr.mxu0 %v1388_v0  ;;  %v273_v16 = vld [vmem:[%s2637_s1 + $0x268] sm:$0xff]  ;;  %v36_v17 = vld [vmem:[%s2638_s0 + $0xb0] sm:$0xff]  ;;  %v38_v18 = vld [vmem:[%s2638_s0 + $0xc0] sm:$0xff] }
  0x1c   :  { %603 = vmatprep.subr.mxu1 %v1388_v0  ;;  %409 = vmatpush1.msra.mxu0 %v198_v27  ;;  %v272_v19 = vld [vmem:[%s2637_s1 + $0x260] sm:$0xff]  ;;  %v37_v20 = vld [vmem:[%s2638_s0 + $0xb8] sm:$0xff]  ;;  %v35_v21 = vld [vmem:[%s2638_s0 + $0xa8] sm:$0xff] }
  0x1d   :  { %604 = vmatpush1.msra.mxu1 %v230_v28  ;;  %410 = vmatprep.subr.mxu0 %v1388_v0  ;;  %v271_v22 = vld [vmem:[%s2637_s1 + $0x258] sm:$0xff]  ;;  %v43_v23 = vld [vmem:[%s2638_s0 + $0xe8] sm:$0xff]  ;;  %v42_v25 = vld [vmem:[%s2638_s0 + $0xe0] sm:$0xff] }
  0x1e   :  { %605 = vmatprep.subr.mxu1 %v1388_v0  ;;  %411 = vmatpush1.msra.mxu0 %v197_v29  ;;  %v45_v24 = vld [vmem:[%s2638_s0 + $0xf8] sm:$0xff]  ;;  %v44_v26 = vld [vmem:[%s2638_s0 + $0xf0] sm:$0xff]  ;;  %v50_v28 = vld [vmem:[%s2638_s0 + $0x120] sm:$0xff] }
  0x1f   :  { %606 = vmatpush1.msra.mxu1 %v229_v30  ;;  %412 = vmatprep.subr.mxu0 %v1388_v0  ;;  %v270_v27 = vld [vmem:[%s2637_s1 + $0x250] sm:$0xff]  ;;  %v49_v30 = vld [vmem:[%s2638_s0 + $0x118] sm:$0xff] }
  0x20   :  { %607 = vmatprep.subr.mxu1 %v1388_v0  ;;  %413 = vmatpush1.msra.mxu0 %v196_v31  ;;  %v52_v29 = vld [vmem:[%s2638_s0 + $0x130] sm:$0xff]  ;;  %v51_v31 = vld [vmem:[%s2638_s0 + $0x128] sm:$0xff] }
  0x21   :  { %608 = vmatpush1.msra.mxu1 %v228_v32  ;;  %414 = vmatprep.subr.mxu0 %v1388_v0  ;;  %v269_v32 = vld [vmem:[%s2637_s1 + $0x248] sm:$0xff] }
  0x22   :  { %609 = vmatprep.subr.mxu1 %v1388_v0  ;;  %415 = vmatpush2.msra.mxu0 %v227_v33  ;;  %v57_v33 = vld [vmem:[%s2638_s0 + $0x158] sm:$0xff] }
  0x23   :  { %610 = vmatpush2.msra.mxu1 %v259_v34  ;;  %416 = vmatprep.subr.mxu0 %v1388_v0  ;;  %v59_v34 = vld [vmem:[%s2638_s0 + $0x168] sm:$0xff] }
  0x24   :  { %611 = vmatprep.subr.mxu1 %v1388_v0  ;;  %417 = vmatpush2.msra.mxu0 %v226_v35  ;;  %v56_v35 = vld [vmem:[%s2638_s0 + $0x150] sm:$0xff] }
  0x25   :  { %612 = vmatpush2.msra.mxu1 %v258_v36  ;;  %418 = vmatprep.subr.mxu0 %v1388_v0  ;;  %v58_v36 = vld [vmem:[%s2638_s0 + $0x160] sm:$0xff] }
  0x26   :  { %613 = vmatprep.subr.mxu1 %v1388_v0  ;;  %419 = vmatpush2.msra.mxu0 %v225_v37  ;;  %v268_v37 = vld [vmem:[%s2637_s1 + $0x240] sm:$0xff] }
  0x27   :  { %614 = vmatpush2.msra.mxu1 %v257_v38  ;;  %420 = vmatprep.subr.mxu0 %v1388_v0  ;;  %v64_v38 = vld [vmem:[%s2638_s0 + $0x190] sm:$0xff] }
  0x28   :  { %615 = vmatprep.subr.mxu1 %v1388_v0  ;;  %421 = vmatpush2.msra.mxu0 %v224_v39  ;;  %v66_v39 = vld [vmem:[%s2638_s0 + $0x1a0] sm:$0xff] }
  0x29   :  { %616 = vmatpush2.msra.mxu1 %v256_v40  ;;  %422 = vmatprep.subr.mxu0 %v1388_v0  ;;  %v267_v40 = vld [vmem:[%s2637_s1 + $0x238] sm:$0xff] }
  0x2a   :  { %617 = vmatprep.subr.mxu1 %v1388_v0  ;;  %423 = vmatpush2.msra.mxu0 %v223_v41  ;;  %v65_v41 = vld [vmem:[%s2638_s0 + $0x198] sm:$0xff] }
  0x2b   :  { %618 = vmatpush2.msra.mxu1 %v255_v42  ;;  %424 = vmatprep.subr.mxu0 %v1388_v0  ;;  %v63_v42 = vld [vmem:[%s2638_s0 + $0x188] sm:$0xff] }
  0x2c   :  { %619 = vmatprep.subr.mxu1 %v1388_v0  ;;  %425 = vmatpush2.msra.mxu0 %v222_v43  ;;  %v71_v43 = vld [vmem:[%s2638_s0 + $0x1c8] sm:$0xff] }
  0x2d   :  { %620 = vmatpush2.msra.mxu1 %v254_v44  ;;  %426 = vmatprep.subr.mxu0 %v1388_v0  ;;  %v73_v44 = vld [vmem:[%s2638_s0 + $0x1d8] sm:$0xff] }
  0x2e   :  { %621 = vmatprep.subr.mxu1 %v1388_v0  ;;  %427 = vmatpush2.msra.mxu0 %v221_v45  ;;  %v266_v45 = vld [vmem:[%s2637_s1 + $0x230] sm:$0xff] }
  0x2f   :  { %622 = vmatpush2.msra.mxu1 %v253_v46  ;;  %428 = vmatprep.subr.mxu0 %v1388_v0  ;;  %v70_v46 = vld [vmem:[%s2638_s0 + $0x1c0] sm:$0xff] }
  0x30   :  { %623 = vmatprep.subr.mxu1 %v1388_v0  ;;  %429 = vmatpush2.msra.mxu0 %v220_v47  ;;  %v72_v47 = vld [vmem:[%s2638_s0 + $0x1d0] sm:$0xff] }
  0x31   :  { %624 = vmatpush2.msra.mxu1 %v252_v48  ;;  %430 = vmatprep.subr.mxu0 %v1388_v0  ;;  %v265_v48 = vld [vmem:[%s2637_s1 + $0x228] sm:$0xff] }
  0x32   :  { %625 = vmatprep.subr.mxu1 %v1388_v0  ;;  %431 = vmatpush2.msra.mxu0 %v219_v49  ;;  %v78_v49 = vld [vmem:[%s2638_s0 + $0x200] sm:$0xff] }
  0x33   :  { %626 = vmatpush2.msra.mxu1 %v251_v50  ;;  %432 = vmatprep.subr.mxu0 %v1388_v0  ;;  %v80_v50 = vld [vmem:[%s2638_s0 + $0x210] sm:$0xff] }
  0x34   :  { %627 = vmatprep.subr.mxu1 %v1388_v0  ;;  %433 = vmatpush2.msra.mxu0 %v218_v51  ;;  %v77_v51 = vld [vmem:[%s2638_s0 + $0x1f8] sm:$0xff] }
  0x35   :  { %628 = vmatpush2.msra.mxu1 %v250_v52  ;;  %434 = vmatprep.subr.mxu0 %v1388_v0  ;;  %v79_v52 = vld [vmem:[%s2638_s0 + $0x208] sm:$0xff] }
  0x36   :  { %629 = vmatprep.subr.mxu1 %v1388_v0  ;;  %435 = vmatpush2.msra.mxu0 %v217_v53  ;;  %v264_v53 = vld [vmem:[%s2637_s1 + $0x220] sm:$0xff] }
  0x37   :  { %630 = vmatpush2.msra.mxu1 %v249_v54  ;;  %436 = vmatprep.subr.mxu0 %v1388_v0  ;;  %v85_v54 = vld [vmem:[%s2638_s0 + $0x238] sm:$0xff] }
  0x38   :  { %631 = vmatprep.subr.mxu1 %v1388_v0  ;;  %437 = vmatpush2.msra.mxu0 %v216_v55  ;;  %v87_v55 = vld [vmem:[%s2638_s0 + $0x248] sm:$0xff] }
  0x39   :  { %632 = vmatpush2.msra.mxu1 %v248_v56  ;;  %438 = vmatprep.subr.mxu0 %v1388_v0  ;;  %v84_v56 = vld [vmem:[%s2638_s0 + $0x230] sm:$0xff] }
  0x3a   :  { %633 = vmatprep.subr.mxu1 %v1388_v0  ;;  %439 = vmatpush2.msra.mxu0 %v215_v57  ;;  %v86_v57 = vld [vmem:[%s2638_s0 + $0x240] sm:$0xff] }
  0x3b   :  { %634 = vmatpush2.msra.mxu1 %v247_v58  ;;  %440 = vmatprep.subr.mxu0 %v1388_v0  ;;  %v263_v58 = vld [vmem:[%s2637_s1 + $0x218] sm:$0xff] }
  0x3c   :  { %635 = vmatprep.subr.mxu1 %v1388_v0  ;;  %441 = vmatpush2.msra.mxu0 %v214_v59  ;;  %v92_v59 = vld [vmem:[%s2638_s0 + $0x270] sm:$0xff] }
  0x3d   :  { %636 = vmatpush2.msra.mxu1 %v246_v60  ;;  %442 = vmatprep.subr.mxu0 %v1388_v0  ;;  %v94_v60 = vld [vmem:[%s2638_s0 + $0x280] sm:$0xff] }
  0x3e   :  { %637 = vmatprep.subr.mxu1 %v1388_v0  ;;  %443 = vmatpush2.msra.mxu0 %v213_v61  ;;  %v91_v61 = vld [vmem:[%s2638_s0 + $0x268] sm:$0xff] }
  0x3f   :  { %638 = vmatpush2.msra.mxu1 %v245_v62  ;;  %444 = vmatprep.subr.mxu0 %v1388_v0  ;;  %v93_v62 = vld [vmem:[%s2638_s0 + $0x278] sm:$0xff] }
  0x40   :  { %639 = vmatprep.subr.mxu1 %v1388_v0  ;;  %445 = vmatpush2.msra.mxu0 %v212_v63  ;;  %v262_v63 = vld [vmem:[%s2637_s1 + $0x210] sm:$0xff] }
  0x41   :  { %446 = vmatprep.mubr.f32.mxu0 %v15_v1  ;;  %640 = vmatpush2.msra.mxu1 %v244_v2  ;;  %v99_v1 = vld [vmem:[%s2638_s0 + $0x2a8] sm:$0xff]  ;;  %v101_v2 = vld [vmem:[%s2638_s0 + $0x2b8] sm:$0xff] }
  0x42   :  { %641 = vmatprep.mubr.f32.mxu1 %v17_v3  ;;  %447 = vmatmul.mubr.f32.vlgmr.msra.gmra.mxu0 %v14_v4  ;;  %v261_v3 = vld [vmem:[%s2637_s1 + $0x208] sm:$0xff]  ;;  %v100_v4 = vld [vmem:[%s2638_s0 + $0x2b0] sm:$0xff] }
  0x43   :  { %642 = vmatmul.mubr.f32.vlgmr.msra.gmra.mxu1 %v16_v5  ;;  %772 = vmatprep.subr.mxu0 %v1388_v0  ;;  %v98_v5 = vld [vmem:[%s2638_s0 + $0x2a0] sm:$0xff] }
  0x44   :  { %451 = vmatprep.mubr.f32.mxu0 %v22_v6  ;;  %773 = vmatpush1.msra.mxu0 %v275_v7  ;;  %v260_v6 = vld [vmem:[%s2637_s1 + $0x200] sm:$0xff] }
  0x45   :  { %646 = vmatprep.mubr.f32.mxu1 %v24_v8  ;;  %1323 = vmatprep.subr.mxu1 %v1388_v0  ;;  %v108_v8 = vld [vmem:[%s2638_s0 + $0x2f0] sm:$0xff] }
  0x46   :  { %774 = vmatprep.subr.mxu0 %v1388_v0  ;;  %452 = vmatmul.mubr.f32.gmra.mxu0 %v21_v9  ;;  %v105_v9 = vld [vmem:[%s2638_s0 + $0x2d8] sm:$0xff] }
  0x47   :  { %647 = vmatmul.mubr.f32.gmra.mxu1 %v23_v10  ;;  %775 = vmatpush1.msra.mxu0 %v274_v11  ;;  %v107_v10 = vld [vmem:[%s2638_s0 + $0x2e8] sm:$0xff] }
  0x48   :  { %1355 = vmatpush1.msra.mxu1 %v275_v7  ;;  %456 = vmatprep.mubr.f32.mxu0 %v29_v12  ;;  %v106_v7 = vld [vmem:[%s2638_s0 + $0x2e0] sm:$0xff]  ;;  %v113_v12 = vld [vmem:[%s2638_s0 + $0x318] sm:$0xff] }
  0x49   :  { %651 = vmatprep.mubr.f32.mxu1 %v31_v13  ;;  %776 = vmatprep.subr.mxu0 %v1388_v0  ;;  %v115_v13 = vld [vmem:[%s2638_s0 + $0x328] sm:$0xff] }
  0x4a   :  { %1324 = vmatprep.subr.mxu1 %v1388_v0  ;;  %457 = vmatmul.mubr.f32.gmra.mxu0 %v28_v14  ;;  %v112_v14 = vld [vmem:[%s2638_s0 + $0x310] sm:$0xff] }
  0x4b   :  { %652 = vmatmul.mubr.f32.gmra.mxu1 %v30_v15  ;;  %777 = vmatpush1.msra.mxu0 %v273_v16  ;;  %v114_v15 = vld [vmem:[%s2638_s0 + $0x320] sm:$0xff] }
  0x4c   :  { %1356 = vmatpush1.msra.mxu1 %v274_v11  ;;  %778 = vmatprep.subr.mxu0 %v1388_v0  ;;  %v291_v11 = vld [vmem:[%s2637_s1 + $0x2f8] sm:$0xff] }
  0x4d   :  { %461 = vmatprep.mubr.f32.mxu0 %v36_v17  ;;  %656 = vmatprep.mubr.f32.mxu1 %v38_v18  ;;  %v120_v17 = vld [vmem:[%s2638_s0 + $0x350] sm:$0xff]  ;;  %v122_v18 = vld [vmem:[%s2638_s0 + $0x360] sm:$0xff] }
  0x4e   :  { %1325 = vmatprep.subr.mxu1 %v1388_v0  ;;  %779 = vmatpush1.msra.mxu0 %v272_v19 }
  0x4f   :  { %657 = vmatmul.mubr.f32.gmra.mxu1 %v37_v20  ;;  %462 = vmatmul.mubr.f32.gmra.mxu0 %v35_v21  ;;  %v121_v20 = vld [vmem:[%s2638_s0 + $0x358] sm:$0xff]  ;;  %v289_v21 = vld [vmem:[%s2637_s1 + $0x2e8] sm:$0xff] }
  0x50   :  { %1357 = vmatpush1.msra.mxu1 %v273_v16  ;;  %780 = vmatprep.subr.mxu0 %v1388_v0  ;;  %v290_v16 = vld [vmem:[%s2637_s1 + $0x2f0] sm:$0xff] }
  0x51   :  { %1326 = vmatprep.subr.mxu1 %v1388_v0  ;;  %781 = vmatpush1.msra.mxu0 %v271_v22 }
  0x52   :  { %466 = vmatprep.mubr.f32.mxu0 %v43_v23  ;;  %661 = vmatprep.mubr.f32.mxu1 %v45_v24  ;;  %v129_v23 = vld [vmem:[%s2638_s0 + $0x398] sm:$0xff]  ;;  %v288_v24 = vld [vmem:[%s2637_s1 + $0x2e0] sm:$0xff] }
  0x53   :  { %1358 = vmatpush1.msra.mxu1 %v272_v19  ;;  %467 = vmatmul.mubr.f32.gmra.mxu0 %v42_v25  ;;  %v119_v19 = vld [vmem:[%s2638_s0 + $0x348] sm:$0xff]  ;;  %v128_v25 = vld [vmem:[%s2638_s0 + $0x390] sm:$0xff] }
  0x54   :  { %662 = vmatmul.mubr.f32.gmra.mxu1 %v44_v26  ;;  %1327 = vmatprep.subr.mxu1 %v1388_v0  ;;  %v126_v26 = vld [vmem:[%s2638_s0 + $0x380] sm:$0xff] }
  0x55   :  { %782 = vmatprep.subr.mxu0 %v1388_v0  ;;  %1359 = vmatpush1.msra.mxu1 %v271_v22  ;;  %v127_v22 = vld [vmem:[%s2638_s0 + $0x388] sm:$0xff] }
  0x56   :  { %783 = vmatpush1.msra.mxu0 %v270_v27  ;;  %471 = vmatprep.mubr.f32.mxu0 %v50_v28  ;;  %v134_v28 = vld [vmem:[%s2638_s0 + $0x3c0] sm:$0xff] }
  0x57   :  { %666 = vmatprep.mubr.f32.mxu1 %v52_v29  ;;  %472 = vmatmul.mubr.f32.gmra.mxu0 %v49_v30  ;;  %v136_v29 = vld [vmem:[%s2638_s0 + $0x3d0] sm:$0xff]  ;;  %v133_v30 = vld [vmem:[%s2638_s0 + $0x3b8] sm:$0xff] }
  0x58   :  { %667 = vmatmul.mubr.f32.gmra.mxu1 %v51_v31  ;;  %784 = vmatprep.subr.mxu0 %v1388_v0  ;;  %v135_v31 = vld [vmem:[%s2638_s0 + $0x3c8] sm:$0xff] }
  0x59   :  { %1328 = vmatprep.subr.mxu1 %v1388_v0  ;;  %785 = vmatpush1.msra.mxu0 %v269_v32 }
  0x5a   :  { %1360 = vmatpush1.msra.mxu1 %v270_v27  ;;  %476 = vmatprep.mubr.f32.mxu0 %v57_v33  ;;  %v287_v27 = vld [vmem:[%s2637_s1 + $0x2d8] sm:$0xff] }
  0x5b   :  { %671 = vmatprep.mubr.f32.mxu1 %v59_v34  ;;  %786 = vmatprep.subr.mxu0 %v1388_v0  ;;  %v141_v33 = vld [vmem:[%s2638_s0 + $0x3f8] sm:$0xff]  ;;  %v143_v34 = vld [vmem:[%s2638_s0 + $0x408] sm:$0xff] }
  0x5c   :  { %477 = vmatmul.mubr.f32.gmra.mxu0 %v56_v35  ;;  %672 = vmatmul.mubr.f32.gmra.mxu1 %v58_v36  ;;  %v140_v35 = vld [vmem:[%s2638_s0 + $0x3f0] sm:$0xff]  ;;  %v142_v36 = vld [vmem:[%s2638_s0 + $0x400] sm:$0xff] }
  0x5d   :  { %1329 = vmatprep.subr.mxu1 %v1388_v0  ;;  %787 = vmatpush1.msra.mxu0 %v268_v37 }
  0x5e   :  { %1361 = vmatpush1.msra.mxu1 %v269_v32  ;;  %788 = vmatprep.subr.mxu0 %v1388_v0  ;;  %v286_v32 = vld [vmem:[%s2637_s1 + $0x2d0] sm:$0xff] }
  0x5f   :  { %481 = vmatprep.mubr.f32.mxu0 %v64_v38  ;;  %676 = vmatprep.mubr.f32.mxu1 %v66_v39  ;;  %v148_v38 = vld [vmem:[%s2638_s0 + $0x430] sm:$0xff]  ;;  %v150_v39 = vld [vmem:[%s2638_s0 + $0x440] sm:$0xff] }
  0x60   :  { %1330 = vmatprep.subr.mxu1 %v1388_v0  ;;  %789 = vmatpush1.msra.mxu0 %v267_v40 }
  0x61   :  { %677 = vmatmul.mubr.f32.gmra.mxu1 %v65_v41  ;;  %482 = vmatmul.mubr.f32.gmra.mxu0 %v63_v42  ;;  %v149_v41 = vld [vmem:[%s2638_s0 + $0x438] sm:$0xff]  ;;  %v284_v42 = vld [vmem:[%s2637_s1 + $0x2c0] sm:$0xff] }
  0x62   :  { %1362 = vmatpush1.msra.mxu1 %v268_v37  ;;  %790 = vmatprep.subr.mxu0 %v1388_v0  ;;  %v285_v37 = vld [vmem:[%s2637_s1 + $0x2c8] sm:$0xff] }
  0x63   :  { %1331 = vmatprep.subr.mxu1 %v1388_v0  ;;  %486 = vmatprep.mubr.f32.mxu0 %v71_v43  ;;  %v155_v43 = vld [vmem:[%s2638_s0 + $0x468] sm:$0xff] }
  0x64   :  { %681 = vmatprep.mubr.f32.mxu1 %v73_v44  ;;  %1363 = vmatpush1.msra.mxu1 %v267_v40  ;;  %v147_v40 = vld [vmem:[%s2638_s0 + $0x428] sm:$0xff]  ;;  %v157_v44 = vld [vmem:[%s2638_s0 + $0x478] sm:$0xff] }
  0x65   :  { %791 = vmatpush1.msra.mxu0 %v266_v45  ;;  %682 = vmatmul.mubr.f32.gmra.mxu1 %v72_v47  ;;  %v154_v47 = vld [vmem:[%s2638_s0 + $0x460] sm:$0xff] }
  0x66   :  { %487 = vmatmul.mubr.f32.gmra.mxu0 %v70_v46  ;;  %792 = vmatprep.subr.mxu0 %v1388_v0  ;;  %v156_v46 = vld [vmem:[%s2638_s0 + $0x470] sm:$0xff] }
  0x67   :  { %1332 = vmatprep.subr.mxu1 %v1388_v0  ;;  %793 = vmatpush1.msra.mxu0 %v265_v48 }
  0x68   :  { %491 = vmatprep.mubr.f32.mxu0 %v78_v49  ;;  %686 = vmatprep.mubr.f32.mxu1 %v80_v50  ;;  %v164_v49 = vld [vmem:[%s2638_s0 + $0x4b0] sm:$0xff] }
  0x69   :  { %1364 = vmatpush1.msra.mxu1 %v266_v45  ;;  %794 = vmatprep.subr.mxu0 %v1388_v0  ;;  %v283_v45 = vld [vmem:[%s2637_s1 + $0x2b8] sm:$0xff]  ;;  %v282_v50 = vld [vmem:[%s2637_s1 + $0x2b0] sm:$0xff] }
  0x6a   :  { %492 = vmatmul.mubr.f32.gmra.mxu0 %v77_v51  ;;  %687 = vmatmul.mubr.f32.gmra.mxu1 %v79_v52  ;;  %v161_v51 = vld [vmem:[%s2638_s0 + $0x498] sm:$0xff]  ;;  %v163_v52 = vld [vmem:[%s2638_s0 + $0x4a8] sm:$0xff] }
  0x6b   :  { %1333 = vmatprep.subr.mxu1 %v1388_v0  ;;  %795 = vmatpush1.msra.mxu0 %v264_v53 }
  0x6c   :  { %1365 = vmatpush1.msra.mxu1 %v265_v48  ;;  %496 = vmatprep.mubr.f32.mxu0 %v85_v54  ;;  %v162_v48 = vld [vmem:[%s2638_s0 + $0x4a0] sm:$0xff]  ;;  %v169_v54 = vld [vmem:[%s2638_s0 + $0x4d8] sm:$0xff] }
  0x6d   :  { %691 = vmatprep.mubr.f32.mxu1 %v87_v55  ;;  %796 = vmatprep.subr.mxu0 %v1388_v0  ;;  %v171_v55 = vld [vmem:[%s2638_s0 + $0x4e8] sm:$0xff] }
  0x6e   :  { %497 = vmatmul.mubr.f32.gmra.mxu0 %v84_v56  ;;  %692 = vmatmul.mubr.f32.gmra.mxu1 %v86_v57  ;;  %v168_v56 = vld [vmem:[%s2638_s0 + $0x4d0] sm:$0xff]  ;;  %v170_v57 = vld [vmem:[%s2638_s0 + $0x4e0] sm:$0xff] }
  0x6f   :  { %1334 = vmatprep.subr.mxu1 %v1388_v0  ;;  %797 = vmatpush1.msra.mxu0 %v263_v58 }
  0x70   :  { %1366 = vmatpush1.msra.mxu1 %v264_v53  ;;  %501 = vmatprep.mubr.f32.mxu0 %v92_v59  ;;  %v281_v53 = vld [vmem:[%s2637_s1 + $0x2a8] sm:$0xff]  ;;  %v176_v59 = vld [vmem:[%s2638_s0 + $0x510] sm:$0xff] }
  0x71   :  { %696 = vmatprep.mubr.f32.mxu1 %v94_v60  ;;  %1335 = vmatprep.subr.mxu1 %v1388_v0  ;;  %v178_v60 = vld [vmem:[%s2638_s0 + $0x520] sm:$0xff] }
  0x72   :  { %798 = vmatprep.subr.mxu0 %v1388_v0  ;;  %502 = vmatmul.mubr.f32.gmra.mxu0 %v91_v61  ;;  %v175_v61 = vld [vmem:[%s2638_s0 + $0x508] sm:$0xff] }
  0x73   :  { %697 = vmatmul.mubr.f32.gmra.mxu1 %v93_v62  ;;  %799 = vmatpush1.msra.mxu0 %v262_v63  ;;  %v177_v62 = vld [vmem:[%s2638_s0 + $0x518] sm:$0xff] }
  0x74   :  { %1367 = vmatpush1.msra.mxu1 %v263_v58  ;;  %800 = vmatprep.subr.mxu0 %v1388_v0  ;;  %v280_v58 = vld [vmem:[%s2637_s1 + $0x2a0] sm:$0xff] }
  0x75   :  { %506 = vmatprep.mubr.f32.mxu0 %v99_v1  ;;  %701 = vmatprep.mubr.f32.mxu1 %v101_v2  ;;  %v183_v1 = vld [vmem:[%s2638_s0 + $0x548] sm:$0xff]  ;;  %v185_v2 = vld [vmem:[%s2638_s0 + $0x558] sm:$0xff] }
  0x76   :  { %1336 = vmatprep.subr.mxu1 %v1388_v0  ;;  %801 = vmatpush1.msra.mxu0 %v261_v3 }
  0x77   :  { %702 = vmatmul.mubr.f32.gmra.mxu1 %v100_v4  ;;  %507 = vmatmul.mubr.f32.gmra.mxu0 %v98_v5  ;;  %v184_v4 = vld [vmem:[%s2638_s0 + $0x550] sm:$0xff] }
  0x78   :  { %1368 = vmatpush1.msra.mxu1 %v262_v63  ;;  %802 = vmatprep.subr.mxu0 %v1388_v0  ;;  %v279_v63 = vld [vmem:[%s2637_s1 + $0x298] sm:$0xff]  ;;  %v278_v5 = vld [vmem:[%s2637_s1 + $0x290] sm:$0xff] }
  0x79   :  { %1337 = vmatprep.subr.mxu1 %v1388_v0  ;;  %803 = vmatpush1.msra.mxu0 %v260_v6 }
  0x7a   :  { %511 = vmatprep.mubr.f32.mxu0 %v106_v7  ;;  %706 = vmatprep.mubr.f32.mxu1 %v108_v8  ;;  %v192_v7 = vld [vmem:[%s2638_s0 + $0x590] sm:$0xff]  ;;  %v277_v8 = vld [vmem:[%s2637_s1 + $0x288] sm:$0xff] }
  0x7b   :  { %1369 = vmatpush1.msra.mxu1 %v261_v3  ;;  %512 = vmatmul.mubr.f32.gmra.mxu0 %v105_v9  ;;  %v182_v3 = vld [vmem:[%s2638_s0 + $0x540] sm:$0xff]  ;;  %v189_v9 = vld [vmem:[%s2638_s0 + $0x578] sm:$0xff] }
  0x7c   :  { %707 = vmatmul.mubr.f32.gmra.mxu1 %v107_v10  ;;  %804 = vmatprep.subr.mxu0 %v1388_v0  ;;  %v191_v10 = vld [vmem:[%s2638_s0 + $0x588] sm:$0xff] }
  0x7d   :  { %1338 = vmatprep.subr.mxu1 %v1388_v0  ;;  %805 = vmatpush2.msra.mxu0 %v291_v11 }
  0x7e   :  { %1370 = vmatpush1.msra.mxu1 %v260_v6  ;;  %516 = vmatprep.mubr.f32.mxu0 %v113_v12  ;;  %v190_v6 = vld [vmem:[%s2638_s0 + $0x580] sm:$0xff]  ;;  %v19_v12 = vld [vmem:[%s2638_s0 + $0x28] sm:$0xff] }
  0x7f   :  { %711 = vmatprep.mubr.f32.mxu1 %v115_v13  ;;  %517 = vmatmul.mubr.f32.gmra.mxu0 %v112_v14  ;;  %v159_v13 = vld [vmem:[%s2638_s0 + $0x488] sm:$0xff]  ;;  %v18_v14 = vld [vmem:[%s2638_s0 + $0x20] sm:$0xff] }
  0x80   :  { %712 = vmatmul.mubr.f32.gmra.mxu1 %v114_v15  ;;  %1339 = vmatprep.subr.mxu1 %v1388_v0  ;;  %v158_v15 = vld [vmem:[%s2638_s0 + $0x480] sm:$0xff] }
  0x81   :  { %806 = vmatprep.subr.mxu0 %v1388_v0  ;;  %1371 = vmatpush2.msra.mxu1 %v291_v11  ;;  %v276_v11 = vld [vmem:[%s2637_s1 + $0x280] sm:$0xff] }
  0x82   :  { %807 = vmatpush2.msra.mxu0 %v290_v16  ;;  %521 = vmatprep.mubr.f32.mxu0 %v120_v17  ;;  %v166_v17 = vld [vmem:[%s2638_s0 + $0x4c0] sm:$0xff] }
  0x83   :  { %716 = vmatprep.mubr.f32.mxu1 %v122_v18  ;;  %808 = vmatprep.subr.mxu0 %v1388_v0  ;;  %v295_v18 = vld [vmem:[%s2637_s1 + $0x318] sm:$0xff] }
  0x84   :  { %522 = vmatmul.mubr.f32.gmra.mxu0 %v119_v19  ;;  %717 = vmatmul.mubr.f32.gmra.mxu1 %v121_v20  ;;  %v165_v19 = vld [vmem:[%s2638_s0 + $0x4b8] sm:$0xff] }
  0x85   :  { %1340 = vmatprep.subr.mxu1 %v1388_v0  ;;  %809 = vmatpush2.msra.mxu0 %v289_v21  ;;  %v33_v20 = vld [vmem:[%s2638_s0 + $0x98] sm:$0xff] }
  0x86   :  { %1372 = vmatpush2.msra.mxu1 %v290_v16  ;;  %810 = vmatprep.subr.mxu0 %v1388_v0  ;;  %v26_v16 = vld [vmem:[%s2638_s0 + $0x60] sm:$0xff] }
  0x87   :  { %526 = vmatprep.mubr.f32.mxu0 %v127_v22  ;;  %721 = vmatprep.mubr.f32.mxu1 %v129_v23  ;;  %v294_v22 = vld [vmem:[%s2637_s1 + $0x310] sm:$0xff] }
  0x88   :  { %1341 = vmatprep.subr.mxu1 %v1388_v0  ;;  %811 = vmatpush2.msra.mxu0 %v288_v24  ;;  %v32_v23 = vld [vmem:[%s2638_s0 + $0x90] sm:$0xff] }
  0x89   :  { %722 = vmatmul.mubr.f32.gmra.mxu1 %v128_v25  ;;  %527 = vmatmul.mubr.f32.gmra.mxu0 %v126_v26  ;;  %v40_v25 = vld [vmem:[%s2638_s0 + $0xd0] sm:$0xff] }
  0x8a   :  { %1373 = vmatpush2.msra.mxu1 %v289_v21  ;;  %812 = vmatprep.subr.mxu0 %v1388_v0  ;;  %v173_v21 = vld [vmem:[%s2638_s0 + $0x4f8] sm:$0xff]  ;;  %v180_v26 = vld [vmem:[%s2638_s0 + $0x530] sm:$0xff] }
  0x8b   :  { %1342 = vmatprep.subr.mxu1 %v1388_v0  ;;  %813 = vmatpush2.msra.mxu0 %v287_v27 }
  0x8c   :  { %531 = vmatprep.mubr.f32.mxu0 %v134_v28  ;;  %726 = vmatprep.mubr.f32.mxu1 %v136_v29  ;;  %v39_v28 = vld [vmem:[%s2638_s0 + $0xc8] sm:$0xff] }
  0x8d   :  { %1374 = vmatpush2.msra.mxu1 %v288_v24  ;;  %532 = vmatmul.mubr.f32.gmra.mxu0 %v133_v30  ;;  %v172_v24 = vld [vmem:[%s2638_s0 + $0x4f0] sm:$0xff]  ;;  %v179_v29 = vld [vmem:[%s2638_s0 + $0x528] sm:$0xff] }
  0x8e   :  { %727 = vmatmul.mubr.f32.gmra.mxu1 %v135_v31  ;;  %1343 = vmatprep.subr.mxu1 %v1388_v0  ;;  %v47_v30 = vld [vmem:[%s2638_s0 + $0x108] sm:$0xff] }
  0x8f   :  { %814 = vmatprep.subr.mxu0 %v1388_v0  ;;  %1375 = vmatpush2.msra.mxu1 %v287_v27  ;;  %v293_v27 = vld [vmem:[%s2637_s1 + $0x308] sm:$0xff] }
  0x90   :  { %815 = vmatpush2.msra.mxu0 %v286_v32  ;;  %536 = vmatprep.mubr.f32.mxu0 %v141_v33  ;;  %v187_v31 = vld [vmem:[%s2638_s0 + $0x568] sm:$0xff]  ;;  %v46_v33 = vld [vmem:[%s2638_s0 + $0x100] sm:$0xff] }
  0x91   :  { %731 = vmatprep.mubr.f32.mxu1 %v143_v34  ;;  %537 = vmatmul.mubr.f32.gmra.mxu0 %v140_v35  ;;  %v186_v34 = vld [vmem:[%s2638_s0 + $0x560] sm:$0xff] }
  0x92   :  { %732 = vmatmul.mubr.f32.gmra.mxu1 %v142_v36  ;;  %816 = vmatprep.subr.mxu0 %v1388_v0  ;;  %v54_v35 = vld [vmem:[%s2638_s0 + $0x140] sm:$0xff] }
  0x93   :  { %1344 = vmatprep.subr.mxu1 %v1388_v0  ;;  %817 = vmatpush2.msra.mxu0 %v285_v37  ;;  %v194_v36 = vld [vmem:[%s2638_s0 + $0x5a0] sm:$0xff] }
  0x94   :  { %1376 = vmatpush2.msra.mxu1 %v286_v32  ;;  %541 = vmatprep.mubr.f32.mxu0 %v148_v38  ;;  %v292_v32 = vld [vmem:[%s2637_s1 + $0x300] sm:$0xff]  ;;  %v193_v38 = vld [vmem:[%s2638_s0 + $0x598] sm:$0xff] }
  0x95   :  { %736 = vmatprep.mubr.f32.mxu1 %v150_v39  ;;  %818 = vmatprep.subr.mxu0 %v1388_v0  ;;  %v61_v39 = vld [vmem:[%s2638_s0 + $0x178] sm:$0xff] }
  0x96   :  { %542 = vmatmul.mubr.f32.gmra.mxu0 %v147_v40  ;;  %737 = vmatmul.mubr.f32.gmra.mxu1 %v149_v41  ;;  %v20_v40 = vld [vmem:[%s2638_s0 + $0x30] sm:$0xff] }
  0x97   :  { %1345 = vmatprep.subr.mxu1 %v1388_v0  ;;  %819 = vmatpush2.msra.mxu0 %v284_v42  ;;  %v60_v41 = vld [vmem:[%s2638_s0 + $0x170] sm:$0xff] }
  0x98   :  { %1377 = vmatpush2.msra.mxu1 %v285_v37  ;;  %820 = vmatprep.subr.mxu0 %v1388_v0  ;;  %v53_v37 = vld [vmem:[%s2638_s0 + $0x138] sm:$0xff] }
  0x99   :  { %546 = vmatprep.mubr.f32.mxu0 %v155_v43  ;;  %741 = vmatprep.mubr.f32.mxu1 %v157_v44  ;;  %v68_v43 = vld [vmem:[%s2638_s0 + $0x1b0] sm:$0xff]  ;;  %v34_v44 = vld [vmem:[%s2638_s0 + $0xa0] sm:$0xff] }
  0x9a   :  { %1346 = vmatprep.subr.mxu1 %v1388_v0  ;;  %821 = vmatpush2.msra.mxu0 %v283_v45 }
  0x9b   :  { %742 = vmatmul.mubr.f32.gmra.mxu1 %v156_v46  ;;  %547 = vmatmul.mubr.f32.gmra.mxu0 %v154_v47  ;;  %v41_v46 = vld [vmem:[%s2638_s0 + $0xd8] sm:$0xff]  ;;  %v75_v47 = vld [vmem:[%s2638_s0 + $0x1e8] sm:$0xff] }
  0x9c   :  { %1378 = vmatpush2.msra.mxu1 %v284_v42  ;;  %822 = vmatprep.subr.mxu0 %v1388_v0  ;;  %v27_v42 = vld [vmem:[%s2638_s0 + $0x68] sm:$0xff] }
  0x9d   :  { %1347 = vmatprep.subr.mxu1 %v1388_v0  ;;  %551 = vmatprep.mubr.f32.mxu0 %v162_v48  ;;  %v48_v48 = vld [vmem:[%s2638_s0 + $0x110] sm:$0xff] }
  0x9e   :  { %746 = vmatprep.mubr.f32.mxu1 %v164_v49  ;;  %1379 = vmatpush2.msra.mxu1 %v283_v45  ;;  %v67_v45 = vld [vmem:[%s2638_s0 + $0x1a8] sm:$0xff]  ;;  %v74_v49 = vld [vmem:[%s2638_s0 + $0x1e0] sm:$0xff] }
  0x9f   :  { %823 = vmatpush2.msra.mxu0 %v282_v50  ;;  %747 = vmatmul.mubr.f32.gmra.mxu1 %v163_v52  ;;  %v62_v52 = vld [vmem:[%s2638_s0 + $0x180] sm:$0xff] }
  0xa0   :  { %552 = vmatmul.mubr.f32.gmra.mxu0 %v161_v51  ;;  %824 = vmatprep.subr.mxu0 %v1388_v0  ;;  %v82_v51 = vld [vmem:[%s2638_s0 + $0x220] sm:$0xff] }
  0xa1   :  { %1348 = vmatprep.subr.mxu1 %v1388_v0  ;;  %825 = vmatpush2.msra.mxu0 %v281_v53 }
  0xa2   :  { %556 = vmatprep.mubr.f32.mxu0 %v169_v54  ;;  %751 = vmatprep.mubr.f32.mxu1 %v171_v55  ;;  %v69_v54 = vld [vmem:[%s2638_s0 + $0x1b8] sm:$0xff] }
  0xa3   :  { %1380 = vmatpush2.msra.mxu1 %v282_v50  ;;  %826 = vmatprep.subr.mxu0 %v1388_v0  ;;  %v55_v50 = vld [vmem:[%s2638_s0 + $0x148] sm:$0xff]  ;;  %v89_v55 = vld [vmem:[%s2638_s0 + $0x258] sm:$0xff] }
  0xa4   :  { %557 = vmatmul.mubr.f32.gmra.mxu0 %v168_v56  ;;  %752 = vmatmul.mubr.f32.gmra.mxu1 %v170_v57  ;;  %v76_v56 = vld [vmem:[%s2638_s0 + $0x1f0] sm:$0xff] }
  0xa5   :  { %1349 = vmatprep.subr.mxu1 %v1388_v0  ;;  %827 = vmatpush2.msra.mxu0 %v280_v58  ;;  %v88_v57 = vld [vmem:[%s2638_s0 + $0x250] sm:$0xff] }
  0xa6   :  { %1381 = vmatpush2.msra.mxu1 %v281_v53  ;;  %561 = vmatprep.mubr.f32.mxu0 %v176_v59  ;;  %v81_v53 = vld [vmem:[%s2638_s0 + $0x218] sm:$0xff]  ;;  %v96_v59 = vld [vmem:[%s2638_s0 + $0x290] sm:$0xff] }
  0xa7   :  { %756 = vmatprep.mubr.f32.mxu1 %v178_v60  ;;  %828 = vmatprep.subr.mxu0 %v1388_v0  ;;  %v90_v60 = vld [vmem:[%s2638_s0 + $0x260] sm:$0xff] }
  0xa8   :  { %562 = vmatmul.mubr.f32.gmra.mxu0 %v175_v61  ;;  %757 = vmatmul.mubr.f32.gmra.mxu1 %v177_v62  ;;  %v95_v61 = vld [vmem:[%s2638_s0 + $0x288] sm:$0xff]  ;;  %v97_v62 = vld [vmem:[%s2638_s0 + $0x298] sm:$0xff] }
  0xa9   :  { %1350 = vmatprep.subr.mxu1 %v1388_v0  ;;  %829 = vmatpush2.msra.mxu0 %v279_v63 }
  0xaa   :  { %1382 = vmatpush2.msra.mxu1 %v280_v58  ;;  %566 = vmatprep.mubr.f32.mxu0 %v183_v1  ;;  %v83_v58 = vld [vmem:[%s2638_s0 + $0x228] sm:$0xff]  ;;  %v104_v1 = vld [vmem:[%s2638_s0 + $0x2d0] sm:$0xff] }
  0xab   :  { %761 = vmatprep.mubr.f32.mxu1 %v185_v2  ;;  %1351 = vmatprep.subr.mxu1 %v1388_v0  ;;  %v102_v2 = vld [vmem:[%s2638_s0 + $0x2c0] sm:$0xff] }
  0xac   :  { %830 = vmatprep.subr.mxu0 %v1388_v0  ;;  %567 = vmatmul.mubr.f32.gmra.mxu0 %v182_v3  ;;  %v111_v3 = vld [vmem:[%s2638_s0 + $0x308] sm:$0xff] }
  0xad   :  { %762 = vmatmul.mubr.f32.gmra.mxu1 %v184_v4  ;;  %831 = vmatpush2.msra.mxu0 %v278_v5  ;;  %v110_v4 = vld [vmem:[%s2638_s0 + $0x300] sm:$0xff] }
  0xae   :  { %1383 = vmatpush2.msra.mxu1 %v279_v63  ;;  %832 = vmatprep.subr.mxu0 %v1388_v0  ;;  %v103_v63 = vld [vmem:[%s2638_s0 + $0x2c8] sm:$0xff] }
  0xaf   :  { %1352 = vmatprep.subr.mxu1 %v1388_v0  ;;  %571 = vmatprep.mubr.f32.mxu0 %v190_v6  ;;  %v109_v6 = vld [vmem:[%s2638_s0 + $0x2f8] sm:$0xff] }
  0xb0   :  { %766 = vmatprep.mubr.f32.mxu1 %v192_v7  ;;  %1384 = vmatpush2.msra.mxu1 %v278_v5  ;;  %v118_v5 = vld [vmem:[%s2638_s0 + $0x340] sm:$0xff]  ;;  %v125_v7 = vld [vmem:[%s2638_s0 + $0x378] sm:$0xff] }
  0xb1   :  { %833 = vmatpush2.msra.mxu0 %v277_v8  ;;  %767 = vmatmul.mubr.f32.gmra.mxu1 %v191_v10  ;;  %v116_v10 = vld [vmem:[%s2638_s0 + $0x330] sm:$0xff] }
  0xb2   :  { %572 = vmatmul.mubr.f32.gmra.mxu0 %v189_v9  ;;  %1353 = vmatprep.subr.mxu1 %v1388_v0  ;;  %v132_v9 = vld [vmem:[%s2638_s0 + $0x3b0] sm:$0xff] }
  0xb3   :  { %834 = vmatprep.subr.mxu0 %v1388_v0  ;;  %1385 = vmatpush2.msra.mxu1 %v277_v8  ;;  %v117_v8 = vld [vmem:[%s2638_s0 + $0x338] sm:$0xff] }
  0xb4   :  { %835 = vmatpush2.msra.mxu0 %v276_v11  ;;  %1354 = vmatprep.subr.mxu1 %v1388_v0  ;;  %v25_v0 = vld [vmem:[%s2638_s0 + $0x58] sm:$0xff] }
  0xb5   :  { %836 = vmatprep.mubr.f32.mxu0 %v19_v12  ;;  %1386 = vmatpush2.msra.mxu1 %v276_v11  ;;  %v139_v11 = vld [vmem:[%s2638_s0 + $0x3e8] sm:$0xff]  ;;  %v124_v12 = vld [vmem:[%s2638_s0 + $0x370] sm:$0xff] }
  0xb6   :  { %936 = vmatprep.mubr.f32.mxu1 %v159_v13  ;;  %837 = vmatmul.mubr.f32.vlgmr.msra.gmra.mxu0 %v18_v14  ;;  %v146_v13 = vld [vmem:[%s2638_s0 + $0x420] sm:$0xff]  ;;  %v123_v14 = vld [vmem:[%s2638_s0 + $0x368] sm:$0xff] }
  0xb7   :  { %937 = vmatmul.mubr.f32.vlgmr.msra.gmra.mxu1 %v158_v15  ;;  %841 = vmatprep.mubr.f32.mxu0 %v26_v16  ;;  %v153_v15 = vld [vmem:[%s2638_s0 + $0x458] sm:$0xff]  ;;  %v131_v16 = vld [vmem:[%s2638_s0 + $0x3a8] sm:$0xff] }
  0xb8   :  { %941 = vmatprep.mubr.f32.mxu1 %v166_v17  ;;  %1276 = vmatprep.subr.mxu1 %v295_v18  ;;  %v160_v17 = vld [vmem:[%s2638_s0 + $0x490] sm:$0xff] }
  0xb9   :  { %1277 = vmatpush3.msra.mxu1 %v295_v18  ;;  %v130_v18 = vld [vmem:[%s2638_s0 + $0x3a0] sm:$0xff] }
  0xba   :  { %842 = vmatmul.mubr.f32.gmra.mxu0 %v25_v0  ;;  %1278 = vmatprep.subr.mxu1 %v294_v22  ;;  %v167_v0 = vld [vmem:[%s2638_s0 + $0x4c8] sm:$0xff] }
  0xbb   :  { %942 = vmatmul.mubr.f32.gmra.mxu1 %v165_v19  ;;  %846 = vmatprep.mubr.f32.mxu0 %v33_v20  ;;  %v138_v19 = vld [vmem:[%s2638_s0 + $0x3e0] sm:$0xff] }
  0xbc   :  { %946 = vmatprep.mubr.f32.mxu1 %v173_v21  ;;  %1279 = vmatpush3.msra.mxu1 %v294_v22  ;;  %v174_v20 = vld [vmem:[%s2638_s0 + $0x500] sm:$0xff]  ;;  %v137_v21 = vld [vmem:[%s2638_s0 + $0x3d8] sm:$0xff] }
  0xbd   :  { %1280 = vmatprep.subr.mxu1 %v293_v27  ;;  %v181_v22 = vld [vmem:[%s2638_s0 + $0x538] sm:$0xff] }
  0xbe   :  { %847 = vmatmul.mubr.f32.gmra.mxu0 %v32_v23  ;;  %1281 = vmatpush3.msra.mxu1 %v293_v27  ;;  %v145_v23 = vld [vmem:[%s2638_s0 + $0x418] sm:$0xff]  ;;  %v152_v27 = vld [vmem:[%s2638_s0 + $0x450] sm:$0xff] }
  0xbf   :  { %947 = vmatmul.mubr.f32.gmra.mxu1 %v172_v24  ;;  %851 = vmatprep.mubr.f32.mxu0 %v40_v25  ;;  %v188_v24 = vld [vmem:[%s2638_s0 + $0x570] sm:$0xff] }
  0xc0   :  { %951 = vmatprep.mubr.f32.mxu1 %v180_v26  ;;  %1282 = vmatprep.subr.mxu1 %v292_v32  ;;  %v144_v25 = vld [vmem:[%s2638_s0 + $0x410] sm:$0xff]  ;;  %v195_v26 = vld [vmem:[%s2638_s0 + $0x5a8] sm:$0xff] }
  0xc1   :  { %1283 = vmatpush3.msra.mxu1 %v292_v32 }
  0xc2   :  { %852 = vmatmul.mubr.f32.gmra.mxu0 %v39_v28  ;;  %v151_v28 = vld [vmem:[%s2638_s0 + $0x448] sm:$0xff] }
  0xc3   :  { %952 = vmatmul.mubr.f32.gmra.mxu1 %v179_v29  ;;  %856 = vmatprep.mubr.f32.mxu0 %v47_v30  ;;  %v2412_v29 = vld [vmem:[%s2639_s2] ss:$0 sm:$0xff] }
  0xc4   :  { %956 = vmatprep.mubr.f32.mxu1 %v187_v31 }
  0xc6   :  { %857 = vmatmul.mubr.f32.gmra.mxu0 %v46_v33 }
  0xc7   :  { %957 = vmatmul.mubr.f32.gmra.mxu1 %v186_v34  ;;  %861 = vmatprep.mubr.f32.mxu0 %v54_v35 }
  0xc8   :  { %961 = vmatprep.mubr.f32.mxu1 %v194_v36 }
  0xca   :  { %862 = vmatmul.mubr.f32.gmra.mxu0 %v53_v37 }
  0xcb   :  { %962 = vmatmul.mubr.f32.gmra.mxu1 %v193_v38  ;;  %866 = vmatprep.mubr.f32.mxu0 %v61_v39 }
  0xcc   :  { %1284 = vmatprep.mubr.msk.f32.mxu1 %vm303_vm0, %v20_v40 }
  0xce   :  { %867 = vmatmul.mubr.f32.gmra.mxu0 %v60_v41 }
  0xcf   :  { %1285 = vmatmul.mubr.msk.f32.vlgmr.msra.gmra.mxu1 %vm303_vm0, %v27_v42  ;;  %871 = vmatprep.mubr.f32.mxu0 %v68_v43 }
  0xd0   :  { %1287 = vmatprep.mubr.msk.f32.mxu1 %vm303_vm0, %v34_v44 }
  0xd2   :  { %872 = vmatmul.mubr.f32.gmra.mxu0 %v67_v45 }
  0xd3   :  { %1288 = vmatmul.mubr.msk.f32.gmra.mxu1 %vm303_vm0, %v41_v46  ;;  %876 = vmatprep.mubr.f32.mxu0 %v75_v47 }
  0xd4   :  { %1290 = vmatprep.mubr.msk.f32.mxu1 %vm303_vm0, %v48_v48 }
  0xd6   :  { %877 = vmatmul.mubr.f32.gmra.mxu0 %v74_v49 }
  0xd7   :  { %1291 = vmatmul.mubr.msk.f32.gmra.mxu1 %vm303_vm0, %v55_v50  ;;  %881 = vmatprep.mubr.f32.mxu0 %v82_v51 }
  0xd8   :  { %1293 = vmatprep.mubr.msk.f32.mxu1 %vm303_vm0, %v62_v52 }
  0xda   :  { %882 = vmatmul.mubr.f32.gmra.mxu0 %v81_v53 }
  0xdb   :  { %1294 = vmatmul.mubr.msk.f32.gmra.mxu1 %vm303_vm0, %v69_v54  ;;  %886 = vmatprep.mubr.f32.mxu0 %v89_v55 }
  0xdc   :  { %1296 = vmatprep.mubr.msk.f32.mxu1 %vm303_vm0, %v76_v56 }
  0xde   :  { %887 = vmatmul.mubr.f32.gmra.mxu0 %v88_v57 }
  0xdf   :  { %1297 = vmatmul.mubr.msk.f32.gmra.mxu1 %vm303_vm0, %v83_v58  ;;  %891 = vmatprep.mubr.f32.mxu0 %v96_v59 }
  0xe0   :  { %1299 = vmatprep.mubr.msk.f32.mxu1 %vm303_vm0, %v90_v60 }
  0xe2   :  { %892 = vmatmul.mubr.f32.gmra.mxu0 %v95_v61 }
  0xe3   :  { %1300 = vmatmul.mubr.msk.f32.gmra.mxu1 %vm303_vm0, %v97_v62  ;;  %896 = vmatprep.mubr.f32.mxu0 %v103_v63 }
  0xe4   :  { %1302 = vmatprep.mubr.msk.f32.mxu1 %vm303_vm0, %v104_v1 }
  0xe6   :  { %897 = vmatmul.mubr.f32.gmra.mxu0 %v102_v2 }
  0xe7   :  { %1303 = vmatmul.mubr.msk.f32.gmra.mxu1 %vm303_vm0, %v111_v3  ;;  %901 = vmatprep.mubr.f32.mxu0 %v110_v4 }
  0xe8   :  { %1305 = vmatprep.mubr.msk.f32.mxu1 %vm303_vm0, %v118_v5 }
  0xea   :  { %902 = vmatmul.mubr.f32.gmra.mxu0 %v109_v6 }
  0xeb   :  { %1306 = vmatmul.mubr.msk.f32.gmra.mxu1 %vm303_vm0, %v125_v7  ;;  %906 = vmatprep.mubr.f32.mxu0 %v117_v8 }
  0xec   :  { %1308 = vmatprep.mubr.msk.f32.mxu1 %vm303_vm0, %v132_v9 }
  0xee   :  { %907 = vmatmul.mubr.f32.gmra.mxu0 %v116_v10 }
  0xef   :  { %1309 = vmatmul.mubr.msk.f32.gmra.mxu1 %vm303_vm0, %v139_v11  ;;  %911 = vmatprep.mubr.f32.mxu0 %v124_v12 }
  0xf0   :  { %1311 = vmatprep.mubr.msk.f32.mxu1 %vm303_vm0, %v146_v13 }
  0xf2   :  { %912 = vmatmul.mubr.f32.gmra.mxu0 %v123_v14 }
  0xf3   :  { %1312 = vmatmul.mubr.msk.f32.gmra.mxu1 %vm303_vm0, %v153_v15  ;;  %916 = vmatprep.mubr.f32.mxu0 %v131_v16 }
  0xf4   :  { %1314 = vmatprep.mubr.msk.f32.mxu1 %vm303_vm0, %v160_v17 }
  0xf6   :  { %917 = vmatmul.mubr.f32.gmra.mxu0 %v130_v18 }
  0xf7   :  { %1315 = vmatmul.mubr.msk.f32.gmra.mxu1 %vm303_vm0, %v167_v0  ;;  %921 = vmatprep.mubr.f32.mxu0 %v138_v19 }
  0xf8   :  { %1317 = vmatprep.mubr.msk.f32.mxu1 %vm303_vm0, %v174_v20 }
  0xfa   :  { %922 = vmatmul.mubr.f32.gmra.mxu0 %v137_v21 }
  0xfb   :  { %1318 = vmatmul.mubr.msk.f32.gmra.mxu1 %vm303_vm0, %v181_v22  ;;  %926 = vmatprep.mubr.f32.mxu0 %v145_v23 }
  0xfc   :  { %1320 = vmatprep.mubr.msk.f32.mxu1 %vm303_vm0, %v188_v24 }
  0xfe   :  { %927 = vmatmul.mubr.f32.gmra.mxu0 %v144_v25 }
  0xff   :  { %1321 = vmatmul.mubr.msk.f32.gmra.mxu1 %vm303_vm0, %v195_v26  ;;  %931 = vmatprep.mubr.f32.mxu0 %v152_v27 }
 0x102   :  { %932 = vmatmul.mubr.f32.gmra.mxu0 %v151_v28  ;;  %v448_v30 = vpop.f32.mrf.mxu0 }
 0x103   :  { %v643_v31 = vpop.f32.mrf.mxu1  ;;  %v449_v32 = vadd.f32 %v2412_v29, %v448_v30 }
 0x104   :  { %v450_v33 = vpop.f32.mrf.mxu0 }
 0x105   :  { %v645_v34 = vpop.f32.mrf.mxu1  ;;  %v2415_v35 = vadd.f32 %v643_v31, %v449_v32 }
 0x106   :  { %v453_v36 = vpop.f32.mrf.mxu0 }
 0x107   :  { %v648_v37 = vpop.f32.mrf.mxu1  ;;  %v454_v38 = vadd.f32 %v2412_v29, %v453_v36 }
 0x108   :  { %v455_v39 = vpop.f32.mrf.mxu0 }
 0x109   :  { %v650_v40 = vpop.f32.mrf.mxu1  ;;  %v2418_v41 = vadd.f32 %v648_v37, %v454_v38 }
 0x10a   :  { %v458_v42 = vpop.f32.mrf.mxu0 }
 0x10b   :  { %v653_v43 = vpop.f32.mrf.mxu1  ;;  %v459_v44 = vadd.f32 %v2412_v29, %v458_v42 }
 0x10c   :  { %v460_v45 = vpop.f32.mrf.mxu0 }
 0x10d   :  { %v655_v46 = vpop.f32.mrf.mxu1  ;;  %v2421_v47 = vadd.f32 %v653_v43, %v459_v44 }
 0x10f   :  { %v658_v48 = vpop.f32.mrf.mxu1  ;;  %v463_v49 = vpop.f32.mrf.mxu0 }
 0x110   :  { %v464_v50 = vadd.f32 %v2412_v29, %v463_v49 }
 0x111   :  { %v660_v51 = vpop.f32.mrf.mxu1  ;;  %v465_v52 = vpop.f32.mrf.mxu0 }
 0x112   :  { %v2424_v53 = vadd.f32 %v658_v48, %v464_v50 }
 0x113   :  { %v468_v54 = vpop.f32.mrf.mxu0 }
 0x114   :  { %v663_v55 = vpop.f32.mrf.mxu1  ;;  %v469_v56 = vadd.f32 %v2412_v29, %v468_v54 }
 0x115   :  { %v470_v57 = vpop.f32.mrf.mxu0 }
 0x116   :  { %v665_v58 = vpop.f32.mrf.mxu1  ;;  %v2427_v59 = vadd.f32 %v663_v55, %v469_v56 }
 0x117   :  { %v473_v60 = vpop.f32.mrf.mxu0 }
 0x118   :  { %v668_v61 = vpop.f32.mrf.mxu1  ;;  %v474_v62 = vadd.f32 %v2412_v29, %v473_v60 }
 0x119   :  { %v475_v63 = vpop.f32.mrf.mxu0 }
 0x11a   :  { %v670_v1 = vpop.f32.mrf.mxu1  ;;  %v2430_v2 = vadd.f32 %v668_v61, %v474_v62 }
 0x11c   :  { %v478_v3 = vpop.f32.mrf.mxu0  ;;  %v673_v5 = vpop.f32.mrf.mxu1 }
 0x11d   :  { %v479_v4 = vadd.f32 %v2412_v29, %v478_v3 }
 0x11e   :  { %v480_v6 = vpop.f32.mrf.mxu0  ;;  %v675_v8 = vpop.f32.mrf.mxu1 }
 0x11f   :  { %v2433_v7 = vadd.f32 %v673_v5, %v479_v4 }
 0x121   :  { %v678_v9 = vpop.f32.mrf.mxu1  ;;  %v483_v10 = vpop.f32.mrf.mxu0 }
 0x122   :  { %v484_v11 = vadd.f32 %v2412_v29, %v483_v10 }
 0x123   :  { %v680_v12 = vpop.f32.mrf.mxu1  ;;  %v485_v13 = vpop.f32.mrf.mxu0 }
 0x124   :  { %v2436_v14 = vadd.f32 %v678_v9, %v484_v11 }
 0x125   :  { %v683_v16 = vpop.f32.mrf.mxu1 }
 0x126   :  { %v488_v15 = vpop.f32.mrf.mxu0 }
 0x127   :  { %v489_v17 = vadd.f32 %v2412_v29, %v488_v15  ;;  %v685_v0 = vpop.f32.mrf.mxu1 }
 0x128   :  { %v490_v18 = vpop.f32.mrf.mxu0 }
 0x129   :  { %v2439_v19 = vadd.f32 %v683_v16, %v489_v17 }
 0x12a   :  { %v493_v20 = vpop.f32.mrf.mxu0  ;;  %v688_v21 = vpop.f32.mrf.mxu1 }
 0x12b   :  { %v494_v22 = vadd.f32 %v2412_v29, %v493_v20 }
 0x12c   :  { %v495_v23 = vpop.f32.mrf.mxu0  ;;  %v690_v24 = vpop.f32.mrf.mxu1 }
 0x12d   :  { %v2442_v25 = vadd.f32 %v688_v21, %v494_v22 }
 0x12e   :  { %v498_v26 = vpop.f32.mrf.mxu0  ;;  %v693_v28 = vpop.f32.mrf.mxu1 }
 0x12f   :  { %v499_v27 = vadd.f32 %v2412_v29, %v498_v26 }
 0x130   :  { %v500_v30 = vpop.f32.mrf.mxu0  ;;  %v695_v32 = vpop.f32.mrf.mxu1 }
 0x131   :  { %v2445_v31 = vadd.f32 %v693_v28, %v499_v27 }
 0x132   :  { %v503_v33 = vpop.f32.mrf.mxu0 }
 0x133   :  { %v698_v34 = vpop.f32.mrf.mxu1  ;;  %v504_v36 = vadd.f32 %v2412_v29, %v503_v33 }
 0x134   :  { %v505_v37 = vpop.f32.mrf.mxu0 }
 0x135   :  { %v700_v38 = vpop.f32.mrf.mxu1  ;;  %v2448_v39 = vadd.f32 %v698_v34, %v504_v36 }
 0x137   :  { %v703_v40 = vpop.f32.mrf.mxu1  ;;  %v508_v42 = vpop.f32.mrf.mxu0 }
 0x138   :  { %v509_v43 = vadd.f32 %v2412_v29, %v508_v42 }
 0x139   :  { %v705_v44 = vpop.f32.mrf.mxu1  ;;  %v510_v45 = vpop.f32.mrf.mxu0 }
 0x13a   :  { %v2451_v46 = vadd.f32 %v703_v40, %v509_v43 }
 0x13b   :  { %v513_v48 = vpop.f32.mrf.mxu0 }
 0x13c   :  { %v708_v49 = vpop.f32.mrf.mxu1  ;;  %v514_v50 = vadd.f32 %v2412_v29, %v513_v48 }
 0x13d   :  { %v515_v51 = vpop.f32.mrf.mxu0 }
 0x13e   :  { %v710_v52 = vpop.f32.mrf.mxu1  ;;  %v2454_v54 = vadd.f32 %v708_v49, %v514_v50 }
 0x13f   :  { %v518_v55 = vpop.f32.mrf.mxu0 }
 0x140   :  { %v713_v56 = vpop.f32.mrf.mxu1  ;;  %v519_v57 = vadd.f32 %v2412_v29, %v518_v55 }
 0x141   :  { %v520_v58 = vpop.f32.mrf.mxu0 }
 0x142   :  { %v715_v60 = vpop.f32.mrf.mxu1  ;;  %v2457_v61 = vadd.f32 %v713_v56, %v519_v57 }
 0x144   :  { %v523_v62 = vpop.f32.mrf.mxu0  ;;  %v718_v1 = vpop.f32.mrf.mxu1 }
 0x145   :  { %v524_v63 = vadd.f32 %v2412_v29, %v523_v62 }
 0x146   :  { %v525_v3 = vpop.f32.mrf.mxu0  ;;  %v720_v5 = vpop.f32.mrf.mxu1 }
 0x147   :  { %v2460_v4 = vadd.f32 %v718_v1, %v524_v63 }
 0x149   :  { %v723_v6 = vpop.f32.mrf.mxu1  ;;  %v528_v8 = vpop.f32.mrf.mxu0 }
 0x14a   :  { %v529_v9 = vadd.f32 %v2412_v29, %v528_v8 }
 0x14b   :  { %v725_v10 = vpop.f32.mrf.mxu1  ;;  %v530_v11 = vpop.f32.mrf.mxu0 }
 0x14c   :  { %v2463_v12 = vadd.f32 %v723_v6, %v529_v9 }
 0x14d   :  { %v533_v13 = vpop.f32.mrf.mxu0 }
 0x14e   :  { %v728_v15 = vpop.f32.mrf.mxu1  ;;  %v534_v16 = vadd.f32 %v2412_v29, %v533_v13 }
 0x14f   :  { %v535_v17 = vpop.f32.mrf.mxu0 }
 0x150   :  { %v730_v18 = vpop.f32.mrf.mxu1  ;;  %v2466_v0 = vadd.f32 %v728_v15, %v534_v16 }
 0x151   :  { %v538_v20 = vpop.f32.mrf.mxu0 }
 0x152   :  { %v733_v21 = vpop.f32.mrf.mxu1  ;;  %v539_v22 = vadd.f32 %v2412_v29, %v538_v20 }
 0x153   :  { %v540_v23 = vpop.f32.mrf.mxu0 }
 0x154   :  { %v735_v24 = vpop.f32.mrf.mxu1  ;;  %v2469_v26 = vadd.f32 %v733_v21, %v539_v22 }
 0x156   :  { %v543_v27 = vpop.f32.mrf.mxu0  ;;  %v738_v30 = vpop.f32.mrf.mxu1 }
 0x157   :  { %v544_v28 = vadd.f32 %v2412_v29, %v543_v27 }
 0x158   :  { %v545_v32 = vpop.f32.mrf.mxu0  ;;  %v740_v34 = vpop.f32.mrf.mxu1 }
 0x159   :  { %v2472_v33 = vadd.f32 %v738_v30, %v544_v28 }
 0x15b   :  { %v743_v36 = vpop.f32.mrf.mxu1  ;;  %v548_v37 = vpop.f32.mrf.mxu0 }
 0x15c   :  { %v549_v38 = vadd.f32 %v2412_v29, %v548_v37 }
 0x15d   :  { %v745_v40 = vpop.f32.mrf.mxu1  ;;  %v550_v42 = vpop.f32.mrf.mxu0 }
 0x15e   :  { %v744_v43 = vadd.f32 %v743_v36, %v549_v38 }
 0x15f   :  { %v748_v45 = vpop.f32.mrf.mxu1 }
 0x160   :  { %v553_v44 = vpop.f32.mrf.mxu0 }
 0x161   :  { %v554_v48 = vadd.f32 %v2412_v29, %v553_v44  ;;  %v750_v50 = vpop.f32.mrf.mxu1 }
 0x162   :  { %v555_v49 = vpop.f32.mrf.mxu0 }
 0x163   :  { %v2476_v51 = vadd.f32 %v748_v45, %v554_v48 }
 0x164   :  { %v558_v52 = vpop.f32.mrf.mxu0  ;;  %v753_v55 = vpop.f32.mrf.mxu1 }
 0x165   :  { %v559_v56 = vadd.f32 %v2412_v29, %v558_v52 }
 0x166   :  { %v560_v57 = vpop.f32.mrf.mxu0  ;;  %v755_v58 = vpop.f32.mrf.mxu1 }
 0x167   :  { %v2479_v60 = vadd.f32 %v753_v55, %v559_v56 }
 0x168   :  { %v563_v62 = vpop.f32.mrf.mxu0  ;;  %v758_v1 = vpop.f32.mrf.mxu1 }
 0x169   :  { %v564_v63 = vadd.f32 %v2412_v29, %v563_v62 }
 0x16a   :  { %v565_v3 = vpop.f32.mrf.mxu0  ;;  %v760_v6 = vpop.f32.mrf.mxu1 }
 0x16b   :  { %v2482_v5 = vadd.f32 %v758_v1, %v564_v63 }
 0x16c   :  { %v568_v8 = vpop.f32.mrf.mxu0 }
 0x16d   :  { %v763_v9 = vpop.f32.mrf.mxu1  ;;  %v569_v10 = vadd.f32 %v2412_v29, %v568_v8 }
 0x16e   :  { %v570_v11 = vpop.f32.mrf.mxu0 }
 0x16f   :  { %v765_v13 = vpop.f32.mrf.mxu1  ;;  %v2485_v15 = vadd.f32 %v763_v9, %v569_v10 }
 0x171   :  { %v768_v17 = vpop.f32.mrf.mxu1 }
 0x172   :  { %v573_v16 = vpop.f32.mrf.mxu0 }
 0x173   :  { %v574_v18 = vadd.f32 %v2412_v29, %v573_v16  ;;  %v770_v21 = vpop.f32.mrf.mxu1 }
 0x174   :  { %v575_v20 = vpop.f32.mrf.mxu0 }
 0x175   :  { %v2488_v22 = vadd.f32 %v768_v17, %v574_v18 }
 0x176   :  { %v838_v23 = vpop.f32.mrf.mxu0 }
 0x177   :  { %v938_v24 = vpop.f32.mrf.mxu1  ;;  %v839_v6 = vadd.f32 %v838_v23, %v2415_v35 }
 0x178   :  { %v2490_v27 = vadd.f32 %v938_v24, %v744_v43  ;;  %v840_v28 = vpop.f32.mrf.mxu0 }
 0x179   :  { %v940_v30 = vpop.f32.mrf.mxu1 }
 0x17a   :  { %v843_v32 = vpop.f32.mrf.mxu0 }
 0x17b   :  { %v2492_v34 = vpop.f32.mrf.mxu1  ;;  %v844_v63 = vadd.f32 %v843_v32, %v2418_v41 }
 0x17c   :  { %v845_v36 = vpop.f32.mrf.mxu0 }
 0x17d   :  { %v945_v37 = vpop.f32.mrf.mxu1 }
 0x17e   :  { %v848_v38 = vpop.f32.mrf.mxu0 }
 0x17f   :  { %v2494_v40 = vpop.f32.mrf.mxu1  ;;  %v849_v20 = vadd.f32 %v848_v38, %v2421_v47 }
 0x180   :  { %v850_v42 = vpop.f32.mrf.mxu0 }
 0x181   :  { %v950_v29 = vpop.f32.mrf.mxu1 }
 0x182   :  { %v853_v44 = vpop.f32.mrf.mxu0 }
 0x183   :  { %v2496_v45 = vpop.f32.mrf.mxu1  ;;  %v854_v11 = vadd.f32 %v853_v44, %v2424_v53 }
 0x184   :  { %v855_v48 = vpop.f32.mrf.mxu0 }
 0x185   :  { %v955_v49 = vpop.f32.mrf.mxu1 }
 0x186   :  { %v858_v50 = vpop.f32.mrf.mxu0 }
 0x187   :  { %v2498_v43 = vpop.f32.mrf.mxu1  ;;  %v859_v32 = vadd.f32 %v858_v50, %v2427_v59 }
 0x188   :  { %v860_v52 = vpop.f32.mrf.mxu0 }
 0x189   :  { %v960_v55 = vpop.f32.mrf.mxu1 }
 0x18a   :  { %v863_v56 = vpop.f32.mrf.mxu0 }
 0x18b   :  { %v2500_v57 = vpop.f32.mrf.mxu1  ;;  %v864_v24 = vadd.f32 %v863_v56, %v2430_v2 }
 0x18c   :  { %v865_v58 = vpop.f32.mrf.mxu0 }
 0x18d   :  { %v965_v62 = vpop.f32.mrf.mxu1 }
 0x18e   :  { %v868_v1 = vpop.f32.mrf.mxu0 }
 0x18f   :  { %v1286_v3 = vpop.f32.mrf.mxu1  ;;  %v869_v49 = vadd.f32 %v868_v1, %v2433_v7 }
 0x190   :  { %v1039_v8 = vadd.f32 %v1286_v3, %v844_v63  ;;  %v870_v9 = vpop.f32.mrf.mxu0 }
 0x191   :  { %v1033_v10 = vpop.f32.mrf.mxu1 }
 0x192   :  { %v1163_v13 = vmax.f32 %v1039_v8, 0.0  ;;  %v1034_v16 = vadd.f32 %v1033_v10, %v839_v6  ;;  %v873_v17 = vpop.f32.mrf.mxu0 }
 0x193   :  { %v1289_v18 = vpop.f32.mrf.mxu1  ;;  %v874_v42 = vadd.f32 %v873_v17, %v2436_v14 }
 0x194   :  { %1190 = vst.msk [vmem:[%s2640_s3 + $0x8] sm:$0xff] %vm1188_vm1, %v1163_v13  ;;  %v1162_v41 = vmax.f32 %v1034_v16, 0.0  ;;  %v1049_v21 = vadd.f32 %v1289_v18, %v854_v11  ;;  %v875_v35 = vpop.f32.mrf.mxu0 }
 0x195   :  { %v1043_v23 = vpop.f32.mrf.mxu1 }
 0x196   :  { %1189 = vst.msk [vmem:[%s2640_s3] sm:$0xff] %vm1188_vm1, %v1162_v41  ;;  %v1165_v53 = vmax.f32 %v1049_v21, 0.0  ;;  %v1044_v28 = vadd.f32 %v1043_v23, %v849_v20  ;;  %v878_v30 = vpop.f32.mrf.mxu0 }
 0x197   :  { %v1292_v47 = vpop.f32.mrf.mxu1  ;;  %v879_v1 = vadd.f32 %v878_v30, %v2439_v19 }
 0x198   :  { %1192 = vst.msk [vmem:[%s2640_s3 + $0x18] sm:$0xff] %vm1188_vm1, %v1165_v53  ;;  %v1164_v36 = vmax.f32 %v1044_v28, 0.0  ;;  %v1059_v37 = vadd.f32 %v1292_v47, %v864_v24  ;;  %v880_v38 = vpop.f32.mrf.mxu0 }
 0x199   :  { %v1053_v2 = vpop.f32.mrf.mxu1 }
 0x19a   :  { %1191 = vst.msk [vmem:[%s2640_s3 + $0x10] sm:$0xff] %vm1188_vm1, %v1164_v36  ;;  %v1167_v29 = vmax.f32 %v1059_v37, 0.0  ;;  %v1054_v44 = vadd.f32 %v1053_v2, %v859_v32  ;;  %v883_v48 = vpop.f32.mrf.mxu0 }
 0x19b   :  { %v1295_v59 = vpop.f32.mrf.mxu1  ;;  %v884_v56 = vadd.f32 %v883_v48, %v2442_v25 }
 0x19c   :  { %1194 = vst.msk [vmem:[%s2640_s3 + $0x28] sm:$0xff] %vm1188_vm1, %v1167_v29  ;;  %v1166_v50 = vmax.f32 %v1054_v44, 0.0  ;;  %v1069_v52 = vadd.f32 %v1295_v59, %v874_v42  ;;  %v885_v55 = vpop.f32.mrf.mxu0 }
 0x19d   :  { %v1063_v14 = vpop.f32.mrf.mxu1 }
 0x19e   :  { %1193 = vst.msk [vmem:[%s2640_s3 + $0x20] sm:$0xff] %vm1188_vm1, %v1166_v50  ;;  %v1169_v58 = vmax.f32 %v1069_v52, 0.0  ;;  %v1064_v62 = vadd.f32 %v1063_v14, %v869_v49  ;;  %v888_v63 = vpop.f32.mrf.mxu0 }
 0x19f   :  { %v1298_v7 = vpop.f32.mrf.mxu1  ;;  %v889_v19 = vadd.f32 %v888_v63, %v2445_v31 }
 0x1a0   :  { %1196 = vst.msk [vmem:[%s2640_s3 + $0x38] sm:$0xff] %vm1188_vm1, %v1169_v58  ;;  %v1168_v3 = vmax.f32 %v1064_v62, 0.0  ;;  %v1079_v6 = vadd.f32 %v1298_v7, %v884_v56  ;;  %v890_v8 = vpop.f32.mrf.mxu0  ;;  %v944_v62 = vadd.f32 %v2492_v34, %v2476_v51 }
 0x1a1   :  { %v1073_v9 = vpop.f32.mrf.mxu1 }
 0x1a2   :  { %1195 = vst.msk [vmem:[%s2640_s3 + $0x30] sm:$0xff] %vm1188_vm1, %v1168_v3  ;;  %v1171_v25 = vmax.f32 %v1079_v6, 0.0  ;;  %v1074_v10 = vadd.f32 %v1073_v9, %v879_v1  ;;  %v893_v11 = vpop.f32.mrf.mxu0 }
 0x1a3   :  { %v1301_v13 = vpop.f32.mrf.mxu1  ;;  %v894_v17 = vadd.f32 %v893_v11, %v2448_v39 }
 0x1a4   :  { %1198 = vst.msk [vmem:[%s2640_s3 + $0x48] sm:$0xff] %vm1188_vm1, %v1171_v25  ;;  %v1170_v16 = vmax.f32 %v1074_v10, 0.0  ;;  %v895_v18 = vpop.f32.mrf.mxu0  ;;  %v949_v10 = vadd.f32 %v2494_v40, %v2479_v60 }
 0x1a5   :  { %v1083_v20 = vpop.f32.mrf.mxu1  ;;  %v1089_v41 = vadd.f32 %v1301_v13, %v894_v17 }
 0x1a6   :  { %1197 = vst.msk [vmem:[%s2640_s3 + $0x40] sm:$0xff] %vm1188_vm1, %v1170_v16  ;;  %v1084_v21 = vadd.f32 %v1083_v20, %v889_v19  ;;  %v898_v35 = vpop.f32.mrf.mxu0 }
 0x1a7   :  { %v1304_v23 = vpop.f32.mrf.mxu1  ;;  %v1173_v31 = vmax.f32 %v1089_v41, 0.0  ;;  %v899_v53 = vadd.f32 %v898_v35, %v2451_v46 }
 0x1a8   :  { %v1172_v24 = vmax.f32 %v1084_v21, 0.0  ;;  %v900_v28 = vpop.f32.mrf.mxu0 }
 0x1a9   :  { %v1093_v30 = vpop.f32.mrf.mxu1  ;;  %1200 = vst.msk [vmem:[%s2640_s3 + $0x58] sm:$0xff] %vm1188_vm1, %v1173_v31 }
 0x1aa   :  { %1199 = vst.msk [vmem:[%s2640_s3 + $0x50] sm:$0xff] %vm1188_vm1, %v1172_v24  ;;  %v1094_v39 = vadd.f32 %v1093_v30, %v899_v53  ;;  %v903_v47 = vpop.f32.mrf.mxu0 }
 0x1ab   :  { %v1307_v32 = vpop.f32.mrf.mxu1  ;;  %v904_v37 = vadd.f32 %v903_v47, %v2454_v54 }
 0x1ac   :  { %v1174_v36 = vmax.f32 %v1094_v39, 0.0  ;;  %v905_v38 = vpop.f32.mrf.mxu0 }
 0x1ad   :  { %v1103_v46 = vpop.f32.mrf.mxu1  ;;  %v1099_v2 = vadd.f32 %v1304_v23, %v904_v37 }
 0x1ae   :  { %1201 = vst.msk [vmem:[%s2640_s3 + $0x60] sm:$0xff] %vm1188_vm1, %v1174_v36  ;;  %v908_v42 = vpop.f32.mrf.mxu0 }
 0x1af   :  { %v1310_v29 = vpop.f32.mrf.mxu1  ;;  %v1175_v44 = vmax.f32 %v1099_v2, 0.0  ;;  %v909_v48 = vadd.f32 %v908_v42, %v2457_v61 }
 0x1b0   :  { %v910_v59 = vpop.f32.mrf.mxu0 }
 0x1b1   :  { %v1113_v49 = vpop.f32.mrf.mxu1  ;;  %1202 = vst.msk [vmem:[%s2640_s3 + $0x68] sm:$0xff] %vm1188_vm1, %v1175_v44  ;;  %v1104_v54 = vadd.f32 %v1103_v46, %v909_v48 }
 0x1b2   :  { %v913_v50 = vpop.f32.mrf.mxu0 }
 0x1b3   :  { %v1313_v52 = vpop.f32.mrf.mxu1  ;;  %v1176_v55 = vmax.f32 %v1104_v54, 0.0  ;;  %v914_v14 = vadd.f32 %v913_v50, %v2460_v4  ;;  %v954_v4 = vadd.f32 %v2496_v45, %v2482_v5 }
 0x1b4   :  { %v915_v56 = vpop.f32.mrf.mxu0 }
 0x1b5   :  { %v1123_v58 = vpop.f32.mrf.mxu1  ;;  %1203 = vst.msk [vmem:[%s2640_s3 + $0x70] sm:$0xff] %vm1188_vm1, %v1176_v55  ;;  %v1109_v61 = vadd.f32 %v1307_v32, %v914_v14 }
 0x1b6   :  { %v918_v63 = vpop.f32.mrf.mxu0 }
 0x1b7   :  { %v1316_v7 = vpop.f32.mrf.mxu1  ;;  %v1177_v1 = vmax.f32 %v1109_v61, 0.0  ;;  %v919_v3 = vadd.f32 %v918_v63, %v2463_v12 }
 0x1b8   :  { %v1139_v6 = vadd.f32 %v1316_v7, %v944_v62  ;;  %v920_v8 = vpop.f32.mrf.mxu0 }
 0x1b9   :  { %v1133_v9 = vpop.f32.mrf.mxu1  ;;  %1204 = vst.msk [vmem:[%s2640_s3 + $0x78] sm:$0xff] %vm1188_vm1, %v1177_v1  ;;  %v1114_v51 = vadd.f32 %v1113_v49, %v919_v3 }
 0x1ba   :  { %v1183_v34 = vmax.f32 %v1139_v6, 0.0  ;;  %v1134_v25 = vadd.f32 %v1133_v9, %v2490_v27  ;;  %v923_v11 = vpop.f32.mrf.mxu0  ;;  %v964_v27 = vadd.f32 %v2500_v57, %v2488_v22 }
 0x1bb   :  { %v1319_v12 = vpop.f32.mrf.mxu1  ;;  %v1178_v13 = vmax.f32 %v1114_v51, 0.0  ;;  %v924_v45 = vadd.f32 %v923_v11, %v2466_v0  ;;  %v959_v0 = vadd.f32 %v2498_v43, %v2485_v15 }
 0x1bc   :  { %1210 = vst.msk [vmem:[%s2640_s3 + $0xa8] sm:$0xff] %vm1188_vm1, %v1183_v34  ;;  %v1182_v5 = vmax.f32 %v1134_v25, 0.0  ;;  %v1149_v19 = vadd.f32 %v1319_v12, %v954_v4  ;;  %v925_v16 = vpop.f32.mrf.mxu0 }
 0x1bd   :  { %v1143_v17 = vpop.f32.mrf.mxu1  ;;  %1205 = vst.msk [vmem:[%s2640_s3 + $0x80] sm:$0xff] %vm1188_vm1, %v1178_v13  ;;  %v1119_v60 = vadd.f32 %v1310_v29, %v924_v45 }
 0x1be   :  { %1209 = vst.msk [vmem:[%s2640_s3 + $0xa0] sm:$0xff] %vm1188_vm1, %v1182_v5  ;;  %v1185_v40 = vmax.f32 %v1149_v19, 0.0  ;;  %v1144_v18 = vadd.f32 %v1143_v17, %v949_v10  ;;  %v928_v20 = vpop.f32.mrf.mxu0 }
 0x1bf   :  { %v1322_v41 = vpop.f32.mrf.mxu1  ;;  %v1179_v21 = vmax.f32 %v1119_v60, 0.0  ;;  %v929_v57 = vadd.f32 %v928_v20, %v2469_v26 }
 0x1c0   :  { %1212 = vst.msk [vmem:[%s2640_s3 + $0xb8] sm:$0xff] %vm1188_vm1, %v1185_v40  ;;  %v1184_v22 = vmax.f32 %v1144_v18, 0.0  ;;  %v1159_v35 = vadd.f32 %v1322_v41, %v964_v27  ;;  %v930_v23 = vpop.f32.mrf.mxu0 }
 0x1c1   :  { %v1153_v31 = vpop.f32.mrf.mxu1  ;;  %1206 = vst.msk [vmem:[%s2640_s3 + $0x88] sm:$0xff] %vm1188_vm1, %v1179_v21  ;;  %v1124_v15 = vadd.f32 %v1123_v58, %v929_v57 }
 0x1c2   :  { %1211 = vst.msk [vmem:[%s2640_s3 + $0xb0] sm:$0xff] %vm1188_vm1, %v1184_v22  ;;  %v1187_v43 = vmax.f32 %v1159_v35, 0.0  ;;  %v1154_v24 = vadd.f32 %v1153_v31, %v959_v0  ;;  %v933_v53 = vpop.f32.mrf.mxu0 }
 0x1c3   :  { %v1180_v28 = vmax.f32 %v1124_v15, 0.0  ;;  %v934_v30 = vadd.f32 %v933_v53, %v2472_v33 }
 0x1c4   :  { %1214 = vst.msk [vmem:[%s2640_s3 + $0xc8] sm:$0xff] %vm1188_vm1, %v1187_v43  ;;  %v1186_v26 = vmax.f32 %v1154_v24, 0.0  ;;  %v935_v39 = vpop.f32.mrf.mxu0 }
 0x1c5   :  { %1207 = vst.msk [vmem:[%s2640_s3 + $0x90] sm:$0xff] %vm1188_vm1, %v1180_v28  ;;  %v1129_v47 = vadd.f32 %v1313_v52, %v934_v30 }
 0x1c6   :  { %1213 = vst.msk [vmem:[%s2640_s3 + $0xc0] sm:$0xff] %vm1188_vm1, %v1186_v26 }
 0x1c7   :  { %v1181_v32 = vmax.f32 %v1129_v47, 0.0 }
 0x1c9   :  { %1208 = vst.msk [vmem:[%s2640_s3 + $0x98] sm:$0xff] %vm1188_vm1, %v1181_v32 }

// kernel: dqn_paper_forward.6
= control target key start
LH: loop header
LB: loop body
LE: loop exit
PB: predicated region body
PF: predicated region fallthrough
CT: control target
= control target key end

     0   :  { %v847_v0 = vmov 0.0   ;;  %vm848_vm0 = vmmov 0   ;;  %vm178_vm1 = vcmask 523264   ;;  %vm713_vm2 = vcmask 519168   ;;  %s1602_s1 = inlined_call_operand.vmem [shape: f32[576,64], index: 1, kind: input, shape index: {}]   ;;  %s1603_s0 = inlined_call_operand.vmem [shape: f32[132,576], index: 0, kind: input, shape index: {}]   ;;  %s1604_s2 = inlined_call_operand.vmem [shape: f32[1,64], index: 2, kind: input, shape index: {}]   ;;  %s1605_s3 = inlined_call_operand.vmem [shape: f32[132,64], index: 3, kind: output, shape index: {}]  }
   0x1   :  { %230 = vmatprep.subr.mxu0 %v847_v0  ;;  %380 = vmatprep.subr.mxu1 %v847_v0  ;;  %v114_v1 = vld [vmem:[%s1602_s1 + $0x78] sm:$0xff]  ;;  %v113_v3 = vld [vmem:[%s1602_s1 + $0x70] sm:$0xff]  ;;  %v112_v5 = vld [vmem:[%s1602_s1 + $0x68] sm:$0xff] }
   0x2   :  { %v146_v2 = vld [vmem:[%s1602_s1 + $0x178] sm:$0xff]  ;;  %231 = vmatpush1.msra.mxu0 %v114_v1  ;;  %v145_v4 = vld [vmem:[%s1602_s1 + $0x170] sm:$0xff]  ;;  %v144_v6 = vld [vmem:[%s1602_s1 + $0x168] sm:$0xff] }
   0x3   :  { %381 = vmatpush1.msra.mxu1 %v146_v2  ;;  %232 = vmatprep.subr.mxu0 %v847_v0  ;;  %v111_v7 = vld [vmem:[%s1602_s1 + $0x60] sm:$0xff]  ;;  %v110_v9 = vld [vmem:[%s1602_s1 + $0x58] sm:$0xff]  ;;  %v109_v11 = vld [vmem:[%s1602_s1 + $0x50] sm:$0xff] }
   0x4   :  { %382 = vmatprep.subr.mxu1 %v847_v0  ;;  %233 = vmatpush1.msra.mxu0 %v113_v3  ;;  %v143_v8 = vld [vmem:[%s1602_s1 + $0x160] sm:$0xff]  ;;  %v142_v10 = vld [vmem:[%s1602_s1 + $0x158] sm:$0xff]  ;;  %v141_v12 = vld [vmem:[%s1602_s1 + $0x150] sm:$0xff] }
   0x5   :  { %383 = vmatpush1.msra.mxu1 %v145_v4  ;;  %234 = vmatprep.subr.mxu0 %v847_v0  ;;  %v108_v13 = vld [vmem:[%s1602_s1 + $0x48] sm:$0xff]  ;;  %v107_v15 = vld [vmem:[%s1602_s1 + $0x40] sm:$0xff]  ;;  %v106_v17 = vld [vmem:[%s1602_s1 + $0x38] sm:$0xff] }
   0x6   :  { %384 = vmatprep.subr.mxu1 %v847_v0  ;;  %235 = vmatpush1.msra.mxu0 %v112_v5  ;;  %v140_v14 = vld [vmem:[%s1602_s1 + $0x148] sm:$0xff]  ;;  %v139_v16 = vld [vmem:[%s1602_s1 + $0x140] sm:$0xff]  ;;  %v138_v18 = vld [vmem:[%s1602_s1 + $0x138] sm:$0xff] }
   0x7   :  { %385 = vmatpush1.msra.mxu1 %v144_v6  ;;  %236 = vmatprep.subr.mxu0 %v847_v0  ;;  %v105_v19 = vld [vmem:[%s1602_s1 + $0x30] sm:$0xff]  ;;  %v104_v21 = vld [vmem:[%s1602_s1 + $0x28] sm:$0xff]  ;;  %v103_v23 = vld [vmem:[%s1602_s1 + $0x20] sm:$0xff] }
   0x8   :  { %386 = vmatprep.subr.mxu1 %v847_v0  ;;  %237 = vmatpush1.msra.mxu0 %v111_v7  ;;  %v137_v20 = vld [vmem:[%s1602_s1 + $0x130] sm:$0xff]  ;;  %v136_v22 = vld [vmem:[%s1602_s1 + $0x128] sm:$0xff]  ;;  %v135_v24 = vld [vmem:[%s1602_s1 + $0x120] sm:$0xff] }
   0x9   :  { %387 = vmatpush1.msra.mxu1 %v143_v8  ;;  %238 = vmatprep.subr.mxu0 %v847_v0  ;;  %v102_v25 = vld [vmem:[%s1602_s1 + $0x18] sm:$0xff]  ;;  %v101_v27 = vld [vmem:[%s1602_s1 + $0x10] sm:$0xff]  ;;  %v100_v29 = vld [vmem:[%s1602_s1 + $0x8] sm:$0xff] }
   0xa   :  { %388 = vmatprep.subr.mxu1 %v847_v0  ;;  %239 = vmatpush1.msra.mxu0 %v110_v9  ;;  %v134_v26 = vld [vmem:[%s1602_s1 + $0x118] sm:$0xff]  ;;  %v133_v28 = vld [vmem:[%s1602_s1 + $0x110] sm:$0xff]  ;;  %v132_v30 = vld [vmem:[%s1602_s1 + $0x108] sm:$0xff] }
   0xb   :  { %389 = vmatpush1.msra.mxu1 %v142_v10  ;;  %240 = vmatprep.subr.mxu0 %v847_v0  ;;  %v99_v31 = vld [vmem:[%s1602_s1] sm:$0xff]  ;;  %v130_v33 = vld [vmem:[%s1602_s1 + $0xf8] sm:$0xff]  ;;  %v129_v35 = vld [vmem:[%s1602_s1 + $0xf0] sm:$0xff] }
   0xc   :  { %390 = vmatprep.subr.mxu1 %v847_v0  ;;  %241 = vmatpush1.msra.mxu0 %v109_v11  ;;  %v131_v32 = vld [vmem:[%s1602_s1 + $0x100] sm:$0xff]  ;;  %v162_v34 = vld [vmem:[%s1602_s1 + $0x1f8] sm:$0xff]  ;;  %v161_v36 = vld [vmem:[%s1602_s1 + $0x1f0] sm:$0xff] }
   0xd   :  { %391 = vmatpush1.msra.mxu1 %v141_v12  ;;  %242 = vmatprep.subr.mxu0 %v847_v0  ;;  %v128_v37 = vld [vmem:[%s1602_s1 + $0xe8] sm:$0xff]  ;;  %v127_v39 = vld [vmem:[%s1602_s1 + $0xe0] sm:$0xff]  ;;  %v126_v41 = vld [vmem:[%s1602_s1 + $0xd8] sm:$0xff] }
   0xe   :  { %392 = vmatprep.subr.mxu1 %v847_v0  ;;  %243 = vmatpush1.msra.mxu0 %v108_v13  ;;  %v160_v38 = vld [vmem:[%s1602_s1 + $0x1e8] sm:$0xff]  ;;  %v159_v40 = vld [vmem:[%s1602_s1 + $0x1e0] sm:$0xff]  ;;  %v158_v42 = vld [vmem:[%s1602_s1 + $0x1d8] sm:$0xff] }
   0xf   :  { %393 = vmatpush1.msra.mxu1 %v140_v14  ;;  %244 = vmatprep.subr.mxu0 %v847_v0  ;;  %v125_v43 = vld [vmem:[%s1602_s1 + $0xd0] sm:$0xff]  ;;  %v124_v45 = vld [vmem:[%s1602_s1 + $0xc8] sm:$0xff]  ;;  %v123_v47 = vld [vmem:[%s1602_s1 + $0xc0] sm:$0xff] }
  0x10   :  { %394 = vmatprep.subr.mxu1 %v847_v0  ;;  %245 = vmatpush1.msra.mxu0 %v107_v15  ;;  %v157_v44 = vld [vmem:[%s1602_s1 + $0x1d0] sm:$0xff]  ;;  %v156_v46 = vld [vmem:[%s1602_s1 + $0x1c8] sm:$0xff]  ;;  %v155_v48 = vld [vmem:[%s1602_s1 + $0x1c0] sm:$0xff] }
  0x11   :  { %395 = vmatpush1.msra.mxu1 %v139_v16  ;;  %246 = vmatprep.subr.mxu0 %v847_v0  ;;  %v122_v49 = vld [vmem:[%s1602_s1 + $0xb8] sm:$0xff]  ;;  %v121_v51 = vld [vmem:[%s1602_s1 + $0xb0] sm:$0xff]  ;;  %v120_v53 = vld [vmem:[%s1602_s1 + $0xa8] sm:$0xff] }
  0x12   :  { %396 = vmatprep.subr.mxu1 %v847_v0  ;;  %247 = vmatpush1.msra.mxu0 %v106_v17  ;;  %v154_v50 = vld [vmem:[%s1602_s1 + $0x1b8] sm:$0xff]  ;;  %v153_v52 = vld [vmem:[%s1602_s1 + $0x1b0] sm:$0xff]  ;;  %v152_v54 = vld [vmem:[%s1602_s1 + $0x1a8] sm:$0xff] }
  0x13   :  { %397 = vmatpush1.msra.mxu1 %v138_v18  ;;  %248 = vmatprep.subr.mxu0 %v847_v0  ;;  %v119_v55 = vld [vmem:[%s1602_s1 + $0xa0] sm:$0xff]  ;;  %v118_v57 = vld [vmem:[%s1602_s1 + $0x98] sm:$0xff]  ;;  %v117_v59 = vld [vmem:[%s1602_s1 + $0x90] sm:$0xff] }
  0x14   :  { %398 = vmatprep.subr.mxu1 %v847_v0  ;;  %249 = vmatpush1.msra.mxu0 %v105_v19  ;;  %v151_v56 = vld [vmem:[%s1602_s1 + $0x1a0] sm:$0xff]  ;;  %v150_v58 = vld [vmem:[%s1602_s1 + $0x198] sm:$0xff]  ;;  %v149_v60 = vld [vmem:[%s1602_s1 + $0x190] sm:$0xff] }
  0x15   :  { %399 = vmatpush1.msra.mxu1 %v137_v20  ;;  %250 = vmatprep.subr.mxu0 %v847_v0  ;;  %v116_v61 = vld [vmem:[%s1602_s1 + $0x88] sm:$0xff]  ;;  %v115_v63 = vld [vmem:[%s1602_s1 + $0x80] sm:$0xff]  ;;  %v17_v3 = vld [vmem:[%s1603_s0 + $0x18] sm:$0xff] }
  0x16   :  { %400 = vmatprep.subr.mxu1 %v847_v0  ;;  %251 = vmatpush1.msra.mxu0 %v104_v21  ;;  %v148_v62 = vld [vmem:[%s1602_s1 + $0x188] sm:$0xff]  ;;  %v147_v2 = vld [vmem:[%s1602_s1 + $0x180] sm:$0xff]  ;;  %v16_v5 = vld [vmem:[%s1603_s0 + $0x10] sm:$0xff] }
  0x17   :  { %401 = vmatpush1.msra.mxu1 %v136_v22  ;;  %252 = vmatprep.subr.mxu0 %v847_v0  ;;  %v15_v1 = vld [vmem:[%s1603_s0 + $0x8] sm:$0xff]  ;;  %v14_v4 = vld [vmem:[%s1603_s0] sm:$0xff]  ;;  %v20_v6 = vld [vmem:[%s1603_s0 + $0x30] sm:$0xff] }
  0x18   :  { %402 = vmatprep.subr.mxu1 %v847_v0  ;;  %253 = vmatpush1.msra.mxu0 %v103_v23  ;;  %v170_v7 = vld [vmem:[%s1602_s1 + $0x238] sm:$0xff]  ;;  %v22_v8 = vld [vmem:[%s1603_s0 + $0x40] sm:$0xff]  ;;  %v19_v9 = vld [vmem:[%s1603_s0 + $0x28] sm:$0xff] }
  0x19   :  { %403 = vmatpush1.msra.mxu1 %v135_v24  ;;  %254 = vmatprep.subr.mxu0 %v847_v0  ;;  %v21_v10 = vld [vmem:[%s1603_s0 + $0x38] sm:$0xff]  ;;  %v27_v12 = vld [vmem:[%s1603_s0 + $0x68] sm:$0xff]  ;;  %v169_v13 = vld [vmem:[%s1602_s1 + $0x230] sm:$0xff] }
  0x1a   :  { %404 = vmatprep.subr.mxu1 %v847_v0  ;;  %255 = vmatpush1.msra.mxu0 %v102_v25  ;;  %v25_v11 = vld [vmem:[%s1603_s0 + $0x58] sm:$0xff]  ;;  %v24_v14 = vld [vmem:[%s1603_s0 + $0x50] sm:$0xff]  ;;  %v26_v15 = vld [vmem:[%s1603_s0 + $0x60] sm:$0xff] }
  0x1b   :  { %405 = vmatpush1.msra.mxu1 %v134_v26  ;;  %256 = vmatprep.subr.mxu0 %v847_v0  ;;  %v30_v16 = vld [vmem:[%s1603_s0 + $0x80] sm:$0xff]  ;;  %v32_v17 = vld [vmem:[%s1603_s0 + $0x90] sm:$0xff]  ;;  %v168_v18 = vld [vmem:[%s1602_s1 + $0x228] sm:$0xff] }
  0x1c   :  { %406 = vmatprep.subr.mxu1 %v847_v0  ;;  %257 = vmatpush1.msra.mxu0 %v101_v27  ;;  %v29_v19 = vld [vmem:[%s1603_s0 + $0x78] sm:$0xff]  ;;  %v31_v20 = vld [vmem:[%s1603_s0 + $0x88] sm:$0xff]  ;;  %v167_v23 = vld [vmem:[%s1602_s1 + $0x220] sm:$0xff] }
  0x1d   :  { %407 = vmatpush1.msra.mxu1 %v133_v28  ;;  %258 = vmatprep.subr.mxu0 %v847_v0  ;;  %v35_v21 = vld [vmem:[%s1603_s0 + $0xa8] sm:$0xff]  ;;  %v37_v22 = vld [vmem:[%s1603_s0 + $0xb8] sm:$0xff]  ;;  %v34_v24 = vld [vmem:[%s1603_s0 + $0xa0] sm:$0xff] }
  0x1e   :  { %408 = vmatprep.subr.mxu1 %v847_v0  ;;  %259 = vmatpush1.msra.mxu0 %v100_v29  ;;  %v36_v25 = vld [vmem:[%s1603_s0 + $0xb0] sm:$0xff]  ;;  %v42_v27 = vld [vmem:[%s1603_s0 + $0xe0] sm:$0xff]  ;;  %v166_v28 = vld [vmem:[%s1602_s1 + $0x218] sm:$0xff] }
  0x1f   :  { %409 = vmatpush1.msra.mxu1 %v132_v30  ;;  %260 = vmatprep.subr.mxu0 %v847_v0  ;;  %v40_v26 = vld [vmem:[%s1603_s0 + $0xd0] sm:$0xff]  ;;  %v39_v29 = vld [vmem:[%s1603_s0 + $0xc8] sm:$0xff]  ;;  %v41_v30 = vld [vmem:[%s1603_s0 + $0xd8] sm:$0xff] }
  0x20   :  { %410 = vmatprep.subr.mxu1 %v847_v0  ;;  %261 = vmatpush1.msra.mxu0 %v99_v31  ;;  %v45_v31 = vld [vmem:[%s1603_s0 + $0xf8] sm:$0xff] }
  0x21   :  { %411 = vmatpush1.msra.mxu1 %v131_v32  ;;  %262 = vmatprep.subr.mxu0 %v847_v0  ;;  %v47_v32 = vld [vmem:[%s1603_s0 + $0x108] sm:$0xff] }
  0x22   :  { %412 = vmatprep.subr.mxu1 %v847_v0  ;;  %263 = vmatpush2.msra.mxu0 %v130_v33  ;;  %v165_v33 = vld [vmem:[%s1602_s1 + $0x210] sm:$0xff] }
  0x23   :  { %413 = vmatpush2.msra.mxu1 %v162_v34  ;;  %264 = vmatprep.subr.mxu0 %v847_v0  ;;  %v44_v34 = vld [vmem:[%s1603_s0 + $0xf0] sm:$0xff] }
  0x24   :  { %414 = vmatprep.subr.mxu1 %v847_v0  ;;  %265 = vmatpush2.msra.mxu0 %v129_v35  ;;  %v46_v35 = vld [vmem:[%s1603_s0 + $0x100] sm:$0xff] }
  0x25   :  { %415 = vmatpush2.msra.mxu1 %v161_v36  ;;  %266 = vmatprep.subr.mxu0 %v847_v0  ;;  %v50_v36 = vld [vmem:[%s1603_s0 + $0x120] sm:$0xff] }
  0x26   :  { %416 = vmatprep.subr.mxu1 %v847_v0  ;;  %267 = vmatpush2.msra.mxu0 %v128_v37  ;;  %v52_v37 = vld [vmem:[%s1603_s0 + $0x130] sm:$0xff] }
  0x27   :  { %417 = vmatpush2.msra.mxu1 %v160_v38  ;;  %268 = vmatprep.subr.mxu0 %v847_v0  ;;  %v164_v38 = vld [vmem:[%s1602_s1 + $0x208] sm:$0xff] }
  0x28   :  { %418 = vmatprep.subr.mxu1 %v847_v0  ;;  %269 = vmatpush2.msra.mxu0 %v127_v39  ;;  %v49_v39 = vld [vmem:[%s1603_s0 + $0x118] sm:$0xff] }
  0x29   :  { %419 = vmatpush2.msra.mxu1 %v159_v40  ;;  %270 = vmatprep.subr.mxu0 %v847_v0  ;;  %v51_v40 = vld [vmem:[%s1603_s0 + $0x128] sm:$0xff] }
  0x2a   :  { %420 = vmatprep.subr.mxu1 %v847_v0  ;;  %271 = vmatpush2.msra.mxu0 %v126_v41  ;;  %v55_v41 = vld [vmem:[%s1603_s0 + $0x148] sm:$0xff] }
  0x2b   :  { %421 = vmatpush2.msra.mxu1 %v158_v42  ;;  %272 = vmatprep.subr.mxu0 %v847_v0  ;;  %v57_v42 = vld [vmem:[%s1603_s0 + $0x158] sm:$0xff] }
  0x2c   :  { %422 = vmatprep.subr.mxu1 %v847_v0  ;;  %273 = vmatpush2.msra.mxu0 %v125_v43  ;;  %v163_v43 = vld [vmem:[%s1602_s1 + $0x200] sm:$0xff] }
  0x2d   :  { %423 = vmatpush2.msra.mxu1 %v157_v44  ;;  %274 = vmatprep.subr.mxu0 %v847_v0  ;;  %v54_v44 = vld [vmem:[%s1603_s0 + $0x140] sm:$0xff] }
  0x2e   :  { %424 = vmatprep.subr.mxu1 %v847_v0  ;;  %275 = vmatpush2.msra.mxu0 %v124_v45  ;;  %v56_v45 = vld [vmem:[%s1603_s0 + $0x150] sm:$0xff] }
  0x2f   :  { %425 = vmatpush2.msra.mxu1 %v156_v46  ;;  %276 = vmatprep.subr.mxu0 %v847_v0  ;;  %v60_v46 = vld [vmem:[%s1603_s0 + $0x170] sm:$0xff] }
  0x30   :  { %426 = vmatprep.subr.mxu1 %v847_v0  ;;  %277 = vmatpush2.msra.mxu0 %v123_v47  ;;  %v62_v47 = vld [vmem:[%s1603_s0 + $0x180] sm:$0xff] }
  0x31   :  { %427 = vmatpush2.msra.mxu1 %v155_v48  ;;  %278 = vmatprep.subr.mxu0 %v847_v0  ;;  %v59_v48 = vld [vmem:[%s1603_s0 + $0x168] sm:$0xff] }
  0x32   :  { %428 = vmatprep.subr.mxu1 %v847_v0  ;;  %279 = vmatpush2.msra.mxu0 %v122_v49  ;;  %v61_v49 = vld [vmem:[%s1603_s0 + $0x178] sm:$0xff] }
  0x33   :  { %429 = vmatpush2.msra.mxu1 %v154_v50  ;;  %280 = vmatprep.subr.mxu0 %v847_v0  ;;  %v65_v50 = vld [vmem:[%s1603_s0 + $0x198] sm:$0xff] }
  0x34   :  { %430 = vmatprep.subr.mxu1 %v847_v0  ;;  %281 = vmatpush2.msra.mxu0 %v121_v51  ;;  %v67_v51 = vld [vmem:[%s1603_s0 + $0x1a8] sm:$0xff] }
  0x35   :  { %431 = vmatpush2.msra.mxu1 %v153_v52  ;;  %282 = vmatprep.subr.mxu0 %v847_v0  ;;  %v64_v52 = vld [vmem:[%s1603_s0 + $0x190] sm:$0xff] }
  0x36   :  { %432 = vmatprep.subr.mxu1 %v847_v0  ;;  %283 = vmatpush2.msra.mxu0 %v120_v53  ;;  %v66_v53 = vld [vmem:[%s1603_s0 + $0x1a0] sm:$0xff] }
  0x37   :  { %433 = vmatpush2.msra.mxu1 %v152_v54  ;;  %284 = vmatprep.subr.mxu0 %v847_v0  ;;  %v70_v54 = vld [vmem:[%s1603_s0 + $0x1c0] sm:$0xff] }
  0x38   :  { %434 = vmatprep.subr.mxu1 %v847_v0  ;;  %285 = vmatpush2.msra.mxu0 %v119_v55  ;;  %v72_v55 = vld [vmem:[%s1603_s0 + $0x1d0] sm:$0xff] }
  0x39   :  { %435 = vmatpush2.msra.mxu1 %v151_v56  ;;  %286 = vmatprep.subr.mxu0 %v847_v0  ;;  %v69_v56 = vld [vmem:[%s1603_s0 + $0x1b8] sm:$0xff] }
  0x3a   :  { %436 = vmatprep.subr.mxu1 %v847_v0  ;;  %287 = vmatpush2.msra.mxu0 %v118_v57  ;;  %v71_v57 = vld [vmem:[%s1603_s0 + $0x1c8] sm:$0xff] }
  0x3b   :  { %437 = vmatpush2.msra.mxu1 %v150_v58  ;;  %288 = vmatprep.subr.mxu0 %v847_v0  ;;  %v75_v58 = vld [vmem:[%s1603_s0 + $0x1e8] sm:$0xff] }
  0x3c   :  { %438 = vmatprep.subr.mxu1 %v847_v0  ;;  %289 = vmatpush2.msra.mxu0 %v117_v59  ;;  %v77_v59 = vld [vmem:[%s1603_s0 + $0x1f8] sm:$0xff] }
  0x3d   :  { %439 = vmatpush2.msra.mxu1 %v149_v60  ;;  %290 = vmatprep.subr.mxu0 %v847_v0  ;;  %v74_v60 = vld [vmem:[%s1603_s0 + $0x1e0] sm:$0xff] }
  0x3e   :  { %440 = vmatprep.subr.mxu1 %v847_v0  ;;  %291 = vmatpush2.msra.mxu0 %v116_v61  ;;  %v76_v61 = vld [vmem:[%s1603_s0 + $0x1f0] sm:$0xff] }
  0x3f   :  { %441 = vmatpush2.msra.mxu1 %v148_v62  ;;  %292 = vmatprep.subr.mxu0 %v847_v0  ;;  %v80_v62 = vld [vmem:[%s1603_s0 + $0x210] sm:$0xff] }
  0x40   :  { %442 = vmatprep.subr.mxu1 %v847_v0  ;;  %293 = vmatpush2.msra.mxu0 %v115_v63  ;;  %v82_v63 = vld [vmem:[%s1603_s0 + $0x220] sm:$0xff] }
  0x41   :  { %294 = vmatprep.mubr.f32.mxu0 %v15_v1  ;;  %443 = vmatpush2.msra.mxu1 %v147_v2  ;;  %v79_v1 = vld [vmem:[%s1603_s0 + $0x208] sm:$0xff]  ;;  %v81_v2 = vld [vmem:[%s1603_s0 + $0x218] sm:$0xff] }
  0x42   :  { %444 = vmatprep.mubr.f32.mxu1 %v17_v3  ;;  %295 = vmatmul.mubr.f32.vlgmr.msra.gmra.mxu0 %v14_v4  ;;  %v85_v3 = vld [vmem:[%s1603_s0 + $0x238] sm:$0xff]  ;;  %v87_v4 = vld [vmem:[%s1603_s0 + $0x248] sm:$0xff] }
  0x43   :  { %445 = vmatmul.mubr.f32.vlgmr.msra.gmra.mxu1 %v16_v5  ;;  %762 = vmatprep.subr.mxu0 %v847_v0  ;;  %v84_v5 = vld [vmem:[%s1603_s0 + $0x230] sm:$0xff] }
  0x44   :  { %299 = vmatprep.mubr.f32.mxu0 %v20_v6  ;;  %763 = vmatpush3.msra.mxu0 %v170_v7  ;;  %v86_v6 = vld [vmem:[%s1603_s0 + $0x240] sm:$0xff] }
  0x45   :  { %449 = vmatprep.mubr.f32.mxu1 %v22_v8  ;;  %829 = vmatprep.subr.mxu1 %v847_v0  ;;  %v92_v8 = vld [vmem:[%s1603_s0 + $0x270] sm:$0xff] }
  0x46   :  { %764 = vmatprep.subr.mxu0 %v847_v0  ;;  %300 = vmatmul.mubr.f32.gmra.mxu0 %v19_v9  ;;  %v89_v9 = vld [vmem:[%s1603_s0 + $0x258] sm:$0xff] }
  0x47   :  { %450 = vmatmul.mubr.f32.gmra.mxu1 %v21_v10  ;;  %304 = vmatprep.mubr.f32.mxu0 %v25_v11  ;;  %v91_v10 = vld [vmem:[%s1603_s0 + $0x268] sm:$0xff] }
  0x48   :  { %837 = vmatpush3.msra.mxu1 %v170_v7  ;;  %454 = vmatprep.mubr.f32.mxu1 %v27_v12  ;;  %v90_v7 = vld [vmem:[%s1603_s0 + $0x260] sm:$0xff]  ;;  %v95_v11 = vld [vmem:[%s1603_s0 + $0x288] sm:$0xf]  ;;  %v97_v12 = vld [vmem:[%s1603_s0 + $0x298] sm:$0xf] }
  0x49   :  { %765 = vmatpush3.msra.mxu0 %v169_v13  ;;  %830 = vmatprep.subr.mxu1 %v847_v0 }
  0x4a   :  { %766 = vmatprep.subr.mxu0 %v847_v0  ;;  %305 = vmatmul.mubr.f32.gmra.mxu0 %v24_v14  ;;  %v96_v14 = vld [vmem:[%s1603_s0 + $0x290] sm:$0xf] }
  0x4b   :  { %455 = vmatmul.mubr.f32.gmra.mxu1 %v26_v15  ;;  %309 = vmatprep.mubr.f32.mxu0 %v30_v16  ;;  %v18_v15 = vld [vmem:[%s1603_s0 + $0x20] sm:$0xff]  ;;  %v63_v16 = vld [vmem:[%s1603_s0 + $0x188] sm:$0xff] }
  0x4c   :  { %459 = vmatprep.mubr.f32.mxu1 %v32_v17  ;;  %838 = vmatpush3.msra.mxu1 %v169_v13  ;;  %v94_v13 = vld [vmem:[%s1603_s0 + $0x280] sm:$0xf]  ;;  %v23_v17 = vld [vmem:[%s1603_s0 + $0x48] sm:$0xff] }
  0x4d   :  { %767 = vmatpush3.msra.mxu0 %v168_v18  ;;  %831 = vmatprep.subr.mxu1 %v847_v0 }
  0x4e   :  { %768 = vmatprep.subr.mxu0 %v847_v0  ;;  %310 = vmatmul.mubr.f32.gmra.mxu0 %v29_v19  ;;  %v28_v19 = vld [vmem:[%s1603_s0 + $0x70] sm:$0xff] }
  0x4f   :  { %460 = vmatmul.mubr.f32.gmra.mxu1 %v31_v20  ;;  %314 = vmatprep.mubr.f32.mxu0 %v35_v21  ;;  %v73_v20 = vld [vmem:[%s1603_s0 + $0x1d8] sm:$0xff] }
  0x50   :  { %464 = vmatprep.mubr.f32.mxu1 %v37_v22  ;;  %839 = vmatpush3.msra.mxu1 %v168_v18  ;;  %v68_v18 = vld [vmem:[%s1603_s0 + $0x1b0] sm:$0xff]  ;;  %v33_v21 = vld [vmem:[%s1603_s0 + $0x98] sm:$0xff]  ;;  %v78_v22 = vld [vmem:[%s1603_s0 + $0x200] sm:$0xff] }
  0x51   :  { %769 = vmatpush3.msra.mxu0 %v167_v23  ;;  %832 = vmatprep.subr.mxu1 %v847_v0 }
  0x52   :  { %770 = vmatprep.subr.mxu0 %v847_v0  ;;  %315 = vmatmul.mubr.f32.gmra.mxu0 %v34_v24  ;;  %v83_v24 = vld [vmem:[%s1603_s0 + $0x228] sm:$0xff] }
  0x53   :  { %465 = vmatmul.mubr.f32.gmra.mxu1 %v36_v25  ;;  %319 = vmatprep.mubr.f32.mxu0 %v40_v26  ;;  %v43_v25 = vld [vmem:[%s1603_s0 + $0xe8] sm:$0xff]  ;;  %v88_v26 = vld [vmem:[%s1603_s0 + $0x250] sm:$0xff] }
  0x54   :  { %469 = vmatprep.mubr.f32.mxu1 %v42_v27  ;;  %840 = vmatpush3.msra.mxu1 %v167_v23  ;;  %v38_v23 = vld [vmem:[%s1603_s0 + $0xc0] sm:$0xff]  ;;  %v48_v27 = vld [vmem:[%s1603_s0 + $0x110] sm:$0xff] }
  0x55   :  { %771 = vmatpush3.msra.mxu0 %v166_v28  ;;  %833 = vmatprep.subr.mxu1 %v847_v0 }
  0x56   :  { %772 = vmatprep.subr.mxu0 %v847_v0  ;;  %320 = vmatmul.mubr.f32.gmra.mxu0 %v39_v29  ;;  %v53_v29 = vld [vmem:[%s1603_s0 + $0x138] sm:$0xff] }
  0x57   :  { %470 = vmatmul.mubr.f32.gmra.mxu1 %v41_v30  ;;  %324 = vmatprep.mubr.f32.mxu0 %v45_v31  ;;  %v98_v30 = vld [vmem:[%s1603_s0 + $0x2a0] sm:$0xf] }
  0x58   :  { %474 = vmatprep.mubr.f32.mxu1 %v47_v32  ;;  %841 = vmatpush3.msra.mxu1 %v166_v28  ;;  %v93_v28 = vld [vmem:[%s1603_s0 + $0x278] sm:$0xff]  ;;  %v58_v31 = vld [vmem:[%s1603_s0 + $0x160] sm:$0xff] }
  0x59   :  { %773 = vmatpush3.msra.mxu0 %v165_v33  ;;  %834 = vmatprep.subr.mxu1 %v847_v0  ;;  %v1474_v32 = vld [vmem:[%s1604_s2] ss:$0 sm:$0xff] }
  0x5a   :  { %774 = vmatprep.subr.mxu0 %v847_v0  ;;  %325 = vmatmul.mubr.f32.gmra.mxu0 %v44_v34 }
  0x5b   :  { %475 = vmatmul.mubr.f32.gmra.mxu1 %v46_v35  ;;  %329 = vmatprep.mubr.f32.mxu0 %v50_v36 }
  0x5c   :  { %479 = vmatprep.mubr.f32.mxu1 %v52_v37  ;;  %842 = vmatpush3.msra.mxu1 %v165_v33 }
  0x5d   :  { %775 = vmatpush3.msra.mxu0 %v164_v38  ;;  %835 = vmatprep.subr.mxu1 %v847_v0 }
  0x5e   :  { %776 = vmatprep.subr.mxu0 %v847_v0  ;;  %330 = vmatmul.mubr.f32.gmra.mxu0 %v49_v39 }
  0x5f   :  { %480 = vmatmul.mubr.f32.gmra.mxu1 %v51_v40  ;;  %334 = vmatprep.mubr.f32.mxu0 %v55_v41 }
  0x60   :  { %484 = vmatprep.mubr.f32.mxu1 %v57_v42  ;;  %843 = vmatpush3.msra.mxu1 %v164_v38 }
  0x61   :  { %777 = vmatpush3.msra.mxu0 %v163_v43  ;;  %836 = vmatprep.subr.mxu1 %v847_v0 }
  0x62   :  { %335 = vmatmul.mubr.f32.gmra.mxu0 %v54_v44  ;;  %844 = vmatpush3.msra.mxu1 %v163_v43 }
  0x63   :  { %485 = vmatmul.mubr.f32.gmra.mxu1 %v56_v45  ;;  %339 = vmatprep.mubr.f32.mxu0 %v60_v46 }
  0x64   :  { %489 = vmatprep.mubr.f32.mxu1 %v62_v47 }
  0x66   :  { %340 = vmatmul.mubr.f32.gmra.mxu0 %v59_v48 }
  0x67   :  { %490 = vmatmul.mubr.f32.gmra.mxu1 %v61_v49  ;;  %344 = vmatprep.mubr.f32.mxu0 %v65_v50 }
  0x68   :  { %494 = vmatprep.mubr.f32.mxu1 %v67_v51 }
  0x6a   :  { %345 = vmatmul.mubr.f32.gmra.mxu0 %v64_v52 }
  0x6b   :  { %495 = vmatmul.mubr.f32.gmra.mxu1 %v66_v53  ;;  %349 = vmatprep.mubr.f32.mxu0 %v70_v54 }
  0x6c   :  { %499 = vmatprep.mubr.f32.mxu1 %v72_v55 }
  0x6e   :  { %350 = vmatmul.mubr.f32.gmra.mxu0 %v69_v56 }
  0x6f   :  { %500 = vmatmul.mubr.f32.gmra.mxu1 %v71_v57  ;;  %354 = vmatprep.mubr.f32.mxu0 %v75_v58 }
  0x70   :  { %504 = vmatprep.mubr.f32.mxu1 %v77_v59 }
  0x72   :  { %355 = vmatmul.mubr.f32.gmra.mxu0 %v74_v60 }
  0x73   :  { %505 = vmatmul.mubr.f32.gmra.mxu1 %v76_v61  ;;  %359 = vmatprep.mubr.f32.mxu0 %v80_v62 }
  0x74   :  { %509 = vmatprep.mubr.f32.mxu1 %v82_v63 }
  0x76   :  { %360 = vmatmul.mubr.f32.gmra.mxu0 %v79_v1 }
  0x77   :  { %510 = vmatmul.mubr.f32.gmra.mxu1 %v81_v2  ;;  %364 = vmatprep.mubr.f32.mxu0 %v85_v3 }
  0x78   :  { %514 = vmatprep.mubr.f32.mxu1 %v87_v4 }
  0x7a   :  { %365 = vmatmul.mubr.f32.gmra.mxu0 %v84_v5 }
  0x7b   :  { %515 = vmatmul.mubr.f32.gmra.mxu1 %v86_v6  ;;  %369 = vmatprep.mubr.f32.mxu0 %v90_v7 }
  0x7c   :  { %519 = vmatprep.mubr.f32.mxu1 %v92_v8 }
  0x7e   :  { %370 = vmatmul.mubr.f32.gmra.mxu0 %v89_v9 }
  0x7f   :  { %520 = vmatmul.mubr.f32.gmra.mxu1 %v91_v10  ;;  %374 = vmatprep.mubr.f32.mxu0 %v95_v11 }
  0x80   :  { %524 = vmatprep.mubr.f32.mxu1 %v97_v12 }
  0x82   :  { %375 = vmatmul.mubr.f32.gmra.mxu0 %v94_v13 }
  0x83   :  { %525 = vmatmul.mubr.f32.gmra.mxu1 %v96_v14  ;;  %778 = vmatprep.mubr.msk.f32.mxu0 %vm848_vm0, %v847_v0 }
  0x84   :  { %805 = vmatprep.mubr.msk.f32.mxu1 %vm848_vm0, %v847_v0 }
  0x86   :  { %779 = vmatmul.mubr.msk.f32.vlgmr.msra.gmra.mxu0 %vm178_vm1, %v18_v15 }
  0x87   :  { %806 = vmatmul.mubr.msk.f32.vlgmr.msra.gmra.mxu1 %vm178_vm1, %v63_v16  ;;  %781 = vmatprep.mubr.msk.f32.mxu0 %vm848_vm0, %v847_v0 }
  0x88   :  { %808 = vmatprep.mubr.msk.f32.mxu1 %vm848_vm0, %v847_v0 }
  0x8a   :  { %782 = vmatmul.mubr.msk.f32.gmra.mxu0 %vm178_vm1, %v23_v17 }
  0x8b   :  { %809 = vmatmul.mubr.msk.f32.gmra.mxu1 %vm178_vm1, %v68_v18  ;;  %784 = vmatprep.mubr.msk.f32.mxu0 %vm848_vm0, %v847_v0 }
  0x8c   :  { %811 = vmatprep.mubr.msk.f32.mxu1 %vm848_vm0, %v847_v0 }
  0x8e   :  { %785 = vmatmul.mubr.msk.f32.gmra.mxu0 %vm178_vm1, %v28_v19 }
  0x8f   :  { %812 = vmatmul.mubr.msk.f32.gmra.mxu1 %vm178_vm1, %v73_v20  ;;  %787 = vmatprep.mubr.msk.f32.mxu0 %vm848_vm0, %v847_v0 }
  0x90   :  { %814 = vmatprep.mubr.msk.f32.mxu1 %vm848_vm0, %v847_v0 }
  0x92   :  { %788 = vmatmul.mubr.msk.f32.gmra.mxu0 %vm178_vm1, %v33_v21 }
  0x93   :  { %815 = vmatmul.mubr.msk.f32.gmra.mxu1 %vm178_vm1, %v78_v22  ;;  %790 = vmatprep.mubr.msk.f32.mxu0 %vm848_vm0, %v847_v0 }
  0x94   :  { %817 = vmatprep.mubr.msk.f32.mxu1 %vm848_vm0, %v847_v0 }
  0x96   :  { %791 = vmatmul.mubr.msk.f32.gmra.mxu0 %vm178_vm1, %v38_v23 }
  0x97   :  { %818 = vmatmul.mubr.msk.f32.gmra.mxu1 %vm178_vm1, %v83_v24  ;;  %793 = vmatprep.mubr.msk.f32.mxu0 %vm848_vm0, %v847_v0 }
  0x98   :  { %820 = vmatprep.mubr.msk.f32.mxu1 %vm848_vm0, %v847_v0 }
  0x9a   :  { %794 = vmatmul.mubr.msk.f32.gmra.mxu0 %vm178_vm1, %v43_v25 }
  0x9b   :  { %821 = vmatmul.mubr.msk.f32.gmra.mxu1 %vm178_vm1, %v88_v26  ;;  %796 = vmatprep.mubr.msk.f32.mxu0 %vm848_vm0, %v847_v0 }
  0x9c   :  { %823 = vmatprep.mubr.msk.f32.mxu1 %vm848_vm0, %v847_v0 }
  0x9e   :  { %797 = vmatmul.mubr.msk.f32.gmra.mxu0 %vm178_vm1, %v48_v27 }
  0x9f   :  { %824 = vmatmul.mubr.msk.f32.gmra.mxu1 %vm178_vm1, %v93_v28  ;;  %799 = vmatprep.mubr.msk.f32.mxu0 %vm848_vm0, %v847_v0 }
  0xa0   :  { %826 = vmatprep.mubr.msk.f32.mxu1 %vm848_vm0, %v847_v0 }
  0xa2   :  { %800 = vmatmul.mubr.msk.f32.gmra.mxu0 %vm178_vm1, %v53_v29 }
  0xa3   :  { %827 = vmatmul.mubr.msk.f32.gmra.mxu1 %vm178_vm1, %v98_v30  ;;  %802 = vmatprep.mubr.msk.f32.mxu0 %vm848_vm0, %v847_v0 }
  0xa6   :  { %803 = vmatmul.mubr.msk.f32.gmra.mxu0 %vm178_vm1, %v58_v31 }
 0x102   :  { %v296_v33 = vpop.f32.mrf.mxu0 }
 0x103   :  { %v446_v34 = vpop.f32.mrf.mxu1  ;;  %v297_v35 = vadd.f32 %v1474_v32, %v296_v33 }
 0x104   :  { %v298_v36 = vpop.f32.mrf.mxu0 }
 0x105   :  { %v448_v37 = vpop.f32.mrf.mxu1  ;;  %v1477_v38 = vadd.f32 %v446_v34, %v297_v35 }
 0x106   :  { %v301_v0 = vpop.f32.mrf.mxu0 }
 0x107   :  { %v451_v39 = vpop.f32.mrf.mxu1  ;;  %v302_v40 = vadd.f32 %v1474_v32, %v301_v0 }
 0x108   :  { %v303_v41 = vpop.f32.mrf.mxu0 }
 0x109   :  { %v453_v42 = vpop.f32.mrf.mxu1  ;;  %v1480_v43 = vadd.f32 %v451_v39, %v302_v40 }
 0x10a   :  { %v306_v44 = vpop.f32.mrf.mxu0 }
 0x10b   :  { %v456_v45 = vpop.f32.mrf.mxu1  ;;  %v307_v46 = vadd.f32 %v1474_v32, %v306_v44 }
 0x10c   :  { %v308_v47 = vpop.f32.mrf.mxu0 }
 0x10d   :  { %v458_v48 = vpop.f32.mrf.mxu1  ;;  %v1483_v49 = vadd.f32 %v456_v45, %v307_v46 }
 0x10e   :  { %v311_v50 = vpop.f32.mrf.mxu0 }
 0x10f   :  { %v461_v51 = vpop.f32.mrf.mxu1  ;;  %v312_v52 = vadd.f32 %v1474_v32, %v311_v50 }
 0x110   :  { %v313_v53 = vpop.f32.mrf.mxu0 }
 0x111   :  { %v463_v54 = vpop.f32.mrf.mxu1  ;;  %v1486_v55 = vadd.f32 %v461_v51, %v312_v52 }
 0x112   :  { %v316_v56 = vpop.f32.mrf.mxu0 }
 0x113   :  { %v466_v57 = vpop.f32.mrf.mxu1  ;;  %v317_v58 = vadd.f32 %v1474_v32, %v316_v56 }
 0x114   :  { %v318_v59 = vpop.f32.mrf.mxu0 }
 0x115   :  { %v468_v60 = vpop.f32.mrf.mxu1  ;;  %v1489_v61 = vadd.f32 %v466_v57, %v317_v58 }
 0x116   :  { %v321_v62 = vpop.f32.mrf.mxu0 }
 0x117   :  { %v471_v63 = vpop.f32.mrf.mxu1  ;;  %v322_v1 = vadd.f32 %v1474_v32, %v321_v62 }
 0x118   :  { %v323_v2 = vpop.f32.mrf.mxu0 }
 0x119   :  { %v473_v3 = vpop.f32.mrf.mxu1  ;;  %v1492_v4 = vadd.f32 %v471_v63, %v322_v1 }
 0x11a   :  { %v326_v5 = vpop.f32.mrf.mxu0 }
 0x11b   :  { %v476_v6 = vpop.f32.mrf.mxu1  ;;  %v327_v7 = vadd.f32 %v1474_v32, %v326_v5 }
 0x11c   :  { %v328_v8 = vpop.f32.mrf.mxu0 }
 0x11d   :  { %v478_v9 = vpop.f32.mrf.mxu1  ;;  %v1495_v10 = vadd.f32 %v476_v6, %v327_v7 }
 0x11e   :  { %v331_v11 = vpop.f32.mrf.mxu0 }
 0x11f   :  { %v481_v12 = vpop.f32.mrf.mxu1  ;;  %v332_v13 = vadd.f32 %v1474_v32, %v331_v11 }
 0x120   :  { %v333_v14 = vpop.f32.mrf.mxu0 }
 0x121   :  { %v483_v15 = vpop.f32.mrf.mxu1  ;;  %v1498_v16 = vadd.f32 %v481_v12, %v332_v13 }
 0x122   :  { %v336_v17 = vpop.f32.mrf.mxu0 }
 0x123   :  { %v486_v18 = vpop.f32.mrf.mxu1  ;;  %v337_v19 = vadd.f32 %v1474_v32, %v336_v17 }
 0x124   :  { %v338_v20 = vpop.f32.mrf.mxu0 }
 0x125   :  { %v488_v21 = vpop.f32.mrf.mxu1  ;;  %v1501_v22 = vadd.f32 %v486_v18, %v337_v19 }
 0x126   :  { %v341_v23 = vpop.f32.mrf.mxu0 }
 0x127   :  { %v491_v24 = vpop.f32.mrf.mxu1  ;;  %v342_v54 = vadd.f32 %v1474_v32, %v341_v23 }
 0x128   :  { %v343_v25 = vpop.f32.mrf.mxu0 }
 0x129   :  { %v493_v26 = vpop.f32.mrf.mxu1  ;;  %v492_v60 = vadd.f32 %v491_v24, %v342_v54 }
 0x12a   :  { %v346_v27 = vpop.f32.mrf.mxu0 }
 0x12b   :  { %v496_v28 = vpop.f32.mrf.mxu1  ;;  %v347_v62 = vadd.f32 %v1474_v32, %v346_v27 }
 0x12c   :  { %v348_v29 = vpop.f32.mrf.mxu0 }
 0x12d   :  { %v498_v30 = vpop.f32.mrf.mxu1  ;;  %v497_v7 = vadd.f32 %v496_v28, %v347_v62 }
 0x12e   :  { %v351_v31 = vpop.f32.mrf.mxu0 }
 0x12f   :  { %v501_v33 = vpop.f32.mrf.mxu1  ;;  %v352_v8 = vadd.f32 %v1474_v32, %v351_v31 }
 0x130   :  { %v353_v34 = vpop.f32.mrf.mxu0 }
 0x131   :  { %v503_v35 = vpop.f32.mrf.mxu1  ;;  %v502_v18 = vadd.f32 %v501_v33, %v352_v8 }
 0x132   :  { %v356_v36 = vpop.f32.mrf.mxu0 }
 0x133   :  { %v506_v37 = vpop.f32.mrf.mxu1  ;;  %v357_v19 = vadd.f32 %v1474_v32, %v356_v36 }
 0x134   :  { %v358_v0 = vpop.f32.mrf.mxu0 }
 0x135   :  { %v508_v39 = vpop.f32.mrf.mxu1  ;;  %v507_v28 = vadd.f32 %v506_v37, %v357_v19 }
 0x136   :  { %v361_v40 = vpop.f32.mrf.mxu0 }
 0x137   :  { %v511_v41 = vpop.f32.mrf.mxu1  ;;  %v362_v29 = vadd.f32 %v1474_v32, %v361_v40 }
 0x138   :  { %v363_v42 = vpop.f32.mrf.mxu0 }
 0x139   :  { %v513_v44 = vpop.f32.mrf.mxu1  ;;  %v512_v0 = vadd.f32 %v511_v41, %v362_v29 }
 0x13a   :  { %v366_v45 = vpop.f32.mrf.mxu0 }
 0x13b   :  { %v1503_v46 = vpop.f32.mrf.mxu1  ;;  %v367_v39 = vadd.f32 %v1474_v32, %v366_v45 }
 0x13c   :  { %v368_v47 = vpop.f32.mrf.mxu0 }
 0x13d   :  { %v518_v48 = vpop.f32.mrf.mxu1  ;;  %v517_v45 = vadd.f32 %v1503_v46, %v367_v39 }
 0x13e   :  { %v1505_v50 = vpop.f32.mrf.mxu0 }
 0x13f   :  { %v1507_v51 = vpop.f32.mrf.mxu1 }
 0x140   :  { %v373_v52 = vpop.f32.mrf.mxu0 }
 0x141   :  { %v523_v53 = vpop.f32.mrf.mxu1 }
 0x142   :  { %v1510_v56 = vpop.f32.mrf.mxu0  ;;  %v372_v53 = vadd.f32 %v1474_v32, %v1505_v50 }
 0x143   :  { %v1512_v57 = vpop.f32.mrf.mxu1 }
 0x144   :  { %v378_v58 = vpop.f32.mrf.mxu0  ;;  %v522_v50 = vadd.f32 %v1507_v51, %v372_v53 }
 0x145   :  { %v528_v59 = vpop.f32.mrf.mxu1 }
 0x146   :  { %v596_v63 = vpop.f32.mrf.mxu0 }
 0x147   :  { %v641_v1 = vpop.f32.mrf.mxu1  ;;  %v597_v2 = vadd.f32 %v596_v63, %v1477_v38 }
 0x148   :  { %v642_v3 = vadd.f32 %v641_v1, %v492_v60  ;;  %v780_v5 = vpop.f32.mrf.mxu0  ;;  %v377_v1 = vadd.f32 %v1474_v32, %v1510_v56 }
 0x149   :  { %v807_v6 = vpop.f32.mrf.mxu1  ;;  %v680_v9 = vmax.f32 %v597_v2, 0.0 }
 0x14a   :  { %v689_v11 = vmax.f32 %v642_v3, 0.0  ;;  %v601_v12 = vpop.f32.mrf.mxu0  ;;  %v527_v32 = vadd.f32 %v1512_v57, %v377_v1 }
 0x14b   :  { %v646_v13 = vpop.f32.mrf.mxu1  ;;  %697 = vst.msk [vmem:[%s1605_s3] sm:$0xff] %vm178_vm1, %v680_v9  ;;  %v602_v38 = vadd.f32 %v601_v12, %v1480_v43 }
 0x14c   :  { %706 = vst.msk [vmem:[%s1605_s3 + $0x48] sm:$0xff] %vm178_vm1, %v689_v11  ;;  %v647_v14 = vadd.f32 %v646_v13, %v497_v7  ;;  %v783_v15 = vpop.f32.mrf.mxu0 }
 0x14d   :  { %v810_v17 = vpop.f32.mrf.mxu1  ;;  %v681_v20 = vmax.f32 %v602_v38, 0.0 }
 0x14e   :  { %v690_v21 = vmax.f32 %v647_v14, 0.0  ;;  %v606_v23 = vpop.f32.mrf.mxu0 }
 0x14f   :  { %v651_v24 = vpop.f32.mrf.mxu1  ;;  %698 = vst.msk [vmem:[%s1605_s3 + $0x8] sm:$0xff] %vm178_vm1, %v681_v20  ;;  %v607_v43 = vadd.f32 %v606_v23, %v1483_v49 }
 0x150   :  { %707 = vst.msk [vmem:[%s1605_s3 + $0x50] sm:$0xff] %vm178_vm1, %v690_v21  ;;  %v652_v25 = vadd.f32 %v651_v24, %v502_v18  ;;  %v786_v26 = vpop.f32.mrf.mxu0 }
 0x151   :  { %v813_v27 = vpop.f32.mrf.mxu1  ;;  %v682_v30 = vmax.f32 %v607_v43, 0.0 }
 0x152   :  { %v691_v31 = vmax.f32 %v652_v25, 0.0  ;;  %v611_v33 = vpop.f32.mrf.mxu0 }
 0x153   :  { %v656_v34 = vpop.f32.mrf.mxu1  ;;  %699 = vst.msk [vmem:[%s1605_s3 + $0x10] sm:$0xff] %vm178_vm1, %v682_v30  ;;  %v612_v49 = vadd.f32 %v611_v33, %v1486_v55 }
 0x154   :  { %708 = vst.msk [vmem:[%s1605_s3 + $0x58] sm:$0xff] %vm178_vm1, %v691_v31  ;;  %v657_v35 = vadd.f32 %v656_v34, %v507_v28  ;;  %v789_v36 = vpop.f32.mrf.mxu0 }
 0x155   :  { %v816_v37 = vpop.f32.mrf.mxu1  ;;  %v683_v40 = vmax.f32 %v612_v49, 0.0 }
 0x156   :  { %v692_v42 = vmax.f32 %v657_v35, 0.0  ;;  %v616_v44 = vpop.f32.mrf.mxu0 }
 0x157   :  { %v661_v47 = vpop.f32.mrf.mxu1  ;;  %700 = vst.msk [vmem:[%s1605_s3 + $0x18] sm:$0xff] %vm178_vm1, %v683_v40  ;;  %v617_v55 = vadd.f32 %v616_v44, %v1489_v61 }
 0x158   :  { %709 = vst.msk [vmem:[%s1605_s3 + $0x60] sm:$0xff] %vm178_vm1, %v692_v42  ;;  %v662_v48 = vadd.f32 %v661_v47, %v512_v0  ;;  %v792_v41 = vpop.f32.mrf.mxu0 }
 0x159   :  { %v819_v52 = vpop.f32.mrf.mxu1  ;;  %v684_v54 = vmax.f32 %v617_v55, 0.0 }
 0x15a   :  { %v693_v58 = vmax.f32 %v662_v48, 0.0  ;;  %v621_v59 = vpop.f32.mrf.mxu0 }
 0x15b   :  { %v666_v60 = vpop.f32.mrf.mxu1  ;;  %701 = vst.msk [vmem:[%s1605_s3 + $0x20] sm:$0xff] %vm178_vm1, %v684_v54  ;;  %v622_v61 = vadd.f32 %v621_v59, %v1492_v4 }
 0x15c   :  { %710 = vst.msk [vmem:[%s1605_s3 + $0x68] sm:$0xff] %vm178_vm1, %v693_v58  ;;  %v667_v46 = vadd.f32 %v666_v60, %v517_v45  ;;  %v795_v62 = vpop.f32.mrf.mxu0 }
 0x15d   :  { %v822_v63 = vpop.f32.mrf.mxu1  ;;  %v685_v2 = vmax.f32 %v622_v61, 0.0 }
 0x15e   :  { %v694_v3 = vmax.f32 %v667_v46, 0.0  ;;  %v626_v5 = vpop.f32.mrf.mxu0 }
 0x15f   :  { %v671_v6 = vpop.f32.mrf.mxu1  ;;  %702 = vst.msk [vmem:[%s1605_s3 + $0x28] sm:$0xff] %vm178_vm1, %v685_v2  ;;  %v627_v4 = vadd.f32 %v626_v5, %v1495_v10 }
 0x160   :  { %711 = vst.msk [vmem:[%s1605_s3 + $0x70] sm:$0xff] %vm178_vm1, %v694_v3  ;;  %v672_v51 = vadd.f32 %v671_v6, %v522_v50  ;;  %v798_v7 = vpop.f32.mrf.mxu0 }
 0x161   :  { %v825_v8 = vpop.f32.mrf.mxu1  ;;  %v686_v56 = vmax.f32 %v627_v4, 0.0 }
 0x162   :  { %v695_v9 = vmax.f32 %v672_v51, 0.0  ;;  %v631_v11 = vpop.f32.mrf.mxu0 }
 0x163   :  { %v676_v12 = vpop.f32.mrf.mxu1  ;;  %703 = vst.msk [vmem:[%s1605_s3 + $0x30] sm:$0xff] %vm178_vm1, %v686_v56  ;;  %v632_v10 = vadd.f32 %v631_v11, %v1498_v16 }
 0x164   :  { %712 = vst.msk [vmem:[%s1605_s3 + $0x78] sm:$0xff] %vm178_vm1, %v695_v9  ;;  %v677_v13 = vadd.f32 %v676_v12, %v527_v32  ;;  %v801_v38 = vpop.f32.mrf.mxu0 }
 0x165   :  { %v828_v57 = vpop.f32.mrf.mxu1  ;;  %v687_v14 = vmax.f32 %v632_v10, 0.0 }
 0x166   :  { %v696_v15 = vmax.f32 %v677_v13, 0.0  ;;  %v636_v17 = vpop.f32.mrf.mxu0 }
 0x167   :  { %704 = vst.msk [vmem:[%s1605_s3 + $0x38] sm:$0xff] %vm178_vm1, %v687_v14  ;;  %v637_v18 = vadd.f32 %v636_v17, %v1501_v22 }
 0x168   :  { %714 = vst.msk [vmem:[%s1605_s3 + $0x80] sm:$0xf] %vm713_vm2, %v696_v15  ;;  %v804_v19 = vpop.f32.mrf.mxu0 }
 0x169   :  { %v688_v16 = vmax.f32 %v637_v18, 0.0 }
 0x16b   :  { %705 = vst.msk [vmem:[%s1605_s3 + $0x40] sm:$0xff] %vm178_vm1, %v688_v16 }

// kernel: dqn_paper_forward.7
= control target key start
LH: loop header
LB: loop body
LE: loop exit
PB: predicated region body
PF: predicated region fallthrough
CT: control target
= control target key end

     0   :  { %v11152_v36 = vmov 1983009808   ;;  %v44_v38 = vlaneseq  ;;  %s14839_s0 = inlined_call_operand.vmem [shape: f32[2,4224], index: 0, kind: input, shape index: {}]   ;;  %s14840_s1 = inlined_call_operand.vmem [shape: bf16[4224,512], index: 1, kind: input, shape index: {}]   ;;  %s14841_s2 = inlined_call_operand.vmem [shape: f32[1,512], index: 2, kind: input, shape index: {}]   ;;  %s14842_s3 = inlined_call_operand.vmem [shape: bf16[512,6], index: 3, kind: input, shape index: {}]   ;;  %s14843_s4 = inlined_call_operand.vmem [shape: f32[1,6], index: 4, kind: input, shape index: {}]   ;;  %s14844_s5 = inlined_call_operand.hbm [shape: f32[2,6], index: 5, kind: output, shape index: {}]  }
   0x1   :  { %v9505_v0 = vld [vmem:[%s14840_s1 + $0xe4] ss:$16 sps:$4 sm:$0xff]   ;;  %v9509_v2 = vld [vmem:[%s14840_s1 + $0xe0] ss:$16 sps:$4 sm:$0xff]   ;;  %v42_v37 = vunpack.c.l.s4 %v11152_v36 }
   0x2   :  { %v9507_v1 = vld [vmem:[%s14840_s1 + $0x2e4] ss:$16 sps:$4 sm:$0xff]   ;;  %6607 = vmatprep.subr.bf16.mxu0 %v9505_v0  ;;  %v9510_v3 = vld [vmem:[%s14840_s1 + $0x2e0] ss:$16 sps:$4 sm:$0xff]   ;;  %v11302_v43 = vshrl.u32 %v44_v38, 7 }
   0x3   :  { %6648 = vmatprep.subr.bf16.mxu1 %v9507_v1  ;;  %v9511_v4 = vld [vmem:[%s14840_s1 + $0xc4] ss:$16 sps:$4 sm:$0xff]   ;;  %6608 = vmatpush1.bf16.msra.mxu0 %v9509_v2  ;;  %v9515_v6 = vld [vmem:[%s14840_s1 + $0xc0] ss:$16 sps:$4 sm:$0xff]   ;;  %v43_v42 = vunpack.c.0.s8 %v42_v37 }
   0x4   :  { %6649 = vmatpush1.bf16.msra.mxu1 %v9510_v3  ;;  %v9513_v5 = vld [vmem:[%s14840_s1 + $0x2c4] ss:$16 sps:$4 sm:$0xff]   ;;  %6609 = vmatprep.subr.bf16.mxu0 %v9511_v4  ;;  %v9516_v7 = vld [vmem:[%s14840_s1 + $0x2c0] ss:$16 sps:$4 sm:$0xff]  }
   0x5   :  { %6650 = vmatprep.subr.bf16.mxu1 %v9513_v5  ;;  %v9517_v8 = vld [vmem:[%s14840_s1 + $0xa4] ss:$16 sps:$4 sm:$0xff]   ;;  %v9521_v10 = vld [vmem:[%s14840_s1 + $0xa0] ss:$16 sps:$4 sm:$0xff]   ;;  %v11320_v49 = vsub.s32 %v43_v42, %v11302_v43  ;;  %v23_v42 = vld [vmem:[%s14839_s0 + $0x8] sm:$0xff] }
   0x6   :  { %v9519_v9 = vld [vmem:[%s14840_s1 + $0x2a4] ss:$16 sps:$4 sm:$0xff]   ;;  %v9522_v11 = vld [vmem:[%s14840_s1 + $0x2a0] ss:$16 sps:$4 sm:$0xff]  }
   0x7   :  { %6610 = vmatpush1.bf16.msra.mxu0 %v9515_v6  ;;  %v9523_v12 = vld [vmem:[%s14840_s1 + $0x84] ss:$16 sps:$4 sm:$0xff]   ;;  %v9527_v14 = vld [vmem:[%s14840_s1 + $0x80] ss:$16 sps:$4 sm:$0xff]  }
   0x8   :  { %6651 = vmatpush1.bf16.msra.mxu1 %v9516_v7  ;;  %6611 = vmatprep.subr.bf16.mxu0 %v9517_v8  ;;  %v9525_v13 = vld [vmem:[%s14840_s1 + $0x284] ss:$16 sps:$4 sm:$0xff]   ;;  %v9528_v15 = vld [vmem:[%s14840_s1 + $0x280] ss:$16 sps:$4 sm:$0xff]  }
   0x9   :  { %6652 = vmatprep.subr.bf16.mxu1 %v9519_v9  ;;  %v9529_v16 = vld [vmem:[%s14840_s1 + $0x64] ss:$16 sps:$4 sm:$0xff]   ;;  %v9533_v18 = vld [vmem:[%s14840_s1 + $0x60] ss:$16 sps:$4 sm:$0xff]  }
   0xa   :  { %v9531_v17 = vld [vmem:[%s14840_s1 + $0x264] ss:$16 sps:$4 sm:$0xff]   ;;  %v9534_v19 = vld [vmem:[%s14840_s1 + $0x260] ss:$16 sps:$4 sm:$0xff]  }
   0xb   :  { %6612 = vmatpush1.bf16.msra.mxu0 %v9521_v10  ;;  %v9535_v20 = vld [vmem:[%s14840_s1 + $0x44] ss:$16 sps:$4 sm:$0xff]   ;;  %v9539_v22 = vld [vmem:[%s14840_s1 + $0x40] ss:$16 sps:$4 sm:$0xff]  }
   0xc   :  { %6653 = vmatpush1.bf16.msra.mxu1 %v9522_v11  ;;  %6613 = vmatprep.subr.bf16.mxu0 %v9523_v12  ;;  %v9537_v21 = vld [vmem:[%s14840_s1 + $0x244] ss:$16 sps:$4 sm:$0xff]   ;;  %v9540_v23 = vld [vmem:[%s14840_s1 + $0x240] ss:$16 sps:$4 sm:$0xff]  }
   0xd   :  { %6654 = vmatprep.subr.bf16.mxu1 %v9525_v13  ;;  %v9541_v24 = vld [vmem:[%s14840_s1 + $0x24] ss:$16 sps:$4 sm:$0xff]   ;;  %v9545_v26 = vld [vmem:[%s14840_s1 + $0x20] ss:$16 sps:$4 sm:$0xff]  }
   0xe   :  { %v9543_v25 = vld [vmem:[%s14840_s1 + $0x224] ss:$16 sps:$4 sm:$0xff]   ;;  %v9546_v27 = vld [vmem:[%s14840_s1 + $0x220] ss:$16 sps:$4 sm:$0xff]  }
   0xf   :  { %6614 = vmatpush1.bf16.msra.mxu0 %v9527_v14  ;;  %v9547_v28 = vld [vmem:[%s14840_s1 + $0x4] ss:$16 sps:$4 sm:$0xff]   ;;  %v9551_v30 = vld [vmem:[%s14840_s1] ss:$16 sps:$4 sm:$0xff]  }
  0x10   :  { %6655 = vmatpush1.bf16.msra.mxu1 %v9528_v15  ;;  %6615 = vmatprep.subr.bf16.mxu0 %v9529_v16  ;;  %v9549_v29 = vld [vmem:[%s14840_s1 + $0x204] ss:$16 sps:$4 sm:$0xff]   ;;  %v9552_v31 = vld [vmem:[%s14840_s1 + $0x200] ss:$16 sps:$4 sm:$0xff]  }
  0x11   :  { %6656 = vmatprep.subr.bf16.mxu1 %v9531_v17  ;;  %v9553_v32 = vld [vmem:[%s14840_s1 + $0x1e4] ss:$16 sps:$4 sm:$0xff]   ;;  %v9557_v34 = vld [vmem:[%s14840_s1 + $0x1e0] ss:$16 sps:$4 sm:$0xff]  }
  0x12   :  { %v9555_v33 = vld [vmem:[%s14840_s1 + $0x3e4] ss:$16 sps:$4 sm:$0xff]   ;;  %v9558_v35 = vld [vmem:[%s14840_s1 + $0x3e0] ss:$16 sps:$4 sm:$0xff]  }
  0x13   :  { %6616 = vmatpush1.bf16.msra.mxu0 %v9533_v18  ;;  %v9559_v39 = vld [vmem:[%s14840_s1 + $0x1c4] ss:$16 sps:$4 sm:$0xff]   ;;  %v9563_v41 = vld [vmem:[%s14840_s1 + $0x1c0] ss:$16 sps:$4 sm:$0xff]  }
  0x14   :  { %6657 = vmatpush1.bf16.msra.mxu1 %v9534_v19  ;;  %6617 = vmatprep.subr.bf16.mxu0 %v9535_v20  ;;  %v9561_v40 = vld [vmem:[%s14840_s1 + $0x3c4] ss:$16 sps:$4 sm:$0xff]   ;;  %v9564_v44 = vld [vmem:[%s14840_s1 + $0x3c0] ss:$16 sps:$4 sm:$0xff]  }
  0x15   :  { %6658 = vmatprep.subr.bf16.mxu1 %v9537_v21  ;;  %v9565_v45 = vld [vmem:[%s14840_s1 + $0x1a4] ss:$16 sps:$4 sm:$0xff]   ;;  %v9569_v47 = vld [vmem:[%s14840_s1 + $0x1a0] ss:$16 sps:$4 sm:$0xff]  }
  0x16   :  { %v9567_v46 = vld [vmem:[%s14840_s1 + $0x3a4] ss:$16 sps:$4 sm:$0xff]   ;;  %v9570_v48 = vld [vmem:[%s14840_s1 + $0x3a0] ss:$16 sps:$4 sm:$0xff]  }
  0x17   :  { %6618 = vmatpush1.bf16.msra.mxu0 %v9539_v22  ;;  %v9571_v50 = vld [vmem:[%s14840_s1 + $0x184] ss:$16 sps:$4 sm:$0xff]   ;;  %v9575_v53 = vld [vmem:[%s14840_s1 + $0x180] ss:$16 sps:$4 sm:$0xff]  }
  0x18   :  { %6659 = vmatpush1.bf16.msra.mxu1 %v9540_v23  ;;  %6619 = vmatprep.subr.bf16.mxu0 %v9541_v24  ;;  %v9573_v51 = vld [vmem:[%s14840_s1 + $0x384] ss:$16 sps:$4 sm:$0xff]   ;;  %v9576_v56 = vld [vmem:[%s14840_s1 + $0x380] ss:$16 sps:$4 sm:$0xff]  }
  0x19   :  { %6660 = vmatprep.subr.bf16.mxu1 %v9543_v25  ;;  %v22_v52 = vld [vmem:[%s14839_s0] sm:$0xff] }
  0x1a   :  { %v47_v54 = vrot.slane %v22_v52, %v11320_v49  ;;  %v40_v55 = vcombine.high %v22_v52, %v22_v52  ;;  %v9577_v57 = vld [vmem:[%s14840_s1 + $0x164] ss:$16 sps:$4 sm:$0xff]   ;;  %v9581_v61 = vld [vmem:[%s14840_s1 + $0x160] ss:$16 sps:$4 sm:$0xff]  }
  0x1b   :  { %6620 = vmatpush1.bf16.msra.mxu0 %v9545_v26  ;;  %v9579_v58 = vld [vmem:[%s14840_s1 + $0x364] ss:$16 sps:$4 sm:$0xff]   ;;  %v9582_v0 = vld [vmem:[%s14840_s1 + $0x360] ss:$16 sps:$4 sm:$0xff]  }
  0x1c   :  { %6661 = vmatpush1.bf16.msra.mxu1 %v9546_v27  ;;  %6621 = vmatprep.subr.bf16.mxu0 %v9547_v28  ;;  %v55_v59 = vcombine.high %v47_v54, %v47_v54  ;;  %v54_v60 = vrot.slane %v40_v55, %v11320_v49  ;;  %v9583_v1 = vld [vmem:[%s14840_s1 + $0x144] ss:$16 sps:$4 sm:$0xff]   ;;  %v9587_v4 = vld [vmem:[%s14840_s1 + $0x140] ss:$16 sps:$4 sm:$0xff]   ;;  %v11399_v16 = vpack.c.bf16 %v47_v54, %v47_v54 }
  0x1d   :  { %6662 = vmatprep.subr.bf16.mxu1 %v9549_v29  ;;  %v9585_v2 = vld [vmem:[%s14840_s1 + $0x344] ss:$16 sps:$4 sm:$0xff]   ;;  %v9588_v5 = vld [vmem:[%s14840_s1 + $0x340] ss:$16 sps:$4 sm:$0xff]  }
  0x1e   :  { %v11348_v62 = vpack.c.bf16 %v55_v59, %v55_v59  ;;  %v56_v63 = vcombine.high %v54_v60, %v54_v60  ;;  %v9589_v6 = vld [vmem:[%s14840_s1 + $0x124] ss:$16 sps:$4 sm:$0xff]   ;;  %v9593_v8 = vld [vmem:[%s14840_s1 + $0x120] ss:$16 sps:$4 sm:$0xff]   ;;  %v11401_v17 = vpack.c.bf16 %v54_v60, %v54_v60 }
  0x1f   :  { %6622 = vmatpush1.bf16.msra.mxu0 %v9551_v30  ;;  %v9591_v7 = vld [vmem:[%s14840_s1 + $0x324] ss:$16 sps:$4 sm:$0xff]   ;;  %v9594_v9 = vld [vmem:[%s14840_s1 + $0x320] ss:$16 sps:$4 sm:$0xff]  }
  0x20   :  { %6663 = vmatpush1.bf16.msra.mxu1 %v9552_v31  ;;  %6623 = vmatprep.subr.bf16.mxu0 %v9553_v32  ;;  %v11359_v3 = vpack.c.bf16 %v56_v63, %v56_v63  ;;  %v9595_v10 = vld [vmem:[%s14840_s1 + $0x104] ss:$16 sps:$4 sm:$0xff]   ;;  %v9599_v12 = vld [vmem:[%s14840_s1 + $0x100] ss:$16 sps:$4 sm:$0xff]  }
  0x21   :  { %6664 = vmatprep.subr.bf16.mxu1 %v9555_v33  ;;  %6639 = vmatprep.mubr.bf16.mxu0 %v11348_v62  ;;  %v9597_v11 = vld [vmem:[%s14840_s1 + $0x304] ss:$16 sps:$4 sm:$0xff]   ;;  %v9600_v13 = vld [vmem:[%s14840_s1 + $0x300] ss:$16 sps:$4 sm:$0xff]  }
  0x22   :  { %6680 = vmatprep.mubr.bf16.mxu1 %v11359_v3  ;;  %v9604_v14 = vld [vmem:[%s14840_s1 + $0x4e4] ss:$16 sps:$4 sm:$0xff]   ;;  %v9602_v18 = vld [vmem:[%s14840_s1 + $0x4e0] ss:$16 sps:$4 sm:$0xff]  }
  0x23   :  { %6624 = vmatpush2.bf16.msra.mxu0 %v9557_v34  ;;  %v9607_v15 = vld [vmem:[%s14840_s1 + $0x6e4] ss:$16 sps:$4 sm:$0xff]   ;;  %v9605_v19 = vld [vmem:[%s14840_s1 + $0x6e0] ss:$16 sps:$4 sm:$0xff]  }
  0x24   :  { %6665 = vmatpush2.bf16.msra.mxu1 %v9558_v35  ;;  %6625 = vmatprep.subr.bf16.mxu0 %v9559_v39  ;;  %v9610_v20 = vld [vmem:[%s14840_s1 + $0x4c4] ss:$16 sps:$4 sm:$0xff]   ;;  %v9608_v22 = vld [vmem:[%s14840_s1 + $0x4c0] ss:$16 sps:$4 sm:$0xff]  }
  0x25   :  { %6666 = vmatprep.subr.bf16.mxu1 %v9561_v40  ;;  %v9613_v21 = vld [vmem:[%s14840_s1 + $0x6c4] ss:$16 sps:$4 sm:$0xff]   ;;  %v9611_v23 = vld [vmem:[%s14840_s1 + $0x6c0] ss:$16 sps:$4 sm:$0xff]  }
  0x26   :  { %v9616_v24 = vld [vmem:[%s14840_s1 + $0x4a4] ss:$16 sps:$4 sm:$0xff]   ;;  %v9614_v26 = vld [vmem:[%s14840_s1 + $0x4a0] ss:$16 sps:$4 sm:$0xff]  }
  0x27   :  { %6626 = vmatpush2.bf16.msra.mxu0 %v9563_v41  ;;  %v9619_v25 = vld [vmem:[%s14840_s1 + $0x6a4] ss:$16 sps:$4 sm:$0xff]   ;;  %v9617_v27 = vld [vmem:[%s14840_s1 + $0x6a0] ss:$16 sps:$4 sm:$0xff]  }
  0x28   :  { %6667 = vmatpush2.bf16.msra.mxu1 %v9564_v44  ;;  %6627 = vmatprep.subr.bf16.mxu0 %v9565_v45  ;;  %v9622_v28 = vld [vmem:[%s14840_s1 + $0x484] ss:$16 sps:$4 sm:$0xff]   ;;  %v9620_v30 = vld [vmem:[%s14840_s1 + $0x480] ss:$16 sps:$4 sm:$0xff]   ;;  %v11481_v44 = vrot.slane %v23_v42, %v11320_v49  ;;  %v57_v45 = vcombine.high %v23_v42, %v23_v42 }
  0x29   :  { %6668 = vmatprep.subr.bf16.mxu1 %v9567_v46  ;;  %v9625_v29 = vld [vmem:[%s14840_s1 + $0x684] ss:$16 sps:$4 sm:$0xff]   ;;  %v9623_v31 = vld [vmem:[%s14840_s1 + $0x680] ss:$16 sps:$4 sm:$0xff]  }
  0x2a   :  { %v9628_v32 = vld [vmem:[%s14840_s1 + $0x464] ss:$16 sps:$4 sm:$0xff]   ;;  %v9626_v34 = vld [vmem:[%s14840_s1 + $0x460] ss:$16 sps:$4 sm:$0xff]  }
  0x2b   :  { %6628 = vmatpush2.bf16.msra.mxu0 %v9569_v47  ;;  %v9631_v33 = vld [vmem:[%s14840_s1 + $0x664] ss:$16 sps:$4 sm:$0xff]   ;;  %v9629_v35 = vld [vmem:[%s14840_s1 + $0x660] ss:$16 sps:$4 sm:$0xff]  }
  0x2c   :  { %6669 = vmatpush2.bf16.msra.mxu1 %v9570_v48  ;;  %6629 = vmatprep.subr.bf16.mxu0 %v9571_v50  ;;  %v9634_v36 = vld [vmem:[%s14840_s1 + $0x444] ss:$16 sps:$4 sm:$0xff]   ;;  %v9632_v38 = vld [vmem:[%s14840_s1 + $0x440] ss:$16 sps:$4 sm:$0xff]   ;;  %v72_v48 = vcombine.high %v11481_v44, %v11481_v44  ;;  %v11492_v50 = vrot.slane %v57_v45, %v11320_v49 }
  0x2d   :  { %6670 = vmatprep.subr.bf16.mxu1 %v9573_v51  ;;  %v9637_v37 = vld [vmem:[%s14840_s1 + $0x644] ss:$16 sps:$4 sm:$0xff]   ;;  %v9635_v39 = vld [vmem:[%s14840_s1 + $0x640] ss:$16 sps:$4 sm:$0xff]  }
  0x2e   :  { %v9640_v40 = vld [vmem:[%s14840_s1 + $0x424] ss:$16 sps:$4 sm:$0xff]   ;;  %v9638_v46 = vld [vmem:[%s14840_s1 + $0x420] ss:$16 sps:$4 sm:$0xff]   ;;  %v73_v54 = vcombine.high %v11492_v50, %v11492_v50 }
  0x2f   :  { %6630 = vmatpush2.bf16.msra.mxu0 %v9575_v53  ;;  %v9643_v41 = vld [vmem:[%s14840_s1 + $0x624] ss:$16 sps:$4 sm:$0xff]   ;;  %v9641_v47 = vld [vmem:[%s14840_s1 + $0x620] ss:$16 sps:$4 sm:$0xff]   ;;  %v11500_v53 = vpack.c.bf16 %v72_v48, %v72_v48 }
  0x30   :  { %6671 = vmatpush2.bf16.msra.mxu1 %v9576_v56  ;;  %6631 = vmatprep.subr.bf16.mxu0 %v9577_v57  ;;  %v9646_v51 = vld [vmem:[%s14840_s1 + $0x404] ss:$16 sps:$4 sm:$0xff]   ;;  %v9644_v55 = vld [vmem:[%s14840_s1 + $0x400] ss:$16 sps:$4 sm:$0xff]   ;;  %v11510_v57 = vpack.c.bf16 %v73_v54, %v73_v54 }
  0x31   :  { %6672 = vmatprep.subr.bf16.mxu1 %v9579_v58  ;;  %v9649_v52 = vld [vmem:[%s14840_s1 + $0x604] ss:$16 sps:$4 sm:$0xff]   ;;  %v9647_v56 = vld [vmem:[%s14840_s1 + $0x600] ss:$16 sps:$4 sm:$0xff]  }
  0x32   :  { %v9652_v58 = vld [vmem:[%s14840_s1 + $0x5e4] ss:$16 sps:$4 sm:$0xff]   ;;  %v9650_v60 = vld [vmem:[%s14840_s1 + $0x5e0] ss:$16 sps:$4 sm:$0xff]  }
  0x33   :  { %6632 = vmatpush2.bf16.msra.mxu0 %v9581_v61  ;;  %v9655_v59 = vld [vmem:[%s14840_s1 + $0x7e4] ss:$16 sps:$4 sm:$0xff]   ;;  %v9653_v61 = vld [vmem:[%s14840_s1 + $0x7e0] ss:$16 sps:$4 sm:$0xff]  }
  0x34   :  { %6673 = vmatpush2.bf16.msra.mxu1 %v9582_v0  ;;  %6633 = vmatprep.subr.bf16.mxu0 %v9583_v1  ;;  %v9658_v63 = vld [vmem:[%s14840_s1 + $0x5c4] ss:$16 sps:$4 sm:$0xff]   ;;  %v9656_v1 = vld [vmem:[%s14840_s1 + $0x5c0] ss:$16 sps:$4 sm:$0xff]  }
  0x35   :  { %6674 = vmatprep.subr.bf16.mxu1 %v9585_v2  ;;  %v9661_v0 = vld [vmem:[%s14840_s1 + $0x7c4] ss:$16 sps:$4 sm:$0xff]   ;;  %v9659_v2 = vld [vmem:[%s14840_s1 + $0x7c0] ss:$16 sps:$4 sm:$0xff]  }
  0x36   :  { %v9708_v45 = vld [vmem:[%s14840_s1 + $0xac0] ss:$16 sps:$4 sm:$0xff]  }
  0x37   :  { %6634 = vmatpush2.bf16.msra.mxu0 %v9587_v4  ;;  %v9664_v4 = vld [vmem:[%s14840_s1 + $0x5a4] ss:$16 sps:$4 sm:$0xff]   ;;  %v9714_v54 = vld [vmem:[%s14840_s1 + $0xaa0] ss:$16 sps:$4 sm:$0xff]  }
  0x38   :  { %6675 = vmatpush2.bf16.msra.mxu1 %v9588_v5  ;;  %6635 = vmatprep.subr.bf16.mxu0 %v9589_v6  ;;  %v9667_v5 = vld [vmem:[%s14840_s1 + $0x7a4] ss:$16 sps:$4 sm:$0xff]   ;;  %v9662_v6 = vld [vmem:[%s14840_s1 + $0x5a0] ss:$16 sps:$4 sm:$0xff]  }
  0x39   :  { %6676 = vmatprep.subr.bf16.mxu1 %v9591_v7  ;;  %v9665_v7 = vld [vmem:[%s14840_s1 + $0x7a0] ss:$16 sps:$4 sm:$0xff]  }
  0x3b   :  { %6636 = vmatpush2.bf16.msra.mxu0 %v9593_v8  ;;  %v9670_v8 = vld [vmem:[%s14840_s1 + $0x584] ss:$16 sps:$4 sm:$0xff]  }
  0x3c   :  { %6677 = vmatpush2.bf16.msra.mxu1 %v9594_v9  ;;  %6637 = vmatprep.subr.bf16.mxu0 %v9595_v10  ;;  %v9673_v9 = vld [vmem:[%s14840_s1 + $0x784] ss:$16 sps:$4 sm:$0xff]   ;;  %v9668_v10 = vld [vmem:[%s14840_s1 + $0x580] ss:$16 sps:$4 sm:$0xff]  }
  0x3d   :  { %6678 = vmatprep.subr.bf16.mxu1 %v9597_v11  ;;  %v9671_v11 = vld [vmem:[%s14840_s1 + $0x780] ss:$16 sps:$4 sm:$0xff]  }
  0x3f   :  { %6638 = vmatpush2.bf16.msra.mxu0 %v9599_v12  ;;  %v9676_v12 = vld [vmem:[%s14840_s1 + $0x564] ss:$16 sps:$4 sm:$0xff]  }
  0x40   :  { %6679 = vmatpush2.bf16.msra.mxu1 %v9600_v13  ;;  %6689 = vmatprep.subr.bf16.mxu0 %v9604_v14  ;;  %v9679_v13 = vld [vmem:[%s14840_s1 + $0x764] ss:$16 sps:$4 sm:$0xff]   ;;  %v9674_v14 = vld [vmem:[%s14840_s1 + $0x560] ss:$16 sps:$4 sm:$0xff]  }
  0x41   :  { %6730 = vmatprep.subr.bf16.mxu1 %v9607_v15  ;;  %v9677_v15 = vld [vmem:[%s14840_s1 + $0x760] ss:$16 sps:$4 sm:$0xff]  }
  0x42   :  { %6640 = vmatmul.mubr.bf16.vlgmr.msra.gmra.mxu0 %v11399_v16 }
  0x43   :  { %6681 = vmatmul.mubr.bf16.vlgmr.msra.gmra.mxu1 %v11401_v17  ;;  %6690 = vmatpush1.bf16.msra.mxu0 %v9602_v18  ;;  %v9682_v18 = vld [vmem:[%s14840_s1 + $0x544] ss:$16 sps:$4 sm:$0xff]  }
  0x44   :  { %6731 = vmatpush1.bf16.msra.mxu1 %v9605_v19  ;;  %6691 = vmatprep.subr.bf16.mxu0 %v9610_v20  ;;  %v9685_v19 = vld [vmem:[%s14840_s1 + $0x744] ss:$16 sps:$4 sm:$0xff]   ;;  %v9680_v20 = vld [vmem:[%s14840_s1 + $0x540] ss:$16 sps:$4 sm:$0xff]  }
  0x45   :  { %6732 = vmatprep.subr.bf16.mxu1 %v9613_v21  ;;  %6721 = vmatprep.mubr.bf16.mxu0 %v11500_v53  ;;  %v9683_v21 = vld [vmem:[%s14840_s1 + $0x740] ss:$16 sps:$4 sm:$0xff]  }
  0x46   :  { %6762 = vmatprep.mubr.bf16.mxu1 %v11510_v57 }
  0x47   :  { %6692 = vmatpush1.bf16.msra.mxu0 %v9608_v22  ;;  %v9688_v22 = vld [vmem:[%s14840_s1 + $0x524] ss:$16 sps:$4 sm:$0xff]  }
  0x48   :  { %6733 = vmatpush1.bf16.msra.mxu1 %v9611_v23  ;;  %6693 = vmatprep.subr.bf16.mxu0 %v9616_v24  ;;  %v9691_v23 = vld [vmem:[%s14840_s1 + $0x724] ss:$16 sps:$4 sm:$0xff]   ;;  %v9686_v24 = vld [vmem:[%s14840_s1 + $0x520] ss:$16 sps:$4 sm:$0xff]  }
  0x49   :  { %6734 = vmatprep.subr.bf16.mxu1 %v9619_v25  ;;  %v9689_v25 = vld [vmem:[%s14840_s1 + $0x720] ss:$16 sps:$4 sm:$0xff]  }
  0x4b   :  { %6694 = vmatpush1.bf16.msra.mxu0 %v9614_v26  ;;  %v9694_v26 = vld [vmem:[%s14840_s1 + $0x504] ss:$16 sps:$4 sm:$0xff]  }
  0x4c   :  { %6735 = vmatpush1.bf16.msra.mxu1 %v9617_v27  ;;  %6695 = vmatprep.subr.bf16.mxu0 %v9622_v28  ;;  %v9697_v27 = vld [vmem:[%s14840_s1 + $0x704] ss:$16 sps:$4 sm:$0xff]   ;;  %v9692_v28 = vld [vmem:[%s14840_s1 + $0x500] ss:$16 sps:$4 sm:$0xff]  }
  0x4d   :  { %6736 = vmatprep.subr.bf16.mxu1 %v9625_v29  ;;  %v9695_v29 = vld [vmem:[%s14840_s1 + $0x700] ss:$16 sps:$4 sm:$0xff]  }
  0x4f   :  { %6696 = vmatpush1.bf16.msra.mxu0 %v9620_v30  ;;  %v9701_v30 = vld [vmem:[%s14840_s1 + $0x8e4] ss:$16 sps:$4 sm:$0xff]  }
  0x50   :  { %6737 = vmatpush1.bf16.msra.mxu1 %v9623_v31  ;;  %6697 = vmatprep.subr.bf16.mxu0 %v9628_v32  ;;  %v9704_v31 = vld [vmem:[%s14840_s1 + $0xae4] ss:$16 sps:$4 sm:$0xff]   ;;  %v11618_v32 = vpack.c.bf16 %v11481_v44, %v11481_v44 }
  0x51   :  { %6738 = vmatprep.subr.bf16.mxu1 %v9631_v33  ;;  %v11622_v33 = vpack.c.bf16 %v11492_v50, %v11492_v50 }
  0x53   :  { %6698 = vmatpush1.bf16.msra.mxu0 %v9626_v34  ;;  %v9699_v34 = vld [vmem:[%s14840_s1 + $0x8e0] ss:$16 sps:$4 sm:$0xff]  }
  0x54   :  { %6739 = vmatpush1.bf16.msra.mxu1 %v9629_v35  ;;  %6699 = vmatprep.subr.bf16.mxu0 %v9634_v36  ;;  %v9702_v35 = vld [vmem:[%s14840_s1 + $0xae0] ss:$16 sps:$4 sm:$0xff]   ;;  %v9707_v36 = vld [vmem:[%s14840_s1 + $0x8c4] ss:$16 sps:$4 sm:$0xff]  }
  0x55   :  { %6740 = vmatprep.subr.bf16.mxu1 %v9637_v37  ;;  %v24_v37 = vld [vmem:[%s14839_s0 + $0x10] sm:$0xff] }
  0x57   :  { %6700 = vmatpush1.bf16.msra.mxu0 %v9632_v38  ;;  %v9710_v38 = vld [vmem:[%s14840_s1 + $0xac4] ss:$16 sps:$4 sm:$0xff]  }
  0x58   :  { %6741 = vmatpush1.bf16.msra.mxu1 %v9635_v39  ;;  %6701 = vmatprep.subr.bf16.mxu0 %v9640_v40  ;;  %v11640_v39 = vrot.slane %v24_v37, %v11320_v49  ;;  %v74_v40 = vcombine.high %v24_v37, %v24_v37  ;;  %v9774_v37 = vld [vmem:[%s14840_s1 + $0xb60] ss:$16 sps:$4 sm:$0xff]  }
  0x59   :  { %6742 = vmatprep.subr.bf16.mxu1 %v9643_v41  ;;  %v9705_v41 = vld [vmem:[%s14840_s1 + $0x8c0] ss:$16 sps:$4 sm:$0xff]  }
  0x5a   :  { %v89_v42 = vcombine.high %v11640_v39, %v11640_v39  ;;  %v11650_v44 = vrot.slane %v74_v40, %v11320_v49  ;;  %v9782_v40 = vld [vmem:[%s14840_s1 + $0xb44] ss:$16 sps:$4 sm:$0xff]  }
  0x5b   :  { %6702 = vmatpush1.bf16.msra.mxu0 %v9638_v46  ;;  %v9713_v46 = vld [vmem:[%s14840_s1 + $0x8a4] ss:$16 sps:$4 sm:$0xff]  }
  0x5c   :  { %6743 = vmatpush1.bf16.msra.mxu1 %v9641_v47  ;;  %6703 = vmatprep.subr.bf16.mxu0 %v9646_v51  ;;  %v9716_v47 = vld [vmem:[%s14840_s1 + $0xaa4] ss:$16 sps:$4 sm:$0xff]   ;;  %v11661_v48 = vpack.c.bf16 %v89_v42, %v89_v42  ;;  %v90_v50 = vcombine.high %v11650_v44, %v11650_v44  ;;  %v9711_v51 = vld [vmem:[%s14840_s1 + $0x8a0] ss:$16 sps:$4 sm:$0xff]   ;;  %v25_v42 = vld [vmem:[%s14839_s0 + $0x18] sm:$0xff] }
  0x5d   :  { %6744 = vmatprep.subr.bf16.mxu1 %v9649_v52 }
  0x5e   :  { %v11669_v52 = vpack.c.bf16 %v90_v50, %v90_v50  ;;  %v91_v50 = vcombine.high %v25_v42, %v25_v42 }
  0x5f   :  { %6704 = vmatpush1.bf16.msra.mxu0 %v9644_v55  ;;  %v9719_v55 = vld [vmem:[%s14840_s1 + $0x884] ss:$16 sps:$4 sm:$0xff]  }
  0x60   :  { %6745 = vmatpush1.bf16.msra.mxu1 %v9647_v56  ;;  %6705 = vmatprep.subr.bf16.mxu0 %v9652_v58  ;;  %v9722_v56 = vld [vmem:[%s14840_s1 + $0xa84] ss:$16 sps:$4 sm:$0xff]   ;;  %v9717_v58 = vld [vmem:[%s14840_s1 + $0x880] ss:$16 sps:$4 sm:$0xff]  }
  0x61   :  { %6746 = vmatprep.subr.bf16.mxu1 %v9655_v59  ;;  %v9720_v59 = vld [vmem:[%s14840_s1 + $0xa80] ss:$16 sps:$4 sm:$0xff]  }
  0x63   :  { %6706 = vmatpush2.bf16.msra.mxu0 %v9650_v60  ;;  %v9725_v60 = vld [vmem:[%s14840_s1 + $0x864] ss:$16 sps:$4 sm:$0xff]  }
  0x64   :  { %6747 = vmatpush2.bf16.msra.mxu1 %v9653_v61  ;;  %6707 = vmatprep.subr.bf16.mxu0 %v9658_v63  ;;  %v9728_v61 = vld [vmem:[%s14840_s1 + $0xa64] ss:$16 sps:$4 sm:$0xff]   ;;  %v9723_v63 = vld [vmem:[%s14840_s1 + $0x860] ss:$16 sps:$4 sm:$0xff]  }
  0x65   :  { %6748 = vmatprep.subr.bf16.mxu1 %v9661_v0  ;;  %v9726_v0 = vld [vmem:[%s14840_s1 + $0xa60] ss:$16 sps:$4 sm:$0xff]  }
  0x67   :  { %6708 = vmatpush2.bf16.msra.mxu0 %v9656_v1  ;;  %v9731_v1 = vld [vmem:[%s14840_s1 + $0x844] ss:$16 sps:$4 sm:$0xff]  }
  0x68   :  { %6749 = vmatpush2.bf16.msra.mxu1 %v9659_v2  ;;  %6709 = vmatprep.subr.bf16.mxu0 %v9664_v4  ;;  %v9734_v2 = vld [vmem:[%s14840_s1 + $0xa44] ss:$16 sps:$4 sm:$0xff]   ;;  %v9729_v4 = vld [vmem:[%s14840_s1 + $0x840] ss:$16 sps:$4 sm:$0xff]  }
  0x69   :  { %6750 = vmatprep.subr.bf16.mxu1 %v9667_v5  ;;  %v9732_v5 = vld [vmem:[%s14840_s1 + $0xa40] ss:$16 sps:$4 sm:$0xff]  }
  0x6b   :  { %6710 = vmatpush2.bf16.msra.mxu0 %v9662_v6  ;;  %v9737_v6 = vld [vmem:[%s14840_s1 + $0x824] ss:$16 sps:$4 sm:$0xff]  }
  0x6c   :  { %6751 = vmatpush2.bf16.msra.mxu1 %v9665_v7  ;;  %6711 = vmatprep.subr.bf16.mxu0 %v9670_v8  ;;  %v9740_v7 = vld [vmem:[%s14840_s1 + $0xa24] ss:$16 sps:$4 sm:$0xff]   ;;  %v9735_v8 = vld [vmem:[%s14840_s1 + $0x820] ss:$16 sps:$4 sm:$0xff]  }
  0x6d   :  { %6752 = vmatprep.subr.bf16.mxu1 %v9673_v9  ;;  %v9738_v9 = vld [vmem:[%s14840_s1 + $0xa20] ss:$16 sps:$4 sm:$0xff]  }
  0x6f   :  { %6712 = vmatpush2.bf16.msra.mxu0 %v9668_v10  ;;  %v9743_v10 = vld [vmem:[%s14840_s1 + $0x804] ss:$16 sps:$4 sm:$0xff]  }
  0x70   :  { %6753 = vmatpush2.bf16.msra.mxu1 %v9671_v11  ;;  %6713 = vmatprep.subr.bf16.mxu0 %v9676_v12  ;;  %v9746_v11 = vld [vmem:[%s14840_s1 + $0xa04] ss:$16 sps:$4 sm:$0xff]   ;;  %v9741_v12 = vld [vmem:[%s14840_s1 + $0x800] ss:$16 sps:$4 sm:$0xff]  }
  0x71   :  { %6754 = vmatprep.subr.bf16.mxu1 %v9679_v13  ;;  %v9744_v13 = vld [vmem:[%s14840_s1 + $0xa00] ss:$16 sps:$4 sm:$0xff]  }
  0x73   :  { %6714 = vmatpush2.bf16.msra.mxu0 %v9674_v14  ;;  %v9749_v14 = vld [vmem:[%s14840_s1 + $0x9e4] ss:$16 sps:$4 sm:$0xff]  }
  0x74   :  { %6755 = vmatpush2.bf16.msra.mxu1 %v9677_v15  ;;  %6715 = vmatprep.subr.bf16.mxu0 %v9682_v18  ;;  %v9752_v15 = vld [vmem:[%s14840_s1 + $0xbe4] ss:$16 sps:$4 sm:$0xff]   ;;  %v9747_v18 = vld [vmem:[%s14840_s1 + $0x9e0] ss:$16 sps:$4 sm:$0xff]  }
  0x75   :  { %6756 = vmatprep.subr.bf16.mxu1 %v9685_v19  ;;  %v9750_v19 = vld [vmem:[%s14840_s1 + $0xbe0] ss:$16 sps:$4 sm:$0xff]  }
  0x77   :  { %6716 = vmatpush2.bf16.msra.mxu0 %v9680_v20  ;;  %v9755_v20 = vld [vmem:[%s14840_s1 + $0x9c4] ss:$16 sps:$4 sm:$0xff]  }
  0x78   :  { %6757 = vmatpush2.bf16.msra.mxu1 %v9683_v21  ;;  %6717 = vmatprep.subr.bf16.mxu0 %v9688_v22  ;;  %v9758_v21 = vld [vmem:[%s14840_s1 + $0xbc4] ss:$16 sps:$4 sm:$0xff]   ;;  %v9753_v22 = vld [vmem:[%s14840_s1 + $0x9c0] ss:$16 sps:$4 sm:$0xff]  }
  0x79   :  { %6758 = vmatprep.subr.bf16.mxu1 %v9691_v23  ;;  %v9756_v23 = vld [vmem:[%s14840_s1 + $0xbc0] ss:$16 sps:$4 sm:$0xff]  }
  0x7b   :  { %6718 = vmatpush2.bf16.msra.mxu0 %v9686_v24  ;;  %v9761_v24 = vld [vmem:[%s14840_s1 + $0x9a4] ss:$16 sps:$4 sm:$0xff]  }
  0x7c   :  { %6759 = vmatpush2.bf16.msra.mxu1 %v9689_v25  ;;  %6719 = vmatprep.subr.bf16.mxu0 %v9694_v26  ;;  %v9764_v25 = vld [vmem:[%s14840_s1 + $0xba4] ss:$16 sps:$4 sm:$0xff]   ;;  %v9759_v26 = vld [vmem:[%s14840_s1 + $0x9a0] ss:$16 sps:$4 sm:$0xff]  }
  0x7d   :  { %6760 = vmatprep.subr.bf16.mxu1 %v9697_v27  ;;  %v9762_v27 = vld [vmem:[%s14840_s1 + $0xba0] ss:$16 sps:$4 sm:$0xff]  }
  0x7f   :  { %6720 = vmatpush2.bf16.msra.mxu0 %v9692_v28  ;;  %v9767_v28 = vld [vmem:[%s14840_s1 + $0x984] ss:$16 sps:$4 sm:$0xff]  }
  0x80   :  { %6761 = vmatpush2.bf16.msra.mxu1 %v9695_v29  ;;  %6771 = vmatprep.subr.bf16.mxu0 %v9701_v30  ;;  %v9770_v29 = vld [vmem:[%s14840_s1 + $0xb84] ss:$16 sps:$4 sm:$0xff]   ;;  %v9765_v30 = vld [vmem:[%s14840_s1 + $0x980] ss:$16 sps:$4 sm:$0xff]  }
  0x81   :  { %6812 = vmatprep.subr.bf16.mxu1 %v9704_v31  ;;  %v9768_v31 = vld [vmem:[%s14840_s1 + $0xb80] ss:$16 sps:$4 sm:$0xff]  }
  0x82   :  { %6722 = vmatmul.mubr.bf16.vlgmr.msra.gmra.mxu0 %v11618_v32 }
  0x83   :  { %6763 = vmatmul.mubr.bf16.vlgmr.msra.gmra.mxu1 %v11622_v33  ;;  %6772 = vmatpush1.bf16.msra.mxu0 %v9699_v34  ;;  %v9773_v34 = vld [vmem:[%s14840_s1 + $0x964] ss:$16 sps:$4 sm:$0xff]  }
  0x84   :  { %6813 = vmatpush1.bf16.msra.mxu1 %v9702_v35  ;;  %6773 = vmatprep.subr.bf16.mxu0 %v9707_v36  ;;  %v9776_v35 = vld [vmem:[%s14840_s1 + $0xb64] ss:$16 sps:$4 sm:$0xff]   ;;  %v9771_v36 = vld [vmem:[%s14840_s1 + $0x960] ss:$16 sps:$4 sm:$0xff]  }
  0x85   :  { %6814 = vmatprep.subr.bf16.mxu1 %v9710_v38  ;;  %6803 = vmatprep.mubr.bf16.mxu0 %v11661_v48  ;;  %v9779_v38 = vld [vmem:[%s14840_s1 + $0x944] ss:$16 sps:$4 sm:$0xff]  }
  0x86   :  { %6844 = vmatprep.mubr.bf16.mxu1 %v11669_v52 }
  0x87   :  { %6774 = vmatpush1.bf16.msra.mxu0 %v9705_v41  ;;  %v9777_v41 = vld [vmem:[%s14840_s1 + $0x940] ss:$16 sps:$4 sm:$0xff]  }
  0x88   :  { %6815 = vmatpush1.bf16.msra.mxu1 %v9708_v45  ;;  %6775 = vmatprep.subr.bf16.mxu0 %v9713_v46  ;;  %v9780_v45 = vld [vmem:[%s14840_s1 + $0xb40] ss:$16 sps:$4 sm:$0xff]   ;;  %v9785_v46 = vld [vmem:[%s14840_s1 + $0x924] ss:$16 sps:$4 sm:$0xff]  }
  0x89   :  { %6816 = vmatprep.subr.bf16.mxu1 %v9716_v47  ;;  %v9788_v47 = vld [vmem:[%s14840_s1 + $0xb24] ss:$16 sps:$4 sm:$0xff]  }
  0x8b   :  { %6776 = vmatpush1.bf16.msra.mxu0 %v9711_v51  ;;  %v9783_v51 = vld [vmem:[%s14840_s1 + $0x920] ss:$16 sps:$4 sm:$0xff]  }
  0x8c   :  { %6817 = vmatpush1.bf16.msra.mxu1 %v9714_v54  ;;  %6777 = vmatprep.subr.bf16.mxu0 %v9719_v55  ;;  %v9786_v54 = vld [vmem:[%s14840_s1 + $0xb20] ss:$16 sps:$4 sm:$0xff]   ;;  %v9791_v55 = vld [vmem:[%s14840_s1 + $0x904] ss:$16 sps:$4 sm:$0xff]  }
  0x8d   :  { %6818 = vmatprep.subr.bf16.mxu1 %v9722_v56  ;;  %v9794_v56 = vld [vmem:[%s14840_s1 + $0xb04] ss:$16 sps:$4 sm:$0xff]  }
  0x8f   :  { %6778 = vmatpush1.bf16.msra.mxu0 %v9717_v58  ;;  %v11829_v58 = vrot.slane %v25_v42, %v11320_v49  ;;  %v9849_v42 = vld [vmem:[%s14840_s1 + $0xfe4] ss:$16 sps:$4 sm:$0xff]  }
  0x90   :  { %6819 = vmatpush1.bf16.msra.mxu1 %v9720_v59  ;;  %6779 = vmatprep.subr.bf16.mxu0 %v9725_v60  ;;  %v11832_v59 = vrot.slane %v91_v50, %v11320_v49  ;;  %v9789_v60 = vld [vmem:[%s14840_s1 + $0x900] ss:$16 sps:$4 sm:$0xff]   ;;  %v9855_v50 = vld [vmem:[%s14840_s1 + $0xfc4] ss:$16 sps:$4 sm:$0xff]  }
  0x91   :  { %6820 = vmatprep.subr.bf16.mxu1 %v9728_v61  ;;  %v9792_v61 = vld [vmem:[%s14840_s1 + $0xb00] ss:$16 sps:$4 sm:$0xff]  }
  0x93   :  { %6780 = vmatpush1.bf16.msra.mxu0 %v9723_v63  ;;  %v9798_v63 = vld [vmem:[%s14840_s1 + $0xce4] ss:$16 sps:$4 sm:$0xff]  }
  0x94   :  { %6821 = vmatpush1.bf16.msra.mxu1 %v9726_v0  ;;  %6781 = vmatprep.subr.bf16.mxu0 %v9731_v1  ;;  %v9801_v0 = vld [vmem:[%s14840_s1 + $0xee4] ss:$16 sps:$4 sm:$0xff]   ;;  %v106_v1 = vcombine.high %v11829_v58, %v11829_v58 }
  0x95   :  { %6822 = vmatprep.subr.bf16.mxu1 %v9734_v2  ;;  %v107_v2 = vcombine.high %v11832_v59, %v11832_v59 }
  0x97   :  { %6782 = vmatpush1.bf16.msra.mxu0 %v9729_v4  ;;  %v11852_v4 = vpack.c.bf16 %v11640_v39, %v11640_v39  ;;  %v9804_v39 = vld [vmem:[%s14840_s1 + $0xcc4] ss:$16 sps:$4 sm:$0xff]  }
  0x98   :  { %6823 = vmatpush1.bf16.msra.mxu1 %v9732_v5  ;;  %6783 = vmatprep.subr.bf16.mxu0 %v9737_v6  ;;  %v11856_v5 = vpack.c.bf16 %v11650_v44, %v11650_v44  ;;  %v9796_v6 = vld [vmem:[%s14840_s1 + $0xce0] ss:$16 sps:$4 sm:$0xff]   ;;  %v9807_v44 = vld [vmem:[%s14840_s1 + $0xec4] ss:$16 sps:$4 sm:$0xff]  }
  0x99   :  { %6824 = vmatprep.subr.bf16.mxu1 %v9740_v7  ;;  %v9799_v7 = vld [vmem:[%s14840_s1 + $0xee0] ss:$16 sps:$4 sm:$0xff]  }
  0x9b   :  { %6784 = vmatpush1.bf16.msra.mxu0 %v9735_v8  ;;  %v11870_v8 = vpack.c.bf16 %v106_v1, %v106_v1  ;;  %v9862_v1 = vld [vmem:[%s14840_s1 + $0xd80] ss:$16 sps:$4 sm:$0xff]  }
  0x9c   :  { %6825 = vmatpush1.bf16.msra.mxu1 %v9738_v9  ;;  %6785 = vmatprep.subr.bf16.mxu0 %v9743_v10  ;;  %v11872_v9 = vpack.c.bf16 %v107_v2, %v107_v2  ;;  %v9802_v10 = vld [vmem:[%s14840_s1 + $0xcc0] ss:$16 sps:$4 sm:$0xff]  }
  0x9d   :  { %6826 = vmatprep.subr.bf16.mxu1 %v9746_v11  ;;  %v9805_v11 = vld [vmem:[%s14840_s1 + $0xec0] ss:$16 sps:$4 sm:$0xff]  }
  0x9e   :  { %v9865_v2 = vld [vmem:[%s14840_s1 + $0xf80] ss:$16 sps:$4 sm:$0xff]  }
  0x9f   :  { %6786 = vmatpush1.bf16.msra.mxu0 %v9741_v12  ;;  %v9810_v12 = vld [vmem:[%s14840_s1 + $0xca4] ss:$16 sps:$4 sm:$0xff]  }
  0xa0   :  { %6827 = vmatpush1.bf16.msra.mxu1 %v9744_v13  ;;  %6787 = vmatprep.subr.bf16.mxu0 %v9749_v14  ;;  %v9813_v13 = vld [vmem:[%s14840_s1 + $0xea4] ss:$16 sps:$4 sm:$0xff]   ;;  %v9808_v14 = vld [vmem:[%s14840_s1 + $0xca0] ss:$16 sps:$4 sm:$0xff]  }
  0xa1   :  { %6828 = vmatprep.subr.bf16.mxu1 %v9752_v15  ;;  %v9811_v15 = vld [vmem:[%s14840_s1 + $0xea0] ss:$16 sps:$4 sm:$0xff]  }
  0xa3   :  { %6788 = vmatpush2.bf16.msra.mxu0 %v9747_v18  ;;  %v9816_v18 = vld [vmem:[%s14840_s1 + $0xc84] ss:$16 sps:$4 sm:$0xff]  }
  0xa4   :  { %6829 = vmatpush2.bf16.msra.mxu1 %v9750_v19  ;;  %6789 = vmatprep.subr.bf16.mxu0 %v9755_v20  ;;  %v9819_v19 = vld [vmem:[%s14840_s1 + $0xe84] ss:$16 sps:$4 sm:$0xff]   ;;  %v9814_v20 = vld [vmem:[%s14840_s1 + $0xc80] ss:$16 sps:$4 sm:$0xff]  }
  0xa5   :  { %6830 = vmatprep.subr.bf16.mxu1 %v9758_v21  ;;  %v9817_v21 = vld [vmem:[%s14840_s1 + $0xe80] ss:$16 sps:$4 sm:$0xff]  }
  0xa7   :  { %6790 = vmatpush2.bf16.msra.mxu0 %v9753_v22  ;;  %v9822_v22 = vld [vmem:[%s14840_s1 + $0xc64] ss:$16 sps:$4 sm:$0xff]  }
  0xa8   :  { %6831 = vmatpush2.bf16.msra.mxu1 %v9756_v23  ;;  %6791 = vmatprep.subr.bf16.mxu0 %v9761_v24  ;;  %v9825_v23 = vld [vmem:[%s14840_s1 + $0xe64] ss:$16 sps:$4 sm:$0xff]   ;;  %v9820_v24 = vld [vmem:[%s14840_s1 + $0xc60] ss:$16 sps:$4 sm:$0xff]  }
  0xa9   :  { %6832 = vmatprep.subr.bf16.mxu1 %v9764_v25  ;;  %v9823_v25 = vld [vmem:[%s14840_s1 + $0xe60] ss:$16 sps:$4 sm:$0xff]  }
  0xab   :  { %6792 = vmatpush2.bf16.msra.mxu0 %v9759_v26  ;;  %v9828_v26 = vld [vmem:[%s14840_s1 + $0xc44] ss:$16 sps:$4 sm:$0xff]  }
  0xac   :  { %6833 = vmatpush2.bf16.msra.mxu1 %v9762_v27  ;;  %6793 = vmatprep.subr.bf16.mxu0 %v9767_v28  ;;  %v9831_v27 = vld [vmem:[%s14840_s1 + $0xe44] ss:$16 sps:$4 sm:$0xff]   ;;  %v9826_v28 = vld [vmem:[%s14840_s1 + $0xc40] ss:$16 sps:$4 sm:$0xff]  }
  0xad   :  { %6834 = vmatprep.subr.bf16.mxu1 %v9770_v29  ;;  %v9829_v29 = vld [vmem:[%s14840_s1 + $0xe40] ss:$16 sps:$4 sm:$0xff]  }
  0xaf   :  { %6794 = vmatpush2.bf16.msra.mxu0 %v9765_v30  ;;  %v9834_v30 = vld [vmem:[%s14840_s1 + $0xc24] ss:$16 sps:$4 sm:$0xff]  }
  0xb0   :  { %6835 = vmatpush2.bf16.msra.mxu1 %v9768_v31  ;;  %6795 = vmatprep.subr.bf16.mxu0 %v9773_v34  ;;  %v9837_v31 = vld [vmem:[%s14840_s1 + $0xe24] ss:$16 sps:$4 sm:$0xff]   ;;  %v9832_v34 = vld [vmem:[%s14840_s1 + $0xc20] ss:$16 sps:$4 sm:$0xff]  }
  0xb1   :  { %6836 = vmatprep.subr.bf16.mxu1 %v9776_v35  ;;  %v9835_v35 = vld [vmem:[%s14840_s1 + $0xe20] ss:$16 sps:$4 sm:$0xff]  }
  0xb3   :  { %6796 = vmatpush2.bf16.msra.mxu0 %v9771_v36  ;;  %v9840_v36 = vld [vmem:[%s14840_s1 + $0xc04] ss:$16 sps:$4 sm:$0xff]  }
  0xb4   :  { %6837 = vmatpush2.bf16.msra.mxu1 %v9774_v37  ;;  %6797 = vmatprep.subr.bf16.mxu0 %v9779_v38  ;;  %v9843_v37 = vld [vmem:[%s14840_s1 + $0xe04] ss:$16 sps:$4 sm:$0xff]   ;;  %v9838_v38 = vld [vmem:[%s14840_s1 + $0xc00] ss:$16 sps:$4 sm:$0xff]  }
  0xb5   :  { %6838 = vmatprep.subr.bf16.mxu1 %v9782_v40  ;;  %v9841_v40 = vld [vmem:[%s14840_s1 + $0xe00] ss:$16 sps:$4 sm:$0xff]  }
  0xb7   :  { %6798 = vmatpush2.bf16.msra.mxu0 %v9777_v41  ;;  %v9846_v41 = vld [vmem:[%s14840_s1 + $0xde4] ss:$16 sps:$4 sm:$0xff]  }
  0xb8   :  { %6839 = vmatpush2.bf16.msra.mxu1 %v9780_v45  ;;  %6799 = vmatprep.subr.bf16.mxu0 %v9785_v46  ;;  %v9844_v45 = vld [vmem:[%s14840_s1 + $0xde0] ss:$16 sps:$4 sm:$0xff]  }
  0xb9   :  { %6840 = vmatprep.subr.bf16.mxu1 %v9788_v47  ;;  %v9847_v46 = vld [vmem:[%s14840_s1 + $0xfe0] ss:$16 sps:$4 sm:$0xff]   ;;  %v9852_v47 = vld [vmem:[%s14840_s1 + $0xdc4] ss:$16 sps:$4 sm:$0xff]  }
  0xbb   :  { %6800 = vmatpush2.bf16.msra.mxu0 %v9783_v51  ;;  %v9850_v51 = vld [vmem:[%s14840_s1 + $0xdc0] ss:$16 sps:$4 sm:$0xff]  }
  0xbc   :  { %6841 = vmatpush2.bf16.msra.mxu1 %v9786_v54  ;;  %6801 = vmatprep.subr.bf16.mxu0 %v9791_v55  ;;  %v9853_v54 = vld [vmem:[%s14840_s1 + $0xfc0] ss:$16 sps:$4 sm:$0xff]   ;;  %v9858_v55 = vld [vmem:[%s14840_s1 + $0xda4] ss:$16 sps:$4 sm:$0xff]  }
  0xbd   :  { %6842 = vmatprep.subr.bf16.mxu1 %v9794_v56  ;;  %v9861_v56 = vld [vmem:[%s14840_s1 + $0xfa4] ss:$16 sps:$4 sm:$0xff]  }
  0xbf   :  { %6802 = vmatpush2.bf16.msra.mxu0 %v9789_v60  ;;  %v9856_v60 = vld [vmem:[%s14840_s1 + $0xda0] ss:$16 sps:$4 sm:$0xff]  }
  0xc0   :  { %6843 = vmatpush2.bf16.msra.mxu1 %v9792_v61  ;;  %6853 = vmatprep.subr.bf16.mxu0 %v9798_v63  ;;  %v9859_v61 = vld [vmem:[%s14840_s1 + $0xfa0] ss:$16 sps:$4 sm:$0xff]   ;;  %v9864_v63 = vld [vmem:[%s14840_s1 + $0xd84] ss:$16 sps:$4 sm:$0xff]  }
  0xc1   :  { %6894 = vmatprep.subr.bf16.mxu1 %v9801_v0  ;;  %v9867_v0 = vld [vmem:[%s14840_s1 + $0xf84] ss:$16 sps:$4 sm:$0xff]  }
  0xc2   :  { %6804 = vmatmul.mubr.bf16.vlgmr.msra.gmra.mxu0 %v11852_v4 }
  0xc3   :  { %6845 = vmatmul.mubr.bf16.vlgmr.msra.gmra.mxu1 %v11856_v5  ;;  %6854 = vmatpush1.bf16.msra.mxu0 %v9796_v6  ;;  %v9870_v6 = vld [vmem:[%s14840_s1 + $0xd64] ss:$16 sps:$4 sm:$0xff]  }
  0xc4   :  { %6895 = vmatpush1.bf16.msra.mxu1 %v9799_v7  ;;  %6855 = vmatprep.subr.bf16.mxu0 %v9804_v39  ;;  %v9873_v7 = vld [vmem:[%s14840_s1 + $0xf64] ss:$16 sps:$4 sm:$0xff]   ;;  %v9868_v39 = vld [vmem:[%s14840_s1 + $0xd60] ss:$16 sps:$4 sm:$0xff]  }
  0xc5   :  { %6896 = vmatprep.subr.bf16.mxu1 %v9807_v44  ;;  %6885 = vmatprep.mubr.bf16.mxu0 %v11870_v8  ;;  %v9871_v44 = vld [vmem:[%s14840_s1 + $0xf60] ss:$16 sps:$4 sm:$0xff]  }
  0xc6   :  { %6926 = vmatprep.mubr.bf16.mxu1 %v11872_v9 }
  0xc7   :  { %6856 = vmatpush1.bf16.msra.mxu0 %v9802_v10  ;;  %v9876_v10 = vld [vmem:[%s14840_s1 + $0xd44] ss:$16 sps:$4 sm:$0xff]  }
  0xc8   :  { %6897 = vmatpush1.bf16.msra.mxu1 %v9805_v11  ;;  %6857 = vmatprep.subr.bf16.mxu0 %v9810_v12  ;;  %v9879_v11 = vld [vmem:[%s14840_s1 + $0xf44] ss:$16 sps:$4 sm:$0xff]  }
  0xc9   :  { %6898 = vmatprep.subr.bf16.mxu1 %v9813_v13  ;;  %v26_v12 = vld [vmem:[%s14839_s0 + $0x20] sm:$0xff] }
  0xca   :  { %v9874_v13 = vld [vmem:[%s14840_s1 + $0xd40] ss:$16 sps:$4 sm:$0xff]  }
  0xcb   :  { %6858 = vmatpush1.bf16.msra.mxu0 %v9808_v14  ;;  %v9877_v14 = vld [vmem:[%s14840_s1 + $0xf40] ss:$16 sps:$4 sm:$0xff]  }
  0xcc   :  { %6899 = vmatpush1.bf16.msra.mxu1 %v9811_v15  ;;  %6859 = vmatprep.subr.bf16.mxu0 %v9816_v18  ;;  %v9882_v15 = vld [vmem:[%s14840_s1 + $0xd24] ss:$16 sps:$4 sm:$0xff]  }
  0xcd   :  { %6900 = vmatprep.subr.bf16.mxu1 %v9819_v19  ;;  %v9885_v18 = vld [vmem:[%s14840_s1 + $0xf24] ss:$16 sps:$4 sm:$0xff]   ;;  %v108_v19 = vcombine.high %v26_v12, %v26_v12 }
  0xcf   :  { %6860 = vmatpush1.bf16.msra.mxu0 %v9814_v20  ;;  %v9880_v20 = vld [vmem:[%s14840_s1 + $0xd20] ss:$16 sps:$4 sm:$0xff]  }
  0xd0   :  { %6901 = vmatpush1.bf16.msra.mxu1 %v9817_v21  ;;  %6861 = vmatprep.subr.bf16.mxu0 %v9822_v22  ;;  %v9883_v21 = vld [vmem:[%s14840_s1 + $0xf20] ss:$16 sps:$4 sm:$0xff]   ;;  %v9888_v22 = vld [vmem:[%s14840_s1 + $0xd04] ss:$16 sps:$4 sm:$0xff]  }
  0xd1   :  { %6902 = vmatprep.subr.bf16.mxu1 %v9825_v23  ;;  %v9891_v23 = vld [vmem:[%s14840_s1 + $0xf04] ss:$16 sps:$4 sm:$0xff]  }
  0xd3   :  { %6862 = vmatpush1.bf16.msra.mxu0 %v9820_v24  ;;  %v12050_v24 = vrot.slane %v26_v12, %v11320_v49 }
  0xd4   :  { %6903 = vmatpush1.bf16.msra.mxu1 %v9823_v25  ;;  %6863 = vmatprep.subr.bf16.mxu0 %v9828_v26  ;;  %v12053_v25 = vrot.slane %v108_v19, %v11320_v49  ;;  %v9886_v26 = vld [vmem:[%s14840_s1 + $0xd00] ss:$16 sps:$4 sm:$0xff]   ;;  %v9919_v19 = vld [vmem:[%s14840_s1 + $0x1064] ss:$16 sps:$4 sm:$0xff]  }
  0xd5   :  { %6904 = vmatprep.subr.bf16.mxu1 %v9831_v27  ;;  %v9889_v27 = vld [vmem:[%s14840_s1 + $0xf00] ss:$16 sps:$4 sm:$0xff]  }
  0xd7   :  { %6864 = vmatpush1.bf16.msra.mxu0 %v9826_v28  ;;  %v1305_v28 = vld [vmem:[%s14841_s2] sm:$0xf] }
  0xd8   :  { %6905 = vmatpush1.bf16.msra.mxu1 %v9829_v29  ;;  %6865 = vmatprep.subr.bf16.mxu0 %v9834_v30  ;;  %v1309_v29 = vsub.s32 0, %v11302_v43  ;;  %v9895_v30 = vld [vmem:[%s14840_s1 + $0x10e4] ss:$16 sps:$4 sm:$0xff]  }
  0xd9   :  { %6906 = vmatprep.subr.bf16.mxu1 %v9837_v31  ;;  %v9898_v31 = vld [vmem:[%s14840_s1 + $0x12e4] ss:$16 sps:$4 sm:$0xff]  }
  0xdb   :  { %6866 = vmatpush1.bf16.msra.mxu0 %v9832_v34  ;;  %v1313_v34 = vsub.s32 1, %v11302_v43 }
  0xdc   :  { %6907 = vmatpush1.bf16.msra.mxu1 %v9835_v35  ;;  %6867 = vmatprep.subr.bf16.mxu0 %v9840_v36  ;;  %v123_v35 = vcombine.high %v12050_v24, %v12050_v24  ;;  %v124_v36 = vcombine.high %v12053_v25, %v12053_v25 }
  0xdd   :  { %6908 = vmatprep.subr.bf16.mxu1 %v9843_v37  ;;  %v12078_v37 = vpack.c.bf16 %v11829_v58, %v11829_v58  ;;  %v9901_v58 = vld [vmem:[%s14840_s1 + $0x10c4] ss:$16 sps:$4 sm:$0xff]  }
  0xdf   :  { %6868 = vmatpush1.bf16.msra.mxu0 %v9838_v38  ;;  %v12082_v38 = vpack.c.bf16 %v11832_v59, %v11832_v59  ;;  %v9904_v59 = vld [vmem:[%s14840_s1 + $0x12c4] ss:$16 sps:$4 sm:$0xff]  }
  0xe0   :  { %6909 = vmatpush1.bf16.msra.mxu1 %v9841_v40  ;;  %6869 = vmatprep.subr.bf16.mxu0 %v9846_v41  ;;  %v1310_v40 = vrot.slane %v1305_v28, %v1309_v29  ;;  %v9893_v41 = vld [vmem:[%s14840_s1 + $0x10e0] ss:$16 sps:$4 sm:$0xff]   ;;  %v9931_v29 = vld [vmem:[%s14840_s1 + $0x1024] ss:$16 sps:$4 sm:$0xff]  }
  0xe1   :  { %6910 = vmatprep.subr.bf16.mxu1 %v9849_v42  ;;  %v9896_v42 = vld [vmem:[%s14840_s1 + $0x12e0] ss:$16 sps:$4 sm:$0xff]  }
  0xe3   :  { %6870 = vmatpush2.bf16.msra.mxu0 %v9844_v45  ;;  %v1314_v45 = vrot.slane %v1305_v28, %v1313_v34  ;;  %v9926_v28 = vld [vmem:[%s14840_s1 + $0x1240] ss:$16 sps:$4 sm:$0xff]  }
  0xe4   :  { %6911 = vmatpush2.bf16.msra.mxu1 %v9847_v46  ;;  %6871 = vmatprep.subr.bf16.mxu0 %v9852_v47  ;;  %v12096_v46 = vpack.c.bf16 %v123_v35, %v123_v35  ;;  %v12098_v47 = vpack.c.bf16 %v124_v36, %v124_v36  ;;  %v9932_v34 = vld [vmem:[%s14840_s1 + $0x1220] ss:$16 sps:$4 sm:$0xff]   ;;  %v9937_v35 = vld [vmem:[%s14840_s1 + $0x1004] ss:$16 sps:$4 sm:$0xff]  }
  0xe5   :  { %6912 = vmatprep.subr.bf16.mxu1 %v9855_v50  ;;  %v9940_v36 = vld [vmem:[%s14840_s1 + $0x1204] ss:$16 sps:$4 sm:$0xff]  }
  0xe7   :  { %6872 = vmatpush2.bf16.msra.mxu0 %v9850_v51 }
  0xe8   :  { %6913 = vmatpush2.bf16.msra.mxu1 %v9853_v54  ;;  %6873 = vmatprep.subr.bf16.mxu0 %v9858_v55  ;;  %v9899_v54 = vld [vmem:[%s14840_s1 + $0x10c0] ss:$16 sps:$4 sm:$0xff]  }
  0xe9   :  { %6914 = vmatprep.subr.bf16.mxu1 %v9861_v56  ;;  %v9902_v56 = vld [vmem:[%s14840_s1 + $0x12c0] ss:$16 sps:$4 sm:$0xff]  }
  0xeb   :  { %6874 = vmatpush2.bf16.msra.mxu0 %v9856_v60  ;;  %v9907_v60 = vld [vmem:[%s14840_s1 + $0x10a4] ss:$16 sps:$4 sm:$0xff]  }
  0xec   :  { %6915 = vmatpush2.bf16.msra.mxu1 %v9859_v61  ;;  %6875 = vmatprep.subr.bf16.mxu0 %v9864_v63 }
  0xed   :  { %6916 = vmatprep.subr.bf16.mxu1 %v9867_v0  ;;  %v9910_v0 = vld [vmem:[%s14840_s1 + $0x12a4] ss:$16 sps:$4 sm:$0xff]  }
  0xef   :  { %6876 = vmatpush2.bf16.msra.mxu0 %v9862_v1 }
  0xf0   :  { %6917 = vmatpush2.bf16.msra.mxu1 %v9865_v2  ;;  %6877 = vmatprep.subr.bf16.mxu0 %v9870_v6 }
  0xf1   :  { %6918 = vmatprep.subr.bf16.mxu1 %v9873_v7 }
  0xf3   :  { %6878 = vmatpush2.bf16.msra.mxu0 %v9868_v39  ;;  %v9905_v39 = vld [vmem:[%s14840_s1 + $0x10a0] ss:$16 sps:$4 sm:$0xff]  }
  0xf4   :  { %6919 = vmatpush2.bf16.msra.mxu1 %v9871_v44  ;;  %6879 = vmatprep.subr.bf16.mxu0 %v9876_v10  ;;  %v9908_v44 = vld [vmem:[%s14840_s1 + $0x12a0] ss:$16 sps:$4 sm:$0xff]  }
  0xf5   :  { %6920 = vmatprep.subr.bf16.mxu1 %v9879_v11 }
  0xf7   :  { %6880 = vmatpush2.bf16.msra.mxu0 %v9874_v13  ;;  %v9913_v13 = vld [vmem:[%s14840_s1 + $0x1084] ss:$16 sps:$4 sm:$0xff]  }
  0xf8   :  { %6921 = vmatpush2.bf16.msra.mxu1 %v9877_v14  ;;  %6881 = vmatprep.subr.bf16.mxu0 %v9882_v15  ;;  %v9916_v14 = vld [vmem:[%s14840_s1 + $0x1284] ss:$16 sps:$4 sm:$0xff]   ;;  %v9911_v15 = vld [vmem:[%s14840_s1 + $0x1080] ss:$16 sps:$4 sm:$0xff]  }
  0xf9   :  { %6922 = vmatprep.subr.bf16.mxu1 %v9885_v18  ;;  %v9914_v18 = vld [vmem:[%s14840_s1 + $0x1280] ss:$16 sps:$4 sm:$0xff]  }
  0xfb   :  { %6882 = vmatpush2.bf16.msra.mxu0 %v9880_v20  ;;  %v9922_v20 = vld [vmem:[%s14840_s1 + $0x1264] ss:$16 sps:$4 sm:$0xff]  }
  0xfc   :  { %6923 = vmatpush2.bf16.msra.mxu1 %v9883_v21  ;;  %6883 = vmatprep.subr.bf16.mxu0 %v9888_v22  ;;  %v9917_v21 = vld [vmem:[%s14840_s1 + $0x1060] ss:$16 sps:$4 sm:$0xff]  }
  0xfd   :  { %6924 = vmatprep.subr.bf16.mxu1 %v9891_v23  ;;  %v9920_v22 = vld [vmem:[%s14840_s1 + $0x1260] ss:$16 sps:$4 sm:$0xff]   ;;  %v9925_v23 = vld [vmem:[%s14840_s1 + $0x1044] ss:$16 sps:$4 sm:$0xff]  }
  0xff   :  { %6884 = vmatpush2.bf16.msra.mxu0 %v9886_v26  ;;  %v9928_v26 = vld [vmem:[%s14840_s1 + $0x1244] ss:$16 sps:$4 sm:$0xff]  }
 0x100   :  { %6925 = vmatpush2.bf16.msra.mxu1 %v9889_v27  ;;  %6935 = vmatprep.subr.bf16.mxu0 %v9895_v30  ;;  %v9923_v27 = vld [vmem:[%s14840_s1 + $0x1040] ss:$16 sps:$4 sm:$0xff]   ;;  %v9934_v30 = vld [vmem:[%s14840_s1 + $0x1224] ss:$16 sps:$4 sm:$0xff]  }
 0x101   :  { %6976 = vmatprep.subr.bf16.mxu1 %v9898_v31  ;;  %v9929_v31 = vld [vmem:[%s14840_s1 + $0x1020] ss:$16 sps:$4 sm:$0xff]  }
 0x102   :  { %v6641_v50 = vpop.f32.mrf.mxu0  ;;  %6886 = vmatmul.mubr.bf16.vlgmr.msra.gmra.mxu0 %v12078_v37 }
 0x103   :  { %v6682_v51 = vpop.f32.mrf.mxu1  ;;  %6927 = vmatmul.mubr.bf16.vlgmr.msra.gmra.mxu1 %v12082_v38  ;;  %v6642_v55 = vadd.f32 %v6641_v50, %v1310_v40  ;;  %6936 = vmatpush1.bf16.msra.mxu0 %v9893_v41  ;;  %v9935_v40 = vld [vmem:[%s14840_s1 + $0x1000] ss:$16 sps:$4 sm:$0xff]   ;;  %v9949_v50 = vld [vmem:[%s14840_s1 + $0x11c4] ss:$16 sps:$4 sm:$0xff]  }
 0x104   :  { %6977 = vmatpush1.bf16.msra.mxu1 %v9896_v42  ;;  %v6643_v61 = vpop.f32.mrf.mxu0  ;;  %6937 = vmatprep.subr.bf16.mxu0 %v9901_v58  ;;  %v9938_v41 = vld [vmem:[%s14840_s1 + $0x1200] ss:$16 sps:$4 sm:$0xff]   ;;  %v9943_v42 = vld [vmem:[%s14840_s1 + $0x11e4] ss:$16 sps:$4 sm:$0xff]  }
 0x105   :  { %v6684_v63 = vpop.f32.mrf.mxu1  ;;  %6978 = vmatprep.subr.bf16.mxu1 %v9904_v59  ;;  %v12114_v1 = vadd.f32 %v6682_v51, %v6642_v55  ;;  %v6644_v2 = vadd.f32 %v6643_v61, %v1314_v45  ;;  %6967 = vmatprep.mubr.bf16.mxu0 %v12096_v46  ;;  %v9946_v58 = vld [vmem:[%s14840_s1 + $0x13e4] ss:$16 sps:$4 sm:$0xff]   ;;  %v9941_v59 = vld [vmem:[%s14840_s1 + $0x11e0] ss:$16 sps:$4 sm:$0xff]  }
 0x106   :  { %7008 = vmatprep.mubr.bf16.mxu1 %v12098_v47  ;;  %v6645_v6 = vpop.f32.mrf.mxu0  ;;  %v9944_v45 = vld [vmem:[%s14840_s1 + $0x13e0] ss:$16 sps:$4 sm:$0xff]   ;;  %v9952_v51 = vld [vmem:[%s14840_s1 + $0x13c4] ss:$16 sps:$4 sm:$0xff]  }
 0x107   :  { %v6686_v7 = vpop.f32.mrf.mxu1  ;;  %v12124_v10 = vadd.f32 %v6684_v63, %v6644_v2  ;;  %6938 = vmatpush1.bf16.msra.mxu0 %v9899_v54  ;;  %v9947_v54 = vld [vmem:[%s14840_s1 + $0x11c0] ss:$16 sps:$4 sm:$0xff]   ;;  %v9964_v2 = vld [vmem:[%s14840_s1 + $0x1384] ss:$16 sps:$4 sm:$0xff]  }
 0x108   :  { %6979 = vmatpush1.bf16.msra.mxu1 %v9902_v56  ;;  %v6646_v11 = vpop.f32.mrf.mxu0  ;;  %6939 = vmatprep.subr.bf16.mxu0 %v9907_v60  ;;  %v9950_v55 = vld [vmem:[%s14840_s1 + $0x13c0] ss:$16 sps:$4 sm:$0xff]   ;;  %v9955_v56 = vld [vmem:[%s14840_s1 + $0x11a4] ss:$16 sps:$4 sm:$0xff]  }
 0x109   :  { %v6687_v12 = vpop.f32.mrf.mxu1  ;;  %6980 = vmatprep.subr.bf16.mxu1 %v9910_v0  ;;  %v9958_v60 = vld [vmem:[%s14840_s1 + $0x13a4] ss:$16 sps:$4 sm:$0xff]   ;;  %v9953_v61 = vld [vmem:[%s14840_s1 + $0x11a0] ss:$16 sps:$4 sm:$0xff]  }
 0x10a   :  { %v9956_v63 = vld [vmem:[%s14840_s1 + $0x13a0] ss:$16 sps:$4 sm:$0xff]   ;;  %v9961_v0 = vld [vmem:[%s14840_s1 + $0x1184] ss:$16 sps:$4 sm:$0xff]  }
 0x10b   :  { %6940 = vmatpush1.bf16.msra.mxu0 %v9905_v39  ;;  %v9959_v6 = vld [vmem:[%s14840_s1 + $0x1180] ss:$16 sps:$4 sm:$0xff]   ;;  %v9967_v39 = vld [vmem:[%s14840_s1 + $0x1164] ss:$16 sps:$4 sm:$0xff]  }
 0x10c   :  { %6981 = vmatpush1.bf16.msra.mxu1 %v9908_v44  ;;  %6941 = vmatprep.subr.bf16.mxu0 %v9913_v13  ;;  %v9962_v7 = vld [vmem:[%s14840_s1 + $0x1380] ss:$16 sps:$4 sm:$0xff]   ;;  %v9970_v44 = vld [vmem:[%s14840_s1 + $0x1364] ss:$16 sps:$4 sm:$0xff]  }
 0x10d   :  { %6982 = vmatprep.subr.bf16.mxu1 %v9916_v14  ;;  %v9965_v11 = vld [vmem:[%s14840_s1 + $0x1160] ss:$16 sps:$4 sm:$0xff]   ;;  %v9973_v13 = vld [vmem:[%s14840_s1 + $0x1144] ss:$16 sps:$4 sm:$0xff]  }
 0x10e   :  { %v9968_v12 = vld [vmem:[%s14840_s1 + $0x1360] ss:$16 sps:$4 sm:$0xff]   ;;  %v9976_v14 = vld [vmem:[%s14840_s1 + $0x1344] ss:$16 sps:$4 sm:$0xff]  }
 0x10f   :  { %6942 = vmatpush1.bf16.msra.mxu0 %v9911_v15  ;;  %v27_v15 = vld [vmem:[%s14839_s0 + $0x28] sm:$0xff] }
 0x110   :  { %6983 = vmatpush1.bf16.msra.mxu1 %v9914_v18  ;;  %6943 = vmatprep.subr.bf16.mxu0 %v9919_v19  ;;  %v9971_v18 = vld [vmem:[%s14840_s1 + $0x1140] ss:$16 sps:$4 sm:$0xff]  }
 0x111   :  { %6984 = vmatprep.subr.bf16.mxu1 %v9922_v20  ;;  %v9974_v19 = vld [vmem:[%s14840_s1 + $0x1340] ss:$16 sps:$4 sm:$0xff]   ;;  %v9979_v20 = vld [vmem:[%s14840_s1 + $0x1124] ss:$16 sps:$4 sm:$0xff]  }
 0x113   :  { %6944 = vmatpush1.bf16.msra.mxu0 %v9917_v21  ;;  %v9982_v21 = vld [vmem:[%s14840_s1 + $0x1324] ss:$16 sps:$4 sm:$0xff]  }
 0x114   :  { %6985 = vmatpush1.bf16.msra.mxu1 %v9920_v22  ;;  %6945 = vmatprep.subr.bf16.mxu0 %v9925_v23  ;;  %v125_v22 = vcombine.high %v27_v15, %v27_v15  ;;  %v9977_v23 = vld [vmem:[%s14840_s1 + $0x1120] ss:$16 sps:$4 sm:$0xff]  }
 0x115   :  { %6986 = vmatprep.subr.bf16.mxu1 %v9928_v26  ;;  %v9980_v26 = vld [vmem:[%s14840_s1 + $0x1320] ss:$16 sps:$4 sm:$0xff]  }
 0x117   :  { %6946 = vmatpush1.bf16.msra.mxu0 %v9923_v27  ;;  %v9985_v27 = vld [vmem:[%s14840_s1 + $0x1104] ss:$16 sps:$4 sm:$0xff]  }
 0x118   :  { %6987 = vmatpush1.bf16.msra.mxu1 %v9926_v28  ;;  %6947 = vmatprep.subr.bf16.mxu0 %v9931_v29  ;;  %v9988_v28 = vld [vmem:[%s14840_s1 + $0x1304] ss:$16 sps:$4 sm:$0xff]   ;;  %v12280_v29 = vrot.slane %v27_v15, %v11320_v49 }
 0x119   :  { %6988 = vmatprep.subr.bf16.mxu1 %v9934_v30  ;;  %v12283_v30 = vrot.slane %v125_v22, %v11320_v49  ;;  %v10010_v15 = vld [vmem:[%s14840_s1 + $0x1484] ss:$16 sps:$4 sm:$0xff]  }
 0x11a   :  { %v10019_v22 = vld [vmem:[%s14840_s1 + $0x1664] ss:$16 sps:$4 sm:$0xff]  }
 0x11b   :  { %6948 = vmatpush1.bf16.msra.mxu0 %v9929_v31  ;;  %v9983_v31 = vld [vmem:[%s14840_s1 + $0x1100] ss:$16 sps:$4 sm:$0xff]  }
 0x11c   :  { %6989 = vmatpush1.bf16.msra.mxu1 %v9932_v34  ;;  %6949 = vmatprep.subr.bf16.mxu0 %v9937_v35  ;;  %v9986_v34 = vld [vmem:[%s14840_s1 + $0x1300] ss:$16 sps:$4 sm:$0xff]   ;;  %v9992_v35 = vld [vmem:[%s14840_s1 + $0x14e4] ss:$16 sps:$4 sm:$0xff]  }
 0x11d   :  { %6990 = vmatprep.subr.bf16.mxu1 %v9940_v36  ;;  %v9995_v36 = vld [vmem:[%s14840_s1 + $0x16e4] ss:$16 sps:$4 sm:$0xff]  }
 0x11f   :  { %6950 = vmatpush1.bf16.msra.mxu0 %v9935_v40  ;;  %v9990_v40 = vld [vmem:[%s14840_s1 + $0x14e0] ss:$16 sps:$4 sm:$0xff]  }
 0x120   :  { %6991 = vmatpush1.bf16.msra.mxu1 %v9938_v41  ;;  %6951 = vmatprep.subr.bf16.mxu0 %v9943_v42  ;;  %v9993_v41 = vld [vmem:[%s14840_s1 + $0x16e0] ss:$16 sps:$4 sm:$0xff]   ;;  %v140_v42 = vcombine.high %v12280_v29, %v12280_v29 }
 0x121   :  { %6992 = vmatprep.subr.bf16.mxu1 %v9946_v58  ;;  %v141_v58 = vcombine.high %v12283_v30, %v12283_v30 }
 0x123   :  { %6952 = vmatpush2.bf16.msra.mxu0 %v9941_v59  ;;  %v12309_v59 = vpack.c.bf16 %v12050_v24, %v12050_v24  ;;  %v9996_v24 = vld [vmem:[%s14840_s1 + $0x14c0] ss:$16 sps:$4 sm:$0xff]  }
 0x124   :  { %6993 = vmatpush2.bf16.msra.mxu1 %v9944_v45  ;;  %6953 = vmatprep.subr.bf16.mxu0 %v9949_v50  ;;  %v12313_v45 = vpack.c.bf16 %v12053_v25, %v12053_v25  ;;  %v9998_v50 = vld [vmem:[%s14840_s1 + $0x14c4] ss:$16 sps:$4 sm:$0xff]   ;;  %v9999_v25 = vld [vmem:[%s14840_s1 + $0x16c0] ss:$16 sps:$4 sm:$0xff]  }
 0x125   :  { %6994 = vmatprep.subr.bf16.mxu1 %v9952_v51  ;;  %v10001_v51 = vld [vmem:[%s14840_s1 + $0x16c4] ss:$16 sps:$4 sm:$0xff]  }
 0x127   :  { %6954 = vmatpush2.bf16.msra.mxu0 %v9947_v54  ;;  %v12327_v54 = vpack.c.bf16 %v140_v42, %v140_v42  ;;  %v10034_v42 = vld [vmem:[%s14840_s1 + $0x1404] ss:$16 sps:$4 sm:$0xff]  }
 0x128   :  { %6995 = vmatpush2.bf16.msra.mxu1 %v9950_v55  ;;  %6955 = vmatprep.subr.bf16.mxu0 %v9955_v56  ;;  %v12329_v55 = vpack.c.bf16 %v141_v58, %v141_v58  ;;  %v10037_v58 = vld [vmem:[%s14840_s1 + $0x1604] ss:$16 sps:$4 sm:$0xff]  }
 0x129   :  { %6996 = vmatprep.subr.bf16.mxu1 %v9958_v60 }
 0x12b   :  { %6956 = vmatpush2.bf16.msra.mxu0 %v9953_v61 }
 0x12c   :  { %6997 = vmatpush2.bf16.msra.mxu1 %v9956_v63  ;;  %6957 = vmatprep.subr.bf16.mxu0 %v9961_v0 }
 0x12d   :  { %6998 = vmatprep.subr.bf16.mxu1 %v9964_v2  ;;  %v10004_v2 = vld [vmem:[%s14840_s1 + $0x14a4] ss:$16 sps:$4 sm:$0xff]  }
 0x12f   :  { %6958 = vmatpush2.bf16.msra.mxu0 %v9959_v6  ;;  %v10007_v6 = vld [vmem:[%s14840_s1 + $0x16a4] ss:$16 sps:$4 sm:$0xff]  }
 0x130   :  { %6999 = vmatpush2.bf16.msra.mxu1 %v9962_v7  ;;  %6959 = vmatprep.subr.bf16.mxu0 %v9967_v39 }
 0x131   :  { %7000 = vmatprep.subr.bf16.mxu1 %v9970_v44  ;;  %v10005_v44 = vld [vmem:[%s14840_s1 + $0x16a0] ss:$16 sps:$4 sm:$0xff]  }
 0x133   :  { %6960 = vmatpush2.bf16.msra.mxu0 %v9965_v11 }
 0x134   :  { %7001 = vmatpush2.bf16.msra.mxu1 %v9968_v12  ;;  %6961 = vmatprep.subr.bf16.mxu0 %v9973_v13 }
 0x135   :  { %7002 = vmatprep.subr.bf16.mxu1 %v9976_v14 }
 0x137   :  { %6962 = vmatpush2.bf16.msra.mxu0 %v9971_v18  ;;  %v10013_v18 = vld [vmem:[%s14840_s1 + $0x1684] ss:$16 sps:$4 sm:$0xff]  }
 0x138   :  { %7003 = vmatpush2.bf16.msra.mxu1 %v9974_v19  ;;  %6963 = vmatprep.subr.bf16.mxu0 %v9979_v20  ;;  %v10008_v19 = vld [vmem:[%s14840_s1 + $0x1480] ss:$16 sps:$4 sm:$0xff]  }
 0x139   :  { %7004 = vmatprep.subr.bf16.mxu1 %v9982_v21  ;;  %v10011_v20 = vld [vmem:[%s14840_s1 + $0x1680] ss:$16 sps:$4 sm:$0xff]   ;;  %v10016_v21 = vld [vmem:[%s14840_s1 + $0x1464] ss:$16 sps:$4 sm:$0xff]  }
 0x13b   :  { %6964 = vmatpush2.bf16.msra.mxu0 %v9977_v23  ;;  %v10014_v23 = vld [vmem:[%s14840_s1 + $0x1460] ss:$16 sps:$4 sm:$0xff]  }
 0x13c   :  { %7005 = vmatpush2.bf16.msra.mxu1 %v9980_v26  ;;  %6965 = vmatprep.subr.bf16.mxu0 %v9985_v27  ;;  %v10017_v26 = vld [vmem:[%s14840_s1 + $0x1660] ss:$16 sps:$4 sm:$0xff]   ;;  %v10022_v27 = vld [vmem:[%s14840_s1 + $0x1444] ss:$16 sps:$4 sm:$0xff]  }
 0x13d   :  { %7006 = vmatprep.subr.bf16.mxu1 %v9988_v28  ;;  %v10025_v28 = vld [vmem:[%s14840_s1 + $0x1644] ss:$16 sps:$4 sm:$0xff]  }
 0x13f   :  { %6966 = vmatpush2.bf16.msra.mxu0 %v9983_v31  ;;  %v10020_v31 = vld [vmem:[%s14840_s1 + $0x1440] ss:$16 sps:$4 sm:$0xff]  }
 0x140   :  { %7007 = vmatpush2.bf16.msra.mxu1 %v9986_v34  ;;  %7017 = vmatprep.subr.bf16.mxu0 %v9992_v35  ;;  %v10023_v34 = vld [vmem:[%s14840_s1 + $0x1640] ss:$16 sps:$4 sm:$0xff]   ;;  %v10028_v35 = vld [vmem:[%s14840_s1 + $0x1424] ss:$16 sps:$4 sm:$0xff]  }
 0x141   :  { %7058 = vmatprep.subr.bf16.mxu1 %v9995_v36  ;;  %v10031_v36 = vld [vmem:[%s14840_s1 + $0x1624] ss:$16 sps:$4 sm:$0xff]  }
 0x142   :  { %v6723_v56 = vpop.f32.mrf.mxu0  ;;  %6968 = vmatmul.mubr.bf16.vlgmr.msra.gmra.mxu0 %v12309_v59 }
 0x143   :  { %v6764_v60 = vpop.f32.mrf.mxu1  ;;  %7009 = vmatmul.mubr.bf16.vlgmr.msra.gmra.mxu1 %v12313_v45  ;;  %v6724_v61 = vadd.f32 %v6723_v56, %v12114_v1  ;;  %7018 = vmatpush1.bf16.msra.mxu0 %v9990_v40  ;;  %v10002_v1 = vld [vmem:[%s14840_s1 + $0x14a0] ss:$16 sps:$4 sm:$0xff]  }
 0x144   :  { %7059 = vmatpush1.bf16.msra.mxu1 %v9993_v41  ;;  %v6725_v63 = vpop.f32.mrf.mxu0  ;;  %7019 = vmatprep.subr.bf16.mxu0 %v9998_v50  ;;  %v10026_v40 = vld [vmem:[%s14840_s1 + $0x1420] ss:$16 sps:$4 sm:$0xff]  }
 0x145   :  { %v6766_v0 = vpop.f32.mrf.mxu1  ;;  %7060 = vmatprep.subr.bf16.mxu1 %v10001_v51  ;;  %v12340_v7 = vadd.f32 %v6764_v60, %v6724_v61  ;;  %v6726_v39 = vadd.f32 %v6725_v63, %v12124_v10  ;;  %7049 = vmatprep.mubr.bf16.mxu0 %v12327_v54  ;;  %v10029_v41 = vld [vmem:[%s14840_s1 + $0x1620] ss:$16 sps:$4 sm:$0xff]   ;;  %v10046_v61 = vld [vmem:[%s14840_s1 + $0x15c4] ss:$16 sps:$4 sm:$0xff]  }
 0x146   :  { %7090 = vmatprep.mubr.bf16.mxu1 %v12329_v55  ;;  %v6727_v11 = vpop.f32.mrf.mxu0  ;;  %v10032_v50 = vld [vmem:[%s14840_s1 + $0x1400] ss:$16 sps:$4 sm:$0xff]   ;;  %v10049_v63 = vld [vmem:[%s14840_s1 + $0x17c4] ss:$16 sps:$4 sm:$0xff]  }
 0x147   :  { %v6768_v12 = vpop.f32.mrf.mxu1  ;;  %v12351_v13 = vadd.f32 %v6766_v0, %v6726_v39  ;;  %7020 = vmatpush1.bf16.msra.mxu0 %v9996_v24  ;;  %v10035_v51 = vld [vmem:[%s14840_s1 + $0x1600] ss:$16 sps:$4 sm:$0xff]   ;;  %v10040_v24 = vld [vmem:[%s14840_s1 + $0x15e4] ss:$16 sps:$4 sm:$0xff]  }
 0x148   :  { %7061 = vmatpush1.bf16.msra.mxu1 %v9999_v25  ;;  %v6728_v14 = vpop.f32.mrf.mxu0  ;;  %7021 = vmatprep.subr.bf16.mxu0 %v10004_v2  ;;  %v10043_v25 = vld [vmem:[%s14840_s1 + $0x17e4] ss:$16 sps:$4 sm:$0xff]   ;;  %v10038_v56 = vld [vmem:[%s14840_s1 + $0x15e0] ss:$16 sps:$4 sm:$0xff]  }
 0x149   :  { %v6769_v10 = vpop.f32.mrf.mxu1  ;;  %7062 = vmatprep.subr.bf16.mxu1 %v10007_v6  ;;  %v10041_v60 = vld [vmem:[%s14840_s1 + $0x17e0] ss:$16 sps:$4 sm:$0xff]   ;;  %v10052_v6 = vld [vmem:[%s14840_s1 + $0x15a4] ss:$16 sps:$4 sm:$0xff]  }
 0x14a   :  { %v10044_v0 = vld [vmem:[%s14840_s1 + $0x15c0] ss:$16 sps:$4 sm:$0xff]   ;;  %v10055_v39 = vld [vmem:[%s14840_s1 + $0x17a4] ss:$16 sps:$4 sm:$0xff]  }
 0x14b   :  { %7022 = vmatpush1.bf16.msra.mxu0 %v10002_v1  ;;  %v10047_v2 = vld [vmem:[%s14840_s1 + $0x17c0] ss:$16 sps:$4 sm:$0xff]   ;;  %v10058_v11 = vld [vmem:[%s14840_s1 + $0x1584] ss:$16 sps:$4 sm:$0xff]  }
 0x14c   :  { %7063 = vmatpush1.bf16.msra.mxu1 %v10005_v44  ;;  %7023 = vmatprep.subr.bf16.mxu0 %v10010_v15  ;;  %v10050_v1 = vld [vmem:[%s14840_s1 + $0x15a0] ss:$16 sps:$4 sm:$0xff]   ;;  %v10061_v12 = vld [vmem:[%s14840_s1 + $0x1784] ss:$16 sps:$4 sm:$0xff]  }
 0x14d   :  { %7064 = vmatprep.subr.bf16.mxu1 %v10013_v18  ;;  %v10053_v44 = vld [vmem:[%s14840_s1 + $0x17a0] ss:$16 sps:$4 sm:$0xff]   ;;  %v10064_v15 = vld [vmem:[%s14840_s1 + $0x1564] ss:$16 sps:$4 sm:$0xff]  }
 0x14e   :  { %v10056_v14 = vld [vmem:[%s14840_s1 + $0x1580] ss:$16 sps:$4 sm:$0xff]   ;;  %v10067_v18 = vld [vmem:[%s14840_s1 + $0x1764] ss:$16 sps:$4 sm:$0xff]  }
 0x14f   :  { %7024 = vmatpush1.bf16.msra.mxu0 %v10008_v19  ;;  %v10059_v10 = vld [vmem:[%s14840_s1 + $0x1780] ss:$16 sps:$4 sm:$0xff]  }
 0x150   :  { %7065 = vmatpush1.bf16.msra.mxu1 %v10011_v20  ;;  %7025 = vmatprep.subr.bf16.mxu0 %v10016_v21  ;;  %v10062_v19 = vld [vmem:[%s14840_s1 + $0x1560] ss:$16 sps:$4 sm:$0xff]   ;;  %v10070_v21 = vld [vmem:[%s14840_s1 + $0x1544] ss:$16 sps:$4 sm:$0xff]  }
 0x151   :  { %7066 = vmatprep.subr.bf16.mxu1 %v10019_v22  ;;  %v10065_v20 = vld [vmem:[%s14840_s1 + $0x1760] ss:$16 sps:$4 sm:$0xff]   ;;  %v10073_v22 = vld [vmem:[%s14840_s1 + $0x1744] ss:$16 sps:$4 sm:$0xff]  }
 0x153   :  { %7026 = vmatpush1.bf16.msra.mxu0 %v10014_v23  ;;  %v28_v23 = vld [vmem:[%s14839_s0 + $0x30] sm:$0xff] }
 0x154   :  { %7067 = vmatpush1.bf16.msra.mxu1 %v10017_v26  ;;  %7027 = vmatprep.subr.bf16.mxu0 %v10022_v27  ;;  %v10068_v26 = vld [vmem:[%s14840_s1 + $0x1540] ss:$16 sps:$4 sm:$0xff]  }
 0x155   :  { %7068 = vmatprep.subr.bf16.mxu1 %v10025_v28  ;;  %v10071_v27 = vld [vmem:[%s14840_s1 + $0x1740] ss:$16 sps:$4 sm:$0xff]   ;;  %v10076_v28 = vld [vmem:[%s14840_s1 + $0x1524] ss:$16 sps:$4 sm:$0xff]  }
 0x157   :  { %7028 = vmatpush1.bf16.msra.mxu0 %v10020_v31  ;;  %v10079_v31 = vld [vmem:[%s14840_s1 + $0x1724] ss:$16 sps:$4 sm:$0xff]  }
 0x158   :  { %7069 = vmatpush1.bf16.msra.mxu1 %v10023_v34  ;;  %7029 = vmatprep.subr.bf16.mxu0 %v10028_v35  ;;  %v142_v34 = vcombine.high %v28_v23, %v28_v23  ;;  %v10074_v35 = vld [vmem:[%s14840_s1 + $0x1520] ss:$16 sps:$4 sm:$0xff]  }
 0x159   :  { %7070 = vmatprep.subr.bf16.mxu1 %v10031_v36  ;;  %v10077_v36 = vld [vmem:[%s14840_s1 + $0x1720] ss:$16 sps:$4 sm:$0xff]  }
 0x15b   :  { %7030 = vmatpush1.bf16.msra.mxu0 %v10026_v40  ;;  %v10082_v40 = vld [vmem:[%s14840_s1 + $0x1504] ss:$16 sps:$4 sm:$0xff]  }
 0x15c   :  { %7071 = vmatpush1.bf16.msra.mxu1 %v10029_v41  ;;  %7031 = vmatprep.subr.bf16.mxu0 %v10034_v42  ;;  %v10085_v41 = vld [vmem:[%s14840_s1 + $0x1704] ss:$16 sps:$4 sm:$0xff]   ;;  %v12507_v42 = vrot.slane %v28_v23, %v11320_v49 }
 0x15d   :  { %7072 = vmatprep.subr.bf16.mxu1 %v10037_v58  ;;  %v12510_v58 = vrot.slane %v142_v34, %v11320_v49  ;;  %v10110_v34 = vld [vmem:[%s14840_s1 + $0x1a84] ss:$16 sps:$4 sm:$0xff]  }
 0x15f   :  { %7032 = vmatpush1.bf16.msra.mxu0 %v10032_v50  ;;  %v10080_v50 = vld [vmem:[%s14840_s1 + $0x1500] ss:$16 sps:$4 sm:$0xff]  }
 0x160   :  { %7073 = vmatpush1.bf16.msra.mxu1 %v10035_v51  ;;  %7033 = vmatprep.subr.bf16.mxu0 %v10040_v24  ;;  %v10083_v51 = vld [vmem:[%s14840_s1 + $0x1700] ss:$16 sps:$4 sm:$0xff]   ;;  %v10089_v24 = vld [vmem:[%s14840_s1 + $0x18e4] ss:$16 sps:$4 sm:$0xff]  }
 0x161   :  { %7074 = vmatprep.subr.bf16.mxu1 %v10043_v25  ;;  %v10092_v25 = vld [vmem:[%s14840_s1 + $0x1ae4] ss:$16 sps:$4 sm:$0xff]  }
 0x163   :  { %7034 = vmatpush2.bf16.msra.mxu0 %v10038_v56  ;;  %v10087_v56 = vld [vmem:[%s14840_s1 + $0x18e0] ss:$16 sps:$4 sm:$0xff]  }
 0x164   :  { %7075 = vmatpush2.bf16.msra.mxu1 %v10041_v60  ;;  %7035 = vmatprep.subr.bf16.mxu0 %v10046_v61  ;;  %v10090_v60 = vld [vmem:[%s14840_s1 + $0x1ae0] ss:$16 sps:$4 sm:$0xff]   ;;  %v157_v61 = vcombine.high %v12507_v42, %v12507_v42 }
 0x165   :  { %7076 = vmatprep.subr.bf16.mxu1 %v10049_v63  ;;  %v158_v63 = vcombine.high %v12510_v58, %v12510_v58 }
 0x167   :  { %7036 = vmatpush2.bf16.msra.mxu0 %v10044_v0  ;;  %v12536_v0 = vpack.c.bf16 %v12280_v29, %v12280_v29  ;;  %v10093_v29 = vld [vmem:[%s14840_s1 + $0x18c0] ss:$16 sps:$4 sm:$0xff]  }
 0x168   :  { %7077 = vmatpush2.bf16.msra.mxu1 %v10047_v2  ;;  %7037 = vmatprep.subr.bf16.mxu0 %v10052_v6  ;;  %v12540_v2 = vpack.c.bf16 %v12283_v30, %v12283_v30  ;;  %v10095_v6 = vld [vmem:[%s14840_s1 + $0x18c4] ss:$16 sps:$4 sm:$0xff]   ;;  %v10096_v30 = vld [vmem:[%s14840_s1 + $0x1ac0] ss:$16 sps:$4 sm:$0xff]  }
 0x169   :  { %7078 = vmatprep.subr.bf16.mxu1 %v10055_v39  ;;  %v10098_v39 = vld [vmem:[%s14840_s1 + $0x1ac4] ss:$16 sps:$4 sm:$0xff]  }
 0x16b   :  { %7038 = vmatpush2.bf16.msra.mxu0 %v10050_v1  ;;  %v12554_v1 = vpack.c.bf16 %v157_v61, %v157_v61  ;;  %v10125_v61 = vld [vmem:[%s14840_s1 + $0x1824] ss:$16 sps:$4 sm:$0xff]  }
 0x16c   :  { %7079 = vmatpush2.bf16.msra.mxu1 %v10053_v44  ;;  %7039 = vmatprep.subr.bf16.mxu0 %v10058_v11  ;;  %v12556_v44 = vpack.c.bf16 %v158_v63, %v158_v63  ;;  %v10128_v63 = vld [vmem:[%s14840_s1 + $0x1a24] ss:$16 sps:$4 sm:$0xff]  }
 0x16d   :  { %7080 = vmatprep.subr.bf16.mxu1 %v10061_v12 }
 0x16f   :  { %7040 = vmatpush2.bf16.msra.mxu0 %v10056_v14 }
 0x170   :  { %7081 = vmatpush2.bf16.msra.mxu1 %v10059_v10  ;;  %7041 = vmatprep.subr.bf16.mxu0 %v10064_v15 }
 0x171   :  { %7082 = vmatprep.subr.bf16.mxu1 %v10067_v18  ;;  %v10101_v18 = vld [vmem:[%s14840_s1 + $0x18a4] ss:$16 sps:$4 sm:$0xff]  }
 0x173   :  { %7042 = vmatpush2.bf16.msra.mxu0 %v10062_v19  ;;  %v10104_v19 = vld [vmem:[%s14840_s1 + $0x1aa4] ss:$16 sps:$4 sm:$0xff]  }
 0x174   :  { %7083 = vmatpush2.bf16.msra.mxu1 %v10065_v20  ;;  %7043 = vmatprep.subr.bf16.mxu0 %v10070_v21 }
 0x175   :  { %7084 = vmatprep.subr.bf16.mxu1 %v10073_v22  ;;  %v10102_v22 = vld [vmem:[%s14840_s1 + $0x1aa0] ss:$16 sps:$4 sm:$0xff]  }
 0x177   :  { %7044 = vmatpush2.bf16.msra.mxu0 %v10068_v26 }
 0x178   :  { %7085 = vmatpush2.bf16.msra.mxu1 %v10071_v27  ;;  %7045 = vmatprep.subr.bf16.mxu0 %v10076_v28 }
 0x179   :  { %7086 = vmatprep.subr.bf16.mxu1 %v10079_v31  ;;  %v10107_v31 = vld [vmem:[%s14840_s1 + $0x1884] ss:$16 sps:$4 sm:$0xff]  }
 0x17b   :  { %7046 = vmatpush2.bf16.msra.mxu0 %v10074_v35  ;;  %v10105_v35 = vld [vmem:[%s14840_s1 + $0x1880] ss:$16 sps:$4 sm:$0xff]  }
 0x17c   :  { %7087 = vmatpush2.bf16.msra.mxu1 %v10077_v36  ;;  %7047 = vmatprep.subr.bf16.mxu0 %v10082_v40  ;;  %v10108_v36 = vld [vmem:[%s14840_s1 + $0x1a80] ss:$16 sps:$4 sm:$0xff]   ;;  %v10113_v40 = vld [vmem:[%s14840_s1 + $0x1864] ss:$16 sps:$4 sm:$0xff]  }
 0x17d   :  { %7088 = vmatprep.subr.bf16.mxu1 %v10085_v41  ;;  %v10116_v41 = vld [vmem:[%s14840_s1 + $0x1a64] ss:$16 sps:$4 sm:$0xff]  }
 0x17f   :  { %7048 = vmatpush2.bf16.msra.mxu0 %v10080_v50  ;;  %v10111_v50 = vld [vmem:[%s14840_s1 + $0x1860] ss:$16 sps:$4 sm:$0xff]  }
 0x180   :  { %7089 = vmatpush2.bf16.msra.mxu1 %v10083_v51  ;;  %7099 = vmatprep.subr.bf16.mxu0 %v10089_v24  ;;  %v10114_v51 = vld [vmem:[%s14840_s1 + $0x1a60] ss:$16 sps:$4 sm:$0xff]   ;;  %v10119_v24 = vld [vmem:[%s14840_s1 + $0x1844] ss:$16 sps:$4 sm:$0xff]  }
 0x181   :  { %7140 = vmatprep.subr.bf16.mxu1 %v10092_v25  ;;  %v10122_v25 = vld [vmem:[%s14840_s1 + $0x1a44] ss:$16 sps:$4 sm:$0xff]  }
 0x182   :  { %v6805_v11 = vpop.f32.mrf.mxu0  ;;  %7050 = vmatmul.mubr.bf16.vlgmr.msra.gmra.mxu0 %v12536_v0 }
 0x183   :  { %v6846_v12 = vpop.f32.mrf.mxu1  ;;  %7091 = vmatmul.mubr.bf16.vlgmr.msra.gmra.mxu1 %v12540_v2  ;;  %v6806_v14 = vadd.f32 %v6805_v11, %v12340_v7  ;;  %7100 = vmatpush1.bf16.msra.mxu0 %v10087_v56  ;;  %v10099_v7 = vld [vmem:[%s14840_s1 + $0x18a0] ss:$16 sps:$4 sm:$0xff]  }
 0x184   :  { %7141 = vmatpush1.bf16.msra.mxu1 %v10090_v60  ;;  %v6807_v10 = vpop.f32.mrf.mxu0  ;;  %7101 = vmatprep.subr.bf16.mxu0 %v10095_v6  ;;  %v10117_v56 = vld [vmem:[%s14840_s1 + $0x1840] ss:$16 sps:$4 sm:$0xff]  }
 0x185   :  { %v6848_v15 = vpop.f32.mrf.mxu1  ;;  %7142 = vmatprep.subr.bf16.mxu1 %v10098_v39  ;;  %v12567_v20 = vadd.f32 %v6846_v12, %v6806_v14  ;;  %v6808_v21 = vadd.f32 %v6807_v10, %v12351_v13  ;;  %7131 = vmatprep.mubr.bf16.mxu0 %v12554_v1  ;;  %v10120_v60 = vld [vmem:[%s14840_s1 + $0x1a40] ss:$16 sps:$4 sm:$0xff]   ;;  %v10137_v14 = vld [vmem:[%s14840_s1 + $0x19e4] ss:$16 sps:$4 sm:$0xff]  }
 0x186   :  { %7172 = vmatprep.mubr.bf16.mxu1 %v12556_v44  ;;  %v6809_v23 = vpop.f32.mrf.mxu0  ;;  %v10123_v6 = vld [vmem:[%s14840_s1 + $0x1820] ss:$16 sps:$4 sm:$0xff]   ;;  %v10140_v10 = vld [vmem:[%s14840_s1 + $0x1be4] ss:$16 sps:$4 sm:$0xff]  }
 0x187   :  { %v6850_v26 = vpop.f32.mrf.mxu1  ;;  %v12578_v27 = vadd.f32 %v6848_v15, %v6808_v21  ;;  %7102 = vmatpush1.bf16.msra.mxu0 %v10093_v29  ;;  %v10126_v39 = vld [vmem:[%s14840_s1 + $0x1a20] ss:$16 sps:$4 sm:$0xff]   ;;  %v10131_v29 = vld [vmem:[%s14840_s1 + $0x1804] ss:$16 sps:$4 sm:$0xff]  }
 0x188   :  { %7143 = vmatpush1.bf16.msra.mxu1 %v10096_v30  ;;  %v6810_v28 = vpop.f32.mrf.mxu0  ;;  %7103 = vmatprep.subr.bf16.mxu0 %v10101_v18  ;;  %v10134_v30 = vld [vmem:[%s14840_s1 + $0x1a04] ss:$16 sps:$4 sm:$0xff]   ;;  %v10129_v11 = vld [vmem:[%s14840_s1 + $0x1800] ss:$16 sps:$4 sm:$0xff]  }
 0x189   :  { %v6851_v13 = vpop.f32.mrf.mxu1  ;;  %7144 = vmatprep.subr.bf16.mxu1 %v10104_v19  ;;  %v10132_v12 = vld [vmem:[%s14840_s1 + $0x1a00] ss:$16 sps:$4 sm:$0xff]   ;;  %v10143_v19 = vld [vmem:[%s14840_s1 + $0x19c4] ss:$16 sps:$4 sm:$0xff]  }
 0x18a   :  { %v10135_v15 = vld [vmem:[%s14840_s1 + $0x19e0] ss:$16 sps:$4 sm:$0xff]   ;;  %v10146_v21 = vld [vmem:[%s14840_s1 + $0x1bc4] ss:$16 sps:$4 sm:$0xff]  }
 0x18b   :  { %7104 = vmatpush1.bf16.msra.mxu0 %v10099_v7  ;;  %v10138_v18 = vld [vmem:[%s14840_s1 + $0x1be0] ss:$16 sps:$4 sm:$0xff]   ;;  %v10149_v23 = vld [vmem:[%s14840_s1 + $0x19a4] ss:$16 sps:$4 sm:$0xff]  }
 0x18c   :  { %7145 = vmatpush1.bf16.msra.mxu1 %v10102_v22  ;;  %7105 = vmatprep.subr.bf16.mxu0 %v10107_v31  ;;  %v10141_v7 = vld [vmem:[%s14840_s1 + $0x19c0] ss:$16 sps:$4 sm:$0xff]   ;;  %v10152_v26 = vld [vmem:[%s14840_s1 + $0x1ba4] ss:$16 sps:$4 sm:$0xff]  }
 0x18d   :  { %7146 = vmatprep.subr.bf16.mxu1 %v10110_v34  ;;  %v10144_v22 = vld [vmem:[%s14840_s1 + $0x1bc0] ss:$16 sps:$4 sm:$0xff]   ;;  %v10155_v31 = vld [vmem:[%s14840_s1 + $0x1984] ss:$16 sps:$4 sm:$0xff]  }
 0x18e   :  { %v10147_v28 = vld [vmem:[%s14840_s1 + $0x19a0] ss:$16 sps:$4 sm:$0xff]   ;;  %v10158_v34 = vld [vmem:[%s14840_s1 + $0x1b84] ss:$16 sps:$4 sm:$0xff]  }
 0x18f   :  { %7106 = vmatpush1.bf16.msra.mxu0 %v10105_v35  ;;  %v10150_v13 = vld [vmem:[%s14840_s1 + $0x1ba0] ss:$16 sps:$4 sm:$0xff]  }
 0x190   :  { %7147 = vmatpush1.bf16.msra.mxu1 %v10108_v36  ;;  %7107 = vmatprep.subr.bf16.mxu0 %v10113_v40  ;;  %v10153_v35 = vld [vmem:[%s14840_s1 + $0x1980] ss:$16 sps:$4 sm:$0xff]   ;;  %v10161_v40 = vld [vmem:[%s14840_s1 + $0x1964] ss:$16 sps:$4 sm:$0xff]  }
 0x191   :  { %7148 = vmatprep.subr.bf16.mxu1 %v10116_v41  ;;  %v10156_v36 = vld [vmem:[%s14840_s1 + $0x1b80] ss:$16 sps:$4 sm:$0xff]   ;;  %v10164_v41 = vld [vmem:[%s14840_s1 + $0x1b64] ss:$16 sps:$4 sm:$0xff]  }
 0x193   :  { %7108 = vmatpush1.bf16.msra.mxu0 %v10111_v50  ;;  %v10159_v50 = vld [vmem:[%s14840_s1 + $0x1960] ss:$16 sps:$4 sm:$0xff]  }
 0x194   :  { %7149 = vmatpush1.bf16.msra.mxu1 %v10114_v51  ;;  %7109 = vmatprep.subr.bf16.mxu0 %v10119_v24  ;;  %v10162_v51 = vld [vmem:[%s14840_s1 + $0x1b60] ss:$16 sps:$4 sm:$0xff]   ;;  %v10167_v24 = vld [vmem:[%s14840_s1 + $0x1944] ss:$16 sps:$4 sm:$0xff]  }
 0x195   :  { %7150 = vmatprep.subr.bf16.mxu1 %v10122_v25  ;;  %v10170_v25 = vld [vmem:[%s14840_s1 + $0x1b44] ss:$16 sps:$4 sm:$0xff]  }
 0x197   :  { %7110 = vmatpush1.bf16.msra.mxu0 %v10117_v56  ;;  %v29_v56 = vld [vmem:[%s14839_s0 + $0x38] sm:$0xff] }
 0x198   :  { %7151 = vmatpush1.bf16.msra.mxu1 %v10120_v60  ;;  %7111 = vmatprep.subr.bf16.mxu0 %v10125_v61  ;;  %v10165_v60 = vld [vmem:[%s14840_s1 + $0x1940] ss:$16 sps:$4 sm:$0xff]  }
 0x199   :  { %7152 = vmatprep.subr.bf16.mxu1 %v10128_v63  ;;  %v10168_v61 = vld [vmem:[%s14840_s1 + $0x1b40] ss:$16 sps:$4 sm:$0xff]   ;;  %v10173_v63 = vld [vmem:[%s14840_s1 + $0x1924] ss:$16 sps:$4 sm:$0xff]  }
 0x19b   :  { %7112 = vmatpush1.bf16.msra.mxu0 %v10123_v6  ;;  %v10176_v6 = vld [vmem:[%s14840_s1 + $0x1b24] ss:$16 sps:$4 sm:$0xff]  }
 0x19c   :  { %7153 = vmatpush1.bf16.msra.mxu1 %v10126_v39  ;;  %7113 = vmatprep.subr.bf16.mxu0 %v10131_v29  ;;  %v159_v39 = vcombine.high %v29_v56, %v29_v56  ;;  %v10171_v29 = vld [vmem:[%s14840_s1 + $0x1920] ss:$16 sps:$4 sm:$0xff]  }
 0x19d   :  { %7154 = vmatprep.subr.bf16.mxu1 %v10134_v30  ;;  %v10174_v30 = vld [vmem:[%s14840_s1 + $0x1b20] ss:$16 sps:$4 sm:$0xff]  }
 0x19f   :  { %7114 = vmatpush1.bf16.msra.mxu0 %v10129_v11  ;;  %v10179_v11 = vld [vmem:[%s14840_s1 + $0x1904] ss:$16 sps:$4 sm:$0xff]  }
 0x1a0   :  { %7155 = vmatpush1.bf16.msra.mxu1 %v10132_v12  ;;  %7115 = vmatprep.subr.bf16.mxu0 %v10137_v14  ;;  %v10182_v12 = vld [vmem:[%s14840_s1 + $0x1b04] ss:$16 sps:$4 sm:$0xff]   ;;  %v12734_v14 = vrot.slane %v29_v56, %v11320_v49 }
 0x1a1   :  { %7156 = vmatprep.subr.bf16.mxu1 %v10140_v10  ;;  %v12737_v10 = vrot.slane %v159_v39, %v11320_v49  ;;  %v10189_v49 = vld [vmem:[%s14840_s1 + $0x1ee4] ss:$16 sps:$4 sm:$0xff]  }
 0x1a3   :  { %7116 = vmatpush2.bf16.msra.mxu0 %v10135_v15  ;;  %v10177_v15 = vld [vmem:[%s14840_s1 + $0x1900] ss:$16 sps:$4 sm:$0xff]  }
 0x1a4   :  { %7157 = vmatpush2.bf16.msra.mxu1 %v10138_v18  ;;  %7117 = vmatprep.subr.bf16.mxu0 %v10143_v19  ;;  %v10180_v18 = vld [vmem:[%s14840_s1 + $0x1b00] ss:$16 sps:$4 sm:$0xff]   ;;  %v10186_v19 = vld [vmem:[%s14840_s1 + $0x1ce4] ss:$16 sps:$4 sm:$0xff]  }
 0x1a5   :  { %7158 = vmatprep.subr.bf16.mxu1 %v10146_v21  ;;  %v10184_v21 = vld [vmem:[%s14840_s1 + $0x1ce0] ss:$16 sps:$4 sm:$0xff]  }
 0x1a7   :  { %7118 = vmatpush2.bf16.msra.mxu0 %v10141_v7  ;;  %v10187_v7 = vld [vmem:[%s14840_s1 + $0x1ee0] ss:$16 sps:$4 sm:$0xff]  }
 0x1a8   :  { %7159 = vmatpush2.bf16.msra.mxu1 %v10144_v22  ;;  %7119 = vmatprep.subr.bf16.mxu0 %v10149_v23  ;;  %v174_v22 = vcombine.high %v12734_v14, %v12734_v14  ;;  %v175_v23 = vcombine.high %v12737_v10, %v12737_v10 }
 0x1a9   :  { %7160 = vmatprep.subr.bf16.mxu1 %v10152_v26  ;;  %v12763_v26 = vpack.c.bf16 %v12507_v42, %v12507_v42  ;;  %v10190_v42 = vld [vmem:[%s14840_s1 + $0x1cc0] ss:$16 sps:$4 sm:$0xff]  }
 0x1ab   :  { %7120 = vmatpush2.bf16.msra.mxu0 %v10147_v28  ;;  %v12767_v28 = vpack.c.bf16 %v12510_v58, %v12510_v58  ;;  %v10193_v58 = vld [vmem:[%s14840_s1 + $0x1ec0] ss:$16 sps:$4 sm:$0xff]  }
 0x1ac   :  { %7161 = vmatpush2.bf16.msra.mxu1 %v10150_v13  ;;  %7121 = vmatprep.subr.bf16.mxu0 %v10155_v31  ;;  %v10192_v13 = vld [vmem:[%s14840_s1 + $0x1cc4] ss:$16 sps:$4 sm:$0xff]  }
 0x1ad   :  { %7162 = vmatprep.subr.bf16.mxu1 %v10158_v34  ;;  %v10195_v31 = vld [vmem:[%s14840_s1 + $0x1ec4] ss:$16 sps:$4 sm:$0xff]   ;;  %v12781_v34 = vpack.c.bf16 %v174_v22, %v174_v22 }
 0x1ae   :  { %v10219_v22 = vld [vmem:[%s14840_s1 + $0x1e44] ss:$16 sps:$4 sm:$0xff]  }
 0x1af   :  { %7122 = vmatpush2.bf16.msra.mxu0 %v10153_v35  ;;  %v12783_v35 = vpack.c.bf16 %v175_v23, %v175_v23  ;;  %v10214_v23 = vld [vmem:[%s14840_s1 + $0x1c40] ss:$16 sps:$4 sm:$0xff]  }
 0x1b0   :  { %7163 = vmatpush2.bf16.msra.mxu1 %v10156_v36  ;;  %7123 = vmatprep.subr.bf16.mxu0 %v10161_v40 }
 0x1b1   :  { %7164 = vmatprep.subr.bf16.mxu1 %v10164_v41 }
 0x1b3   :  { %7124 = vmatpush2.bf16.msra.mxu0 %v10159_v50 }
 0x1b4   :  { %7165 = vmatpush2.bf16.msra.mxu1 %v10162_v51  ;;  %7125 = vmatprep.subr.bf16.mxu0 %v10167_v24  ;;  %v10198_v24 = vld [vmem:[%s14840_s1 + $0x1ca4] ss:$16 sps:$4 sm:$0xff]  }
 0x1b5   :  { %7166 = vmatprep.subr.bf16.mxu1 %v10170_v25  ;;  %v10201_v25 = vld [vmem:[%s14840_s1 + $0x1ea4] ss:$16 sps:$4 sm:$0xff]  }
 0x1b7   :  { %7126 = vmatpush2.bf16.msra.mxu0 %v10165_v60 }
 0x1b8   :  { %7167 = vmatpush2.bf16.msra.mxu1 %v10168_v61  ;;  %7127 = vmatprep.subr.bf16.mxu0 %v10173_v63  ;;  %v10199_v61 = vld [vmem:[%s14840_s1 + $0x1ea0] ss:$16 sps:$4 sm:$0xff]  }
 0x1b9   :  { %7168 = vmatprep.subr.bf16.mxu1 %v10176_v6 }
 0x1bb   :  { %7128 = vmatpush2.bf16.msra.mxu0 %v10171_v29 }
 0x1bc   :  { %7169 = vmatpush2.bf16.msra.mxu1 %v10174_v30  ;;  %7129 = vmatprep.subr.bf16.mxu0 %v10179_v11  ;;  %v10204_v30 = vld [vmem:[%s14840_s1 + $0x1c84] ss:$16 sps:$4 sm:$0xff]  }
 0x1bd   :  { %7170 = vmatprep.subr.bf16.mxu1 %v10182_v12  ;;  %v10207_v11 = vld [vmem:[%s14840_s1 + $0x1e84] ss:$16 sps:$4 sm:$0xff]   ;;  %v10202_v12 = vld [vmem:[%s14840_s1 + $0x1c80] ss:$16 sps:$4 sm:$0xff]  }
 0x1bf   :  { %7130 = vmatpush2.bf16.msra.mxu0 %v10177_v15  ;;  %v10205_v15 = vld [vmem:[%s14840_s1 + $0x1e80] ss:$16 sps:$4 sm:$0xff]  }
 0x1c0   :  { %7171 = vmatpush2.bf16.msra.mxu1 %v10180_v18  ;;  %7181 = vmatprep.subr.bf16.mxu0 %v10186_v19  ;;  %v10210_v18 = vld [vmem:[%s14840_s1 + $0x1c64] ss:$16 sps:$4 sm:$0xff]  }
 0x1c1   :  { %7222 = vmatprep.subr.bf16.mxu1 %v10189_v49  ;;  %v10213_v19 = vld [vmem:[%s14840_s1 + $0x1e64] ss:$16 sps:$4 sm:$0xff]   ;;  %v10208_v49 = vld [vmem:[%s14840_s1 + $0x1c60] ss:$16 sps:$4 sm:$0xff]  }
 0x1c2   :  { %v6887_v36 = vpop.f32.mrf.mxu0  ;;  %7132 = vmatmul.mubr.bf16.vlgmr.msra.gmra.mxu0 %v12763_v26 }
 0x1c3   :  { %v6928_v40 = vpop.f32.mrf.mxu1  ;;  %7173 = vmatmul.mubr.bf16.vlgmr.msra.gmra.mxu1 %v12767_v28  ;;  %v6888_v41 = vadd.f32 %v6887_v36, %v12567_v20  ;;  %7182 = vmatpush1.bf16.msra.mxu0 %v10184_v21  ;;  %v10196_v20 = vld [vmem:[%s14840_s1 + $0x1ca0] ss:$16 sps:$4 sm:$0xff]  }
 0x1c4   :  { %7223 = vmatpush1.bf16.msra.mxu1 %v10187_v7  ;;  %v6889_v50 = vpop.f32.mrf.mxu0  ;;  %7183 = vmatprep.subr.bf16.mxu0 %v10192_v13  ;;  %v10211_v21 = vld [vmem:[%s14840_s1 + $0x1e60] ss:$16 sps:$4 sm:$0xff]   ;;  %v10216_v7 = vld [vmem:[%s14840_s1 + $0x1c44] ss:$16 sps:$4 sm:$0xff]  }
 0x1c5   :  { %v6930_v51 = vpop.f32.mrf.mxu1  ;;  %7224 = vmatprep.subr.bf16.mxu1 %v10195_v31  ;;  %v12794_v56 = vadd.f32 %v6928_v40, %v6888_v41  ;;  %v6890_v60 = vadd.f32 %v6889_v50, %v12578_v27  ;;  %7213 = vmatprep.mubr.bf16.mxu0 %v12781_v34  ;;  %v10217_v13 = vld [vmem:[%s14840_s1 + $0x1e40] ss:$16 sps:$4 sm:$0xff]   ;;  %v10222_v31 = vld [vmem:[%s14840_s1 + $0x1c24] ss:$16 sps:$4 sm:$0xff]  }
 0x1c6   :  { %7254 = vmatprep.mubr.bf16.mxu1 %v12783_v35  ;;  %v6891_v63 = vpop.f32.mrf.mxu0  ;;  %v10223_v36 = vld [vmem:[%s14840_s1 + $0x1e20] ss:$16 sps:$4 sm:$0xff]   ;;  %v10228_v40 = vld [vmem:[%s14840_s1 + $0x1c04] ss:$16 sps:$4 sm:$0xff]  }
 0x1c7   :  { %v6932_v6 = vpop.f32.mrf.mxu1  ;;  %v12805_v39 = vadd.f32 %v6930_v51, %v6890_v60  ;;  %7184 = vmatpush1.bf16.msra.mxu0 %v10190_v42  ;;  %v10225_v42 = vld [vmem:[%s14840_s1 + $0x1e24] ss:$16 sps:$4 sm:$0xff]   ;;  %v10226_v50 = vld [vmem:[%s14840_s1 + $0x1c00] ss:$16 sps:$4 sm:$0xff]  }
 0x1c8   :  { %7225 = vmatpush1.bf16.msra.mxu1 %v10193_v58  ;;  %v6892_v29 = vpop.f32.mrf.mxu0  ;;  %7185 = vmatprep.subr.bf16.mxu0 %v10198_v24  ;;  %v10220_v58 = vld [vmem:[%s14840_s1 + $0x1c20] ss:$16 sps:$4 sm:$0xff]   ;;  %v10231_v41 = vld [vmem:[%s14840_s1 + $0x1e04] ss:$16 sps:$4 sm:$0xff]  }
 0x1c9   :  { %v6933_v27 = vpop.f32.mrf.mxu1  ;;  %7226 = vmatprep.subr.bf16.mxu1 %v10201_v25  ;;  %v10229_v51 = vld [vmem:[%s14840_s1 + $0x1e00] ss:$16 sps:$4 sm:$0xff]   ;;  %v10234_v24 = vld [vmem:[%s14840_s1 + $0x1de4] ss:$16 sps:$4 sm:$0xff]  }
 0x1ca   :  { %v10237_v25 = vld [vmem:[%s14840_s1 + $0x1fe4] ss:$16 sps:$4 sm:$0xff]   ;;  %v10232_v60 = vld [vmem:[%s14840_s1 + $0x1de0] ss:$16 sps:$4 sm:$0xff]  }
 0x1cb   :  { %7186 = vmatpush1.bf16.msra.mxu0 %v10196_v20  ;;  %v10235_v20 = vld [vmem:[%s14840_s1 + $0x1fe0] ss:$16 sps:$4 sm:$0xff]   ;;  %v10243_v63 = vld [vmem:[%s14840_s1 + $0x1fc4] ss:$16 sps:$4 sm:$0xff]  }
 0x1cc   :  { %7227 = vmatpush1.bf16.msra.mxu1 %v10199_v61  ;;  %7187 = vmatprep.subr.bf16.mxu0 %v10204_v30  ;;  %v10240_v61 = vld [vmem:[%s14840_s1 + $0x1dc4] ss:$16 sps:$4 sm:$0xff]   ;;  %v10238_v6 = vld [vmem:[%s14840_s1 + $0x1dc0] ss:$16 sps:$4 sm:$0xff]  }
 0x1cd   :  { %7228 = vmatprep.subr.bf16.mxu1 %v10207_v11  ;;  %v10241_v29 = vld [vmem:[%s14840_s1 + $0x1fc0] ss:$16 sps:$4 sm:$0xff]   ;;  %v10246_v27 = vld [vmem:[%s14840_s1 + $0x1da4] ss:$16 sps:$4 sm:$0xff]  }
 0x1ce   :  { %v10249_v30 = vld [vmem:[%s14840_s1 + $0x1fa4] ss:$16 sps:$4 sm:$0xff]   ;;  %v10244_v11 = vld [vmem:[%s14840_s1 + $0x1da0] ss:$16 sps:$4 sm:$0xff]  }
 0x1cf   :  { %7188 = vmatpush1.bf16.msra.mxu0 %v10202_v12  ;;  %v10247_v12 = vld [vmem:[%s14840_s1 + $0x1fa0] ss:$16 sps:$4 sm:$0xff]  }
 0x1d0   :  { %7229 = vmatpush1.bf16.msra.mxu1 %v10205_v15  ;;  %7189 = vmatprep.subr.bf16.mxu0 %v10210_v18  ;;  %v10252_v15 = vld [vmem:[%s14840_s1 + $0x1d84] ss:$16 sps:$4 sm:$0xff]  }
 0x1d1   :  { %7230 = vmatprep.subr.bf16.mxu1 %v10213_v19  ;;  %v10255_v18 = vld [vmem:[%s14840_s1 + $0x1f84] ss:$16 sps:$4 sm:$0xff]   ;;  %v10250_v19 = vld [vmem:[%s14840_s1 + $0x1d80] ss:$16 sps:$4 sm:$0xff]  }
 0x1d3   :  { %7190 = vmatpush1.bf16.msra.mxu0 %v10208_v49  ;;  %v10253_v49 = vld [vmem:[%s14840_s1 + $0x1f80] ss:$16 sps:$4 sm:$0xff]  }
 0x1d4   :  { %7231 = vmatpush1.bf16.msra.mxu1 %v10211_v21  ;;  %7191 = vmatprep.subr.bf16.mxu0 %v10216_v7  ;;  %v10258_v21 = vld [vmem:[%s14840_s1 + $0x1d64] ss:$16 sps:$4 sm:$0xff]  }
 0x1d5   :  { %7232 = vmatprep.subr.bf16.mxu1 %v10219_v22  ;;  %v10261_v7 = vld [vmem:[%s14840_s1 + $0x1f64] ss:$16 sps:$4 sm:$0xff]   ;;  %v10256_v22 = vld [vmem:[%s14840_s1 + $0x1d60] ss:$16 sps:$4 sm:$0xff]  }
 0x1d7   :  { %7192 = vmatpush1.bf16.msra.mxu0 %v10214_v23  ;;  %v10259_v23 = vld [vmem:[%s14840_s1 + $0x1f60] ss:$16 sps:$4 sm:$0xff]  }
 0x1d8   :  { %7233 = vmatpush1.bf16.msra.mxu1 %v10217_v13  ;;  %7193 = vmatprep.subr.bf16.mxu0 %v10222_v31  ;;  %v10264_v13 = vld [vmem:[%s14840_s1 + $0x1d44] ss:$16 sps:$4 sm:$0xff]  }
 0x1d9   :  { %7234 = vmatprep.subr.bf16.mxu1 %v10225_v42  ;;  %v10267_v31 = vld [vmem:[%s14840_s1 + $0x1f44] ss:$16 sps:$4 sm:$0xff]   ;;  %v10262_v42 = vld [vmem:[%s14840_s1 + $0x1d40] ss:$16 sps:$4 sm:$0xff]  }
 0x1db   :  { %7194 = vmatpush1.bf16.msra.mxu0 %v10220_v58  ;;  %v10265_v58 = vld [vmem:[%s14840_s1 + $0x1f40] ss:$16 sps:$4 sm:$0xff]  }
 0x1dc   :  { %7235 = vmatpush1.bf16.msra.mxu1 %v10223_v36  ;;  %7195 = vmatprep.subr.bf16.mxu0 %v10228_v40  ;;  %v10270_v36 = vld [vmem:[%s14840_s1 + $0x1d24] ss:$16 sps:$4 sm:$0xff]  }
 0x1dd   :  { %7236 = vmatprep.subr.bf16.mxu1 %v10231_v41  ;;  %v10273_v40 = vld [vmem:[%s14840_s1 + $0x1f24] ss:$16 sps:$4 sm:$0xff]   ;;  %v10268_v41 = vld [vmem:[%s14840_s1 + $0x1d20] ss:$16 sps:$4 sm:$0xff]  }
 0x1df   :  { %7196 = vmatpush1.bf16.msra.mxu0 %v10226_v50  ;;  %v10271_v50 = vld [vmem:[%s14840_s1 + $0x1f20] ss:$16 sps:$4 sm:$0xff]  }
 0x1e0   :  { %7237 = vmatpush1.bf16.msra.mxu1 %v10229_v51  ;;  %7197 = vmatprep.subr.bf16.mxu0 %v10234_v24  ;;  %v10276_v51 = vld [vmem:[%s14840_s1 + $0x1d04] ss:$16 sps:$4 sm:$0xff]  }
 0x1e1   :  { %7238 = vmatprep.subr.bf16.mxu1 %v10237_v25  ;;  %v10279_v24 = vld [vmem:[%s14840_s1 + $0x1f04] ss:$16 sps:$4 sm:$0xff]   ;;  %v10274_v25 = vld [vmem:[%s14840_s1 + $0x1d00] ss:$16 sps:$4 sm:$0xff]  }
 0x1e3   :  { %7198 = vmatpush2.bf16.msra.mxu0 %v10232_v60  ;;  %v10277_v60 = vld [vmem:[%s14840_s1 + $0x1f00] ss:$16 sps:$4 sm:$0xff]  }
 0x1e4   :  { %7239 = vmatpush2.bf16.msra.mxu1 %v10235_v20  ;;  %7199 = vmatprep.subr.bf16.mxu0 %v10240_v61  ;;  %v10283_v20 = vld [vmem:[%s14840_s1 + $0x20e4] ss:$16 sps:$4 sm:$0xff]   ;;  %v10286_v61 = vld [vmem:[%s14840_s1 + $0xec] ss:$16 sps:$4 sm:$0xff]  }
 0x1e5   :  { %7240 = vmatprep.subr.bf16.mxu1 %v10243_v63  ;;  %v10281_v63 = vld [vmem:[%s14840_s1 + $0x20e0] ss:$16 sps:$4 sm:$0xff]  }
 0x1e7   :  { %7200 = vmatpush2.bf16.msra.mxu0 %v10238_v6  ;;  %v10284_v6 = vld [vmem:[%s14840_s1 + $0xe8] ss:$16 sps:$4 sm:$0xff]  }
 0x1e8   :  { %7241 = vmatpush2.bf16.msra.mxu1 %v10241_v29  ;;  %7201 = vmatprep.subr.bf16.mxu0 %v10246_v27  ;;  %v12977_v29 = vpack.c.bf16 %v12734_v14, %v12734_v14  ;;  %v12981_v27 = vpack.c.bf16 %v12737_v10, %v12737_v10  ;;  %v10287_v14 = vld [vmem:[%s14840_s1 + $0x20c0] ss:$16 sps:$4 sm:$0xff]   ;;  %v10290_v10 = vld [vmem:[%s14840_s1 + $0xc8] ss:$16 sps:$4 sm:$0xff]  }
 0x1e9   :  { %7242 = vmatprep.subr.bf16.mxu1 %v10249_v30  ;;  %v10289_v30 = vld [vmem:[%s14840_s1 + $0x20c4] ss:$16 sps:$4 sm:$0xff]  }
 0x1eb   :  { %7202 = vmatpush2.bf16.msra.mxu0 %v10244_v11  ;;  %v10292_v11 = vld [vmem:[%s14840_s1 + $0xcc] ss:$16 sps:$4 sm:$0xff]  }
 0x1ec   :  { %7243 = vmatpush2.bf16.msra.mxu1 %v10247_v12  ;;  %7203 = vmatprep.subr.bf16.mxu0 %v10252_v15 }
 0x1ed   :  { %7244 = vmatprep.subr.bf16.mxu1 %v10255_v18 }
 0x1ef   :  { %7204 = vmatpush2.bf16.msra.mxu0 %v10250_v19 }
 0x1f0   :  { %7245 = vmatpush2.bf16.msra.mxu1 %v10253_v49  ;;  %7205 = vmatprep.subr.bf16.mxu0 %v10258_v21  ;;  %v10295_v21 = vld [vmem:[%s14840_s1 + $0x20a4] ss:$16 sps:$4 sm:$0xff]  }
 0x1f1   :  { %7246 = vmatprep.subr.bf16.mxu1 %v10261_v7  ;;  %v10298_v7 = vld [vmem:[%s14840_s1 + $0xac] ss:$16 sps:$4 sm:$0xff]  }
 0x1f3   :  { %7206 = vmatpush2.bf16.msra.mxu0 %v10256_v22 }
 0x1f4   :  { %7247 = vmatpush2.bf16.msra.mxu1 %v10259_v23  ;;  %7207 = vmatprep.subr.bf16.mxu0 %v10264_v13  ;;  %v10296_v13 = vld [vmem:[%s14840_s1 + $0xa8] ss:$16 sps:$4 sm:$0xff]  }
 0x1f5   :  { %7248 = vmatprep.subr.bf16.mxu1 %v10267_v31  ;;  %v11153_v31 = vmov 0  }
 0x1f7   :  { %7208 = vmatpush2.bf16.msra.mxu0 %v10262_v42 }
 0x1f8   :  { %7249 = vmatpush2.bf16.msra.mxu1 %v10265_v58  ;;  %7209 = vmatprep.subr.bf16.mxu0 %v10270_v36 }
 0x1f9   :  { %7250 = vmatprep.subr.bf16.mxu1 %v10273_v40 }
 0x1fb   :  { %7210 = vmatpush2.bf16.msra.mxu0 %v10268_v41  ;;  %v10301_v41 = vld [vmem:[%s14840_s1 + $0x2084] ss:$16 sps:$4 sm:$0xff]  }
 0x1fc   :  { %7251 = vmatpush2.bf16.msra.mxu1 %v10271_v50  ;;  %7211 = vmatprep.subr.bf16.mxu0 %v10276_v51  ;;  %v10304_v50 = vld [vmem:[%s14840_s1 + $0x8c] ss:$16 sps:$4 sm:$0xff]   ;;  %v10302_v51 = vld [vmem:[%s14840_s1 + $0x88] ss:$16 sps:$4 sm:$0xff]  }
 0x1fd   :  { %7252 = vmatprep.subr.bf16.mxu1 %v10279_v24  ;;  %v10307_v24 = vld [vmem:[%s14840_s1 + $0x2064] ss:$16 sps:$4 sm:$0xff]  }
 0x1ff   :  { %7212 = vmatpush2.bf16.msra.mxu0 %v10274_v25  ;;  %v10310_v25 = vld [vmem:[%s14840_s1 + $0x6c] ss:$16 sps:$4 sm:$0xff]  }
 0x200   :  { %7253 = vmatpush2.bf16.msra.mxu1 %v10277_v60  ;;  %7263 = vmatprep.subr.bf16.mxu0 %v10283_v20  ;;  %v10305_v60 = vld [vmem:[%s14840_s1 + $0x2060] ss:$16 sps:$4 sm:$0xff]   ;;  %v10308_v20 = vld [vmem:[%s14840_s1 + $0x68] ss:$16 sps:$4 sm:$0xff]  }
 0x201   :  { %7304 = vmatprep.subr.bf16.mxu1 %v10286_v61  ;;  %v10313_v61 = vld [vmem:[%s14840_s1 + $0x2044] ss:$16 sps:$4 sm:$0xff]  }
 0x202   :  { %v6969_v12 = vpop.f32.mrf.mxu0  ;;  %7214 = vmatmul.mubr.bf16.vlgmr.msra.gmra.mxu0 %v12977_v29 }
 0x203   :  { %v7010_v15 = vpop.f32.mrf.mxu1  ;;  %7255 = vmatmul.mubr.bf16.vlgmr.msra.gmra.mxu1 %v12981_v27  ;;  %v6970_v18 = vadd.f32 %v6969_v12, %v12794_v56  ;;  %7264 = vmatpush1.bf16.msra.mxu0 %v10281_v63  ;;  %v10293_v56 = vld [vmem:[%s14840_s1 + $0x20a0] ss:$16 sps:$4 sm:$0xff]   ;;  %v10316_v63 = vld [vmem:[%s14840_s1 + $0x4c] ss:$16 sps:$4 sm:$0xff]   ;;  %v10320_v12 = vld [vmem:[%s14840_s1 + $0x28] ss:$16 sps:$4 sm:$0xff]  }
 0x204   :  { %7305 = vmatpush1.bf16.msra.mxu1 %v10284_v6  ;;  %v6971_v19 = vpop.f32.mrf.mxu0  ;;  %7265 = vmatprep.subr.bf16.mxu0 %v10289_v30  ;;  %v10311_v6 = vld [vmem:[%s14840_s1 + $0x2040] ss:$16 sps:$4 sm:$0xff]   ;;  %v10314_v30 = vld [vmem:[%s14840_s1 + $0x48] ss:$16 sps:$4 sm:$0xff]  }
 0x205   :  { %v7012_v49 = vpop.f32.mrf.mxu1  ;;  %7306 = vmatprep.subr.bf16.mxu1 %v10292_v11  ;;  %v13004_v22 = vadd.f32 %v7010_v15, %v6970_v18  ;;  %v6972_v23 = vadd.f32 %v6971_v19, %v12805_v39  ;;  %7295 = vmatprep.mubr.bf16.mxu0 %v11153_v31  ;;  %v10319_v11 = vld [vmem:[%s14840_s1 + $0x2024] ss:$16 sps:$4 sm:$0xff]   ;;  %v10328_v18 = vld [vmem:[%s14840_s1 + $0xc] ss:$16 sps:$4 sm:$0xff]   ;;  %v10323_v19 = vld [vmem:[%s14840_s1 + $0x2000] ss:$16 sps:$4 sm:$0xff]  }
 0x206   :  { %7336 = vmatprep.mubr.bf16.mxu1 %v11348_v62  ;;  %v6973_v42 = vpop.f32.mrf.mxu0  ;;  %v10299_v62 = vld [vmem:[%s14840_s1 + $0x2080] ss:$16 sps:$4 sm:$0xff]   ;;  %v10325_v15 = vld [vmem:[%s14840_s1 + $0x2004] ss:$16 sps:$4 sm:$0xff]  }
 0x207   :  { %v7014_v58 = vpop.f32.mrf.mxu1  ;;  %v13015_v36 = vadd.f32 %v7012_v49, %v6972_v23  ;;  %7266 = vmatpush1.bf16.msra.mxu0 %v10287_v14  ;;  %v10322_v14 = vld [vmem:[%s14840_s1 + $0x2c] ss:$16 sps:$4 sm:$0xff]   ;;  %v10326_v49 = vld [vmem:[%s14840_s1 + $0x8] ss:$16 sps:$4 sm:$0xff]  }
 0x208   :  { %7307 = vmatpush1.bf16.msra.mxu1 %v10290_v10  ;;  %v6974_v39 = vpop.f32.mrf.mxu0  ;;  %7267 = vmatprep.subr.bf16.mxu0 %v10295_v21  ;;  %v10317_v10 = vld [vmem:[%s14840_s1 + $0x2020] ss:$16 sps:$4 sm:$0xff]   ;;  %v10334_v23 = vld [vmem:[%s14840_s1 + $0x2ec] ss:$16 sps:$4 sm:$0xff]  }
 0x209   :  { %v7015_v40 = vpop.f32.mrf.mxu1  ;;  %7308 = vmatprep.subr.bf16.mxu1 %v10298_v7  ;;  %v8368_v21 = vld.sshfl [vmem:[%s14839_s0 + $0x40] sm:$0x3 pattern:$0x76325410]  ;;  %v10331_v7 = vld [vmem:[%s14840_s1 + $0x1ec] ss:$16 sps:$4 sm:$0xff]  }
 0x20a   :  { %v13092_v42 = vpack.c.bf16 %v8368_v21, %v8368_v21  ;;  %v10337_v58 = vld [vmem:[%s14840_s1 + $0x1cc] ss:$16 sps:$4 sm:$0xff]   ;;  %v10335_v40 = vld [vmem:[%s14840_s1 + $0x1c8] ss:$16 sps:$4 sm:$0xff]  }
 0x20b   :  { %7268 = vmatpush1.bf16.msra.mxu0 %v10293_v56  ;;  %v10329_v56 = vld [vmem:[%s14840_s1 + $0x1e8] ss:$16 sps:$4 sm:$0xff]   ;;  %v10340_v39 = vld [vmem:[%s14840_s1 + $0x2cc] ss:$16 sps:$4 sm:$0xff]  }
 0x20c   :  { %7309 = vmatpush1.bf16.msra.mxu1 %v10296_v13  ;;  %7269 = vmatprep.subr.bf16.mxu0 %v10301_v41  ;;  %v10332_v13 = vld [vmem:[%s14840_s1 + $0x2e8] ss:$16 sps:$4 sm:$0xff]   ;;  %v10373_v21 = vld [vmem:[%s14840_s1 + $0x10c] ss:$16 sps:$4 sm:$0xff]  }
 0x20d   :  { %7310 = vmatprep.subr.bf16.mxu1 %v10304_v50  ;;  %v10338_v41 = vld [vmem:[%s14840_s1 + $0x2c8] ss:$16 sps:$4 sm:$0xff]   ;;  %v10343_v50 = vld [vmem:[%s14840_s1 + $0x1ac] ss:$16 sps:$4 sm:$0xff]  }
 0x20f   :  { %7270 = vmatpush1.bf16.msra.mxu0 %v10299_v62  ;;  %v10346_v62 = vld [vmem:[%s14840_s1 + $0x2ac] ss:$16 sps:$4 sm:$0xff]  }
 0x210   :  { %7311 = vmatpush1.bf16.msra.mxu1 %v10302_v51  ;;  %7271 = vmatprep.subr.bf16.mxu0 %v10307_v24  ;;  %v10341_v51 = vld [vmem:[%s14840_s1 + $0x1a8] ss:$16 sps:$4 sm:$0xff]  }
 0x211   :  { %7312 = vmatprep.subr.bf16.mxu1 %v10310_v25  ;;  %v10344_v24 = vld [vmem:[%s14840_s1 + $0x2a8] ss:$16 sps:$4 sm:$0xff]   ;;  %v10349_v25 = vld [vmem:[%s14840_s1 + $0x18c] ss:$16 sps:$4 sm:$0xff]  }
 0x213   :  { %7272 = vmatpush1.bf16.msra.mxu0 %v10305_v60  ;;  %v10347_v60 = vld [vmem:[%s14840_s1 + $0x188] ss:$16 sps:$4 sm:$0xff]  }
 0x214   :  { %7313 = vmatpush1.bf16.msra.mxu1 %v10308_v20  ;;  %7273 = vmatprep.subr.bf16.mxu0 %v10313_v61  ;;  %v10350_v20 = vld [vmem:[%s14840_s1 + $0x288] ss:$16 sps:$4 sm:$0xff]   ;;  %v10355_v61 = vld [vmem:[%s14840_s1 + $0x16c] ss:$16 sps:$4 sm:$0xff]  }
 0x215   :  { %7314 = vmatprep.subr.bf16.mxu1 %v10316_v63  ;;  %v10358_v63 = vld [vmem:[%s14840_s1 + $0x26c] ss:$16 sps:$4 sm:$0xff]  }
 0x217   :  { %7274 = vmatpush1.bf16.msra.mxu0 %v10311_v6  ;;  %v10353_v6 = vld [vmem:[%s14840_s1 + $0x168] ss:$16 sps:$4 sm:$0xff]  }
 0x218   :  { %7315 = vmatpush1.bf16.msra.mxu1 %v10314_v30  ;;  %7275 = vmatprep.subr.bf16.mxu0 %v10319_v11  ;;  %v10356_v30 = vld [vmem:[%s14840_s1 + $0x268] ss:$16 sps:$4 sm:$0xff]   ;;  %v10361_v11 = vld [vmem:[%s14840_s1 + $0x14c] ss:$16 sps:$4 sm:$0xff]  }
 0x219   :  { %7316 = vmatprep.subr.bf16.mxu1 %v10322_v14  ;;  %v10364_v14 = vld [vmem:[%s14840_s1 + $0x24c] ss:$16 sps:$4 sm:$0xff]  }
 0x21b   :  { %7276 = vmatpush1.bf16.msra.mxu0 %v10317_v10  ;;  %v10359_v10 = vld [vmem:[%s14840_s1 + $0x148] ss:$16 sps:$4 sm:$0xff]  }
 0x21c   :  { %7317 = vmatpush1.bf16.msra.mxu1 %v10320_v12  ;;  %7277 = vmatprep.subr.bf16.mxu0 %v10325_v15  ;;  %v10362_v12 = vld [vmem:[%s14840_s1 + $0x248] ss:$16 sps:$4 sm:$0xff]   ;;  %v10367_v15 = vld [vmem:[%s14840_s1 + $0x12c] ss:$16 sps:$4 sm:$0xff]  }
 0x21d   :  { %7318 = vmatprep.subr.bf16.mxu1 %v10328_v18  ;;  %v10370_v18 = vld [vmem:[%s14840_s1 + $0x22c] ss:$16 sps:$4 sm:$0xff]  }
 0x21f   :  { %7278 = vmatpush1.bf16.msra.mxu0 %v10323_v19  ;;  %v10365_v19 = vld [vmem:[%s14840_s1 + $0x128] ss:$16 sps:$4 sm:$0xff]  }
 0x220   :  { %7319 = vmatpush1.bf16.msra.mxu1 %v10326_v49  ;;  %7345 = vmatprep.subr.bf16.mxu0 %v10334_v23  ;;  %v10368_v49 = vld [vmem:[%s14840_s1 + $0x228] ss:$16 sps:$4 sm:$0xff]  }
 0x221   :  { %7320 = vmatprep.subr.bf16.mxu1 %v10331_v7  ;;  %v10376_v7 = vld [vmem:[%s14840_s1 + $0x20c] ss:$16 sps:$4 sm:$0xff]   ;;  %v10371_v23 = vld [vmem:[%s14840_s1 + $0x108] ss:$16 sps:$4 sm:$0xff]  }
 0x222   :  { %7296 = vmatmul.mubr.bf16.vlgmr.msra.gmra.mxu0 %v13092_v42 }
 0x223   :  { %7346 = vmatpush1.bf16.msra.mxu0 %v10332_v13  ;;  %7377 = vmatprep.mubr.bf16.mxu0 %v11359_v3  ;;  %v10352_v3 = vld [vmem:[%s14840_s1 + $0x28c] ss:$16 sps:$4 sm:$0xff]  }
 0x224   :  { %7321 = vmatpush2.bf16.msra.mxu1 %v10329_v56  ;;  %7347 = vmatprep.subr.bf16.mxu0 %v10340_v39  ;;  %v10374_v56 = vld [vmem:[%s14840_s1 + $0x208] ss:$16 sps:$4 sm:$0xff]   ;;  %v10379_v13 = vld [vmem:[%s14840_s1 + $0x3ec] ss:$16 sps:$4 sm:$0xff]  }
 0x225   :  { %7322 = vmatprep.subr.bf16.mxu1 %v10337_v58  ;;  %v10382_v58 = vld [vmem:[%s14840_s1 + $0x4ec] ss:$16 sps:$4 sm:$0xff]   ;;  %v10377_v39 = vld [vmem:[%s14840_s1 + $0x3e8] ss:$16 sps:$4 sm:$0xff]  }
 0x227   :  { %7348 = vmatpush1.bf16.msra.mxu0 %v10338_v41  ;;  %v10385_v41 = vld [vmem:[%s14840_s1 + $0x3cc] ss:$16 sps:$4 sm:$0xff]  }
 0x228   :  { %7323 = vmatpush2.bf16.msra.mxu1 %v10335_v40  ;;  %7349 = vmatprep.subr.bf16.mxu0 %v10346_v62  ;;  %v10380_v40 = vld [vmem:[%s14840_s1 + $0x4e8] ss:$16 sps:$4 sm:$0xff]  }
 0x229   :  { %7324 = vmatprep.subr.bf16.mxu1 %v10343_v50  ;;  %v10388_v50 = vld [vmem:[%s14840_s1 + $0x4cc] ss:$16 sps:$4 sm:$0xff]   ;;  %v10383_v62 = vld [vmem:[%s14840_s1 + $0x3c8] ss:$16 sps:$4 sm:$0xff]  }
 0x22b   :  { %7350 = vmatpush1.bf16.msra.mxu0 %v10344_v24 }
 0x22c   :  { %7325 = vmatpush2.bf16.msra.mxu1 %v10341_v51  ;;  %7351 = vmatprep.subr.bf16.mxu0 %v10352_v3  ;;  %v10386_v51 = vld [vmem:[%s14840_s1 + $0x4c8] ss:$16 sps:$4 sm:$0xff]  }
 0x22d   :  { %7326 = vmatprep.subr.bf16.mxu1 %v10349_v25 }
 0x22f   :  { %7352 = vmatpush1.bf16.msra.mxu0 %v10350_v20 }
 0x230   :  { %7327 = vmatpush2.bf16.msra.mxu1 %v10347_v60  ;;  %7353 = vmatprep.subr.bf16.mxu0 %v10358_v63  ;;  %v10394_v63 = vld [vmem:[%s14840_s1 + $0x4ac] ss:$16 sps:$4 sm:$0xff]  }
 0x231   :  { %7328 = vmatprep.subr.bf16.mxu1 %v10355_v61  ;;  %v10391_v61 = vld [vmem:[%s14840_s1 + $0x3ac] ss:$16 sps:$4 sm:$0xff]  }
 0x233   :  { %7354 = vmatpush1.bf16.msra.mxu0 %v10356_v30  ;;  %v10392_v30 = vld [vmem:[%s14840_s1 + $0x4a8] ss:$16 sps:$4 sm:$0xff]  }
 0x234   :  { %7329 = vmatpush2.bf16.msra.mxu1 %v10353_v6  ;;  %7355 = vmatprep.subr.bf16.mxu0 %v10364_v14 }
 0x235   :  { %7330 = vmatprep.subr.bf16.mxu1 %v10361_v11 }
 0x237   :  { %7356 = vmatpush1.bf16.msra.mxu0 %v10362_v12 }
 0x238   :  { %7331 = vmatpush2.bf16.msra.mxu1 %v10359_v10  ;;  %7357 = vmatprep.subr.bf16.mxu0 %v10370_v18  ;;  %v10400_v18 = vld [vmem:[%s14840_s1 + $0x48c] ss:$16 sps:$4 sm:$0xff]  }
 0x239   :  { %7332 = vmatprep.subr.bf16.mxu1 %v10367_v15 }
 0x23b   :  { %7358 = vmatpush1.bf16.msra.mxu0 %v10368_v49  ;;  %v10403_v49 = vld [vmem:[%s14840_s1 + $0x36c] ss:$16 sps:$4 sm:$0xff]  }
 0x23c   :  { %7333 = vmatpush2.bf16.msra.mxu1 %v10365_v19  ;;  %7359 = vmatprep.subr.bf16.mxu0 %v10376_v7  ;;  %v10398_v19 = vld [vmem:[%s14840_s1 + $0x488] ss:$16 sps:$4 sm:$0xff]  }
 0x23d   :  { %7334 = vmatprep.subr.bf16.mxu1 %v10373_v21  ;;  %v10406_v21 = vld [vmem:[%s14840_s1 + $0x46c] ss:$16 sps:$4 sm:$0xff]   ;;  %v10401_v7 = vld [vmem:[%s14840_s1 + $0x368] ss:$16 sps:$4 sm:$0xff]  }
 0x23f   :  { %7360 = vmatpush1.bf16.msra.mxu0 %v10374_v56  ;;  %v10409_v56 = vld [vmem:[%s14840_s1 + $0x34c] ss:$16 sps:$4 sm:$0xff]  }
 0x240   :  { %7335 = vmatpush2.bf16.msra.mxu1 %v10371_v23  ;;  %7361 = vmatprep.subr.bf16.mxu0 %v10379_v13  ;;  %v10404_v23 = vld [vmem:[%s14840_s1 + $0x468] ss:$16 sps:$4 sm:$0xff]   ;;  %v10412_v13 = vld [vmem:[%s14840_s1 + $0x44c] ss:$16 sps:$4 sm:$0xff]  }
 0x241   :  { %7386 = vmatprep.subr.bf16.mxu1 %v10382_v58  ;;  %v10407_v58 = vld [vmem:[%s14840_s1 + $0x348] ss:$16 sps:$4 sm:$0xff]  }
 0x242   :  { %v7051_v24 = vpop.f32.mrf.mxu0 }
 0x243   :  { %v7092_v25 = vpop.f32.mrf.mxu1  ;;  %7337 = vmatmul.mubr.bf16.vlgmr.msra.gmra.mxu1 %v11399_v16  ;;  %v7052_v3 = vadd.f32 %v7051_v24, %v13004_v22  ;;  %7362 = vmatpush2.bf16.msra.mxu0 %v10377_v39  ;;  %v10389_v22 = vld [vmem:[%s14840_s1 + $0x3a8] ss:$16 sps:$4 sm:$0xff]   ;;  %v10424_v24 = vld [vmem:[%s14840_s1 + $0x40c] ss:$16 sps:$4 sm:$0xff]  }
 0x244   :  { %7387 = vmatpush1.bf16.msra.mxu1 %v10380_v40  ;;  %v7053_v60 = vpop.f32.mrf.mxu0  ;;  %7363 = vmatprep.subr.bf16.mxu0 %v10385_v41  ;;  %v10410_v39 = vld [vmem:[%s14840_s1 + $0x448] ss:$16 sps:$4 sm:$0xff]   ;;  %v10415_v40 = vld [vmem:[%s14840_s1 + $0x32c] ss:$16 sps:$4 sm:$0xff]  }
 0x245   :  { %v7094_v20 = vpop.f32.mrf.mxu1  ;;  %7388 = vmatprep.subr.bf16.mxu1 %v10388_v50  ;;  %v13212_v6 = vadd.f32 %v7092_v25, %v7052_v3  ;;  %v7054_v16 = vadd.f32 %v7053_v60, %v13015_v36  ;;  %7418 = vmatprep.mubr.bf16.mxu1 %v11500_v53  ;;  %v10397_v36 = vld [vmem:[%s14840_s1 + $0x38c] ss:$16 sps:$4 sm:$0xff]   ;;  %v10395_v53 = vld [vmem:[%s14840_s1 + $0x388] ss:$16 sps:$4 sm:$0xff]  }
 0x246   :  { %v7055_v11 = vpop.f32.mrf.mxu0  ;;  %v10418_v41 = vld [vmem:[%s14840_s1 + $0x42c] ss:$16 sps:$4 sm:$0xff]   ;;  %v10413_v50 = vld [vmem:[%s14840_s1 + $0x328] ss:$16 sps:$4 sm:$0xff]  }
 0x247   :  { %v7096_v14 = vpop.f32.mrf.mxu1  ;;  %v13222_v10 = vadd.f32 %v7094_v20, %v7054_v16  ;;  %7364 = vmatpush2.bf16.msra.mxu0 %v10383_v62  ;;  %v10416_v62 = vld [vmem:[%s14840_s1 + $0x428] ss:$16 sps:$4 sm:$0xff]   ;;  %v10427_v60 = vld [vmem:[%s14840_s1 + $0x5ec] ss:$16 sps:$4 sm:$0xff]  }
 0x248   :  { %7389 = vmatpush1.bf16.msra.mxu1 %v10386_v51  ;;  %v7056_v12 = vpop.f32.mrf.mxu0  ;;  %7365 = vmatprep.subr.bf16.mxu0 %v10391_v61  ;;  %v10421_v51 = vld [vmem:[%s14840_s1 + $0x30c] ss:$16 sps:$4 sm:$0xff]   ;;  %v10419_v25 = vld [vmem:[%s14840_s1 + $0x308] ss:$16 sps:$4 sm:$0xff]  }
 0x249   :  { %v7097_v15 = vpop.f32.mrf.mxu1  ;;  %7390 = vmatprep.subr.bf16.mxu1 %v10394_v63  ;;  %v10422_v3 = vld [vmem:[%s14840_s1 + $0x408] ss:$16 sps:$4 sm:$0xff]   ;;  %v10430_v20 = vld [vmem:[%s14840_s1 + $0x6ec] ss:$16 sps:$4 sm:$0xff]  }
 0x24a   :  { %v10425_v61 = vld [vmem:[%s14840_s1 + $0x5e8] ss:$16 sps:$4 sm:$0xff]   ;;  %v10433_v16 = vld [vmem:[%s14840_s1 + $0x5cc] ss:$16 sps:$4 sm:$0xff]  }
 0x24b   :  { %7366 = vmatpush2.bf16.msra.mxu0 %v10389_v22  ;;  %v10428_v63 = vld [vmem:[%s14840_s1 + $0x6e8] ss:$16 sps:$4 sm:$0xff]   ;;  %v10436_v22 = vld [vmem:[%s14840_s1 + $0x6cc] ss:$16 sps:$4 sm:$0xff]  }
 0x24c   :  { %7391 = vmatpush1.bf16.msra.mxu1 %v10392_v30  ;;  %7367 = vmatprep.subr.bf16.mxu0 %v10397_v36  ;;  %v10431_v30 = vld [vmem:[%s14840_s1 + $0x5c8] ss:$16 sps:$4 sm:$0xff]   ;;  %v10439_v14 = vld [vmem:[%s14840_s1 + $0x5ac] ss:$16 sps:$4 sm:$0xff]  }
 0x24d   :  { %7392 = vmatprep.subr.bf16.mxu1 %v10400_v18  ;;  %v10434_v11 = vld [vmem:[%s14840_s1 + $0x6c8] ss:$16 sps:$4 sm:$0xff]   ;;  %v10442_v12 = vld [vmem:[%s14840_s1 + $0x6ac] ss:$16 sps:$4 sm:$0xff]  }
 0x24e   :  { %v10437_v15 = vld [vmem:[%s14840_s1 + $0x5a8] ss:$16 sps:$4 sm:$0xff]   ;;  %v10445_v36 = vld [vmem:[%s14840_s1 + $0x58c] ss:$16 sps:$4 sm:$0xff]  }
 0x24f   :  { %7368 = vmatpush2.bf16.msra.mxu0 %v10395_v53  ;;  %v10448_v18 = vld [vmem:[%s14840_s1 + $0x68c] ss:$16 sps:$4 sm:$0xff]   ;;  %v10443_v53 = vld [vmem:[%s14840_s1 + $0x588] ss:$16 sps:$4 sm:$0xff]  }
 0x250   :  { %7393 = vmatpush1.bf16.msra.mxu1 %v10398_v19  ;;  %7369 = vmatprep.subr.bf16.mxu0 %v10403_v49  ;;  %v10451_v19 = vld [vmem:[%s14840_s1 + $0x56c] ss:$16 sps:$4 sm:$0xff]  }
 0x251   :  { %7394 = vmatprep.subr.bf16.mxu1 %v10406_v21  ;;  %v10454_v49 = vld [vmem:[%s14840_s1 + $0x66c] ss:$16 sps:$4 sm:$0xff]   ;;  %v10449_v21 = vld [vmem:[%s14840_s1 + $0x568] ss:$16 sps:$4 sm:$0xff]  }
 0x253   :  { %7370 = vmatpush2.bf16.msra.mxu0 %v10401_v7  ;;  %v10452_v7 = vld [vmem:[%s14840_s1 + $0x668] ss:$16 sps:$4 sm:$0xff]  }
 0x254   :  { %7395 = vmatpush1.bf16.msra.mxu1 %v10404_v23  ;;  %7371 = vmatprep.subr.bf16.mxu0 %v10409_v56  ;;  %v10457_v23 = vld [vmem:[%s14840_s1 + $0x54c] ss:$16 sps:$4 sm:$0xff]  }
 0x255   :  { %7396 = vmatprep.subr.bf16.mxu1 %v10412_v13  ;;  %v10460_v56 = vld [vmem:[%s14840_s1 + $0x64c] ss:$16 sps:$4 sm:$0xff]   ;;  %v10455_v13 = vld [vmem:[%s14840_s1 + $0x548] ss:$16 sps:$4 sm:$0xff]  }
 0x257   :  { %7372 = vmatpush2.bf16.msra.mxu0 %v10407_v58  ;;  %v10458_v58 = vld [vmem:[%s14840_s1 + $0x648] ss:$16 sps:$4 sm:$0xff]  }
 0x258   :  { %7397 = vmatpush1.bf16.msra.mxu1 %v10410_v39  ;;  %7373 = vmatprep.subr.bf16.mxu0 %v10415_v40  ;;  %v10463_v39 = vld [vmem:[%s14840_s1 + $0x52c] ss:$16 sps:$4 sm:$0xff]  }
 0x259   :  { %7398 = vmatprep.subr.bf16.mxu1 %v10418_v41  ;;  %v10466_v40 = vld [vmem:[%s14840_s1 + $0x62c] ss:$16 sps:$4 sm:$0xff]  }
 0x25b   :  { %7374 = vmatpush2.bf16.msra.mxu0 %v10413_v50 }
 0x25c   :  { %7399 = vmatpush1.bf16.msra.mxu1 %v10416_v62  ;;  %7375 = vmatprep.subr.bf16.mxu0 %v10421_v51 }
 0x25d   :  { %7400 = vmatprep.subr.bf16.mxu1 %v10424_v24 }
 0x25f   :  { %7376 = vmatpush2.bf16.msra.mxu0 %v10419_v25 }
 0x260   :  { %7401 = vmatpush1.bf16.msra.mxu1 %v10422_v3  ;;  %7427 = vmatprep.subr.bf16.mxu0 %v10430_v20 }
 0x261   :  { %7402 = vmatprep.subr.bf16.mxu1 %v10427_v60 }
 0x262   :  { %7378 = vmatmul.mubr.bf16.vlgmr.msra.gmra.mxu0 %v11401_v17  ;;  %v10440_v17 = vld [vmem:[%s14840_s1 + $0x6a8] ss:$16 sps:$4 sm:$0xff]  }
 0x263   :  { %7428 = vmatpush1.bf16.msra.mxu0 %v10428_v63  ;;  %7459 = vmatprep.mubr.bf16.mxu0 %v11510_v57  ;;  %v10446_v57 = vld [vmem:[%s14840_s1 + $0x688] ss:$16 sps:$4 sm:$0xff]  }
 0x264   :  { %7403 = vmatpush2.bf16.msra.mxu1 %v10425_v61  ;;  %7429 = vmatprep.subr.bf16.mxu0 %v10436_v22 }
 0x265   :  { %7404 = vmatprep.subr.bf16.mxu1 %v10433_v16 }
 0x267   :  { %7430 = vmatpush1.bf16.msra.mxu0 %v10434_v11 }
 0x268   :  { %7405 = vmatpush2.bf16.msra.mxu1 %v10431_v30  ;;  %7431 = vmatprep.subr.bf16.mxu0 %v10442_v12 }
 0x269   :  { %7406 = vmatprep.subr.bf16.mxu1 %v10439_v14 }
 0x26b   :  { %7432 = vmatpush1.bf16.msra.mxu0 %v10440_v17 }
 0x26c   :  { %7407 = vmatpush2.bf16.msra.mxu1 %v10437_v15  ;;  %7433 = vmatprep.subr.bf16.mxu0 %v10448_v18 }
 0x26d   :  { %7408 = vmatprep.subr.bf16.mxu1 %v10445_v36 }
 0x26f   :  { %7434 = vmatpush1.bf16.msra.mxu0 %v10446_v57 }
 0x270   :  { %7409 = vmatpush2.bf16.msra.mxu1 %v10443_v53  ;;  %7435 = vmatprep.subr.bf16.mxu0 %v10454_v49 }
 0x271   :  { %7410 = vmatprep.subr.bf16.mxu1 %v10451_v19 }
 0x273   :  { %7436 = vmatpush1.bf16.msra.mxu0 %v10452_v7 }
 0x274   :  { %7411 = vmatpush2.bf16.msra.mxu1 %v10449_v21  ;;  %7437 = vmatprep.subr.bf16.mxu0 %v10460_v56 }
 0x275   :  { %7412 = vmatprep.subr.bf16.mxu1 %v10457_v23 }
 0x276   :  { %10 = vsyncpa [#allocation3], 0  ;;  %v10461_v41 = vld [vmem:[%s14840_s1 + $0x528] ss:$16 sps:$4 sm:$0xff]   ;;  %v10469_v62 = vld [vmem:[%s14840_s1 + $0x50c] ss:$16 sps:$4 sm:$0xff]  }
 0x277   :  { %7438 = vmatpush1.bf16.msra.mxu0 %v10458_v58  ;;  %v10464_v50 = vld [vmem:[%s14840_s1 + $0x628] ss:$16 sps:$4 sm:$0xff]   ;;  %v10472_v51 = vld [vmem:[%s14840_s1 + $0x60c] ss:$16 sps:$4 sm:$0xff]   ;;  %s11154_s27 = smov [#allocation2]   ;;  %vm8352_vm0 = vcmask 41984  }
 0x278   :  { %7413 = vmatpush2.bf16.msra.mxu1 %v10455_v13  ;;  %7439 = vmatprep.subr.bf16.mxu0 %v10466_v40  ;;  %v10467_v24 = vld [vmem:[%s14840_s1 + $0x508] ss:$16 sps:$4 sm:$0xff]   ;;  %v10475_v3 = vld [vmem:[%s14840_s1 + $0x7ec] ss:$16 sps:$4 sm:$0xff]   ;;  %s8360_s28 = sshll.u32 %s11154_s27, 4  ;;  %s8361_s28 = int_to_ptr.vmem [resolvable:$true] %s8360_s28 }
 0x279   :  { %7414 = vmatprep.subr.bf16.mxu1 %v10463_v39  ;;  %v10470_v25 = vld [vmem:[%s14840_s1 + $0x608] ss:$16 sps:$4 sm:$0xff]   ;;  %v10478_v60 = vld [vmem:[%s14840_s1 + $0x8ec] ss:$16 sps:$4 sm:$0xff]   ;;  %s11130_s29 = scalar_lea.vmem %s8361_s28, 32  ;;  %p11135_p1 = scmp.lt.s32.totalorder %s8361_s28, %s8361_s28 }
 0x27a   :  { %v10473_v20 = vld [vmem:[%s14840_s1 + $0x7e8] ss:$16 sps:$4 sm:$0xff]   ;;  %v10481_v63 = vld [vmem:[%s14840_s1 + $0x7cc] ss:$16 sps:$4 sm:$0xff]   ;;  %p11131_p0 = scmp.ne.s32.totalorder %s8361_s28, %s11130_s29  ;;  %p11136_p2 = scmp.lt.s32.totalorder %s11130_s29, %s11130_s29 }
 0x27b   :  { %7440 = vmatpush1.bf16.msra.mxu0 %v10464_v50  ;;  %v10476_v61 = vld [vmem:[%s14840_s1 + $0x8e8] ss:$16 sps:$4 sm:$0xff]   ;;  %v10484_v16 = vld [vmem:[%s14840_s1 + $0x8cc] ss:$16 sps:$4 sm:$0xff]  }
 0x27c   :  { %7415 = vmatpush2.bf16.msra.mxu1 %v10461_v41  ;;  %7441 = vmatprep.subr.bf16.mxu0 %v10472_v51  ;;  %v10479_v14 = vld [vmem:[%s14840_s1 + $0x7c8] ss:$16 sps:$4 sm:$0xff]   ;;  %v10499_v58 = vld [vmem:[%s14840_s1 + $0x76c] ss:$16 sps:$4 sm:$0xff]   ;;  %p11137_p3 = por %p11136_p2, %p11135_p1 }
 0x27d   :  { %7416 = vmatprep.subr.bf16.mxu1 %v10469_v62  ;;  %v10482_v12 = vld [vmem:[%s14840_s1 + $0x8c8] ss:$16 sps:$4 sm:$0xff]   ;;  %v10502_v39 = vld [vmem:[%s14840_s1 + $0x86c] ss:$16 sps:$4 sm:$0xff]  }
 0x27e   :  { %v10485_v49 = vld [vmem:[%s14840_s1 + $0x7a8] ss:$16 sps:$4 sm:$0xff]   ;;  %v10505_v50 = vld [vmem:[%s14840_s1 + $0x74c] ss:$16 sps:$4 sm:$0xff]   ;;  %p11138_p4 = pnand %p11137_p3, %p11131_p0 }
 0x27f   :  { %7442 = vmatpush1.bf16.msra.mxu0 %v10470_v25  ;;  %v10488_v21 = vld [vmem:[%s14840_s1 + $0x8a8] ss:$16 sps:$4 sm:$0xff]   ;;  %v10508_v62 = vld [vmem:[%s14840_s1 + $0x84c] ss:$16 sps:$4 sm:$0xff]  }
 0x280   :  { %7417 = vmatpush2.bf16.msra.mxu1 %v10467_v24  ;;  %7443 = vmatprep.subr.bf16.mxu0 %v10475_v3  ;;  %v10491_v56 = vld [vmem:[%s14840_s1 + $0x788] ss:$16 sps:$4 sm:$0xff]   ;;  %v10511_v25 = vld [vmem:[%s14840_s1 + $0x72c] ss:$16 sps:$4 sm:$0xff]  }
 0x281   :  { %7468 = vmatprep.subr.bf16.mxu1 %v10478_v60  ;;  %v10494_v13 = vld [vmem:[%s14840_s1 + $0x888] ss:$16 sps:$4 sm:$0xff]   ;;  %v10514_v3 = vld [vmem:[%s14840_s1 + $0x82c] ss:$16 sps:$4 sm:$0xff]  }
 0x282   :  { %v7133_v22 = vpop.f32.mrf.mxu0  ;;  %v10497_v40 = vld [vmem:[%s14840_s1 + $0x768] ss:$16 sps:$4 sm:$0xff]  }
 0x283   :  { %v7174_v30 = vpop.f32.mrf.mxu1  ;;  %7419 = vmatmul.mubr.bf16.vlgmr.msra.gmra.mxu1 %v11618_v32  ;;  %v7134_v11 = vadd.f32 %v7133_v22, %v13212_v6  ;;  %7444 = vmatpush2.bf16.msra.mxu0 %v10473_v20  ;;  %v10487_v32 = vld [vmem:[%s14840_s1 + $0x7ac] ss:$16 sps:$4 sm:$0xff]   ;;  %v10500_v41 = vld [vmem:[%s14840_s1 + $0x868] ss:$16 sps:$4 sm:$0xff]  }
 0x284   :  { %7469 = vmatpush1.bf16.msra.mxu1 %v10476_v61  ;;  %v7135_v15 = vpop.f32.mrf.mxu0  ;;  %7445 = vmatprep.subr.bf16.mxu0 %v10481_v63  ;;  %v10490_v6 = vld [vmem:[%s14840_s1 + $0x8ac] ss:$16 sps:$4 sm:$0xff]   ;;  %v10503_v51 = vld [vmem:[%s14840_s1 + $0x748] ss:$16 sps:$4 sm:$0xff]  }
 0x285   :  { %v7176_v17 = vpop.f32.mrf.mxu1  ;;  %7470 = vmatprep.subr.bf16.mxu1 %v10484_v16  ;;  %v13414_v36 = vadd.f32 %v7174_v30, %v7134_v11  ;;  %v7136_v18 = vadd.f32 %v7135_v15, %v13222_v10  ;;  %7500 = vmatprep.mubr.bf16.mxu1 %v11661_v48  ;;  %v10493_v48 = vld [vmem:[%s14840_s1 + $0x78c] ss:$16 sps:$4 sm:$0xff]   ;;  %v10506_v24 = vld [vmem:[%s14840_s1 + $0x848] ss:$16 sps:$4 sm:$0xff]  }
 0x286   :  { %v7137_v53 = vpop.f32.mrf.mxu0  ;;  %v10496_v10 = vld [vmem:[%s14840_s1 + $0x88c] ss:$16 sps:$4 sm:$0xff]   ;;  %v10509_v60 = vld [vmem:[%s14840_s1 + $0x728] ss:$16 sps:$4 sm:$0xff]  }
 0x287   :  { %v7178_v57 = vpop.f32.mrf.mxu1  ;;  %v13418_v19 = vadd.f32 %v7176_v17, %v7136_v18  ;;  %7446 = vmatpush2.bf16.msra.mxu0 %v10479_v14  ;;  %v10512_v20 = vld [vmem:[%s14840_s1 + $0x828] ss:$16 sps:$4 sm:$0xff]   ;;  %v10517_v61 = vld [vmem:[%s14840_s1 + $0x70c] ss:$16 sps:$4 sm:$0xff]  }
 0x288   :  { %7471 = vmatpush1.bf16.msra.mxu1 %v10482_v12  ;;  %v7138_v7 = vpop.f32.mrf.mxu0  ;;  %7447 = vmatprep.subr.bf16.mxu0 %v10487_v32  ;;  %v10520_v63 = vld [vmem:[%s14840_s1 + $0x80c] ss:$16 sps:$4 sm:$0xff]   ;;  %v10515_v16 = vld [vmem:[%s14840_s1 + $0x708] ss:$16 sps:$4 sm:$0xff]  }
 0x289   :  { %v7179_v23 = vpop.f32.mrf.mxu1  ;;  %7472 = vmatprep.subr.bf16.mxu1 %v10490_v6  ;;  %v10518_v22 = vld [vmem:[%s14840_s1 + $0x808] ss:$16 sps:$4 sm:$0xff]   ;;  %v10523_v30 = vld [vmem:[%s14840_s1 + $0x9ec] ss:$16 sps:$4 sm:$0xff]  }
 0x28a   :  { %v10526_v11 = vld [vmem:[%s14840_s1 + $0xaec] ss:$16 sps:$4 sm:$0xff]   ;;  %v10521_v14 = vld [vmem:[%s14840_s1 + $0x9e8] ss:$16 sps:$4 sm:$0xff]  }
 0x28b   :  { %7448 = vmatpush2.bf16.msra.mxu0 %v10485_v49  ;;  %v10524_v12 = vld [vmem:[%s14840_s1 + $0xae8] ss:$16 sps:$4 sm:$0xff]   ;;  %v10529_v15 = vld [vmem:[%s14840_s1 + $0x9cc] ss:$16 sps:$4 sm:$0xff]  }
 0x28c   :  { %7473 = vmatpush1.bf16.msra.mxu1 %v10488_v21  ;;  %7449 = vmatprep.subr.bf16.mxu0 %v10493_v48  ;;  %v10532_v17 = vld [vmem:[%s14840_s1 + $0xacc] ss:$16 sps:$4 sm:$0xff]   ;;  %v10527_v32 = vld [vmem:[%s14840_s1 + $0x9c8] ss:$16 sps:$4 sm:$0xff]  }
 0x28d   :  { %7474 = vmatprep.subr.bf16.mxu1 %v10496_v10  ;;  %v10530_v6 = vld [vmem:[%s14840_s1 + $0xac8] ss:$16 sps:$4 sm:$0xff]   ;;  %v10535_v18 = vld [vmem:[%s14840_s1 + $0x9ac] ss:$16 sps:$4 sm:$0xff]  }
 0x28e   :  { %v10533_v53 = vld [vmem:[%s14840_s1 + $0x9a8] ss:$16 sps:$4 sm:$0xff]   ;;  %v10541_v49 = vld [vmem:[%s14840_s1 + $0x98c] ss:$16 sps:$4 sm:$0xff]  }
 0x28f   :  { %7450 = vmatpush2.bf16.msra.mxu0 %v10491_v56  ;;  %v10536_v57 = vld [vmem:[%s14840_s1 + $0xaa8] ss:$16 sps:$4 sm:$0xff]   ;;  %v10547_v23 = vld [vmem:[%s14840_s1 + $0x96c] ss:$16 sps:$4 sm:$0xff]  }
 0x290   :  { %7475 = vmatpush1.bf16.msra.mxu1 %v10494_v13  ;;  %7451 = vmatprep.subr.bf16.mxu0 %v10499_v58  ;;  %v10539_v21 = vld [vmem:[%s14840_s1 + $0x988] ss:$16 sps:$4 sm:$0xff]   ;;  %v10550_v48 = vld [vmem:[%s14840_s1 + $0xa6c] ss:$16 sps:$4 sm:$0xff]  }
 0x291   :  { %7476 = vmatprep.subr.bf16.mxu1 %v10502_v39  ;;  %v10542_v7 = vld [vmem:[%s14840_s1 + $0xa88] ss:$16 sps:$4 sm:$0xff]   ;;  %v10553_v13 = vld [vmem:[%s14840_s1 + $0x94c] ss:$16 sps:$4 sm:$0xff]  }
 0x292   :  { %v10545_v10 = vld [vmem:[%s14840_s1 + $0x968] ss:$16 sps:$4 sm:$0xff]   ;;  %v10556_v58 = vld [vmem:[%s14840_s1 + $0xa4c] ss:$16 sps:$4 sm:$0xff]  }
 0x293   :  { %7452 = vmatpush2.bf16.msra.mxu0 %v10497_v40  ;;  %v10548_v56 = vld [vmem:[%s14840_s1 + $0xa68] ss:$16 sps:$4 sm:$0xff]  }
 0x294   :  { %7477 = vmatpush1.bf16.msra.mxu1 %v10500_v41  ;;  %7453 = vmatprep.subr.bf16.mxu0 %v10505_v50  ;;  %v10551_v39 = vld [vmem:[%s14840_s1 + $0x948] ss:$16 sps:$4 sm:$0xff]   ;;  %v10559_v41 = vld [vmem:[%s14840_s1 + $0x92c] ss:$16 sps:$4 sm:$0xff]  }
 0x295   :  { %7478 = vmatprep.subr.bf16.mxu1 %v10508_v62  ;;  %v10554_v40 = vld [vmem:[%s14840_s1 + $0xa48] ss:$16 sps:$4 sm:$0xff]   ;;  %v10562_v50 = vld [vmem:[%s14840_s1 + $0xa2c] ss:$16 sps:$4 sm:$0xff]  }
 0x296   :  { %v10557_v62 = vld [vmem:[%s14840_s1 + $0x928] ss:$16 sps:$4 sm:$0xff]  }
 0x297   :  { %7454 = vmatpush2.bf16.msra.mxu0 %v10503_v51  ;;  %v10560_v51 = vld [vmem:[%s14840_s1 + $0xa28] ss:$16 sps:$4 sm:$0xff]  }
 0x298   :  { %7479 = vmatpush1.bf16.msra.mxu1 %v10506_v24  ;;  %7455 = vmatprep.subr.bf16.mxu0 %v10511_v25  ;;  %v10565_v24 = vld [vmem:[%s14840_s1 + $0x90c] ss:$16 sps:$4 sm:$0xff]  }
 0x299   :  { %7480 = vmatprep.subr.bf16.mxu1 %v10514_v3  ;;  %v10568_v25 = vld [vmem:[%s14840_s1 + $0xa0c] ss:$16 sps:$4 sm:$0xff]   ;;  %v10563_v3 = vld [vmem:[%s14840_s1 + $0x908] ss:$16 sps:$4 sm:$0xff]  }
 0x29b   :  { %7456 = vmatpush2.bf16.msra.mxu0 %v10509_v60  ;;  %v10566_v60 = vld [vmem:[%s14840_s1 + $0xa08] ss:$16 sps:$4 sm:$0xff]  }
 0x29c   :  { %7481 = vmatpush1.bf16.msra.mxu1 %v10512_v20  ;;  %7457 = vmatprep.subr.bf16.mxu0 %v10517_v61  ;;  %v10571_v20 = vld [vmem:[%s14840_s1 + $0xbec] ss:$16 sps:$4 sm:$0xff]  }
 0x29d   :  { %7482 = vmatprep.subr.bf16.mxu1 %v10520_v63  ;;  %v10574_v61 = vld [vmem:[%s14840_s1 + $0xcec] ss:$16 sps:$4 sm:$0xff]   ;;  %v10569_v63 = vld [vmem:[%s14840_s1 + $0xbe8] ss:$16 sps:$4 sm:$0xff]  }
 0x29f   :  { %7458 = vmatpush2.bf16.msra.mxu0 %v10515_v16  ;;  %v10572_v16 = vld [vmem:[%s14840_s1 + $0xce8] ss:$16 sps:$4 sm:$0xff]  }
 0x2a0   :  { %7483 = vmatpush1.bf16.msra.mxu1 %v10518_v22  ;;  %7509 = vmatprep.subr.bf16.mxu0 %v10526_v11  ;;  %v10577_v22 = vld [vmem:[%s14840_s1 + $0xbcc] ss:$16 sps:$4 sm:$0xff]  }
 0x2a1   :  { %7484 = vmatprep.subr.bf16.mxu1 %v10523_v30  ;;  %v10580_v30 = vld [vmem:[%s14840_s1 + $0xccc] ss:$16 sps:$4 sm:$0xff]  }
 0x2a2   :  { %7460 = vmatmul.mubr.bf16.vlgmr.msra.gmra.mxu0 %v11622_v33  ;;  %v10538_v33 = vld [vmem:[%s14840_s1 + $0xaac] ss:$16 sps:$4 sm:$0xff]  }
 0x2a3   :  { %7510 = vmatpush1.bf16.msra.mxu0 %v10524_v12  ;;  %7541 = vmatprep.mubr.bf16.mxu0 %v11669_v52  ;;  %v10544_v52 = vld [vmem:[%s14840_s1 + $0xa8c] ss:$16 sps:$4 sm:$0xff]  }
 0x2a4   :  { %7485 = vmatpush2.bf16.msra.mxu1 %v10521_v14  ;;  %7511 = vmatprep.subr.bf16.mxu0 %v10532_v17  ;;  %v10578_v17 = vld [vmem:[%s14840_s1 + $0xcc8] ss:$16 sps:$4 sm:$0xff]  }
 0x2a5   :  { %7486 = vmatprep.subr.bf16.mxu1 %v10529_v15  ;;  %v10575_v15 = vld [vmem:[%s14840_s1 + $0xbc8] ss:$16 sps:$4 sm:$0xff]  }
 0x2a7   :  { %7512 = vmatpush1.bf16.msra.mxu0 %v10530_v6 }
 0x2a8   :  { %7487 = vmatpush2.bf16.msra.mxu1 %v10527_v32  ;;  %7513 = vmatprep.subr.bf16.mxu0 %v10538_v33 }
 0x2a9   :  { %7488 = vmatprep.subr.bf16.mxu1 %v10535_v18 }
 0x2ab   :  { %7514 = vmatpush1.bf16.msra.mxu0 %v10536_v57 }
 0x2ac   :  { %7489 = vmatpush2.bf16.msra.mxu1 %v10533_v53  ;;  %7515 = vmatprep.subr.bf16.mxu0 %v10544_v52  ;;  %v10581_v52 = vld [vmem:[%s14840_s1 + $0xba8] ss:$16 sps:$4 sm:$0xff]  }
 0x2ad   :  { %7490 = vmatprep.subr.bf16.mxu1 %v10541_v49 }
 0x2af   :  { %7516 = vmatpush1.bf16.msra.mxu0 %v10542_v7 }
 0x2b0   :  { %7491 = vmatpush2.bf16.msra.mxu1 %v10539_v21  ;;  %7517 = vmatprep.subr.bf16.mxu0 %v10550_v48  ;;  %v10584_v21 = vld [vmem:[%s14840_s1 + $0xca8] ss:$16 sps:$4 sm:$0xff]  }
 0x2b1   :  { %7492 = vmatprep.subr.bf16.mxu1 %v10547_v23  ;;  %v10587_v48 = vld [vmem:[%s14840_s1 + $0xb88] ss:$16 sps:$4 sm:$0xff]  }
 0x2b3   :  { %7518 = vmatpush1.bf16.msra.mxu0 %v10548_v56  ;;  %v10595_v56 = vld [vmem:[%s14840_s1 + $0xb6c] ss:$16 sps:$4 sm:$0xff]  }
 0x2b4   :  { %7493 = vmatpush2.bf16.msra.mxu1 %v10545_v10  ;;  %7519 = vmatprep.subr.bf16.mxu0 %v10556_v58  ;;  %v10590_v10 = vld [vmem:[%s14840_s1 + $0xc88] ss:$16 sps:$4 sm:$0xff]  }
 0x2b5   :  { %7494 = vmatprep.subr.bf16.mxu1 %v10553_v13  ;;  %v10598_v13 = vld [vmem:[%s14840_s1 + $0xc6c] ss:$16 sps:$4 sm:$0xff]   ;;  %v10593_v58 = vld [vmem:[%s14840_s1 + $0xb68] ss:$16 sps:$4 sm:$0xff]  }
 0x2b7   :  { %7520 = vmatpush1.bf16.msra.mxu0 %v10554_v40  ;;  %v10601_v40 = vld [vmem:[%s14840_s1 + $0xb4c] ss:$16 sps:$4 sm:$0xff]  }
 0x2b8   :  { %7495 = vmatpush2.bf16.msra.mxu1 %v10551_v39  ;;  %7521 = vmatprep.subr.bf16.mxu0 %v10562_v50  ;;  %v10596_v39 = vld [vmem:[%s14840_s1 + $0xc68] ss:$16 sps:$4 sm:$0xff]  }
 0x2b9   :  { %7496 = vmatprep.subr.bf16.mxu1 %v10559_v41  ;;  %v10604_v41 = vld [vmem:[%s14840_s1 + $0xc4c] ss:$16 sps:$4 sm:$0xff]   ;;  %v10599_v50 = vld [vmem:[%s14840_s1 + $0xb48] ss:$16 sps:$4 sm:$0xff]  }
 0x2bb   :  { %7522 = vmatpush1.bf16.msra.mxu0 %v10560_v51  ;;  %v10607_v51 = vld [vmem:[%s14840_s1 + $0xb2c] ss:$16 sps:$4 sm:$0xff]  }
 0x2bc   :  { %7497 = vmatpush2.bf16.msra.mxu1 %v10557_v62  ;;  %7523 = vmatprep.subr.bf16.mxu0 %v10568_v25  ;;  %v10602_v62 = vld [vmem:[%s14840_s1 + $0xc48] ss:$16 sps:$4 sm:$0xff]  }
 0x2bd   :  { %7498 = vmatprep.subr.bf16.mxu1 %v10565_v24  ;;  %v10610_v24 = vld [vmem:[%s14840_s1 + $0xc2c] ss:$16 sps:$4 sm:$0xff]   ;;  %v10605_v25 = vld [vmem:[%s14840_s1 + $0xb28] ss:$16 sps:$4 sm:$0xff]  }
 0x2bf   :  { %7524 = vmatpush1.bf16.msra.mxu0 %v10566_v60  ;;  %v10613_v60 = vld [vmem:[%s14840_s1 + $0xb0c] ss:$16 sps:$4 sm:$0xff]  }
 0x2c0   :  { %7499 = vmatpush2.bf16.msra.mxu1 %v10563_v3  ;;  %7525 = vmatprep.subr.bf16.mxu0 %v10571_v20  ;;  %v10608_v3 = vld [vmem:[%s14840_s1 + $0xc28] ss:$16 sps:$4 sm:$0xff]   ;;  %v10616_v20 = vld [vmem:[%s14840_s1 + $0xc0c] ss:$16 sps:$4 sm:$0xff]  }
 0x2c1   :  { %7550 = vmatprep.subr.bf16.mxu1 %v10574_v61  ;;  %v10611_v61 = vld [vmem:[%s14840_s1 + $0xb08] ss:$16 sps:$4 sm:$0xff]  }
 0x2c2   :  { %v7215_v11 = vpop.f32.mrf.mxu0 }
 0x2c3   :  { %v7256_v14 = vpop.f32.mrf.mxu1  ;;  %7501 = vmatmul.mubr.bf16.vlgmr.msra.gmra.mxu1 %v11852_v4  ;;  %v7216_v12 = vadd.f32 %v7215_v11, %v13414_v36  ;;  %7526 = vmatpush2.bf16.msra.mxu0 %v10569_v63  ;;  %v10583_v4 = vld [vmem:[%s14840_s1 + $0xbac] ss:$16 sps:$4 sm:$0xff]   ;;  %v10614_v63 = vld [vmem:[%s14840_s1 + $0xc08] ss:$16 sps:$4 sm:$0xff]  }
 0x2c4   :  { %7551 = vmatpush1.bf16.msra.mxu1 %v10572_v16  ;;  %v7217_v32 = vpop.f32.mrf.mxu0  ;;  %7527 = vmatprep.subr.bf16.mxu0 %v10577_v22  ;;  %v10586_v36 = vld [vmem:[%s14840_s1 + $0xcac] ss:$16 sps:$4 sm:$0xff]   ;;  %v10620_v11 = vld [vmem:[%s14840_s1 + $0xee8] ss:$16 sps:$4 sm:$0xff]  }
 0x2c5   :  { %v7258_v6 = vpop.f32.mrf.mxu1  ;;  %7552 = vmatprep.subr.bf16.mxu1 %v10580_v30  ;;  %v13616_v18 = vadd.f32 %v7256_v14, %v7216_v12  ;;  %v7218_v33 = vadd.f32 %v7217_v32, %v13418_v19  ;;  %7582 = vmatprep.mubr.bf16.mxu1 %v11870_v8  ;;  %v10589_v8 = vld [vmem:[%s14840_s1 + $0xb8c] ss:$16 sps:$4 sm:$0xff]   ;;  %v10617_v30 = vld [vmem:[%s14840_s1 + $0xde8] ss:$16 sps:$4 sm:$0xff]  }
 0x2c6   :  { %v7219_v53 = vpop.f32.mrf.mxu0  ;;  %v10592_v19 = vld [vmem:[%s14840_s1 + $0xc8c] ss:$16 sps:$4 sm:$0xff]   ;;  %v10623_v32 = vld [vmem:[%s14840_s1 + $0xdc8] ss:$16 sps:$4 sm:$0xff]  }
 0x2c7   :  { %v7260_v57 = vpop.f32.mrf.mxu1  ;;  %v13620_v49 = vadd.f32 %v7258_v6, %v7218_v33  ;;  %7528 = vmatpush2.bf16.msra.mxu0 %v10575_v15  ;;  %v10619_v16 = vld [vmem:[%s14840_s1 + $0xdec] ss:$16 sps:$4 sm:$0xff]   ;;  %v10626_v6 = vld [vmem:[%s14840_s1 + $0xec8] ss:$16 sps:$4 sm:$0xff]  }
 0x2c8   :  { %7553 = vmatpush1.bf16.msra.mxu1 %v10578_v17  ;;  %v7220_v7 = vpop.f32.mrf.mxu0  ;;  %7529 = vmatprep.subr.bf16.mxu0 %v10583_v4  ;;  %v10622_v22 = vld [vmem:[%s14840_s1 + $0xeec] ss:$16 sps:$4 sm:$0xff]   ;;  %v10629_v53 = vld [vmem:[%s14840_s1 + $0xda8] ss:$16 sps:$4 sm:$0xff]  }
 0x2c9   :  { %v7261_v23 = vpop.f32.mrf.mxu1  ;;  %7554 = vmatprep.subr.bf16.mxu1 %v10586_v36  ;;  %v10625_v14 = vld [vmem:[%s14840_s1 + $0xdcc] ss:$16 sps:$4 sm:$0xff]   ;;  %v10632_v57 = vld [vmem:[%s14840_s1 + $0xea8] ss:$16 sps:$4 sm:$0xff]  }
 0x2ca   :  { %v10628_v12 = vld [vmem:[%s14840_s1 + $0xecc] ss:$16 sps:$4 sm:$0xff]   ;;  %v10638_v7 = vld [vmem:[%s14840_s1 + $0xe88] ss:$16 sps:$4 sm:$0xff]  }
 0x2cb   :  { %7530 = vmatpush2.bf16.msra.mxu0 %v10581_v52  ;;  %v10634_v36 = vld [vmem:[%s14840_s1 + $0xeac] ss:$16 sps:$4 sm:$0xff]  }
 0x2cc   :  { %7555 = vmatpush1.bf16.msra.mxu1 %v10584_v21  ;;  %7531 = vmatprep.subr.bf16.mxu0 %v10589_v8  ;;  %v10635_v21 = vld [vmem:[%s14840_s1 + $0xd88] ss:$16 sps:$4 sm:$0xff]   ;;  %v10643_v23 = vld [vmem:[%s14840_s1 + $0xd6c] ss:$16 sps:$4 sm:$0xff]  }
 0x2cd   :  { %7556 = vmatprep.subr.bf16.mxu1 %v10592_v19  ;;  %v10646_v8 = vld [vmem:[%s14840_s1 + $0xe6c] ss:$16 sps:$4 sm:$0xff]   ;;  %v10641_v19 = vld [vmem:[%s14840_s1 + $0xd68] ss:$16 sps:$4 sm:$0xff]  }
 0x2cf   :  { %7532 = vmatpush2.bf16.msra.mxu0 %v10587_v48  ;;  %v10644_v48 = vld [vmem:[%s14840_s1 + $0xe68] ss:$16 sps:$4 sm:$0xff]  }
 0x2d0   :  { %7557 = vmatpush1.bf16.msra.mxu1 %v10590_v10  ;;  %7533 = vmatprep.subr.bf16.mxu0 %v10595_v56  ;;  %v10649_v10 = vld [vmem:[%s14840_s1 + $0xd4c] ss:$16 sps:$4 sm:$0xff]  }
 0x2d1   :  { %7558 = vmatprep.subr.bf16.mxu1 %v10598_v13  ;;  %v10652_v56 = vld [vmem:[%s14840_s1 + $0xe4c] ss:$16 sps:$4 sm:$0xff]   ;;  %v10647_v13 = vld [vmem:[%s14840_s1 + $0xd48] ss:$16 sps:$4 sm:$0xff]  }
 0x2d3   :  { %7534 = vmatpush2.bf16.msra.mxu0 %v10593_v58  ;;  %v10650_v58 = vld [vmem:[%s14840_s1 + $0xe48] ss:$16 sps:$4 sm:$0xff]  }
 0x2d4   :  { %7559 = vmatpush1.bf16.msra.mxu1 %v10596_v39  ;;  %7535 = vmatprep.subr.bf16.mxu0 %v10601_v40  ;;  %v10655_v39 = vld [vmem:[%s14840_s1 + $0xd2c] ss:$16 sps:$4 sm:$0xff]  }
 0x2d5   :  { %7560 = vmatprep.subr.bf16.mxu1 %v10604_v41  ;;  %v10658_v40 = vld [vmem:[%s14840_s1 + $0xe2c] ss:$16 sps:$4 sm:$0xff]   ;;  %v10653_v41 = vld [vmem:[%s14840_s1 + $0xd28] ss:$16 sps:$4 sm:$0xff]  }
 0x2d7   :  { %7536 = vmatpush2.bf16.msra.mxu0 %v10599_v50  ;;  %v10656_v50 = vld [vmem:[%s14840_s1 + $0xe28] ss:$16 sps:$4 sm:$0xff]  }
 0x2d8   :  { %7561 = vmatpush1.bf16.msra.mxu1 %v10602_v62  ;;  %7537 = vmatprep.subr.bf16.mxu0 %v10607_v51  ;;  %v10661_v62 = vld [vmem:[%s14840_s1 + $0xd0c] ss:$16 sps:$4 sm:$0xff]  }
 0x2d9   :  { %7562 = vmatprep.subr.bf16.mxu1 %v10610_v24  ;;  %v10664_v51 = vld [vmem:[%s14840_s1 + $0xe0c] ss:$16 sps:$4 sm:$0xff]   ;;  %v10659_v24 = vld [vmem:[%s14840_s1 + $0xd08] ss:$16 sps:$4 sm:$0xff]  }
 0x2db   :  { %7538 = vmatpush2.bf16.msra.mxu0 %v10605_v25  ;;  %v10662_v25 = vld [vmem:[%s14840_s1 + $0xe08] ss:$16 sps:$4 sm:$0xff]  }
 0x2dc   :  { %7563 = vmatpush1.bf16.msra.mxu1 %v10608_v3  ;;  %7539 = vmatprep.subr.bf16.mxu0 %v10613_v60  ;;  %v10667_v3 = vld [vmem:[%s14840_s1 + $0xfec] ss:$16 sps:$4 sm:$0xff]  }
 0x2dd   :  { %7564 = vmatprep.subr.bf16.mxu1 %v10616_v20  ;;  %v10670_v60 = vld [vmem:[%s14840_s1 + $0x10ec] ss:$16 sps:$4 sm:$0xff]   ;;  %v10665_v20 = vld [vmem:[%s14840_s1 + $0xfe8] ss:$16 sps:$4 sm:$0xff]  }
 0x2df   :  { %7540 = vmatpush2.bf16.msra.mxu0 %v10611_v61  ;;  %v10668_v61 = vld [vmem:[%s14840_s1 + $0x10e8] ss:$16 sps:$4 sm:$0xff]  }
 0x2e0   :  { %7565 = vmatpush1.bf16.msra.mxu1 %v10614_v63  ;;  %7591 = vmatprep.subr.bf16.mxu0 %v10622_v22  ;;  %v10673_v63 = vld [vmem:[%s14840_s1 + $0xfcc] ss:$16 sps:$4 sm:$0xff]  }
 0x2e1   :  { %7566 = vmatprep.subr.bf16.mxu1 %v10619_v16  ;;  %v10676_v16 = vld [vmem:[%s14840_s1 + $0x10cc] ss:$16 sps:$4 sm:$0xff]  }
 0x2e2   :  { %v7297_v15 = vpop.f32.mrf.mxu0  ;;  %7542 = vmatmul.mubr.bf16.vlgmr.msra.gmra.mxu0 %v11856_v5  ;;  %v10631_v5 = vld [vmem:[%s14840_s1 + $0xdac] ss:$16 sps:$4 sm:$0xff]  }
 0x2e3   :  { %v13708_v17 = vadd.f32 %v7297_v15, %v13616_v18  ;;  %7592 = vmatpush1.bf16.msra.mxu0 %v10620_v11  ;;  %7623 = vmatprep.mubr.bf16.mxu0 %v11872_v9  ;;  %v10640_v9 = vld [vmem:[%s14840_s1 + $0xe8c] ss:$16 sps:$4 sm:$0xff]   ;;  %v10674_v11 = vld [vmem:[%s14840_s1 + $0x10c8] ss:$16 sps:$4 sm:$0xff]  }
 0x2e4   :  { %7567 = vmatpush2.bf16.msra.mxu1 %v10617_v30  ;;  %v7299_v4 = vpop.f32.mrf.mxu0  ;;  %7593 = vmatprep.subr.bf16.mxu0 %v10628_v12  ;;  %v10671_v30 = vld [vmem:[%s14840_s1 + $0xfc8] ss:$16 sps:$4 sm:$0xff]   ;;  %v10679_v12 = vld [vmem:[%s14840_s1 + $0xfac] ss:$16 sps:$4 sm:$0xff]  }
 0x2e5   :  { %7568 = vmatprep.subr.bf16.mxu1 %v10625_v14  ;;  %v13723_v18 = vadd.f32 %v7299_v4, %v13620_v49  ;;  %v10637_v49 = vld [vmem:[%s14840_s1 + $0xd8c] ss:$16 sps:$4 sm:$0xff]  }
 0x2e6   :  { %v7301_v33 = vpop.f32.mrf.mxu0 }
 0x2e7   :  { %7594 = vmatpush1.bf16.msra.mxu0 %v10626_v6  ;;  %v10680_v6 = vld [vmem:[%s14840_s1 + $0x10a8] ss:$16 sps:$4 sm:$0xff]  }
 0x2e8   :  { %7569 = vmatpush2.bf16.msra.mxu1 %v10623_v32  ;;  %v7302_v52 = vpop.f32.mrf.mxu0  ;;  %7595 = vmatprep.subr.bf16.mxu0 %v10634_v36  ;;  %v10677_v32 = vld [vmem:[%s14840_s1 + $0xfa8] ss:$16 sps:$4 sm:$0xff]  }
 0x2e9   :  { %7570 = vmatprep.subr.bf16.mxu1 %v10631_v5  ;;  %v10685_v5 = vld [vmem:[%s14840_s1 + $0xf8c] ss:$16 sps:$4 sm:$0xff]   ;;  %v10683_v36 = vld [vmem:[%s14840_s1 + $0xf88] ss:$16 sps:$4 sm:$0xff]  }
 0x2ea   :  { %v10686_v33 = vld [vmem:[%s14840_s1 + $0x1088] ss:$16 sps:$4 sm:$0xff]  }
 0x2eb   :  { %7596 = vmatpush1.bf16.msra.mxu0 %v10632_v57  ;;  %v10694_v57 = vld [vmem:[%s14840_s1 + $0x106c] ss:$16 sps:$4 sm:$0xff]   ;;  %v10689_v52 = vld [vmem:[%s14840_s1 + $0xf68] ss:$16 sps:$4 sm:$0xff]  }
 0x2ec   :  { %7571 = vmatpush2.bf16.msra.mxu1 %v10629_v53  ;;  %7597 = vmatprep.subr.bf16.mxu0 %v10640_v9  ;;  %v10691_v53 = vld [vmem:[%s14840_s1 + $0xf6c] ss:$16 sps:$4 sm:$0xff]  }
 0x2ed   :  { %7572 = vmatprep.subr.bf16.mxu1 %v10637_v49  ;;  %v10692_v49 = vld [vmem:[%s14840_s1 + $0x1068] ss:$16 sps:$4 sm:$0xff]   ;;  %v10697_v9 = vld [vmem:[%s14840_s1 + $0xf4c] ss:$16 sps:$4 sm:$0xff]  }
 0x2ef   :  { %7598 = vmatpush1.bf16.msra.mxu0 %v10638_v7  ;;  %v10695_v7 = vld [vmem:[%s14840_s1 + $0xf48] ss:$16 sps:$4 sm:$0xff]  }
 0x2f0   :  { %7573 = vmatpush2.bf16.msra.mxu1 %v10635_v21  ;;  %7599 = vmatprep.subr.bf16.mxu0 %v10646_v8  ;;  %v10700_v21 = vld [vmem:[%s14840_s1 + $0x104c] ss:$16 sps:$4 sm:$0xff]  }
 0x2f1   :  { %7574 = vmatprep.subr.bf16.mxu1 %v10643_v23  ;;  %v10698_v23 = vld [vmem:[%s14840_s1 + $0x1048] ss:$16 sps:$4 sm:$0xff]   ;;  %v10703_v8 = vld [vmem:[%s14840_s1 + $0xf2c] ss:$16 sps:$4 sm:$0xff]  }
 0x2f3   :  { %7600 = vmatpush1.bf16.msra.mxu0 %v10644_v48  ;;  %v10701_v48 = vld [vmem:[%s14840_s1 + $0xf28] ss:$16 sps:$4 sm:$0xff]  }
 0x2f4   :  { %7575 = vmatpush2.bf16.msra.mxu1 %v10641_v19  ;;  %7601 = vmatprep.subr.bf16.mxu0 %v10652_v56  ;;  %v10706_v19 = vld [vmem:[%s14840_s1 + $0x102c] ss:$16 sps:$4 sm:$0xff]  }
 0x2f5   :  { %7576 = vmatprep.subr.bf16.mxu1 %v10649_v10  ;;  %v10704_v10 = vld [vmem:[%s14840_s1 + $0x1028] ss:$16 sps:$4 sm:$0xff]   ;;  %v10709_v56 = vld [vmem:[%s14840_s1 + $0xf0c] ss:$16 sps:$4 sm:$0xff]  }
 0x2f7   :  { %7602 = vmatpush1.bf16.msra.mxu0 %v10650_v58  ;;  %v1317_v58 = vsub.s32 2, %v11302_v43 }
 0x2f8   :  { %7577 = vmatpush2.bf16.msra.mxu1 %v10647_v13  ;;  %7603 = vmatprep.subr.bf16.mxu0 %v10658_v40  ;;  %v10712_v13 = vld [vmem:[%s14840_s1 + $0x100c] ss:$16 sps:$4 sm:$0xff]   ;;  %v10707_v40 = vld [vmem:[%s14840_s1 + $0xf08] ss:$16 sps:$4 sm:$0xff]  }
 0x2f9   :  { %7578 = vmatprep.subr.bf16.mxu1 %v10655_v39  ;;  %v1321_v39 = vsub.s32 3, %v11302_v43  ;;  %v10718_v43 = vld [vmem:[%s14840_s1 + $0x12ec] ss:$16 sps:$4 sm:$0xff]  }
 0x2fb   :  { %7604 = vmatpush1.bf16.msra.mxu0 %v10656_v50  ;;  %v10715_v50 = vld [vmem:[%s14840_s1 + $0x11ec] ss:$16 sps:$4 sm:$0xff]  }
 0x2fc   :  { %7579 = vmatpush2.bf16.msra.mxu1 %v10653_v41  ;;  %7605 = vmatprep.subr.bf16.mxu0 %v10664_v51  ;;  %v10710_v41 = vld [vmem:[%s14840_s1 + $0x1008] ss:$16 sps:$4 sm:$0xff]  }
 0x2fd   :  { %7580 = vmatprep.subr.bf16.mxu1 %v10661_v62  ;;  %v11129_v62 = vld [vmem:[%s14841_s2] sm:$0xf] }
 0x2fe   :  { %v1318_v51 = vrot.slane %v11129_v62, %v1317_v58  ;;  %v10758_v58 = vld [vmem:[%s14840_s1 + $0x1208] ss:$16 sps:$4 sm:$0xff]  }
 0x2ff   :  { %7606 = vmatpush1.bf16.msra.mxu0 %v10662_v25  ;;  %v10713_v25 = vld [vmem:[%s14840_s1 + $0x11e8] ss:$16 sps:$4 sm:$0xff]  }
 0x300   :  { %7581 = vmatpush2.bf16.msra.mxu1 %v10659_v24  ;;  %7607 = vmatprep.subr.bf16.mxu0 %v10667_v3  ;;  %v1322_v24 = vrot.slane %v11129_v62, %v1321_v39  ;;  %v10716_v3 = vld [vmem:[%s14840_s1 + $0x12e8] ss:$16 sps:$4 sm:$0xff]   ;;  %v10763_v39 = vld [vmem:[%s14840_s1 + $0x13ec] ss:$16 sps:$4 sm:$0xff]  }
 0x301   :  { %7632 = vmatprep.subr.bf16.mxu1 %v10670_v60  ;;  %v10721_v60 = vld [vmem:[%s14840_s1 + $0x11cc] ss:$16 sps:$4 sm:$0xff]  }
 0x302   :  { %v10772_v62 = vld [vmem:[%s14840_s1 + $0x14cc] ss:$16 sps:$4 sm:$0xff]  }
 0x303   :  { %v13810_v22 = vpop.f32.mrf.mxu1  ;;  %7583 = vmatmul.mubr.bf16.vlgmr.msra.gmra.mxu1 %v12078_v37  ;;  %7608 = vmatpush2.bf16.msra.mxu0 %v10665_v20  ;;  %v10682_v37 = vld [vmem:[%s14840_s1 + $0x10ac] ss:$16 sps:$4 sm:$0xff]  }
 0x304   :  { %7633 = vmatpush1.bf16.msra.mxu1 %v10668_v61  ;;  %7609 = vmatprep.subr.bf16.mxu0 %v10673_v63  ;;  %v10724_v20 = vld [vmem:[%s14840_s1 + $0x12cc] ss:$16 sps:$4 sm:$0xff]   ;;  %v7339_v61 = vadd.f32 %v13810_v22, %v1318_v51 }
 0x305   :  { %v13819_v14 = vpop.f32.mrf.mxu1  ;;  %7634 = vmatprep.subr.bf16.mxu1 %v10676_v16  ;;  %7664 = vmatprep.mubr.bf16.mxu1 %v12096_v46  ;;  %v10688_v46 = vld [vmem:[%s14840_s1 + $0x108c] ss:$16 sps:$4 sm:$0xff]  }
 0x306   :  { %v7341_v16 = vadd.f32 %v13819_v14, %v1322_v24  ;;  %v10730_v22 = vld [vmem:[%s14840_s1 + $0x12ac] ss:$16 sps:$4 sm:$0xff]  }
 0x307   :  { %v7342_v15 = vpop.f32.mrf.mxu1  ;;  %7610 = vmatpush2.bf16.msra.mxu0 %v10671_v30 }
 0x308   :  { %7635 = vmatpush1.bf16.msra.mxu1 %v10674_v11  ;;  %7611 = vmatprep.subr.bf16.mxu0 %v10679_v12  ;;  %v10719_v11 = vld [vmem:[%s14840_s1 + $0x11c8] ss:$16 sps:$4 sm:$0xff]  }
 0x309   :  { %v7343_v4 = vpop.f32.mrf.mxu1  ;;  %7636 = vmatprep.subr.bf16.mxu1 %v10682_v37  ;;  %v10722_v12 = vld [vmem:[%s14840_s1 + $0x12c8] ss:$16 sps:$4 sm:$0xff]  }
 0x30b   :  { %7612 = vmatpush2.bf16.msra.mxu0 %v10677_v32  ;;  %v10725_v32 = vld [vmem:[%s14840_s1 + $0x11a8] ss:$16 sps:$4 sm:$0xff]  }
 0x30c   :  { %7637 = vmatpush1.bf16.msra.mxu1 %v10680_v6  ;;  %7613 = vmatprep.subr.bf16.mxu0 %v10685_v5  ;;  %v10728_v6 = vld [vmem:[%s14840_s1 + $0x12a8] ss:$16 sps:$4 sm:$0xff]   ;;  %v10733_v5 = vld [vmem:[%s14840_s1 + $0x118c] ss:$16 sps:$4 sm:$0xff]  }
 0x30d   :  { %7638 = vmatprep.subr.bf16.mxu1 %v10688_v46  ;;  %v10731_v46 = vld [vmem:[%s14840_s1 + $0x1188] ss:$16 sps:$4 sm:$0xff]  }
 0x30f   :  { %7614 = vmatpush2.bf16.msra.mxu0 %v10683_v36  ;;  %v10734_v36 = vld [vmem:[%s14840_s1 + $0x1288] ss:$16 sps:$4 sm:$0xff]  }
 0x310   :  { %7639 = vmatpush1.bf16.msra.mxu1 %v10686_v33  ;;  %7615 = vmatprep.subr.bf16.mxu0 %v10691_v53  ;;  %v10739_v33 = vld [vmem:[%s14840_s1 + $0x116c] ss:$16 sps:$4 sm:$0xff]  }
 0x311   :  { %7640 = vmatprep.subr.bf16.mxu1 %v10694_v57  ;;  %v10742_v53 = vld [vmem:[%s14840_s1 + $0x126c] ss:$16 sps:$4 sm:$0xff]   ;;  %v10737_v57 = vld [vmem:[%s14840_s1 + $0x1168] ss:$16 sps:$4 sm:$0xff]  }
 0x313   :  { %7616 = vmatpush2.bf16.msra.mxu0 %v10689_v52  ;;  %v10740_v52 = vld [vmem:[%s14840_s1 + $0x1268] ss:$16 sps:$4 sm:$0xff]  }
 0x314   :  { %7641 = vmatpush1.bf16.msra.mxu1 %v10692_v49  ;;  %7617 = vmatprep.subr.bf16.mxu0 %v10697_v9  ;;  %v10745_v49 = vld [vmem:[%s14840_s1 + $0x114c] ss:$16 sps:$4 sm:$0xff]  }
 0x315   :  { %7642 = vmatprep.subr.bf16.mxu1 %v10700_v21  ;;  %v10748_v9 = vld [vmem:[%s14840_s1 + $0x124c] ss:$16 sps:$4 sm:$0xff]   ;;  %v10743_v21 = vld [vmem:[%s14840_s1 + $0x1148] ss:$16 sps:$4 sm:$0xff]  }
 0x317   :  { %7618 = vmatpush2.bf16.msra.mxu0 %v10695_v7  ;;  %v10746_v7 = vld [vmem:[%s14840_s1 + $0x1248] ss:$16 sps:$4 sm:$0xff]  }
 0x318   :  { %7643 = vmatpush1.bf16.msra.mxu1 %v10698_v23  ;;  %7619 = vmatprep.subr.bf16.mxu0 %v10703_v8  ;;  %v10751_v23 = vld [vmem:[%s14840_s1 + $0x112c] ss:$16 sps:$4 sm:$0xff]  }
 0x319   :  { %7644 = vmatprep.subr.bf16.mxu1 %v10706_v19  ;;  %v10754_v8 = vld [vmem:[%s14840_s1 + $0x122c] ss:$16 sps:$4 sm:$0xff]   ;;  %v10749_v19 = vld [vmem:[%s14840_s1 + $0x1128] ss:$16 sps:$4 sm:$0xff]  }
 0x31b   :  { %7620 = vmatpush2.bf16.msra.mxu0 %v10701_v48  ;;  %v10752_v48 = vld [vmem:[%s14840_s1 + $0x1228] ss:$16 sps:$4 sm:$0xff]  }
 0x31c   :  { %7645 = vmatpush1.bf16.msra.mxu1 %v10704_v10  ;;  %7621 = vmatprep.subr.bf16.mxu0 %v10709_v56  ;;  %v10757_v10 = vld [vmem:[%s14840_s1 + $0x110c] ss:$16 sps:$4 sm:$0xff]  }
 0x31d   :  { %7646 = vmatprep.subr.bf16.mxu1 %v10712_v13  ;;  %v10760_v56 = vld [vmem:[%s14840_s1 + $0x120c] ss:$16 sps:$4 sm:$0xff]   ;;  %v10755_v13 = vld [vmem:[%s14840_s1 + $0x1108] ss:$16 sps:$4 sm:$0xff]  }
 0x31f   :  { %7622 = vmatpush2.bf16.msra.mxu0 %v10707_v40  ;;  %v10766_v40 = vld [vmem:[%s14840_s1 + $0x14ec] ss:$16 sps:$4 sm:$0xff]  }
 0x320   :  { %7647 = vmatpush1.bf16.msra.mxu1 %v10710_v41  ;;  %7673 = vmatprep.subr.bf16.mxu0 %v10718_v43  ;;  %v10761_v41 = vld [vmem:[%s14840_s1 + $0x13e8] ss:$16 sps:$4 sm:$0xff]   ;;  %v10769_v43 = vld [vmem:[%s14840_s1 + $0x13cc] ss:$16 sps:$4 sm:$0xff]  }
 0x321   :  { %7648 = vmatprep.subr.bf16.mxu1 %v10715_v50  ;;  %v10764_v50 = vld [vmem:[%s14840_s1 + $0x14e8] ss:$16 sps:$4 sm:$0xff]  }
 0x322   :  { %v7379_v63 = vpop.f32.mrf.mxu0  ;;  %7624 = vmatmul.mubr.bf16.vlgmr.msra.gmra.mxu0 %v12082_v38  ;;  %v10727_v38 = vld [vmem:[%s14840_s1 + $0x11ac] ss:$16 sps:$4 sm:$0xff]  }
 0x323   :  { %v13920_v30 = vadd.f32 %v7379_v63, %v7339_v61  ;;  %7674 = vmatpush1.bf16.msra.mxu0 %v10716_v3  ;;  %7705 = vmatprep.mubr.bf16.mxu0 %v12098_v47  ;;  %v10736_v47 = vld [vmem:[%s14840_s1 + $0x128c] ss:$16 sps:$4 sm:$0xff]   ;;  %v10770_v3 = vld [vmem:[%s14840_s1 + $0x14c8] ss:$16 sps:$4 sm:$0xff]  }
 0x324   :  { %7649 = vmatpush2.bf16.msra.mxu1 %v10713_v25  ;;  %v7381_v37 = vpop.f32.mrf.mxu0  ;;  %7675 = vmatprep.subr.bf16.mxu0 %v10724_v20  ;;  %v10767_v25 = vld [vmem:[%s14840_s1 + $0x13c8] ss:$16 sps:$4 sm:$0xff]   ;;  %v10778_v20 = vld [vmem:[%s14840_s1 + $0x14ac] ss:$16 sps:$4 sm:$0xff]  }
 0x325   :  { %7650 = vmatprep.subr.bf16.mxu1 %v10721_v60  ;;  %v13934_v14 = vadd.f32 %v7381_v37, %v7341_v16  ;;  %v10773_v16 = vld [vmem:[%s14840_s1 + $0x13a8] ss:$16 sps:$4 sm:$0xff]  }
 0x326   :  { %v7383_v15 = vpop.f32.mrf.mxu0  ;;  %v10779_v37 = vld [vmem:[%s14840_s1 + $0x1388] ss:$16 sps:$4 sm:$0xff]  }
 0x327   :  { %7676 = vmatpush1.bf16.msra.mxu0 %v10722_v12  ;;  %v10781_v12 = vld [vmem:[%s14840_s1 + $0x138c] ss:$16 sps:$4 sm:$0xff]   ;;  %v10785_v15 = vld [vmem:[%s14840_s1 + $0x1368] ss:$16 sps:$4 sm:$0xff]  }
 0x328   :  { %7651 = vmatpush2.bf16.msra.mxu1 %v10719_v11  ;;  %v7384_v4 = vpop.f32.mrf.mxu0  ;;  %7677 = vmatprep.subr.bf16.mxu0 %v10730_v22  ;;  %v10787_v22 = vld [vmem:[%s14840_s1 + $0x136c] ss:$16 sps:$4 sm:$0xff]  }
 0x329   :  { %7652 = vmatprep.subr.bf16.mxu1 %v10727_v38  ;;  %v10782_v38 = vld [vmem:[%s14840_s1 + $0x1488] ss:$16 sps:$4 sm:$0xff]   ;;  %v10796_v4 = vld [vmem:[%s14840_s1 + $0x144c] ss:$16 sps:$4 sm:$0xff]  }
 0x32b   :  { %7678 = vmatpush1.bf16.msra.mxu0 %v10728_v6  ;;  %v10793_v6 = vld [vmem:[%s14840_s1 + $0x134c] ss:$16 sps:$4 sm:$0xff]  }
 0x32c   :  { %7653 = vmatpush2.bf16.msra.mxu1 %v10725_v32  ;;  %7679 = vmatprep.subr.bf16.mxu0 %v10736_v47  ;;  %v10788_v32 = vld [vmem:[%s14840_s1 + $0x1468] ss:$16 sps:$4 sm:$0xff]  }
 0x32d   :  { %7654 = vmatprep.subr.bf16.mxu1 %v10733_v5  ;;  %v10791_v5 = vld [vmem:[%s14840_s1 + $0x1348] ss:$16 sps:$4 sm:$0xff]  }
 0x32e   :  { %v10794_v47 = vld [vmem:[%s14840_s1 + $0x1448] ss:$16 sps:$4 sm:$0xff]  }
 0x32f   :  { %7680 = vmatpush1.bf16.msra.mxu0 %v10734_v36  ;;  %v10802_v36 = vld [vmem:[%s14840_s1 + $0x142c] ss:$16 sps:$4 sm:$0xff]  }
 0x330   :  { %7655 = vmatpush2.bf16.msra.mxu1 %v10731_v46  ;;  %7681 = vmatprep.subr.bf16.mxu0 %v10742_v53  ;;  %v10799_v46 = vld [vmem:[%s14840_s1 + $0x132c] ss:$16 sps:$4 sm:$0xff]   ;;  %v10800_v53 = vld [vmem:[%s14840_s1 + $0x1428] ss:$16 sps:$4 sm:$0xff]  }
 0x331   :  { %7656 = vmatprep.subr.bf16.mxu1 %v10739_v33  ;;  %v10797_v33 = vld [vmem:[%s14840_s1 + $0x1328] ss:$16 sps:$4 sm:$0xff]  }
 0x333   :  { %7682 = vmatpush1.bf16.msra.mxu0 %v10740_v52  ;;  %v10808_v52 = vld [vmem:[%s14840_s1 + $0x140c] ss:$16 sps:$4 sm:$0xff]  }
 0x334   :  { %7657 = vmatpush2.bf16.msra.mxu1 %v10737_v57  ;;  %7683 = vmatprep.subr.bf16.mxu0 %v10748_v9  ;;  %v10805_v57 = vld [vmem:[%s14840_s1 + $0x130c] ss:$16 sps:$4 sm:$0xff]   ;;  %v10806_v9 = vld [vmem:[%s14840_s1 + $0x1408] ss:$16 sps:$4 sm:$0xff]  }
 0x335   :  { %7658 = vmatprep.subr.bf16.mxu1 %v10745_v49  ;;  %v10803_v49 = vld [vmem:[%s14840_s1 + $0x1308] ss:$16 sps:$4 sm:$0xff]  }
 0x337   :  { %7684 = vmatpush1.bf16.msra.mxu0 %v10746_v7  ;;  %v10814_v7 = vld [vmem:[%s14840_s1 + $0x16ec] ss:$16 sps:$4 sm:$0xff]  }
 0x338   :  { %7659 = vmatpush2.bf16.msra.mxu1 %v10743_v21  ;;  %7685 = vmatprep.subr.bf16.mxu0 %v10754_v8  ;;  %v10811_v21 = vld [vmem:[%s14840_s1 + $0x15ec] ss:$16 sps:$4 sm:$0xff]   ;;  %v10812_v8 = vld [vmem:[%s14840_s1 + $0x16e8] ss:$16 sps:$4 sm:$0xff]  }
 0x339   :  { %7660 = vmatprep.subr.bf16.mxu1 %v10751_v23  ;;  %v10809_v23 = vld [vmem:[%s14840_s1 + $0x15e8] ss:$16 sps:$4 sm:$0xff]  }
 0x33b   :  { %7686 = vmatpush1.bf16.msra.mxu0 %v10752_v48  ;;  %v10820_v48 = vld [vmem:[%s14840_s1 + $0x16cc] ss:$16 sps:$4 sm:$0xff]  }
 0x33c   :  { %7661 = vmatpush2.bf16.msra.mxu1 %v10749_v19  ;;  %7687 = vmatprep.subr.bf16.mxu0 %v10760_v56  ;;  %v10817_v19 = vld [vmem:[%s14840_s1 + $0x15cc] ss:$16 sps:$4 sm:$0xff]  }
 0x33d   :  { %7662 = vmatprep.subr.bf16.mxu1 %v10757_v10 }
 0x33f   :  { %7688 = vmatpush1.bf16.msra.mxu0 %v10758_v58  ;;  %v10818_v58 = vld [vmem:[%s14840_s1 + $0x16c8] ss:$16 sps:$4 sm:$0xff]  }
 0x340   :  { %7663 = vmatpush2.bf16.msra.mxu1 %v10755_v13  ;;  %7689 = vmatprep.subr.bf16.mxu0 %v10763_v39  ;;  %v10815_v13 = vld [vmem:[%s14840_s1 + $0x15c8] ss:$16 sps:$4 sm:$0xff]  }
 0x341   :  { %7714 = vmatprep.subr.bf16.mxu1 %v10766_v40  ;;  %v10826_v40 = vld [vmem:[%s14840_s1 + $0x16ac] ss:$16 sps:$4 sm:$0xff]  }
 0x343   :  { %v7420_v51 = vpop.f32.mrf.mxu1  ;;  %7665 = vmatmul.mubr.bf16.vlgmr.msra.gmra.mxu1 %v12309_v59  ;;  %7690 = vmatpush2.bf16.msra.mxu0 %v10761_v41  ;;  %v10775_v59 = vld [vmem:[%s14840_s1 + $0x13ac] ss:$16 sps:$4 sm:$0xff]  }
 0x344   :  { %v14023_v24 = vadd.f32 %v7420_v51, %v13920_v30  ;;  %7715 = vmatpush1.bf16.msra.mxu1 %v10764_v50  ;;  %7691 = vmatprep.subr.bf16.mxu0 %v10769_v43  ;;  %v10776_v30 = vld [vmem:[%s14840_s1 + $0x14a8] ss:$16 sps:$4 sm:$0xff]  }
 0x345   :  { %v7422_v60 = vpop.f32.mrf.mxu1  ;;  %7716 = vmatprep.subr.bf16.mxu1 %v10772_v62  ;;  %7746 = vmatprep.mubr.bf16.mxu1 %v12327_v54  ;;  %v10784_v54 = vld [vmem:[%s14840_s1 + $0x148c] ss:$16 sps:$4 sm:$0xff]   ;;  %v10821_v43 = vld [vmem:[%s14840_s1 + $0x15a8] ss:$16 sps:$4 sm:$0xff]  }
 0x346   :  { %v14038_v61 = vadd.f32 %v7422_v60, %v13934_v14  ;;  %v10790_v14 = vld [vmem:[%s14840_s1 + $0x146c] ss:$16 sps:$4 sm:$0xff]   ;;  %v10824_v62 = vld [vmem:[%s14840_s1 + $0x16a8] ss:$16 sps:$4 sm:$0xff]  }
 0x347   :  { %v7424_v63 = vpop.f32.mrf.mxu1  ;;  %7692 = vmatpush2.bf16.msra.mxu0 %v10767_v25  ;;  %v10827_v25 = vld [vmem:[%s14840_s1 + $0x1588] ss:$16 sps:$4 sm:$0xff]   ;;  %v10835_v60 = vld [vmem:[%s14840_s1 + $0x156c] ss:$16 sps:$4 sm:$0xff]  }
 0x348   :  { %7717 = vmatpush1.bf16.msra.mxu1 %v10770_v3  ;;  %7693 = vmatprep.subr.bf16.mxu0 %v10775_v59  ;;  %v10830_v3 = vld [vmem:[%s14840_s1 + $0x1688] ss:$16 sps:$4 sm:$0xff]   ;;  %v10838_v59 = vld [vmem:[%s14840_s1 + $0x166c] ss:$16 sps:$4 sm:$0xff]  }
 0x349   :  { %v7425_v11 = vpop.f32.mrf.mxu1  ;;  %7718 = vmatprep.subr.bf16.mxu1 %v10778_v20  ;;  %v10833_v20 = vld [vmem:[%s14840_s1 + $0x1568] ss:$16 sps:$4 sm:$0xff]   ;;  %v10841_v63 = vld [vmem:[%s14840_s1 + $0x154c] ss:$16 sps:$4 sm:$0xff]  }
 0x34a   :  { %v10842_v11 = vld [vmem:[%s14840_s1 + $0x1648] ss:$16 sps:$4 sm:$0xff]  }
 0x34b   :  { %7694 = vmatpush2.bf16.msra.mxu0 %v10773_v16  ;;  %v10844_v16 = vld [vmem:[%s14840_s1 + $0x164c] ss:$16 sps:$4 sm:$0xff]  }
 0x34c   :  { %7719 = vmatpush1.bf16.msra.mxu1 %v10776_v30  ;;  %7695 = vmatprep.subr.bf16.mxu0 %v10781_v12  ;;  %v10839_v30 = vld [vmem:[%s14840_s1 + $0x1548] ss:$16 sps:$4 sm:$0xff]   ;;  %v10847_v12 = vld [vmem:[%s14840_s1 + $0x152c] ss:$16 sps:$4 sm:$0xff]  }
 0x34d   :  { %7720 = vmatprep.subr.bf16.mxu1 %v10784_v54  ;;  %v10850_v54 = vld [vmem:[%s14840_s1 + $0x162c] ss:$16 sps:$4 sm:$0xff]  }
 0x34f   :  { %7696 = vmatpush2.bf16.msra.mxu0 %v10779_v37  ;;  %v10845_v37 = vld [vmem:[%s14840_s1 + $0x1528] ss:$16 sps:$4 sm:$0xff]  }
 0x350   :  { %7721 = vmatpush1.bf16.msra.mxu1 %v10782_v38  ;;  %7697 = vmatprep.subr.bf16.mxu0 %v10787_v22  ;;  %v10848_v38 = vld [vmem:[%s14840_s1 + $0x1628] ss:$16 sps:$4 sm:$0xff]   ;;  %v10853_v22 = vld [vmem:[%s14840_s1 + $0x150c] ss:$16 sps:$4 sm:$0xff]  }
 0x351   :  { %7722 = vmatprep.subr.bf16.mxu1 %v10790_v14  ;;  %v10856_v14 = vld [vmem:[%s14840_s1 + $0x160c] ss:$16 sps:$4 sm:$0xff]  }
 0x353   :  { %7698 = vmatpush2.bf16.msra.mxu0 %v10785_v15  ;;  %v10851_v15 = vld [vmem:[%s14840_s1 + $0x1508] ss:$16 sps:$4 sm:$0xff]  }
 0x354   :  { %7723 = vmatpush1.bf16.msra.mxu1 %v10788_v32  ;;  %7699 = vmatprep.subr.bf16.mxu0 %v10793_v6  ;;  %v10854_v32 = vld [vmem:[%s14840_s1 + $0x1608] ss:$16 sps:$4 sm:$0xff]   ;;  %v10859_v6 = vld [vmem:[%s14840_s1 + $0x17ec] ss:$16 sps:$4 sm:$0xff]  }
 0x355   :  { %7724 = vmatprep.subr.bf16.mxu1 %v10796_v4  ;;  %v10862_v4 = vld [vmem:[%s14840_s1 + $0x18ec] ss:$16 sps:$4 sm:$0xff]  }
 0x357   :  { %7700 = vmatpush2.bf16.msra.mxu0 %v10791_v5  ;;  %v10857_v5 = vld [vmem:[%s14840_s1 + $0x17e8] ss:$16 sps:$4 sm:$0xff]  }
 0x358   :  { %7725 = vmatpush1.bf16.msra.mxu1 %v10794_v47  ;;  %7701 = vmatprep.subr.bf16.mxu0 %v10799_v46  ;;  %v10860_v47 = vld [vmem:[%s14840_s1 + $0x18e8] ss:$16 sps:$4 sm:$0xff]   ;;  %v10865_v46 = vld [vmem:[%s14840_s1 + $0x17cc] ss:$16 sps:$4 sm:$0xff]  }
 0x359   :  { %7726 = vmatprep.subr.bf16.mxu1 %v10802_v36  ;;  %v10868_v36 = vld [vmem:[%s14840_s1 + $0x18cc] ss:$16 sps:$4 sm:$0xff]  }
 0x35b   :  { %7702 = vmatpush2.bf16.msra.mxu0 %v10797_v33 }
 0x35c   :  { %7727 = vmatpush1.bf16.msra.mxu1 %v10800_v53  ;;  %7703 = vmatprep.subr.bf16.mxu0 %v10805_v57  ;;  %v10863_v57 = vld [vmem:[%s14840_s1 + $0x17c8] ss:$16 sps:$4 sm:$0xff]  }
 0x35d   :  { %7728 = vmatprep.subr.bf16.mxu1 %v10808_v52  ;;  %v10866_v52 = vld [vmem:[%s14840_s1 + $0x18c8] ss:$16 sps:$4 sm:$0xff]  }
 0x35f   :  { %7704 = vmatpush2.bf16.msra.mxu0 %v10803_v49 }
 0x360   :  { %7729 = vmatpush1.bf16.msra.mxu1 %v10806_v9  ;;  %7755 = vmatprep.subr.bf16.mxu0 %v10814_v7  ;;  %v10874_v9 = vld [vmem:[%s14840_s1 + $0x18ac] ss:$16 sps:$4 sm:$0xff]  }
 0x361   :  { %7730 = vmatprep.subr.bf16.mxu1 %v10811_v21 }
 0x362   :  { %v7461_v10 = vpop.f32.mrf.mxu0  ;;  %7706 = vmatmul.mubr.bf16.vlgmr.msra.gmra.mxu0 %v12313_v45  ;;  %v10823_v45 = vld [vmem:[%s14840_s1 + $0x15ac] ss:$16 sps:$4 sm:$0xff]  }
 0x363   :  { %v14127_v56 = vadd.f32 %v7461_v10, %v14023_v24  ;;  %7756 = vmatpush1.bf16.msra.mxu0 %v10812_v8  ;;  %7787 = vmatprep.mubr.bf16.mxu0 %v12329_v55  ;;  %v10829_v24 = vld [vmem:[%s14840_s1 + $0x158c] ss:$16 sps:$4 sm:$0xff]   ;;  %v10872_v8 = vld [vmem:[%s14840_s1 + $0x18a8] ss:$16 sps:$4 sm:$0xff]  }
 0x364   :  { %7731 = vmatpush2.bf16.msra.mxu1 %v10809_v23  ;;  %v7463_v39 = vpop.f32.mrf.mxu0  ;;  %7757 = vmatprep.subr.bf16.mxu0 %v10820_v48  ;;  %v10832_v55 = vld [vmem:[%s14840_s1 + $0x168c] ss:$16 sps:$4 sm:$0xff]   ;;  %v10869_v23 = vld [vmem:[%s14840_s1 + $0x17a8] ss:$16 sps:$4 sm:$0xff]  }
 0x365   :  { %7732 = vmatprep.subr.bf16.mxu1 %v10817_v19  ;;  %v14142_v41 = vadd.f32 %v7463_v39, %v14038_v61  ;;  %v10836_v61 = vld [vmem:[%s14840_s1 + $0x1668] ss:$16 sps:$4 sm:$0xff]   ;;  %v10877_v48 = vld [vmem:[%s14840_s1 + $0x178c] ss:$16 sps:$4 sm:$0xff]  }
 0x366   :  { %v7465_v50 = vpop.f32.mrf.mxu0  ;;  %v10875_v10 = vld [vmem:[%s14840_s1 + $0x1788] ss:$16 sps:$4 sm:$0xff]  }
 0x367   :  { %7758 = vmatpush1.bf16.msra.mxu0 %v10818_v58  ;;  %v10886_v58 = vld [vmem:[%s14840_s1 + $0x186c] ss:$16 sps:$4 sm:$0xff]   ;;  %v10881_v39 = vld [vmem:[%s14840_s1 + $0x1768] ss:$16 sps:$4 sm:$0xff]  }
 0x368   :  { %7733 = vmatpush2.bf16.msra.mxu1 %v10815_v13  ;;  %v7466_v51 = vpop.f32.mrf.mxu0  ;;  %7759 = vmatprep.subr.bf16.mxu0 %v10826_v40  ;;  %v10883_v13 = vld [vmem:[%s14840_s1 + $0x176c] ss:$16 sps:$4 sm:$0xff]   ;;  %v10887_v50 = vld [vmem:[%s14840_s1 + $0x1748] ss:$16 sps:$4 sm:$0xff]  }
 0x369   :  { %7734 = vmatprep.subr.bf16.mxu1 %v10823_v45  ;;  %v10884_v45 = vld [vmem:[%s14840_s1 + $0x1868] ss:$16 sps:$4 sm:$0xff]   ;;  %v10889_v40 = vld [vmem:[%s14840_s1 + $0x174c] ss:$16 sps:$4 sm:$0xff]  }
 0x36a   :  { %v10898_v51 = vld [vmem:[%s14840_s1 + $0x182c] ss:$16 sps:$4 sm:$0xff]  }
 0x36b   :  { %7760 = vmatpush1.bf16.msra.mxu0 %v10824_v62  ;;  %v10895_v62 = vld [vmem:[%s14840_s1 + $0x172c] ss:$16 sps:$4 sm:$0xff]  }
 0x36c   :  { %7735 = vmatpush2.bf16.msra.mxu1 %v10821_v43  ;;  %7761 = vmatprep.subr.bf16.mxu0 %v10832_v55  ;;  %v10890_v43 = vld [vmem:[%s14840_s1 + $0x1848] ss:$16 sps:$4 sm:$0xff]  }
 0x36d   :  { %7736 = vmatprep.subr.bf16.mxu1 %v10829_v24  ;;  %v10893_v24 = vld [vmem:[%s14840_s1 + $0x1728] ss:$16 sps:$4 sm:$0xff]  }
 0x36e   :  { %v10896_v55 = vld [vmem:[%s14840_s1 + $0x1828] ss:$16 sps:$4 sm:$0xff]  }
 0x36f   :  { %7762 = vmatpush1.bf16.msra.mxu0 %v10830_v3  ;;  %v10904_v3 = vld [vmem:[%s14840_s1 + $0x180c] ss:$16 sps:$4 sm:$0xff]  }
 0x370   :  { %7737 = vmatpush2.bf16.msra.mxu1 %v10827_v25  ;;  %7763 = vmatprep.subr.bf16.mxu0 %v10838_v59  ;;  %v10901_v25 = vld [vmem:[%s14840_s1 + $0x170c] ss:$16 sps:$4 sm:$0xff]   ;;  %v10902_v59 = vld [vmem:[%s14840_s1 + $0x1808] ss:$16 sps:$4 sm:$0xff]  }
 0x371   :  { %7738 = vmatprep.subr.bf16.mxu1 %v10835_v60  ;;  %v10899_v60 = vld [vmem:[%s14840_s1 + $0x1708] ss:$16 sps:$4 sm:$0xff]  }
 0x373   :  { %7764 = vmatpush1.bf16.msra.mxu0 %v10836_v61  ;;  %v10910_v61 = vld [vmem:[%s14840_s1 + $0x1aec] ss:$16 sps:$4 sm:$0xff]  }
 0x374   :  { %7739 = vmatpush2.bf16.msra.mxu1 %v10833_v20  ;;  %7765 = vmatprep.subr.bf16.mxu0 %v10844_v16  ;;  %v10907_v20 = vld [vmem:[%s14840_s1 + $0x19ec] ss:$16 sps:$4 sm:$0xff]   ;;  %v10908_v16 = vld [vmem:[%s14840_s1 + $0x1ae8] ss:$16 sps:$4 sm:$0xff]  }
 0x375   :  { %7740 = vmatprep.subr.bf16.mxu1 %v10841_v63  ;;  %v10905_v63 = vld [vmem:[%s14840_s1 + $0x19e8] ss:$16 sps:$4 sm:$0xff]  }
 0x377   :  { %7766 = vmatpush1.bf16.msra.mxu0 %v10842_v11  ;;  %v10916_v11 = vld [vmem:[%s14840_s1 + $0x1acc] ss:$16 sps:$4 sm:$0xff]  }
 0x378   :  { %7741 = vmatpush2.bf16.msra.mxu1 %v10839_v30  ;;  %7767 = vmatprep.subr.bf16.mxu0 %v10850_v54  ;;  %v10913_v30 = vld [vmem:[%s14840_s1 + $0x19cc] ss:$16 sps:$4 sm:$0xff]  }
 0x379   :  { %7742 = vmatprep.subr.bf16.mxu1 %v10847_v12 }
 0x37b   :  { %7768 = vmatpush1.bf16.msra.mxu0 %v10848_v38  ;;  %v10914_v38 = vld [vmem:[%s14840_s1 + $0x1ac8] ss:$16 sps:$4 sm:$0xff]  }
 0x37c   :  { %7743 = vmatpush2.bf16.msra.mxu1 %v10845_v37  ;;  %7769 = vmatprep.subr.bf16.mxu0 %v10856_v14  ;;  %v10911_v37 = vld [vmem:[%s14840_s1 + $0x19c8] ss:$16 sps:$4 sm:$0xff]   ;;  %v10922_v14 = vld [vmem:[%s14840_s1 + $0x1aac] ss:$16 sps:$4 sm:$0xff]  }
 0x37d   :  { %7744 = vmatprep.subr.bf16.mxu1 %v10853_v22 }
 0x37f   :  { %7770 = vmatpush1.bf16.msra.mxu0 %v10854_v32 }
 0x380   :  { %7745 = vmatpush2.bf16.msra.mxu1 %v10851_v15  ;;  %7771 = vmatprep.subr.bf16.mxu0 %v10859_v6  ;;  %v10917_v6 = vld [vmem:[%s14840_s1 + $0x19a8] ss:$16 sps:$4 sm:$0xff]  }
 0x381   :  { %7796 = vmatprep.subr.bf16.mxu1 %v10862_v4  ;;  %v10920_v4 = vld [vmem:[%s14840_s1 + $0x1aa8] ss:$16 sps:$4 sm:$0xff]  }
 0x383   :  { %v7502_v33 = vpop.f32.mrf.mxu1  ;;  %7747 = vmatmul.mubr.bf16.vlgmr.msra.gmra.mxu1 %v12536_v0  ;;  %7772 = vmatpush2.bf16.msra.mxu0 %v10857_v5  ;;  %v10871_v0 = vld [vmem:[%s14840_s1 + $0x17ac] ss:$16 sps:$4 sm:$0xff]  }
 0x384   :  { %v14231_v53 = vadd.f32 %v7502_v33, %v14127_v56  ;;  %7797 = vmatpush1.bf16.msra.mxu1 %v10860_v47  ;;  %7773 = vmatprep.subr.bf16.mxu0 %v10865_v46  ;;  %v10878_v56 = vld [vmem:[%s14840_s1 + $0x1888] ss:$16 sps:$4 sm:$0xff]   ;;  %v10925_v47 = vld [vmem:[%s14840_s1 + $0x198c] ss:$16 sps:$4 sm:$0xff]  }
 0x385   :  { %v7504_v49 = vpop.f32.mrf.mxu1  ;;  %7798 = vmatprep.subr.bf16.mxu1 %v10868_v36  ;;  %7828 = vmatprep.mubr.bf16.mxu1 %v12554_v1  ;;  %v10880_v1 = vld [vmem:[%s14840_s1 + $0x188c] ss:$16 sps:$4 sm:$0xff]   ;;  %v10923_v46 = vld [vmem:[%s14840_s1 + $0x1988] ss:$16 sps:$4 sm:$0xff]  }
 0x386   :  { %v14246_v21 = vadd.f32 %v7504_v49, %v14142_v41  ;;  %v10892_v41 = vld [vmem:[%s14840_s1 + $0x184c] ss:$16 sps:$4 sm:$0xff]   ;;  %v10926_v36 = vld [vmem:[%s14840_s1 + $0x1a88] ss:$16 sps:$4 sm:$0xff]  }
 0x387   :  { %v7506_v7 = vpop.f32.mrf.mxu1  ;;  %7774 = vmatpush2.bf16.msra.mxu0 %v10863_v57  ;;  %v10931_v33 = vld [vmem:[%s14840_s1 + $0x196c] ss:$16 sps:$4 sm:$0xff]   ;;  %v10929_v57 = vld [vmem:[%s14840_s1 + $0x1968] ss:$16 sps:$4 sm:$0xff]  }
 0x388   :  { %7799 = vmatpush1.bf16.msra.mxu1 %v10866_v52  ;;  %7775 = vmatprep.subr.bf16.mxu0 %v10871_v0  ;;  %v10932_v52 = vld [vmem:[%s14840_s1 + $0x1a68] ss:$16 sps:$4 sm:$0xff]   ;;  %v10937_v49 = vld [vmem:[%s14840_s1 + $0x194c] ss:$16 sps:$4 sm:$0xff]  }
 0x389   :  { %v7507_v19 = vpop.f32.mrf.mxu1  ;;  %7800 = vmatprep.subr.bf16.mxu1 %v10874_v9  ;;  %v10940_v0 = vld [vmem:[%s14840_s1 + $0x1a4c] ss:$16 sps:$4 sm:$0xff]   ;;  %v10935_v9 = vld [vmem:[%s14840_s1 + $0x1948] ss:$16 sps:$4 sm:$0xff]  }
 0x38a   :  { %v10943_v7 = vld [vmem:[%s14840_s1 + $0x192c] ss:$16 sps:$4 sm:$0xff]   ;;  %v10944_v19 = vld [vmem:[%s14840_s1 + $0x1a28] ss:$16 sps:$4 sm:$0xff]  }
 0x38b   :  { %7776 = vmatpush2.bf16.msra.mxu0 %v10869_v23  ;;  %v10946_v23 = vld [vmem:[%s14840_s1 + $0x1a2c] ss:$16 sps:$4 sm:$0xff]  }
 0x38c   :  { %7801 = vmatpush1.bf16.msra.mxu1 %v10872_v8  ;;  %7777 = vmatprep.subr.bf16.mxu0 %v10877_v48  ;;  %v10941_v8 = vld [vmem:[%s14840_s1 + $0x1928] ss:$16 sps:$4 sm:$0xff]   ;;  %v10949_v48 = vld [vmem:[%s14840_s1 + $0x190c] ss:$16 sps:$4 sm:$0xff]  }
 0x38d   :  { %7802 = vmatprep.subr.bf16.mxu1 %v10880_v1  ;;  %v10952_v1 = vld [vmem:[%s14840_s1 + $0x1a0c] ss:$16 sps:$4 sm:$0xff]  }
 0x38f   :  { %7778 = vmatpush2.bf16.msra.mxu0 %v10875_v10  ;;  %v10947_v10 = vld [vmem:[%s14840_s1 + $0x1908] ss:$16 sps:$4 sm:$0xff]  }
 0x390   :  { %7803 = vmatpush1.bf16.msra.mxu1 %v10878_v56  ;;  %7779 = vmatprep.subr.bf16.mxu0 %v10883_v13  ;;  %v10950_v56 = vld [vmem:[%s14840_s1 + $0x1a08] ss:$16 sps:$4 sm:$0xff]   ;;  %v10955_v13 = vld [vmem:[%s14840_s1 + $0x1bec] ss:$16 sps:$4 sm:$0xff]  }
 0x391   :  { %7804 = vmatprep.subr.bf16.mxu1 %v10886_v58  ;;  %v10958_v58 = vld [vmem:[%s14840_s1 + $0x1cec] ss:$16 sps:$4 sm:$0xff]  }
 0x393   :  { %7780 = vmatpush2.bf16.msra.mxu0 %v10881_v39  ;;  %v10953_v39 = vld [vmem:[%s14840_s1 + $0x1be8] ss:$16 sps:$4 sm:$0xff]  }
 0x394   :  { %7805 = vmatpush1.bf16.msra.mxu1 %v10884_v45  ;;  %7781 = vmatprep.subr.bf16.mxu0 %v10889_v40  ;;  %v10956_v45 = vld [vmem:[%s14840_s1 + $0x1ce8] ss:$16 sps:$4 sm:$0xff]   ;;  %v10961_v40 = vld [vmem:[%s14840_s1 + $0x1bcc] ss:$16 sps:$4 sm:$0xff]  }
 0x395   :  { %7806 = vmatprep.subr.bf16.mxu1 %v10892_v41  ;;  %v10964_v41 = vld [vmem:[%s14840_s1 + $0x1ccc] ss:$16 sps:$4 sm:$0xff]  }
 0x397   :  { %7782 = vmatpush2.bf16.msra.mxu0 %v10887_v50 }
 0x398   :  { %7807 = vmatpush1.bf16.msra.mxu1 %v10890_v43  ;;  %7783 = vmatprep.subr.bf16.mxu0 %v10895_v62  ;;  %v10959_v62 = vld [vmem:[%s14840_s1 + $0x1bc8] ss:$16 sps:$4 sm:$0xff]  }
 0x399   :  { %7808 = vmatprep.subr.bf16.mxu1 %v10898_v51  ;;  %v10962_v51 = vld [vmem:[%s14840_s1 + $0x1cc8] ss:$16 sps:$4 sm:$0xff]  }
 0x39b   :  { %7784 = vmatpush2.bf16.msra.mxu0 %v10893_v24 }
 0x39c   :  { %7809 = vmatpush1.bf16.msra.mxu1 %v10896_v55  ;;  %7785 = vmatprep.subr.bf16.mxu0 %v10901_v25  ;;  %v10970_v55 = vld [vmem:[%s14840_s1 + $0x1cac] ss:$16 sps:$4 sm:$0xff]  }
 0x39d   :  { %7810 = vmatprep.subr.bf16.mxu1 %v10904_v3 }
 0x39f   :  { %7786 = vmatpush2.bf16.msra.mxu0 %v10899_v60  ;;  %v10965_v60 = vld [vmem:[%s14840_s1 + $0x1ba8] ss:$16 sps:$4 sm:$0xff]  }
 0x3a0   :  { %7811 = vmatpush1.bf16.msra.mxu1 %v10902_v59  ;;  %7837 = vmatprep.subr.bf16.mxu0 %v10910_v61  ;;  %v10968_v59 = vld [vmem:[%s14840_s1 + $0x1ca8] ss:$16 sps:$4 sm:$0xff]   ;;  %v10973_v61 = vld [vmem:[%s14840_s1 + $0x1b8c] ss:$16 sps:$4 sm:$0xff]  }
 0x3a1   :  { %7812 = vmatprep.subr.bf16.mxu1 %v10907_v20 }
 0x3a2   :  { %v7543_v12 = vpop.f32.mrf.mxu0  ;;  %7788 = vmatmul.mubr.bf16.vlgmr.msra.gmra.mxu0 %v12540_v2  ;;  %v10919_v2 = vld [vmem:[%s14840_s1 + $0x19ac] ss:$16 sps:$4 sm:$0xff]  }
 0x3a3   :  { %v14335_v54 = vadd.f32 %v7543_v12, %v14231_v53  ;;  %7838 = vmatpush1.bf16.msra.mxu0 %v10908_v16  ;;  %7869 = vmatprep.mubr.bf16.mxu0 %v12556_v44  ;;  %v10928_v44 = vld [vmem:[%s14840_s1 + $0x1a8c] ss:$16 sps:$4 sm:$0xff]   ;;  %v10974_v16 = vld [vmem:[%s14840_s1 + $0x1c88] ss:$16 sps:$4 sm:$0xff]  }
 0x3a4   :  { %7813 = vmatpush2.bf16.msra.mxu1 %v10905_v63  ;;  %v7545_v22 = vpop.f32.mrf.mxu0  ;;  %7839 = vmatprep.subr.bf16.mxu0 %v10916_v11  ;;  %v10934_v53 = vld [vmem:[%s14840_s1 + $0x1a6c] ss:$16 sps:$4 sm:$0xff]   ;;  %v10971_v63 = vld [vmem:[%s14840_s1 + $0x1b88] ss:$16 sps:$4 sm:$0xff]  }
 0x3a5   :  { %7814 = vmatprep.subr.bf16.mxu1 %v10913_v30  ;;  %v14350_v15 = vadd.f32 %v7545_v22, %v14246_v21  ;;  %v10938_v21 = vld [vmem:[%s14840_s1 + $0x1a48] ss:$16 sps:$4 sm:$0xff]   ;;  %v10979_v30 = vld [vmem:[%s14840_s1 + $0x1b6c] ss:$16 sps:$4 sm:$0xff]  }
 0x3a6   :  { %v7547_v32 = vpop.f32.mrf.mxu0  ;;  %v10982_v11 = vld [vmem:[%s14840_s1 + $0x1c6c] ss:$16 sps:$4 sm:$0xff]   ;;  %v10977_v12 = vld [vmem:[%s14840_s1 + $0x1b68] ss:$16 sps:$4 sm:$0xff]  }
 0x3a7   :  { %7840 = vmatpush1.bf16.msra.mxu0 %v10914_v38  ;;  %v10988_v38 = vld [vmem:[%s14840_s1 + $0x1c4c] ss:$16 sps:$4 sm:$0xff]   ;;  %v10983_v22 = vld [vmem:[%s14840_s1 + $0x1b48] ss:$16 sps:$4 sm:$0xff]  }
 0x3a8   :  { %7815 = vmatpush2.bf16.msra.mxu1 %v10911_v37  ;;  %v7548_v5 = vpop.f32.mrf.mxu0  ;;  %7841 = vmatprep.subr.bf16.mxu0 %v10922_v14  ;;  %v10985_v37 = vld [vmem:[%s14840_s1 + $0x1b4c] ss:$16 sps:$4 sm:$0xff]   ;;  %v10989_v32 = vld [vmem:[%s14840_s1 + $0x1b28] ss:$16 sps:$4 sm:$0xff]  }
 0x3a9   :  { %7816 = vmatprep.subr.bf16.mxu1 %v10919_v2  ;;  %v10986_v2 = vld [vmem:[%s14840_s1 + $0x1c48] ss:$16 sps:$4 sm:$0xff]   ;;  %v10991_v14 = vld [vmem:[%s14840_s1 + $0x1b2c] ss:$16 sps:$4 sm:$0xff]  }
 0x3aa   :  { %v11000_v5 = vld [vmem:[%s14840_s1 + $0x1c0c] ss:$16 sps:$4 sm:$0xff]  }
 0x3ab   :  { %7842 = vmatpush1.bf16.msra.mxu0 %v10920_v4  ;;  %v10997_v4 = vld [vmem:[%s14840_s1 + $0x1b0c] ss:$16 sps:$4 sm:$0xff]  }
 0x3ac   :  { %7817 = vmatpush2.bf16.msra.mxu1 %v10917_v6  ;;  %7843 = vmatprep.subr.bf16.mxu0 %v10928_v44  ;;  %v10992_v6 = vld [vmem:[%s14840_s1 + $0x1c28] ss:$16 sps:$4 sm:$0xff]  }
 0x3ad   :  { %7818 = vmatprep.subr.bf16.mxu1 %v10925_v47  ;;  %v10995_v47 = vld [vmem:[%s14840_s1 + $0x1b08] ss:$16 sps:$4 sm:$0xff]  }
 0x3ae   :  { %v10998_v44 = vld [vmem:[%s14840_s1 + $0x1c08] ss:$16 sps:$4 sm:$0xff]  }
 0x3af   :  { %7844 = vmatpush1.bf16.msra.mxu0 %v10926_v36  ;;  %v11006_v36 = vld [vmem:[%s14840_s1 + $0x1eec] ss:$16 sps:$4 sm:$0xff]  }
 0x3b0   :  { %7819 = vmatpush2.bf16.msra.mxu1 %v10923_v46  ;;  %7845 = vmatprep.subr.bf16.mxu0 %v10934_v53  ;;  %v11003_v46 = vld [vmem:[%s14840_s1 + $0x1dec] ss:$16 sps:$4 sm:$0xff]   ;;  %v11004_v53 = vld [vmem:[%s14840_s1 + $0x1ee8] ss:$16 sps:$4 sm:$0xff]  }
 0x3b1   :  { %7820 = vmatprep.subr.bf16.mxu1 %v10931_v33  ;;  %v11001_v33 = vld [vmem:[%s14840_s1 + $0x1de8] ss:$16 sps:$4 sm:$0xff]  }
 0x3b3   :  { %7846 = vmatpush1.bf16.msra.mxu0 %v10932_v52  ;;  %v11012_v52 = vld [vmem:[%s14840_s1 + $0x1ecc] ss:$16 sps:$4 sm:$0xff]  }
 0x3b4   :  { %7821 = vmatpush2.bf16.msra.mxu1 %v10929_v57  ;;  %7847 = vmatprep.subr.bf16.mxu0 %v10940_v0  ;;  %v11009_v57 = vld [vmem:[%s14840_s1 + $0x1dcc] ss:$16 sps:$4 sm:$0xff]  }
 0x3b5   :  { %7822 = vmatprep.subr.bf16.mxu1 %v10937_v49 }
 0x3b7   :  { %7848 = vmatpush1.bf16.msra.mxu0 %v10938_v21  ;;  %v11010_v21 = vld [vmem:[%s14840_s1 + $0x1ec8] ss:$16 sps:$4 sm:$0xff]  }
 0x3b8   :  { %7823 = vmatpush2.bf16.msra.mxu1 %v10935_v9  ;;  %7849 = vmatprep.subr.bf16.mxu0 %v10946_v23  ;;  %v11007_v9 = vld [vmem:[%s14840_s1 + $0x1dc8] ss:$16 sps:$4 sm:$0xff]   ;;  %v11018_v23 = vld [vmem:[%s14840_s1 + $0x1eac] ss:$16 sps:$4 sm:$0xff]  }
 0x3b9   :  { %7824 = vmatprep.subr.bf16.mxu1 %v10943_v7 }
 0x3bb   :  { %7850 = vmatpush1.bf16.msra.mxu0 %v10944_v19 }
 0x3bc   :  { %7825 = vmatpush2.bf16.msra.mxu1 %v10941_v8  ;;  %7851 = vmatprep.subr.bf16.mxu0 %v10952_v1  ;;  %v11016_v1 = vld [vmem:[%s14840_s1 + $0x1ea8] ss:$16 sps:$4 sm:$0xff]  }
 0x3bd   :  { %7826 = vmatprep.subr.bf16.mxu1 %v10949_v48  ;;  %v11013_v48 = vld [vmem:[%s14840_s1 + $0x1da8] ss:$16 sps:$4 sm:$0xff]  }
 0x3bf   :  { %7852 = vmatpush1.bf16.msra.mxu0 %v10950_v56  ;;  %v11021_v56 = vld [vmem:[%s14840_s1 + $0x1d8c] ss:$16 sps:$4 sm:$0xff]  }
 0x3c0   :  { %7827 = vmatpush2.bf16.msra.mxu1 %v10947_v10  ;;  %7853 = vmatprep.subr.bf16.mxu0 %v10955_v13  ;;  %v11019_v13 = vld [vmem:[%s14840_s1 + $0x1d88] ss:$16 sps:$4 sm:$0xff]  }
 0x3c1   :  { %7878 = vmatprep.subr.bf16.mxu1 %v10958_v58  ;;  %v11022_v58 = vld [vmem:[%s14840_s1 + $0x1e88] ss:$16 sps:$4 sm:$0xff]  }
 0x3c3   :  { %v7584_v50 = vpop.f32.mrf.mxu1  ;;  %7829 = vmatmul.mubr.bf16.vlgmr.msra.gmra.mxu1 %v12763_v26  ;;  %7854 = vmatpush2.bf16.msra.mxu0 %v10953_v39  ;;  %v10967_v26 = vld [vmem:[%s14840_s1 + $0x1bac] ss:$16 sps:$4 sm:$0xff]  }
 0x3c4   :  { %v14439_v43 = vadd.f32 %v7584_v50, %v14335_v54  ;;  %7879 = vmatpush1.bf16.msra.mxu1 %v10956_v45  ;;  %7855 = vmatprep.subr.bf16.mxu0 %v10961_v40  ;;  %v10980_v54 = vld [vmem:[%s14840_s1 + $0x1c68] ss:$16 sps:$4 sm:$0xff]   ;;  %v11027_v39 = vld [vmem:[%s14840_s1 + $0x1d6c] ss:$16 sps:$4 sm:$0xff]  }
 0x3c5   :  { %v7586_v24 = vpop.f32.mrf.mxu1  ;;  %7880 = vmatprep.subr.bf16.mxu1 %v10964_v41  ;;  %7910 = vmatprep.mubr.bf16.mxu1 %v12781_v34  ;;  %v10976_v34 = vld [vmem:[%s14840_s1 + $0x1c8c] ss:$16 sps:$4 sm:$0xff]   ;;  %v11025_v40 = vld [vmem:[%s14840_s1 + $0x1d68] ss:$16 sps:$4 sm:$0xff]  }
 0x3c6   :  { %v14454_v25 = vadd.f32 %v7586_v24, %v14350_v15  ;;  %v10994_v15 = vld [vmem:[%s14840_s1 + $0x1c2c] ss:$16 sps:$4 sm:$0xff]   ;;  %v11028_v41 = vld [vmem:[%s14840_s1 + $0x1e68] ss:$16 sps:$4 sm:$0xff]  }
 0x3c7   :  { %v7588_v3 = vpop.f32.mrf.mxu1  ;;  %7856 = vmatpush2.bf16.msra.mxu0 %v10959_v62  ;;  %v11030_v45 = vld [vmem:[%s14840_s1 + $0x1e6c] ss:$16 sps:$4 sm:$0xff]   ;;  %v11031_v62 = vld [vmem:[%s14840_s1 + $0x1d48] ss:$16 sps:$4 sm:$0xff]  }
 0x3c8   :  { %7881 = vmatpush1.bf16.msra.mxu1 %v10962_v51  ;;  %7857 = vmatprep.subr.bf16.mxu0 %v10967_v26  ;;  %v11033_v50 = vld [vmem:[%s14840_s1 + $0x1d4c] ss:$16 sps:$4 sm:$0xff]   ;;  %v11034_v51 = vld [vmem:[%s14840_s1 + $0x1e48] ss:$16 sps:$4 sm:$0xff]  }
 0x3c9   :  { %v7589_v20 = vpop.f32.mrf.mxu1  ;;  %7882 = vmatprep.subr.bf16.mxu1 %v10970_v55  ;;  %v11039_v24 = vld [vmem:[%s14840_s1 + $0x1d2c] ss:$16 sps:$4 sm:$0xff]   ;;  %v11037_v55 = vld [vmem:[%s14840_s1 + $0x1d28] ss:$16 sps:$4 sm:$0xff]  }
 0x3ca   :  { %v11042_v26 = vld [vmem:[%s14840_s1 + $0x1e2c] ss:$16 sps:$4 sm:$0xff]   ;;  %v11046_v20 = vld [vmem:[%s14840_s1 + $0x1e08] ss:$16 sps:$4 sm:$0xff]  }
 0x3cb   :  { %7858 = vmatpush2.bf16.msra.mxu0 %v10965_v60  ;;  %v11045_v3 = vld [vmem:[%s14840_s1 + $0x1d0c] ss:$16 sps:$4 sm:$0xff]  }
 0x3cc   :  { %7883 = vmatpush1.bf16.msra.mxu1 %v10968_v59  ;;  %7859 = vmatprep.subr.bf16.mxu0 %v10973_v61  ;;  %v11048_v60 = vld [vmem:[%s14840_s1 + $0x1e0c] ss:$16 sps:$4 sm:$0xff]   ;;  %v11043_v59 = vld [vmem:[%s14840_s1 + $0x1d08] ss:$16 sps:$4 sm:$0xff]  }
 0x3cd   :  { %7884 = vmatprep.subr.bf16.mxu1 %v10976_v34  ;;  %v11051_v61 = vld [vmem:[%s14840_s1 + $0x1fec] ss:$16 sps:$4 sm:$0xff]  }
 0x3ce   :  { %v11054_v34 = vld [vmem:[%s14840_s1 + $0x20ec] ss:$16 sps:$4 sm:$0xff]  }
 0x3cf   :  { %7860 = vmatpush2.bf16.msra.mxu0 %v10971_v63  ;;  %v11049_v63 = vld [vmem:[%s14840_s1 + $0x1fe8] ss:$16 sps:$4 sm:$0xff]  }
 0x3d0   :  { %7885 = vmatpush1.bf16.msra.mxu1 %v10974_v16  ;;  %7861 = vmatprep.subr.bf16.mxu0 %v10979_v30  ;;  %v11052_v16 = vld [vmem:[%s14840_s1 + $0x20e8] ss:$16 sps:$4 sm:$0xff]   ;;  %v11057_v30 = vld [vmem:[%s14840_s1 + $0x1fcc] ss:$16 sps:$4 sm:$0xff]  }
 0x3d1   :  { %7886 = vmatprep.subr.bf16.mxu1 %v10982_v11  ;;  %v11060_v11 = vld [vmem:[%s14840_s1 + $0x20cc] ss:$16 sps:$4 sm:$0xff]  }
 0x3d3   :  { %7862 = vmatpush2.bf16.msra.mxu0 %v10977_v12 }
 0x3d4   :  { %7887 = vmatpush1.bf16.msra.mxu1 %v10980_v54  ;;  %7863 = vmatprep.subr.bf16.mxu0 %v10985_v37  ;;  %v11055_v37 = vld [vmem:[%s14840_s1 + $0x1fc8] ss:$16 sps:$4 sm:$0xff]  }
 0x3d5   :  { %7888 = vmatprep.subr.bf16.mxu1 %v10988_v38  ;;  %v11058_v38 = vld [vmem:[%s14840_s1 + $0x20c8] ss:$16 sps:$4 sm:$0xff]  }
 0x3d7   :  { %7864 = vmatpush2.bf16.msra.mxu0 %v10983_v22 }
 0x3d8   :  { %7889 = vmatpush1.bf16.msra.mxu1 %v10986_v2  ;;  %7865 = vmatprep.subr.bf16.mxu0 %v10991_v14  ;;  %v11066_v2 = vld [vmem:[%s14840_s1 + $0x20ac] ss:$16 sps:$4 sm:$0xff]  }
 0x3d9   :  { %7890 = vmatprep.subr.bf16.mxu1 %v10994_v15 }
 0x3db   :  { %7866 = vmatpush2.bf16.msra.mxu0 %v10989_v32  ;;  %v11061_v32 = vld [vmem:[%s14840_s1 + $0x1fa8] ss:$16 sps:$4 sm:$0xff]  }
 0x3dc   :  { %7891 = vmatpush1.bf16.msra.mxu1 %v10992_v6  ;;  %7867 = vmatprep.subr.bf16.mxu0 %v10997_v4  ;;  %v11064_v6 = vld [vmem:[%s14840_s1 + $0x20a8] ss:$16 sps:$4 sm:$0xff]  }
 0x3dd   :  { %7892 = vmatprep.subr.bf16.mxu1 %v11000_v5  ;;  %v11069_v5 = vld [vmem:[%s14840_s1 + $0x1f8c] ss:$16 sps:$4 sm:$0xff]  }
 0x3df   :  { %7868 = vmatpush2.bf16.msra.mxu0 %v10995_v47  ;;  %v11067_v47 = vld [vmem:[%s14840_s1 + $0x1f88] ss:$16 sps:$4 sm:$0xff]  }
 0x3e0   :  { %7893 = vmatpush1.bf16.msra.mxu1 %v10998_v44  ;;  %7919 = vmatprep.subr.bf16.mxu0 %v11006_v36  ;;  %v11070_v44 = vld [vmem:[%s14840_s1 + $0x2088] ss:$16 sps:$4 sm:$0xff]   ;;  %v11078_v36 = vld [vmem:[%s14840_s1 + $0x206c] ss:$16 sps:$4 sm:$0xff]  }
 0x3e1   :  { %7894 = vmatprep.subr.bf16.mxu1 %v11003_v46  ;;  %v11075_v46 = vld [vmem:[%s14840_s1 + $0x1f6c] ss:$16 sps:$4 sm:$0xff]  }
 0x3e2   :  { %v7625_v49 = vpop.f32.mrf.mxu0  ;;  %7870 = vmatmul.mubr.bf16.vlgmr.msra.gmra.mxu0 %v12767_v28  ;;  %v11015_v28 = vld [vmem:[%s14840_s1 + $0x1dac] ss:$16 sps:$4 sm:$0xff]  }
 0x3e3   :  { %v14543_v0 = vadd.f32 %v7625_v49, %v14439_v43  ;;  %7920 = vmatpush1.bf16.msra.mxu0 %v11004_v53  ;;  %7951 = vmatprep.mubr.bf16.mxu0 %v12783_v35  ;;  %v11024_v35 = vld [vmem:[%s14840_s1 + $0x1e8c] ss:$16 sps:$4 sm:$0xff]   ;;  %v11076_v53 = vld [vmem:[%s14840_s1 + $0x2068] ss:$16 sps:$4 sm:$0xff]  }
 0x3e4   :  { %7895 = vmatpush2.bf16.msra.mxu1 %v11001_v33  ;;  %v7627_v7 = vpop.f32.mrf.mxu0  ;;  %7921 = vmatprep.subr.bf16.mxu0 %v11012_v52  ;;  %v11036_v43 = vld [vmem:[%s14840_s1 + $0x1e4c] ss:$16 sps:$4 sm:$0xff]   ;;  %v11073_v33 = vld [vmem:[%s14840_s1 + $0x1f68] ss:$16 sps:$4 sm:$0xff]  }
 0x3e5   :  { %7896 = vmatprep.subr.bf16.mxu1 %v11009_v57  ;;  %v14558_v8 = vadd.f32 %v7627_v7, %v14454_v25  ;;  %v11040_v25 = vld [vmem:[%s14840_s1 + $0x1e28] ss:$16 sps:$4 sm:$0xff]   ;;  %v11081_v57 = vld [vmem:[%s14840_s1 + $0x1f4c] ss:$16 sps:$4 sm:$0xff]  }
 0x3e6   :  { %v7629_v19 = vpop.f32.mrf.mxu0  ;;  %v11084_v52 = vld [vmem:[%s14840_s1 + $0x204c] ss:$16 sps:$4 sm:$0xff]   ;;  %v11079_v49 = vld [vmem:[%s14840_s1 + $0x1f48] ss:$16 sps:$4 sm:$0xff]  }
 0x3e7   :  { %7922 = vmatpush1.bf16.msra.mxu0 %v11010_v21  ;;  %v11090_v21 = vld [vmem:[%s14840_s1 + $0x202c] ss:$16 sps:$4 sm:$0xff]   ;;  %v11085_v7 = vld [vmem:[%s14840_s1 + $0x1f28] ss:$16 sps:$4 sm:$0xff]  }
 0x3e8   :  { %7897 = vmatpush2.bf16.msra.mxu1 %v11007_v9  ;;  %v7630_v10 = vpop.f32.mrf.mxu0  ;;  %7923 = vmatprep.subr.bf16.mxu0 %v11018_v23  ;;  %v11087_v9 = vld [vmem:[%s14840_s1 + $0x1f2c] ss:$16 sps:$4 sm:$0xff]   ;;  %v11091_v19 = vld [vmem:[%s14840_s1 + $0x1f08] ss:$16 sps:$4 sm:$0xff]  }
 0x3e9   :  { %7898 = vmatprep.subr.bf16.mxu1 %v11015_v28  ;;  %v11088_v28 = vld [vmem:[%s14840_s1 + $0x2028] ss:$16 sps:$4 sm:$0xff]   ;;  %v11093_v23 = vld [vmem:[%s14840_s1 + $0x1f0c] ss:$16 sps:$4 sm:$0xff]   ;;  %v8002_v10 = vmax.f32 %v13723_v18, 0.0  ;;  %v11100_v18 = vld [vmem:[%s14842_s3 + $0x30] sm:$0xff]  }
 0x3eb   :  { %7924 = vmatpush1.bf16.msra.mxu0 %v11016_v1  ;;  %v11097_v1 = vld [vmem:[%s14842_s3 + $0x78] sm:$0xff]  }
 0x3ec   :  { %7899 = vmatpush2.bf16.msra.mxu1 %v11013_v48  ;;  %7925 = vmatprep.subr.bf16.mxu0 %v11024_v35  ;;  %v11094_v48 = vld [vmem:[%s14840_s1 + $0x2008] ss:$16 sps:$4 sm:$0xff]   ;;  %v11099_v35 = vld [vmem:[%s14842_s3 + $0x70] sm:$0xff]  }
 0x3ed   :  { %7900 = vmatprep.subr.bf16.mxu1 %v11021_v56  ;;  %v11098_v56 = vld [vmem:[%s14842_s3 + $0x38] sm:$0xff]  }
 0x3ef   :  { %7926 = vmatpush1.bf16.msra.mxu0 %v11022_v58 }
 0x3f0   :  { %7901 = vmatpush2.bf16.msra.mxu1 %v11019_v13  ;;  %7927 = vmatprep.subr.bf16.mxu0 %v11030_v45  ;;  %v8006_v13 = vpack.c.bf16 %v8002_v10, %v8002_v10 }
 0x3f1   :  { %7902 = vmatprep.subr.bf16.mxu1 %v11027_v39 }
 0x3f3   :  { %7928 = vmatpush1.bf16.msra.mxu0 %v11028_v41 }
 0x3f4   :  { %7903 = vmatpush2.bf16.msra.mxu1 %v11025_v40  ;;  %7929 = vmatprep.subr.bf16.mxu0 %v11036_v43  ;;  %v11101_v40 = vld [vmem:[%s14842_s3 + $0x68] sm:$0xff]   ;;  %v11103_v43 = vld [vmem:[%s14842_s3 + $0x60] sm:$0xff]  }
 0x3f5   :  { %7904 = vmatprep.subr.bf16.mxu1 %v11033_v50 }
 0x3f7   :  { %7930 = vmatpush1.bf16.msra.mxu0 %v11034_v51  ;;  %v11105_v51 = vld [vmem:[%s14842_s3 + $0x58] sm:$0xff]  }
 0x3f8   :  { %7905 = vmatpush2.bf16.msra.mxu1 %v11031_v62  ;;  %7931 = vmatprep.subr.bf16.mxu0 %v11042_v26  ;;  %v11104_v62 = vld [vmem:[%s14842_s3 + $0x20] sm:$0xff]   ;;  %v11107_v26 = vld [vmem:[%s14842_s3 + $0x50] sm:$0xff]  }
 0x3f9   :  { %7906 = vmatprep.subr.bf16.mxu1 %v11039_v24  ;;  %v11106_v24 = vld [vmem:[%s14842_s3 + $0x18] sm:$0xff]  }
 0x3fb   :  { %7932 = vmatpush1.bf16.msra.mxu0 %v11040_v25  ;;  %v11109_v25 = vld [vmem:[%s14842_s3 + $0x48] sm:$0xff]  }
 0x3fc   :  { %7907 = vmatpush2.bf16.msra.mxu1 %v11037_v55  ;;  %7933 = vmatprep.subr.bf16.mxu0 %v11048_v60  ;;  %v11108_v55 = vld [vmem:[%s14842_s3 + $0x10] sm:$0xff]   ;;  %v11111_v60 = vld [vmem:[%s14842_s3 + $0x40] sm:$0xff]  }
 0x3fd   :  { %7908 = vmatprep.subr.bf16.mxu1 %v11045_v3  ;;  %v11110_v3 = vld [vmem:[%s14842_s3 + $0x8] sm:$0xff]  }
 0x3ff   :  { %7934 = vmatpush1.bf16.msra.mxu0 %v11046_v20  ;;  %v8001_v20 = vmax.f32 %v13708_v17, 0.0  ;;  %v11115_v17 = vld [vmem:[%s14842_s3 + $0xf0] sm:$0xff]  }
 0x400   :  { %7909 = vmatpush2.bf16.msra.mxu1 %v11043_v59  ;;  %7935 = vmatprep.subr.bf16.mxu0 %v11051_v61  ;;  %v11112_v59 = vld [vmem:[%s14842_s3] sm:$0xff]  }
 0x401   :  { %7960 = vmatprep.subr.bf16.mxu1 %v11054_v34  ;;  %v8005_v61 = vpack.c.bf16 %v8001_v20, %v8001_v20 }
 0x403   :  { %v7666_v12 = vpop.f32.mrf.mxu1  ;;  %7911 = vmatmul.mubr.bf16.vlgmr.msra.gmra.mxu1 %v12977_v29  ;;  %7936 = vmatpush2.bf16.msra.mxu0 %v11049_v63  ;;  %v11063_v29 = vld [vmem:[%s14840_s1 + $0x1fac] ss:$16 sps:$4 sm:$0xff]  }
 0x404   :  { %v14647_v54 = vadd.f32 %v7666_v12, %v14543_v0  ;;  %7961 = vmatpush1.bf16.msra.mxu1 %v11052_v16  ;;  %7937 = vmatprep.subr.bf16.mxu0 %v11057_v30  ;;  %v11082_v0 = vld [vmem:[%s14840_s1 + $0x2048] ss:$16 sps:$4 sm:$0xff]  }
 0x405   :  { %v7668_v22 = vpop.f32.mrf.mxu1  ;;  %7962 = vmatprep.subr.bf16.mxu1 %v11060_v11  ;;  %7992 = vmatprep.mubr.bf16.mxu1 %v11153_v31  ;;  %v11072_v31 = vld [vmem:[%s14840_s1 + $0x208c] ss:$16 sps:$4 sm:$0xff]  }
 0x406   :  { %v14662_v14 = vadd.f32 %v7668_v22, %v14558_v8  ;;  %v11096_v8 = vld [vmem:[%s14840_s1 + $0x200c] ss:$16 sps:$4 sm:$0xff]  }
 0x407   :  { %v7670_v15 = vpop.f32.mrf.mxu1  ;;  %7938 = vmatpush2.bf16.msra.mxu0 %v11055_v37  ;;  %v11114_v37 = vld [vmem:[%s14842_s3 + $0xb8] sm:$0xff]   ;;  %v11117_v22 = vld [vmem:[%s14842_s3 + $0xe8] sm:$0xff]  }
 0x408   :  { %7963 = vmatpush1.bf16.msra.mxu1 %v11058_v38  ;;  %7939 = vmatprep.subr.bf16.mxu0 %v11063_v29  ;;  %v11116_v38 = vld [vmem:[%s14842_s3 + $0xb0] sm:$0xff]   ;;  %v11118_v29 = vld [vmem:[%s14842_s3 + $0xa8] sm:$0xff]   ;;  %v11121_v15 = vld [vmem:[%s14842_s3 + $0xd8] sm:$0xff]  }
 0x409   :  { %v7671_v4 = vpop.f32.mrf.mxu1  ;;  %7964 = vmatprep.subr.bf16.mxu1 %v11066_v2  ;;  %v11119_v2 = vld [vmem:[%s14842_s3 + $0xe0] sm:$0xff]  }
 0x40a   :  { %v11124_v4 = vld [vmem:[%s14842_s3 + $0x90] sm:$0xff]  }
 0x40b   :  { %7940 = vmatpush2.bf16.msra.mxu0 %v11061_v32  ;;  %v11122_v32 = vld [vmem:[%s14842_s3 + $0x98] sm:$0xff]  }
 0x40c   :  { %7965 = vmatpush1.bf16.msra.mxu1 %v11064_v6  ;;  %7941 = vmatprep.subr.bf16.mxu0 %v11069_v5  ;;  %v11123_v6 = vld [vmem:[%s14842_s3 + $0xd0] sm:$0xff]  }
 0x40d   :  { %7966 = vmatprep.subr.bf16.mxu1 %v11072_v31 }
 0x40f   :  { %7942 = vmatpush2.bf16.msra.mxu0 %v11067_v47 }
 0x410   :  { %7967 = vmatpush1.bf16.msra.mxu1 %v11070_v44  ;;  %7943 = vmatprep.subr.bf16.mxu0 %v11075_v46  ;;  %v11125_v44 = vld [vmem:[%s14842_s3 + $0xc8] sm:$0xff]  }
 0x411   :  { %7968 = vmatprep.subr.bf16.mxu1 %v11078_v36  ;;  %v11126_v36 = vld [vmem:[%s14842_s3 + $0x88] sm:$0xff]  }
 0x413   :  { %7944 = vmatpush2.bf16.msra.mxu0 %v11073_v33 }
 0x414   :  { %7969 = vmatpush1.bf16.msra.mxu1 %v11076_v53  ;;  %7945 = vmatprep.subr.bf16.mxu0 %v11081_v57  ;;  %v11127_v57 = vld [vmem:[%s14842_s3 + $0xc0] sm:$0xff]  }
 0x415   :  { %7970 = vmatprep.subr.bf16.mxu1 %v11084_v52  ;;  %v11128_v52 = vld [vmem:[%s14842_s3 + $0x80] sm:$0xff]  }
 0x417   :  { %7946 = vmatpush2.bf16.msra.mxu0 %v11079_v49 }
 0x418   :  { %7971 = vmatpush1.bf16.msra.mxu1 %v11082_v0  ;;  %7947 = vmatprep.subr.bf16.mxu0 %v11087_v9 }
 0x419   :  { %7972 = vmatprep.subr.bf16.mxu1 %v11090_v21 }
 0x41b   :  { %7948 = vmatpush2.bf16.msra.mxu0 %v11085_v7 }
 0x41c   :  { %7973 = vmatpush1.bf16.msra.mxu1 %v11088_v28  ;;  %7949 = vmatprep.subr.bf16.mxu0 %v11093_v23 }
 0x41d   :  { %7974 = vmatprep.subr.bf16.mxu1 %v11096_v8 }
 0x41f   :  { %7950 = vmatpush2.bf16.msra.mxu0 %v11091_v19 }
 0x420   :  { %7975 = vmatpush1.bf16.msra.mxu1 %v11094_v48  ;;  %9458 = vmatprep.subr.bf16.mxu0 %v11097_v1 }
 0x422   :  { %v7707_v58 = vpop.f32.mrf.mxu0  ;;  %7952 = vmatmul.mubr.bf16.vlgmr.msra.gmra.mxu0 %v12981_v27  ;;  %v11102_v27 = vld [vmem:[%s14842_s3 + $0x28] sm:$0xff]  }
 0x423   :  { %7993 = vmatmul.mubr.bf16.vlgmr.msra.gmra.mxu1 %v13092_v42  ;;  %v7708_v39 = vadd.f32 %v7707_v58, %v14647_v54  ;;  %9459 = vmatpush3.bf16.msra.mxu0 %v11098_v56  ;;  %v11113_v54 = vld [vmem:[%s14842_s3 + $0xf8] sm:$0xff]  }
 0x424   :  { %8304 = vmatprep.mubr.bf16.mxu0 %v8006_v13  ;;  %v7709_v45 = vpop.f32.mrf.mxu0  ;;  %9460 = vmatprep.subr.bf16.mxu0 %v11099_v35 }
 0x425   :  { %v7710_v41 = vadd.f32 %v7709_v45, %v14662_v14  ;;  %9480 = vmatprep.subr.bf16.mxu1 %v11113_v54  ;;  %v11120_v14 = vld [vmem:[%s14842_s3 + $0xa0] sm:$0xff]  }
 0x426   :  { %v7711_v50 = vpop.f32.mrf.mxu0  ;;  %9481 = vmatpush3.bf16.msra.mxu1 %v11114_v37 }
 0x427   :  { %9461 = vmatpush3.bf16.msra.mxu0 %v11100_v18  ;;  %9482 = vmatprep.subr.bf16.mxu1 %v11115_v17 }
 0x428   :  { %v7712_v42 = vpop.f32.mrf.mxu0  ;;  %9462 = vmatprep.subr.bf16.mxu0 %v11101_v40 }
 0x42a   :  { %9483 = vmatpush3.bf16.msra.mxu1 %v11116_v38 }
 0x42b   :  { %9463 = vmatpush3.bf16.msra.mxu0 %v11102_v27  ;;  %9484 = vmatprep.subr.bf16.mxu1 %v11117_v22 }
 0x42c   :  { %9464 = vmatprep.subr.bf16.mxu0 %v11103_v43 }
 0x42e   :  { %9485 = vmatpush3.bf16.msra.mxu1 %v11118_v29 }
 0x42f   :  { %9465 = vmatpush3.bf16.msra.mxu0 %v11104_v62  ;;  %9486 = vmatprep.subr.bf16.mxu1 %v11119_v2 }
 0x430   :  { %9466 = vmatprep.subr.bf16.mxu0 %v11105_v51 }
 0x432   :  { %9487 = vmatpush3.bf16.msra.mxu1 %v11120_v14 }
 0x433   :  { %9467 = vmatpush3.bf16.msra.mxu0 %v11106_v24  ;;  %9488 = vmatprep.subr.bf16.mxu1 %v11121_v15 }
 0x434   :  { %9468 = vmatprep.subr.bf16.mxu0 %v11107_v26 }
 0x436   :  { %9489 = vmatpush3.bf16.msra.mxu1 %v11122_v32 }
 0x437   :  { %9469 = vmatpush3.bf16.msra.mxu0 %v11108_v55  ;;  %9490 = vmatprep.subr.bf16.mxu1 %v11123_v6 }
 0x438   :  { %9470 = vmatprep.subr.bf16.mxu0 %v11109_v25 }
 0x43a   :  { %9491 = vmatpush3.bf16.msra.mxu1 %v11124_v4 }
 0x43b   :  { %9471 = vmatpush3.bf16.msra.mxu0 %v11110_v3  ;;  %9492 = vmatprep.subr.bf16.mxu1 %v11125_v44 }
 0x43c   :  { %9472 = vmatprep.subr.bf16.mxu0 %v11111_v60 }
 0x43e   :  { %9493 = vmatpush3.bf16.msra.mxu1 %v11126_v36 }
 0x43f   :  { %9473 = vmatpush3.bf16.msra.mxu0 %v11112_v59  ;;  %9494 = vmatprep.subr.bf16.mxu1 %v11127_v57 }
 0x442   :  { %8305 = vmatmul.mubr.bf16.vlgmr.msra.gmra.mxu0 %v8005_v61  ;;  %9495 = vmatpush3.bf16.msra.mxu1 %v11128_v52 }
 0x443   :  { %v7748_v34 = vpop.f32.mrf.mxu1 }
 0x444   :  { %v7749_v63 = vadd.f32 %v7748_v34, %v7708_v39 }
 0x445   :  { %v7750_v16 = vpop.f32.mrf.mxu1 }
 0x446   :  { %v7751_v30 = vadd.f32 %v7750_v16, %v7710_v41 }
 0x447   :  { %v7752_v11 = vpop.f32.mrf.mxu1 }
 0x449   :  { %v7753_v12 = vpop.f32.mrf.mxu1 }
 0x462   :  { %v7789_v5 = vpop.f32.mrf.mxu0 }
 0x463   :  { %v7790_v31 = vadd.f32 %v7789_v5, %v7749_v63 }
 0x464   :  { %v7791_v47 = vpop.f32.mrf.mxu0 }
 0x465   :  { %v7792_v46 = vadd.f32 %v7791_v47, %v7751_v30  ;;  %v9425_v30 = vld [vmem:[%s14843_s4] ss:$0 sm:$0xff] }
 0x466   :  { %v7793_v33 = vpop.f32.mrf.mxu0 }
 0x468   :  { %v7794_v53 = vpop.f32.mrf.mxu0 }
 0x483   :  { %v7830_v49 = vpop.f32.mrf.mxu1 }
 0x484   :  { %v7831_v0 = vadd.f32 %v7830_v49, %v7790_v31 }
 0x485   :  { %v7832_v9 = vpop.f32.mrf.mxu1 }
 0x486   :  { %v7833_v21 = vadd.f32 %v7832_v9, %v7792_v46 }
 0x487   :  { %v7834_v7 = vpop.f32.mrf.mxu1 }
 0x489   :  { %v7835_v28 = vpop.f32.mrf.mxu1 }
 0x4a2   :  { %v7871_v23 = vpop.f32.mrf.mxu0 }
 0x4a3   :  { %v7872_v13 = vadd.f32 %v7871_v23, %v7831_v0 }
 0x4a4   :  { %v7873_v8 = vpop.f32.mrf.mxu0 }
 0x4a5   :  { %v7874_v58 = vadd.f32 %v7873_v8, %v7833_v21 }
 0x4a6   :  { %v7875_v19 = vpop.f32.mrf.mxu0 }
 0x4a8   :  { %v7876_v48 = vpop.f32.mrf.mxu0 }
 0x4c3   :  { %v7912_v1 = vpop.f32.mrf.mxu1 }
 0x4c4   :  { %v7913_v39 = vadd.f32 %v7912_v1, %v7872_v13 }
 0x4c5   :  { %v7914_v10 = vpop.f32.mrf.mxu1 }
 0x4c6   :  { %v7915_v40 = vadd.f32 %v7914_v10, %v7874_v58 }
 0x4c7   :  { %v7916_v56 = vpop.f32.mrf.mxu1 }
 0x4c9   :  { %v7917_v35 = vpop.f32.mrf.mxu1 }
 0x4e2   :  { %v7953_v18 = vpop.f32.mrf.mxu0 }
 0x4e3   :  { %v7994_v45 = vpop.f32.mrf.mxu1  ;;  %v7954_v41 = vadd.f32 %v7953_v18, %v7913_v39 }
 0x4e4   :  { %v7955_v50 = vpop.f32.mrf.mxu0 }
 0x4e5   :  { %v7996_v27 = vpop.f32.mrf.mxu1  ;;  %v7995_v42 = vadd.f32 %v7994_v45, %v7954_v41  ;;  %v7956_v43 = vadd.f32 %v7955_v50, %v7915_v40 }
 0x4e6   :  { %v7957_v62 = vpop.f32.mrf.mxu0 }
 0x4e7   :  { %v7998_v51 = vpop.f32.mrf.mxu1  ;;  %v7997_v24 = vadd.f32 %v7996_v27, %v7956_v43  ;;  %v8003_v26 = vmax.f32 %v7995_v42, 0.0 }
 0x4e8   :  { %v7958_v55 = vpop.f32.mrf.mxu0 }
 0x4e9   :  { %v7999_v25 = vpop.f32.mrf.mxu1  ;;  %v8004_v3 = vmax.f32 %v7997_v24, 0.0  ;;  %v8007_v59 = vpack.c.bf16 %v8003_v26, %v8003_v26 }
 0x4eb   :  { %v8008_v60 = vpack.c.bf16 %v8004_v3, %v8004_v3 }
 0x4ed   :  { %8344 = vmatprep.mubr.bf16.mxu1 %v8008_v60 }
 0x4ee   :  { %8345 = vmatmul.mubr.bf16.vlgmr.msra.gmra.mxu1 %v8007_v59 }
 0x502   :  { %v9474_v20 = vpop.f32.mrf.mxu0 }
 0x504   :  { %v9475_v61 = vpop.f32.mrf.mxu0 }
 0x505   :  { %v9476_v34 = vadd.f32 %v9475_v61, %v9474_v20 }
 0x506   :  { %v9477_v63 = vpop.f32.mrf.mxu0 }
 0x507   :  { %v8307_v54 = vadd.f32 %v9476_v34, %v9425_v30 }
 0x508   :  { %v9478_v16 = vpop.f32.mrf.mxu0 }
 0x5ae   :  { %v9496_v11 = vpop.f32.mrf.mxu1 }
 0x5b0   :  { %v9497_v12 = vpop.f32.mrf.mxu1 }
 0x5b1   :  { %v9498_v37 = vadd.f32 %v9497_v12, %v9496_v11 }
 0x5b2   :  { %v9499_v17 = vpop.f32.mrf.mxu1 }
 0x5b3   :  { %v8347_v38 = vadd.f32 %v9498_v37, %v8307_v54 }
 0x5b4   :  { %v9500_v22 = vpop.f32.mrf.mxu1 }
 0x5b5   :  { %8353 = vst.msk [vmem:[#allocation2] sm:$0x3] %vm8352_vm0, %v8347_v38 }
 0x5b6   :  { %11141 = shalt.err (!%p11138_p4)
}
 0x5b7   :  { %8363 = dma.vmem_to_hbm [thread:$0]  %s8361_s28, 32, %s14844_s5, [#allocation3]  }
 0x5b8   :  { %11150 = dma.done.wait [#allocation3], 32  }
 0x5b9   :  { %11151 = vsyncadd [#allocation3], 4294967264 }
 0x5ba   :  { %8367 = vsyncpa [#allocation3], 1 }

</bundles_post_ra>
